<compile_context>
chip_gen: v6e
topology: v6e:2x2x1
jax: 0.10.0
libtpu: 0.0.40
codegen_flags: <defaults>
</compile_context>

<pallas_src>
import functools

import numpy as np
import jax
import jax.numpy as jnp
from jax import lax
from jax.experimental import pallas as pl
from jax.experimental.pallas import tpu as pltpu

LANE = 128                    # lane width: channels / attention hidden are padded to this
HALO = 8                      # aligned (full sublane tile) halo width on each side of W
MATMUL_DTYPE = jnp.bfloat16   # MXU input dtype; jnp.float32 for exact-parity numerics
BN_EPS = 1e-5


def _round_up(x, m):
    return (x + m - 1) // m * m


# --------- fused 3x3 conv (+ optional input-side BN finalize/apply + ReLU) + BN partials ---------
def _conv3x3_kernel(*refs, bn_relu_input, n_count):
    if bn_relu_input:
        (x_ref, sum_in_ref, sq_in_ref, gamma_ref, beta_ref, w_ref,
         o_ref, osum_ref, osq_ref, xpad_ref) = refs
    else:
        x_ref, w_ref, o_ref, osum_ref, osq_ref, xpad_ref = refs

    H, W, Cp = x_ref.shape
    wpad = W + 2 * HALO
    cd = w_ref.dtype

    xin = x_ref[...].astype(jnp.float32)                       # (H, W, Cp)
    if bn_relu_input:
        # BN finalize of the *previous* conv, folded in (per-batch partials -> scale/bias).
        mean = jnp.sum(sum_in_ref[...], axis=0) / n_count       # (1, Cp)
        var = jnp.sum(sq_in_ref[...], axis=0) / n_count - mean * mean
        scale = gamma_ref[...] * lax.rsqrt(var + BN_EPS)
        bias = beta_ref[...] - mean * scale
        xin = jnp.maximum(xin * scale + bias, 0.0)

    # Re-write only the halo border each step (all stores sublane-aligned, full tiles);
    # the interior is fully overwritten, so no cross-step scratch state is relied upon
    # (safe when the batch grid axis is split across TensorCores).
    zero_row = jnp.zeros((1, wpad, Cp), jnp.float32)
    zero_col = jnp.zeros((H, HALO, Cp), jnp.float32)
    xpad_ref[0:1, :, :] = zero_row
    xpad_ref[H + 1:H + 2, :, :] = zero_row
    xpad_ref[1:H + 1, 0:HALO, :] = zero_col
    xpad_ref[1:H + 1, HALO + W:HALO + 2 * W if False else HALO + W + HALO, :] = zero_col
    xpad_ref[1:H + 1, HALO:HALO + W, :] = xin                  # aligned interior store

    # im2col: nine (H, W, Cp) windows concatenated along the lane-dense channel axis,
    # then a single (H*W, 9*Cp) x (9*Cp, Cp) MXU contraction with f32 accumulation.
    chunks = [xpad_ref[dy:dy + H, HALO - 1 + dx:HALO - 1 + dx + W, :].astype(cd)
              for dy in range(3) for dx in range(3)]
    patches = jnp.concatenate(chunks, axis=-1)                  # (H, W, 9*Cp)
    acc = jnp.dot(patches.reshape(H * W, 9 * Cp), w_ref[...],
                  preferred_element_type=jnp.float32)           # (H*W, Cp)

    o_ref[...] = acc                                            # lane-dense raw conv output
    osum_ref[...] = jnp.sum(acc, axis=0, keepdims=True)         # BN partial stats
    osq_ref[...] = jnp.sum(acc * acc, axis=0, keepdims=True)


def _conv3x3_bn(x_nhwc, w_flat, prev_stats, gamma, beta, *, n_count):
    B, H, W, Cp = x_nhwc.shape
    bn_relu_input = prev_stats is not None
    kernel = functools.partial(_conv3x3_kernel, bn_relu_input=bn_relu_input,
                               n_count=float(n_count))

    in_specs = [pl.BlockSpec((None, H, W, Cp), lambda b: (b, 0, 0, 0))]
    args = [x_nhwc]
    if bn_relu_input:
        s_in, q_in = prev_stats
        in_specs += [
            pl.BlockSpec((B, 1, Cp), lambda b: (0, 0, 0)),
            pl.BlockSpec((B, 1, Cp), lambda b: (0, 0, 0)),
            pl.BlockSpec((1, Cp), lambda b: (0, 0)),
            pl.BlockSpec((1, Cp), lambda b: (0, 0)),
        ]
        args += [s_in, q_in, gamma, beta]
    in_specs.append(pl.BlockSpec((9 * Cp, Cp), lambda b: (0, 0)))
    args.append(w_flat)

    return pl.pallas_call(
        kernel,
        out_shape=(jax.ShapeDtypeStruct((B, H * W, Cp), jnp.float32),
                   jax.ShapeDtypeStruct((B, 1, Cp), jnp.float32),
                   jax.ShapeDtypeStruct((B, 1, Cp), jnp.float32)),
        grid=(B,),
        in_specs=in_specs,
        out_specs=(pl.BlockSpec((None, H * W, Cp), lambda b: (b, 0, 0)),
                   pl.BlockSpec((None, 1, Cp), lambda b: (b, 0, 0)),
                   pl.BlockSpec((None, 1, Cp), lambda b: (b, 0, 0))),
        scratch_shapes=[pltpu.VMEM((H + 2, W + 2 * HALO, Cp), jnp.float32)],
        compiler_params=pltpu.CompilerParams(dimension_semantics=("parallel",)),
    )(*args)


# --------- fused: BN2 finalize/apply + axial attention (H and W) + residual + ReLU ---------
def _axial_attn_res_kernel(c2_ref, sum_ref, sq_ref, gamma_ref, beta_ref,
                           wqkv_ref, wo_ref, bo_ref, mask_h_ref, mask_w_ref,
                           ident_ref, o_ref, *, e_true, n_count):
    cd = wqkv_ref.dtype
    Ep = wo_ref.shape[0] // 2
    sm = float(e_true) ** -0.5

    mean = jnp.sum(sum_ref[...], axis=0) / n_count               # (1, Cp)
    var = jnp.sum(sq_ref[...], axis=0) / n_count - mean * mean
    scale = gamma_ref[...] * lax.rsqrt(var + BN_EPS)
    bias = beta_ref[...] - mean * scale
    xn = c2_ref[...] * scale + bias                              # (T, Cp), BN2 applied

    # Fused q/k/v projection for BOTH axial attentions: one (T,Cp)x(Cp,6*Ep) matmul.
    qkv = jnp.dot(xn.astype(cd), wqkv_ref[...],
                  preferred_element_type=jnp.float32)            # (T, 6*Ep)

    def attend(off, mask_add):
        q = qkv[:, off:off + Ep]
        k = qkv[:, off + Ep:off + 2 * Ep]
        v = qkv[:, off + 2 * Ep:off + 3 * Ep]
        # Full lane-dense (T,Ep)x(Ep,T) scores; the additive mask restricts each row's
        # softmax to its own axial sequence (same image row / same image column).
        s = lax.dot_general(q.astype(cd), k.astype(cd), (((1,), (1,)), ((), ())),
                            preferred_element_type=jnp.float32) * sm + mask_add
        s = s - jnp.max(s, axis=-1, keepdims=True)
        p = jnp.exp(s)
        p = p / jnp.sum(p, axis=-1, keepdims=True)               # exact divide (parity)
        return jnp.dot(p.astype(cd), v.astype(cd),
                       preferred_element_type=jnp.float32)       # (T, Ep)

    o_h = attend(0, mask_h_ref[...])            # attention over H (same-column mask)
    o_w = attend(3 * Ep, mask_w_ref[...])       # attention over W (same-row mask)

    # Fused output projections of both axes + summed biases, then residuals + ReLU.
    attn = jnp.dot(jnp.concatenate([o_h, o_w], axis=-1).astype(cd), wo_ref[...],
                   preferred_element_type=jnp.float32) + bo_ref[...]
    y = xn + attn + ident_ref[...]
    o_ref[...] = jnp.maximum(y, 0.0)


def _axial_attention_block(c2_flat, stats2, gamma2, beta2, wqkv, wo_cat, bo_sum,
                           mask_h, mask_w, ident_flat, *, e_true, n_count):
    B, T, Cp = c2_flat.shape
    E6 = wqkv.shape[1]
    E2 = wo_cat.shape[0]
    s2, q2 = stats2
    kernel = functools.partial(_axial_attn_res_kernel, e_true=e_true,
                               n_count=float(n_count))
    return pl.pallas_call(
        kernel,
        out_shape=jax.ShapeDtypeStruct((B, T, Cp), jnp.float32),
        grid=(B,),
        in_specs=[
            pl.BlockSpec((None, T, Cp), lambda b: (b, 0, 0)),
            pl.BlockSpec((B, 1, Cp), lambda b: (0, 0, 0)),
            pl.BlockSpec((B, 1, Cp), lambda b: (0, 0, 0)),
            pl.BlockSpec((1, Cp), lambda b: (0, 0)),
            pl.BlockSpec((1, Cp), lambda b: (0, 0)),
            pl.BlockSpec((Cp, E6), lambda b: (0, 0)),
            pl.BlockSpec((E2, Cp), lambda b: (0, 0)),
            pl.BlockSpec((1, Cp), lambda b: (0, 0)),
            pl.BlockSpec((T, T), lambda b: (0, 0)),
            pl.BlockSpec((T, T), lambda b: (0, 0)),
            pl.BlockSpec((None, T, Cp), lambda b: (b, 0, 0)),
        ],
        out_specs=pl.BlockSpec((None, T, Cp), lambda b: (b, 0, 0)),
        compiler_params=pltpu.CompilerParams(dimension_semantics=("parallel",)),
    )(c2_flat, s2, q2, gamma2, beta2, wqkv, wo_cat, bo_sum, mask_h, mask_w, ident_flat)


# -------------------------------------- parameters --------------------------------------
def init_params(key, in_planes, planes, dim_heads=32, heads=1):
    e = dim_heads * heads
    ks = jax.random.split(key, 4)
    n = lambda k, shape, std: std * jax.random.normal(k, shape, jnp.float32)

    def attn_params(k):
        kq, kk, kv, ko = jax.random.split(k, 4)
        return {"wq": n(kq, (planes, e), planes ** -0.5),
                "wk": n(kk, (planes, e), planes ** -0.5),
                "wv": n(kv, (planes, e), planes ** -0.5),
                "wo": n(ko, (e, planes), e ** -0.5),
                "bo": jnp.zeros((planes,), jnp.float32)}

    return {
        "w1": n(ks[0], (3, 3, in_planes, planes), (2.0 / (9 * in_planes)) ** 0.5),
        "gamma1": jnp.ones((planes,), jnp.float32),
        "beta1": jnp.zeros((planes,), jnp.float32),
        "w2": n(ks[1], (3, 3, planes, planes), (2.0 / (9 * planes)) ** 0.5),
        "gamma2": jnp.ones((planes,), jnp.float32),
        "beta2": jnp.zeros((planes,), jnp.float32),
        "attn_h": attn_params(ks[2]),   # axial attention over H (permutation [0,3,2,1])
        "attn_w": attn_params(ks[3]),   # axial attention over W (permutation [0,2,3,1])
    }


# -------------------------------------- BasicBlock --------------------------------------
@jax.jit
def basic_block_forward(x_nchw, params):
    # x_nchw: [B, C, H, W] (PyTorch layout); stride=1, downsample=None
    B, C, H, W = x_nchw.shape
    planes = params["gamma1"].shape[0]
    assert C == planes, "identity residual requires in_planes == planes"
    e_true = params["attn_h"]["wq"].shape[1]
    Cp = _round_up(planes, LANE)
    Ep = _round_up(e_true, LANE)
    T = H * W
    n = B * H * W

    # ---- pad & reformat parameters: lane-dense, MXU dtype; zero padding keeps the ----
    # ---- padded channels exactly zero through conv/BN(gamma_pad=0)/relu/attention. ----
    def pad2(a, r, c):
        return jnp.pad(a, ((0, r - a.shape[0]), (0, c - a.shape[1])))

    def pad_vec(a):
        return jnp.pad(a, (0, Cp - a.shape[0])).reshape(1, Cp)

    w1 = jnp.pad(params["w1"], ((0, 0), (0, 0), (0, Cp - C), (0, Cp - planes))
                 ).reshape(9 * Cp, Cp).astype(MATMUL_DTYPE)
    w2 = jnp.pad(params["w2"], ((0, 0), (0, 0), (0, Cp - planes), (0, Cp - planes))
                 ).reshape(9 * Cp, Cp).astype(MATMUL_DTYPE)
    gamma1, beta1 = pad_vec(params["gamma1"]), pad_vec(params["beta1"])
    gamma2, beta2 = pad_vec(params["gamma2"]), pad_vec(params["beta2"])

    def attn_mats(p):
        return (pad2(p["wq"], Cp, Ep), pad2(p["wk"], Cp, Ep), pad2(p["wv"], Cp, Ep),
                pad2(p["wo"], Ep, Cp), pad_vec(p["bo"]))

    qh, kh, vh, woh, boh = attn_mats(params["attn_h"])
    qw, kw, vw, wow, bow = attn_mats(params["attn_w"])
    wqkv = jnp.concatenate([qh, kh, vh, qw, kw, vw], axis=1).astype(MATMUL_DTYPE)   # (Cp, 6*Ep)
    wo_cat = jnp.concatenate([woh, wow], axis=0).astype(MATMUL_DTYPE)               # (2*Ep, Cp)
    bo_sum = boh + bow                                                              # (1, Cp) f32

    # ---- axial-sequence additive masks over the flat (H*W) index (trace-time consts) ----
    idx = np.arange(T)
    same_row = (idx[:, None] // W) == (idx[None, :] // W)    # W-axis sequences (rows)
    same_col = (idx[:, None] % W) == (idx[None, :] % W)      # H-axis sequences (columns)
    mask_w = jnp.asarray(np.where(same_row, 0.0, -1e30), jnp.float32)
    mask_h = jnp.asarray(np.where(same_col, 0.0, -1e30), jnp.float32)

    # ---- layout: NCHW -> NHWC, channel-pad to Cp lanes ----
    x = jnp.transpose(x_nchw, (0, 2, 3, 1)).astype(jnp.float32)
    x = jnp.pad(x, ((0, 0), (0, 0), (0, 0), (0, Cp - C)))
    ident_flat = x.reshape(B, T, Cp)

    # conv1 (+ BN1 partial stats)
    c1, s1, q1 = _conv3x3_bn(x, w1, None, None, None, n_count=n)
    # conv2 with BN1 finalize/apply + ReLU fused on its input (+ BN2 partial stats)
    c2, s2, q2 = _conv3x3_bn(c1.reshape(B, H, W, Cp), w2, (s1, q1), gamma1, beta1,
                             n_count=n)
    # BN2 finalize/apply + both axial attentions + residual adds + final ReLU, one kernel
    y = _axial_attention_block(c2, (s2, q2), gamma2, beta2, wqkv, wo_cat, bo_sum,
                               mask_h, mask_w, ident_flat, e_true=e_true, n_count=n)

    y = y.reshape(B, H, W, Cp)[..., :C]
    return jnp.transpose(y, (0, 3, 1, 2)).astype(x_nchw.dtype)   # back to NCHW


if __name__ == "__main__":
    B, C, H, W = 2, 32, 16, 16          # in_planes == planes (no downsample), dim_heads=32
    key = jax.random.PRNGKey(0)
    kx, kp = jax.random.split(key)
    x = jax.random.normal(kx, (B, C, H, W), jnp.float32)
    params = init_params(kp, in_planes=C, planes=C, dim_heads=32, heads=1)

    out = jax.block_until_ready(basic_block_forward(x, params))
    assert out.shape == (B, C, H, W) and out.dtype == jnp.float32
    assert bool(jnp.all(jnp.isfinite(out)))
    print("KERNEL_OK")
</pallas_src>

<mosaic_0001>
module attributes {stable_mosaic.version = 11 : i64} {
  func.func @_conv3x3_kernel(%arg0: i32, %arg1: memref<1x16x16x128xf32, #tpu.memory_space<vmem>>, %arg2: memref<1152x128xbf16, #tpu.memory_space<vmem>>, %arg3: memref<1x256x128xf32, #tpu.memory_space<vmem>>, %arg4: memref<1x1x128xf32, #tpu.memory_space<vmem>>, %arg5: memref<1x1x128xf32, #tpu.memory_space<vmem>>, %arg6: memref<18x32x128xf32, #tpu.memory_space<vmem>>) attributes {dimension_semantics = [#tpu.dimension_semantics<parallel>], iteration_bounds = array<i64: 2>, scalar_prefetch = 0 : i64, scratch_operands = 1 : i64, tpu.core_type = #tpu.core_type<tc>, window_params = [{transform_indices = @transform_0, window_bounds = array<i64: 1, 16, 16, 128>}, {pipeline_mode = #tpu.pipeline_mode<synchronous>, transform_indices = @transform_1, window_bounds = array<i64: 1152, 128>}, {transform_indices = @transform_2, window_bounds = array<i64: 1, 256, 128>}, {transform_indices = @transform_3, window_bounds = array<i64: 1, 1, 128>}, {transform_indices = @transform_4, window_bounds = array<i64: 1, 1, 128>}]} {
    %c0 = arith.constant 0 : index
    %c0_0 = arith.constant 0 : index
    %c0_1 = arith.constant 0 : index
    %c0_2 = arith.constant 0 : index
    %0 = vector.load %arg1[%c0, %c0_0, %c0_1, %c0_2] : memref<1x16x16x128xf32, #tpu.memory_space<vmem>>, vector<1x16x16x128xf32>
    %1 = vector.shape_cast %0 : vector<1x16x16x128xf32> to vector<16x16x128xf32>
    %cst = arith.constant 0.000000e+00 : f32
    %2 = vector.broadcast %cst : f32 to vector<1x32x128xf32>
    %cst_3 = arith.constant 0.000000e+00 : f32
    %3 = vector.broadcast %cst_3 : f32 to vector<16x8x128xf32>
    %c0_4 = arith.constant 0 : index
    %c0_5 = arith.constant 0 : index
    %c0_6 = arith.constant 0 : index
    %4 = vector.load %arg6[%c0_4, %c0_5, %c0_6] : memref<18x32x128xf32, #tpu.memory_space<vmem>>, vector<1x32x128xf32>
    tpu.vector_store %arg6[%c0_4, %c0_5, %c0_6], %2 {strides = array<i32>} : memref<18x32x128xf32, #tpu.memory_space<vmem>>, vector<1x32x128xf32>,
    %c17 = arith.constant 17 : index
    %c0_7 = arith.constant 0 : index
    %c0_8 = arith.constant 0 : index
    %5 = vector.load %arg6[%c17, %c0_7, %c0_8] : memref<18x32x128xf32, #tpu.memory_space<vmem>>, vector<1x32x128xf32>
    tpu.vector_store %arg6[%c17, %c0_7, %c0_8], %2 {strides = array<i32>} : memref<18x32x128xf32, #tpu.memory_space<vmem>>, vector<1x32x128xf32>,
    %c1 = arith.constant 1 : index
    %c0_9 = arith.constant 0 : index
    %c0_10 = arith.constant 0 : index
    %6 = vector.load %arg6[%c1, %c0_9, %c0_10] : memref<18x32x128xf32, #tpu.memory_space<vmem>>, vector<16x8x128xf32>
    tpu.vector_store %arg6[%c1, %c0_9, %c0_10], %3 {strides = array<i32>} : memref<18x32x128xf32, #tpu.memory_space<vmem>>, vector<16x8x128xf32>,
    %c1_11 = arith.constant 1 : index
    %c24 = arith.constant 24 : index
    %c0_12 = arith.constant 0 : index
    %7 = vector.load %arg6[%c1_11, %c24, %c0_12] : memref<18x32x128xf32, #tpu.memory_space<vmem>>, vector<16x8x128xf32>
    tpu.vector_store %arg6[%c1_11, %c24, %c0_12], %3 {strides = array<i32>} : memref<18x32x128xf32, #tpu.memory_space<vmem>>, vector<16x8x128xf32>,
    %c1_13 = arith.constant 1 : index
    %c8 = arith.constant 8 : index
    %c0_14 = arith.constant 0 : index
    %8 = vector.load %arg6[%c1_13, %c8, %c0_14] : memref<18x32x128xf32, #tpu.memory_space<vmem>>, vector<16x16x128xf32>
    tpu.vector_store %arg6[%c1_13, %c8, %c0_14], %1 {strides = array<i32>} : memref<18x32x128xf32, #tpu.memory_space<vmem>>, vector<16x16x128xf32>,
    %c0_15 = arith.constant 0 : index
    %c7 = arith.constant 7 : index
    %c0_16 = arith.constant 0 : index
    %9 = vector.load %arg6[%c0_15, %c7, %c0_16] : memref<18x32x128xf32, #tpu.memory_space<vmem>>, vector<16x16x128xf32>
    %10 = arith.truncf %9 : vector<16x16x128xf32> to vector<16x16x128xbf16>
    %c0_17 = arith.constant 0 : index
    %c8_18 = arith.constant 8 : index
    %c0_19 = arith.constant 0 : index
    %11 = vector.load %arg6[%c0_17, %c8_18, %c0_19] : memref<18x32x128xf32, #tpu.memory_space<vmem>>, vector<16x16x128xf32>
    %12 = arith.truncf %11 : vector<16x16x128xf32> to vector<16x16x128xbf16>
    %c0_20 = arith.constant 0 : index
    %c9 = arith.constant 9 : index
    %c0_21 = arith.constant 0 : index
    %13 = vector.load %arg6[%c0_20, %c9, %c0_21] : memref<18x32x128xf32, #tpu.memory_space<vmem>>, vector<16x16x128xf32>
    %14 = arith.truncf %13 : vector<16x16x128xf32> to vector<16x16x128xbf16>
    %c1_22 = arith.constant 1 : index
    %c7_23 = arith.constant 7 : index
    %c0_24 = arith.constant 0 : index
    %15 = vector.load %arg6[%c1_22, %c7_23, %c0_24] : memref<18x32x128xf32, #tpu.memory_space<vmem>>, vector<16x16x128xf32>
    %16 = arith.truncf %15 : vector<16x16x128xf32> to vector<16x16x128xbf16>
    %c1_25 = arith.constant 1 : index
    %c8_26 = arith.constant 8 : index
    %c0_27 = arith.constant 0 : index
    %17 = vector.load %arg6[%c1_25, %c8_26, %c0_27] : memref<18x32x128xf32, #tpu.memory_space<vmem>>, vector<16x16x128xf32>
    %18 = arith.truncf %17 : vector<16x16x128xf32> to vector<16x16x128xbf16>
    %c1_28 = arith.constant 1 : index
    %c9_29 = arith.constant 9 : index
    %c0_30 = arith.constant 0 : index
    %19 = vector.load %arg6[%c1_28, %c9_29, %c0_30] : memref<18x32x128xf32, #tpu.memory_space<vmem>>, vector<16x16x128xf32>
    %20 = arith.truncf %19 : vector<16x16x128xf32> to vector<16x16x128xbf16>
    %c2 = arith.constant 2 : index
    %c7_31 = arith.constant 7 : index
    %c0_32 = arith.constant 0 : index
    %21 = vector.load %arg6[%c2, %c7_31, %c0_32] : memref<18x32x128xf32, #tpu.memory_space<vmem>>, vector<16x16x128xf32>
    %22 = arith.truncf %21 : vector<16x16x128xf32> to vector<16x16x128xbf16>
    %c2_33 = arith.constant 2 : index
    %c8_34 = arith.constant 8 : index
    %c0_35 = arith.constant 0 : index
    %23 = vector.load %arg6[%c2_33, %c8_34, %c0_35] : memref<18x32x128xf32, #tpu.memory_space<vmem>>, vector<16x16x128xf32>
    %24 = arith.truncf %23 : vector<16x16x128xf32> to vector<16x16x128xbf16>
    %c2_36 = arith.constant 2 : index
    %c9_37 = arith.constant 9 : index
    %c0_38 = arith.constant 0 : index
    %25 = vector.load %arg6[%c2_36, %c9_37, %c0_38] : memref<18x32x128xf32, #tpu.memory_space<vmem>>, vector<16x16x128xf32>
    %26 = arith.truncf %25 : vector<16x16x128xf32> to vector<16x16x128xbf16>
    %27 = tpu.concatenate %10, %12, %14, %16, %18, %20, %22, %24, %26 in 2 : vector<16x16x128xbf16>, vector<16x16x128xbf16>, vector<16x16x128xbf16>, vector<16x16x128xbf16>, vector<16x16x128xbf16>, vector<16x16x128xbf16>, vector<16x16x128xbf16>, vector<16x16x128xbf16>, vector<16x16x128xbf16> -> vector<16x16x1152xbf16>
    %28 = vector.shape_cast %27 : vector<16x16x1152xbf16> to vector<256x1152xbf16>
    %c0_39 = arith.constant 0 : index
    %c0_40 = arith.constant 0 : index
    %29 = vector.load %arg2[%c0_39, %c0_40] : memref<1152x128xbf16, #tpu.memory_space<vmem>>, vector<1152x128xbf16>
    %cst_41 = arith.constant dense<0.000000e+00> : vector<256x128xf32>
    %30 = tpu.matmul %28, %29, %cst_41 {dimension_numbers = #tpu.dot_dimension_numbers<[1], [0], [0], [1], [0, 0, 1, 1], [], []>} : vector<256x1152xbf16>, vector<1152x128xbf16>, vector<256x128xf32> -> vector<256x128xf32>
    %c0_42 = arith.constant 0 : index
    %c0_43 = arith.constant 0 : index
    %c0_44 = arith.constant 0 : index
    %31 = vector.load %arg3[%c0_42, %c0_43, %c0_44] : memref<1x256x128xf32, #tpu.memory_space<vmem>>, vector<1x256x128xf32>
    %32 = vector.shape_cast %31 : vector<1x256x128xf32> to vector<256x128xf32>
    %33 = vector.shape_cast %30 : vector<256x128xf32> to vector<1x256x128xf32>
    tpu.vector_store %arg3[%c0_42, %c0_43, %c0_44], %33 {strides = array<i32>} : memref<1x256x128xf32, #tpu.memory_space<vmem>>, vector<1x256x128xf32>,
    %cst_45 = arith.constant dense<0.000000e+00> : vector<128xf32>
    %34 = vector.multi_reduction <add>, %30, %cst_45 [0] : vector<256x128xf32> to vector<128xf32>
    %35 = vector.shape_cast %34 : vector<128xf32> to vector<1x128xf32>
    %c0_46 = arith.constant 0 : index
    %c0_47 = arith.constant 0 : index
    %c0_48 = arith.constant 0 : index
    %36 = vector.load %arg4[%c0_46, %c0_47, %c0_48] : memref<1x1x128xf32, #tpu.memory_space<vmem>>, vector<1x1x128xf32>
    %37 = vector.shape_cast %36 : vector<1x1x128xf32> to vector<1x128xf32>
    %38 = vector.shape_cast %35 : vector<1x128xf32> to vector<1x1x128xf32>
    tpu.vector_store %arg4[%c0_46, %c0_47, %c0_48], %38 {strides = array<i32>} : memref<1x1x128xf32, #tpu.memory_space<vmem>>, vector<1x1x128xf32>,
    %39 = arith.mulf %30, %30 : vector<256x128xf32>
    %cst_49 = arith.constant dense<0.000000e+00> : vector<128xf32>
    %40 = vector.multi_reduction <add>, %39, %cst_49 [0] : vector<256x128xf32> to vector<128xf32>
    %41 = vector.shape_cast %40 : vector<128xf32> to vector<1x128xf32>
    %c0_50 = arith.constant 0 : index
    %c0_51 = arith.constant 0 : index
    %c0_52 = arith.constant 0 : index
    %42 = vector.load %arg5[%c0_50, %c0_51, %c0_52] : memref<1x1x128xf32, #tpu.memory_space<vmem>>, vector<1x1x128xf32>
    %43 = vector.shape_cast %42 : vector<1x1x128xf32> to vector<1x128xf32>
    %44 = vector.shape_cast %41 : vector<1x128xf32> to vector<1x1x128xf32>
    tpu.vector_store %arg5[%c0_50, %c0_51, %c0_52], %44 {strides = array<i32>} : memref<1x1x128xf32, #tpu.memory_space<vmem>>, vector<1x1x128xf32>,
    return
  }
  func.func @transform_0(%arg0: i32) -> (i32, i32, i32, i32) {
    %c0_i32 = arith.constant 0 : i32
    %c0_i32_0 = arith.constant 0 : i32
    %c0_i32_1 = arith.constant 0 : i32
    %c0_i32_2 = arith.constant 0 : i32
    return %arg0, %c0_i32, %c0_i32_0, %c0_i32_1 : i32, i32, i32, i32
  }
  func.func @transform_1(%arg0: i32) -> (i32, i32) {
    %c0_i32 = arith.constant 0 : i32
    %c0_i32_0 = arith.constant 0 : i32
    %c0_i32_1 = arith.constant 0 : i32
    return %c0_i32, %c0_i32_0 : i32, i32
  }
  func.func @transform_2(%arg0: i32) -> (i32, i32, i32) {
    %c0_i32 = arith.constant 0 : i32
    %c0_i32_0 = arith.constant 0 : i32
    %c0_i32_1 = arith.constant 0 : i32
    return %arg0, %c0_i32, %c0_i32_0 : i32, i32, i32
  }
  func.func @transform_3(%arg0: i32) -> (i32, i32, i32) {
    %c0_i32 = arith.constant 0 : i32
    %c0_i32_0 = arith.constant 0 : i32
    %c0_i32_1 = arith.constant 0 : i32
    return %arg0, %c0_i32, %c0_i32_0 : i32, i32, i32
  }
  func.func @transform_4(%arg0: i32) -> (i32, i32, i32) {
    %c0_i32 = arith.constant 0 : i32
    %c0_i32_0 = arith.constant 0 : i32
    %c0_i32_1 = arith.constant 0 : i32
    return %arg0, %c0_i32, %c0_i32_0 : i32, i32, i32
  }
}

module attributes {stable_mosaic.version = 11 : i64} {
  func.func @_conv3x3_kernel(%arg0: i32, %arg1: memref<1x16x16x128xf32, #tpu.memory_space<vmem>>, %arg2: memref<2x1x128xf32, #tpu.memory_space<vmem>>, %arg3: memref<2x1x128xf32, #tpu.memory_space<vmem>>, %arg4: memref<1x128xf32, #tpu.memory_space<vmem>>, %arg5: memref<1x128xf32, #tpu.memory_space<vmem>>, %arg6: memref<1152x128xbf16, #tpu.memory_space<vmem>>, %arg7: memref<1x256x128xf32, #tpu.memory_space<vmem>>, %arg8: memref<1x1x128xf32, #tpu.memory_space<vmem>>, %arg9: memref<1x1x128xf32, #tpu.memory_space<vmem>>, %arg10: memref<18x32x128xf32, #tpu.memory_space<vmem>>) attributes {dimension_semantics = [#tpu.dimension_semantics<parallel>], iteration_bounds = array<i64: 2>, scalar_prefetch = 0 : i64, scratch_operands = 1 : i64, tpu.core_type = #tpu.core_type<tc>, window_params = [{transform_indices = @transform_0, window_bounds = array<i64: 1, 16, 16, 128>}, {pipeline_mode = #tpu.pipeline_mode<synchronous>, transform_indices = @transform_1, window_bounds = array<i64: 2, 1, 128>}, {pipeline_mode = #tpu.pipeline_mode<synchronous>, transform_indices = @transform_2, window_bounds = array<i64: 2, 1, 128>}, {pipeline_mode = #tpu.pipeline_mode<synchronous>, transform_indices = @transform_3, window_bounds = array<i64: 1, 128>}, {pipeline_mode = #tpu.pipeline_mode<synchronous>, transform_indices = @transform_4, window_bounds = array<i64: 1, 128>}, {pipeline_mode = #tpu.pipeline_mode<synchronous>, transform_indices = @transform_5, window_bounds = array<i64: 1152, 128>}, {transform_indices = @transform_6, window_bounds = array<i64: 1, 256, 128>}, {transform_indices = @transform_7, window_bounds = array<i64: 1, 1, 128>}, {transform_indices = @transform_8, window_bounds = array<i64: 1, 1, 128>}]} {
    %c0 = arith.constant 0 : index
    %c0_0 = arith.constant 0 : index
    %c0_1 = arith.constant 0 : index
    %c0_2 = arith.constant 0 : index
    %0 = vector.load %arg1[%c0, %c0_0, %c0_1, %c0_2] : memref<1x16x16x128xf32, #tpu.memory_space<vmem>>, vector<1x16x16x128xf32>
    %1 = vector.shape_cast %0 : vector<1x16x16x128xf32> to vector<16x16x128xf32>
    %c0_3 = arith.constant 0 : index
    %c0_4 = arith.constant 0 : index
    %c0_5 = arith.constant 0 : index
    %2 = vector.load %arg2[%c0_3, %c0_4, %c0_5] : memref<2x1x128xf32, #tpu.memory_space<vmem>>, vector<2x1x128xf32>
    %cst = arith.constant dense<0.000000e+00> : vector<1x128xf32>
    %3 = vector.multi_reduction <add>, %2, %cst [0] : vector<2x1x128xf32> to vector<1x128xf32>
    %cst_6 = arith.constant 5.120000e+02 : f32
    %4 = vector.broadcast %cst_6 : f32 to vector<1x128xf32>
    %5 = arith.divf %3, %4 : vector<1x128xf32>
    %c0_7 = arith.constant 0 : index
    %c0_8 = arith.constant 0 : index
    %c0_9 = arith.constant 0 : index
    %6 = vector.load %arg3[%c0_7, %c0_8, %c0_9] : memref<2x1x128xf32, #tpu.memory_space<vmem>>, vector<2x1x128xf32>
    %cst_10 = arith.constant dense<0.000000e+00> : vector<1x128xf32>
    %7 = vector.multi_reduction <add>, %6, %cst_10 [0] : vector<2x1x128xf32> to vector<1x128xf32>
    %cst_11 = arith.constant 5.120000e+02 : f32
    %8 = vector.broadcast %cst_11 : f32 to vector<1x128xf32>
    %9 = arith.divf %7, %8 : vector<1x128xf32>
    %10 = arith.mulf %5, %5 : vector<1x128xf32>
    %11 = arith.subf %9, %10 : vector<1x128xf32>
    %c0_12 = arith.constant 0 : index
    %c0_13 = arith.constant 0 : index
    %12 = vector.load %arg4[%c0_12, %c0_13] : memref<1x128xf32, #tpu.memory_space<vmem>>, vector<1x128xf32>
    %cst_14 = arith.constant 9.99999974E-6 : f32
    %13 = vector.broadcast %cst_14 : f32 to vector<1x128xf32>
    %14 = arith.addf %11, %13 : vector<1x128xf32>
    %15 = math.rsqrt %14 : vector<1x128xf32>
    %16 = arith.mulf %12, %15 : vector<1x128xf32>
    %c0_15 = arith.constant 0 : index
    %c0_16 = arith.constant 0 : index
    %17 = vector.load %arg5[%c0_15, %c0_16] : memref<1x128xf32, #tpu.memory_space<vmem>>, vector<1x128xf32>
    %18 = arith.mulf %5, %16 : vector<1x128xf32>
    %19 = arith.subf %17, %18 : vector<1x128xf32>
    %20 = vector.shape_cast %16 : vector<1x128xf32> to vector<1x1x128xf32>
    %21 = vector.broadcast %20 : vector<1x1x128xf32> to vector<16x16x128xf32>
    %22 = arith.mulf %1, %21 : vector<16x16x128xf32>
    %23 = vector.shape_cast %19 : vector<1x128xf32> to vector<1x1x128xf32>
    %24 = vector.broadcast %23 : vector<1x1x128xf32> to vector<16x16x128xf32>
    %25 = arith.addf %22, %24 : vector<16x16x128xf32>
    %cst_17 = arith.constant 0.000000e+00 : f32
    %26 = vector.broadcast %cst_17 : f32 to vector<16x16x128xf32>
    %27 = arith.maximumf %25, %26 : vector<16x16x128xf32>
    %cst_18 = arith.constant 0.000000e+00 : f32
    %28 = vector.broadcast %cst_18 : f32 to vector<1x32x128xf32>
    %cst_19 = arith.constant 0.000000e+00 : f32
    %29 = vector.broadcast %cst_19 : f32 to vector<16x8x128xf32>
    %c0_20 = arith.constant 0 : index
    %c0_21 = arith.constant 0 : index
    %c0_22 = arith.constant 0 : index
    %30 = vector.load %arg10[%c0_20, %c0_21, %c0_22] : memref<18x32x128xf32, #tpu.memory_space<vmem>>, vector<1x32x128xf32>
    tpu.vector_store %arg10[%c0_20, %c0_21, %c0_22], %28 {strides = array<i32>} : memref<18x32x128xf32, #tpu.memory_space<vmem>>, vector<1x32x128xf32>,
    %c17 = arith.constant 17 : index
    %c0_23 = arith.constant 0 : index
    %c0_24 = arith.constant 0 : index
    %31 = vector.load %arg10[%c17, %c0_23, %c0_24] : memref<18x32x128xf32, #tpu.memory_space<vmem>>, vector<1x32x128xf32>
    tpu.vector_store %arg10[%c17, %c0_23, %c0_24], %28 {strides = array<i32>} : memref<18x32x128xf32, #tpu.memory_space<vmem>>, vector<1x32x128xf32>,
    %c1 = arith.constant 1 : index
    %c0_25 = arith.constant 0 : index
    %c0_26 = arith.constant 0 : index
    %32 = vector.load %arg10[%c1, %c0_25, %c0_26] : memref<18x32x128xf32, #tpu.memory_space<vmem>>, vector<16x8x128xf32>
    tpu.vector_store %arg10[%c1, %c0_25, %c0_26], %29 {strides = array<i32>} : memref<18x32x128xf32, #tpu.memory_space<vmem>>, vector<16x8x128xf32>,
    %c1_27 = arith.constant 1 : index
    %c24 = arith.constant 24 : index
    %c0_28 = arith.constant 0 : index
    %33 = vector.load %arg10[%c1_27, %c24, %c0_28] : memref<18x32x128xf32, #tpu.memory_space<vmem>>, vector<16x8x128xf32>
    tpu.vector_store %arg10[%c1_27, %c24, %c0_28], %29 {strides = array<i32>} : memref<18x32x128xf32, #tpu.memory_space<vmem>>, vector<16x8x128xf32>,
    %c1_29 = arith.constant 1 : index
    %c8 = arith.constant 8 : index
    %c0_30 = arith.constant 0 : index
    %34 = vector.load %arg10[%c1_29, %c8, %c0_30] : memref<18x32x128xf32, #tpu.memory_space<vmem>>, vector<16x16x128xf32>
    tpu.vector_store %arg10[%c1_29, %c8, %c0_30], %27 {strides = array<i32>} : memref<18x32x128xf32, #tpu.memory_space<vmem>>, vector<16x16x128xf32>,
    %c0_31 = arith.constant 0 : index
    %c7 = arith.constant 7 : index
    %c0_32 = arith.constant 0 : index
    %35 = vector.load %arg10[%c0_31, %c7, %c0_32] : memref<18x32x128xf32, #tpu.memory_space<vmem>>, vector<16x16x128xf32>
    %36 = arith.truncf %35 : vector<16x16x128xf32> to vector<16x16x128xbf16>
    %c0_33 = arith.constant 0 : index
    %c8_34 = arith.constant 8 : index
    %c0_35 = arith.constant 0 : index
    %37 = vector.load %arg10[%c0_33, %c8_34, %c0_35] : memref<18x32x128xf32, #tpu.memory_space<vmem>>, vector<16x16x128xf32>
    %38 = arith.truncf %37 : vector<16x16x128xf32> to vector<16x16x128xbf16>
    %c0_36 = arith.constant 0 : index
    %c9 = arith.constant 9 : index
    %c0_37 = arith.constant 0 : index
    %39 = vector.load %arg10[%c0_36, %c9, %c0_37] : memref<18x32x128xf32, #tpu.memory_space<vmem>>, vector<16x16x128xf32>
    %40 = arith.truncf %39 : vector<16x16x128xf32> to vector<16x16x128xbf16>
    %c1_38 = arith.constant 1 : index
    %c7_39 = arith.constant 7 : index
    %c0_40 = arith.constant 0 : index
    %41 = vector.load %arg10[%c1_38, %c7_39, %c0_40] : memref<18x32x128xf32, #tpu.memory_space<vmem>>, vector<16x16x128xf32>
    %42 = arith.truncf %41 : vector<16x16x128xf32> to vector<16x16x128xbf16>
    %c1_41 = arith.constant 1 : index
    %c8_42 = arith.constant 8 : index
    %c0_43 = arith.constant 0 : index
    %43 = vector.load %arg10[%c1_41, %c8_42, %c0_43] : memref<18x32x128xf32, #tpu.memory_space<vmem>>, vector<16x16x128xf32>
    %44 = arith.truncf %43 : vector<16x16x128xf32> to vector<16x16x128xbf16>
    %c1_44 = arith.constant 1 : index
    %c9_45 = arith.constant 9 : index
    %c0_46 = arith.constant 0 : index
    %45 = vector.load %arg10[%c1_44, %c9_45, %c0_46] : memref<18x32x128xf32, #tpu.memory_space<vmem>>, vector<16x16x128xf32>
    %46 = arith.truncf %45 : vector<16x16x128xf32> to vector<16x16x128xbf16>
    %c2 = arith.constant 2 : index
    %c7_47 = arith.constant 7 : index
    %c0_48 = arith.constant 0 : index
    %47 = vector.load %arg10[%c2, %c7_47, %c0_48] : memref<18x32x128xf32, #tpu.memory_space<vmem>>, vector<16x16x128xf32>
    %48 = arith.truncf %47 : vector<16x16x128xf32> to vector<16x16x128xbf16>
    %c2_49 = arith.constant 2 : index
    %c8_50 = arith.constant 8 : index
    %c0_51 = arith.constant 0 : index
    %49 = vector.load %arg10[%c2_49, %c8_50, %c0_51] : memref<18x32x128xf32, #tpu.memory_space<vmem>>, vector<16x16x128xf32>
    %50 = arith.truncf %49 : vector<16x16x128xf32> to vector<16x16x128xbf16>
    %c2_52 = arith.constant 2 : index
    %c9_53 = arith.constant 9 : index
    %c0_54 = arith.constant 0 : index
    %51 = vector.load %arg10[%c2_52, %c9_53, %c0_54] : memref<18x32x128xf32, #tpu.memory_space<vmem>>, vector<16x16x128xf32>
    %52 = arith.truncf %51 : vector<16x16x128xf32> to vector<16x16x128xbf16>
    %53 = tpu.concatenate %36, %38, %40, %42, %44, %46, %48, %50, %52 in 2 : vector<16x16x128xbf16>, vector<16x16x128xbf16>, vector<16x16x128xbf16>, vector<16x16x128xbf16>, vector<16x16x128xbf16>, vector<16x16x128xbf16>, vector<16x16x128xbf16>, vector<16x16x128xbf16>, vector<16x16x128xbf16> -> vector<16x16x1152xbf16>
    %54 = vector.shape_cast %53 : vector<16x16x1152xbf16> to vector<256x1152xbf16>
    %c0_55 = arith.constant 0 : index
    %c0_56 = arith.constant 0 : index
    %55 = vector.load %arg6[%c0_55, %c0_56] : memref<1152x128xbf16, #tpu.memory_space<vmem>>, vector<1152x128xbf16>
    %cst_57 = arith.constant dense<0.000000e+00> : vector<256x128xf32>
    %56 = tpu.matmul %54, %55, %cst_57 {dimension_numbers = #tpu.dot_dimension_numbers<[1], [0], [0], [1], [0, 0, 1, 1], [], []>} : vector<256x1152xbf16>, vector<1152x128xbf16>, vector<256x128xf32> -> vector<256x128xf32>
    %c0_58 = arith.constant 0 : index
    %c0_59 = arith.constant 0 : index
    %c0_60 = arith.constant 0 : index
    %57 = vector.load %arg7[%c0_58, %c0_59, %c0_60] : memref<1x256x128xf32, #tpu.memory_space<vmem>>, vector<1x256x128xf32>
    %58 = vector.shape_cast %57 : vector<1x256x128xf32> to vector<256x128xf32>
    %59 = vector.shape_cast %56 : vector<256x128xf32> to vector<1x256x128xf32>
    tpu.vector_store %arg7[%c0_58, %c0_59, %c0_60], %59 {strides = array<i32>} : memref<1x256x128xf32, #tpu.memory_space<vmem>>, vector<1x256x128xf32>,
    %cst_61 = arith.constant dense<0.000000e+00> : vector<128xf32>
    %60 = vector.multi_reduction <add>, %56, %cst_61 [0] : vector<256x128xf32> to vector<128xf32>
    %61 = vector.shape_cast %60 : vector<128xf32> to vector<1x128xf32>
    %c0_62 = arith.constant 0 : index
    %c0_63 = arith.constant 0 : index
    %c0_64 = arith.constant 0 : index
    %62 = vector.load %arg8[%c0_62, %c0_63, %c0_64] : memref<1x1x128xf32, #tpu.memory_space<vmem>>, vector<1x1x128xf32>
    %63 = vector.shape_cast %62 : vector<1x1x128xf32> to vector<1x128xf32>
    %64 = vector.shape_cast %61 : vector<1x128xf32> to vector<1x1x128xf32>
    tpu.vector_store %arg8[%c0_62, %c0_63, %c0_64], %64 {strides = array<i32>} : memref<1x1x128xf32, #tpu.memory_space<vmem>>, vector<1x1x128xf32>,
    %65 = arith.mulf %56, %56 : vector<256x128xf32>
    %cst_65 = arith.constant dense<0.000000e+00> : vector<128xf32>
    %66 = vector.multi_reduction <add>, %65, %cst_65 [0] : vector<256x128xf32> to vector<128xf32>
    %67 = vector.shape_cast %66 : vector<128xf32> to vector<1x128xf32>
    %c0_66 = arith.constant 0 : index
    %c0_67 = arith.constant 0 : index
    %c0_68 = arith.constant 0 : index
    %68 = vector.load %arg9[%c0_66, %c0_67, %c0_68] : memref<1x1x128xf32, #tpu.memory_space<vmem>>, vector<1x1x128xf32>
    %69 = vector.shape_cast %68 : vector<1x1x128xf32> to vector<1x128xf32>
    %70 = vector.shape_cast %67 : vector<1x128xf32> to vector<1x1x128xf32>
    tpu.vector_store %arg9[%c0_66, %c0_67, %c0_68], %70 {strides = array<i32>} : memref<1x1x128xf32, #tpu.memory_space<vmem>>, vector<1x1x128xf32>,
    return
  }
  func.func @transform_0(%arg0: i32) -> (i32, i32, i32, i32) {
    %c0_i32 = arith.constant 0 : i32
    %c0_i32_0 = arith.constant 0 : i32
    %c0_i32_1 = arith.constant 0 : i32
    %c0_i32_2 = arith.constant 0 : i32
    return %arg0, %c0_i32, %c0_i32_0, %c0_i32_1 : i32, i32, i32, i32
  }
  func.func @transform_1(%arg0: i32) -> (i32, i32, i32) {
    %c0_i32 = arith.constant 0 : i32
    %c0_i32_0 = arith.constant 0 : i32
    %c0_i32_1 = arith.constant 0 : i32
    %c0_i32_2 = arith.constant 0 : i32
    return %c0_i32, %c0_i32_0, %c0_i32_1 : i32, i32, i32
  }
  func.func @transform_2(%arg0: i32) -> (i32, i32, i32) {
    %c0_i32 = arith.constant 0 : i32
    %c0_i32_0 = arith.constant 0 : i32
    %c0_i32_1 = arith.constant 0 : i32
    %c0_i32_2 = arith.constant 0 : i32
    return %c0_i32, %c0_i32_0, %c0_i32_1 : i32, i32, i32
  }
  func.func @transform_3(%arg0: i32) -> (i32, i32) {
    %c0_i32 = arith.constant 0 : i32
    %c0_i32_0 = arith.constant 0 : i32
    %c0_i32_1 = arith.constant 0 : i32
    return %c0_i32, %c0_i32_0 : i32, i32
  }
  func.func @transform_4(%arg0: i32) -> (i32, i32) {
    %c0_i32 = arith.constant 0 : i32
    %c0_i32_0 = arith.constant 0 : i32
    %c0_i32_1 = arith.constant 0 : i32
    return %c0_i32, %c0_i32_0 : i32, i32
  }
  func.func @transform_5(%arg0: i32) -> (i32, i32) {
    %c0_i32 = arith.constant 0 : i32
    %c0_i32_0 = arith.constant 0 : i32
    %c0_i32_1 = arith.constant 0 : i32
    return %c0_i32, %c0_i32_0 : i32, i32
  }
  func.func @transform_6(%arg0: i32) -> (i32, i32, i32) {
    %c0_i32 = arith.constant 0 : i32
    %c0_i32_0 = arith.constant 0 : i32
    %c0_i32_1 = arith.constant 0 : i32
    return %arg0, %c0_i32, %c0_i32_0 : i32, i32, i32
  }
  func.func @transform_7(%arg0: i32) -> (i32, i32, i32) {
    %c0_i32 = arith.constant 0 : i32
    %c0_i32_0 = arith.constant 0 : i32
    %c0_i32_1 = arith.constant 0 : i32
    return %arg0, %c0_i32, %c0_i32_0 : i32, i32, i32
  }
  func.func @transform_8(%arg0: i32) -> (i32, i32, i32) {
    %c0_i32 = arith.constant 0 : i32
    %c0_i32_0 = arith.constant 0 : i32
    %c0_i32_1 = arith.constant 0 : i32
    return %arg0, %c0_i32, %c0_i32_0 : i32, i32, i32
  }
}

module attributes {stable_mosaic.version = 11 : i64} {
  func.func @_axial_attn_res_kernel(%arg0: i32, %arg1: memref<1x256x128xf32, #tpu.memory_space<vmem>>, %arg2: memref<2x1x128xf32, #tpu.memory_space<vmem>>, %arg3: memref<2x1x128xf32, #tpu.memory_space<vmem>>, %arg4: memref<1x128xf32, #tpu.memory_space<vmem>>, %arg5: memref<1x128xf32, #tpu.memory_space<vmem>>, %arg6: memref<128x768xbf16, #tpu.memory_space<vmem>>, %arg7: memref<256x128xbf16, #tpu.memory_space<vmem>>, %arg8: memref<1x128xf32, #tpu.memory_space<vmem>>, %arg9: memref<256x256xf32, #tpu.memory_space<vmem>>, %arg10: memref<256x256xf32, #tpu.memory_space<vmem>>, %arg11: memref<1x256x128xf32, #tpu.memory_space<vmem>>, %arg12: memref<1x256x128xf32, #tpu.memory_space<vmem>>) attributes {dimension_semantics = [#tpu.dimension_semantics<parallel>], iteration_bounds = array<i64: 2>, scalar_prefetch = 0 : i64, scratch_operands = 0 : i64, tpu.core_type = #tpu.core_type<tc>, window_params = [{transform_indices = @transform_0, window_bounds = array<i64: 1, 256, 128>}, {pipeline_mode = #tpu.pipeline_mode<synchronous>, transform_indices = @transform_1, window_bounds = array<i64: 2, 1, 128>}, {pipeline_mode = #tpu.pipeline_mode<synchronous>, transform_indices = @transform_2, window_bounds = array<i64: 2, 1, 128>}, {pipeline_mode = #tpu.pipeline_mode<synchronous>, transform_indices = @transform_3, window_bounds = array<i64: 1, 128>}, {pipeline_mode = #tpu.pipeline_mode<synchronous>, transform_indices = @transform_4, window_bounds = array<i64: 1, 128>}, {pipeline_mode = #tpu.pipeline_mode<synchronous>, transform_indices = @transform_5, window_bounds = array<i64: 128, 768>}, {pipeline_mode = #tpu.pipeline_mode<synchronous>, transform_indices = @transform_6, window_bounds = array<i64: 256, 128>}, {pipeline_mode = #tpu.pipeline_mode<synchronous>, transform_indices = @transform_7, window_bounds = array<i64: 1, 128>}, {pipeline_mode = #tpu.pipeline_mode<synchronous>, transform_indices = @transform_8, window_bounds = array<i64: 256, 256>}, {pipeline_mode = #tpu.pipeline_mode<synchronous>, transform_indices = @transform_9, window_bounds = array<i64: 256, 256>}, {transform_indices = @transform_10, window_bounds = array<i64: 1, 256, 128>}, {transform_indices = @transform_11, window_bounds = array<i64: 1, 256, 128>}]} {
    %c0 = arith.constant 0 : index
    %c0_0 = arith.constant 0 : index
    %c0_1 = arith.constant 0 : index
    %0 = vector.load %arg2[%c0, %c0_0, %c0_1] : memref<2x1x128xf32, #tpu.memory_space<vmem>>, vector<2x1x128xf32>
    %cst = arith.constant dense<0.000000e+00> : vector<1x128xf32>
    %1 = vector.multi_reduction <add>, %0, %cst [0] : vector<2x1x128xf32> to vector<1x128xf32>
    %cst_2 = arith.constant 5.120000e+02 : f32
    %2 = vector.broadcast %cst_2 : f32 to vector<1x128xf32>
    %3 = arith.divf %1, %2 : vector<1x128xf32>
    %c0_3 = arith.constant 0 : index
    %c0_4 = arith.constant 0 : index
    %c0_5 = arith.constant 0 : index
    %4 = vector.load %arg3[%c0_3, %c0_4, %c0_5] : memref<2x1x128xf32, #tpu.memory_space<vmem>>, vector<2x1x128xf32>
    %cst_6 = arith.constant dense<0.000000e+00> : vector<1x128xf32>
    %5 = vector.multi_reduction <add>, %4, %cst_6 [0] : vector<2x1x128xf32> to vector<1x128xf32>
    %cst_7 = arith.constant 5.120000e+02 : f32
    %6 = vector.broadcast %cst_7 : f32 to vector<1x128xf32>
    %7 = arith.divf %5, %6 : vector<1x128xf32>
    %8 = arith.mulf %3, %3 : vector<1x128xf32>
    %9 = arith.subf %7, %8 : vector<1x128xf32>
    %c0_8 = arith.constant 0 : index
    %c0_9 = arith.constant 0 : index
    %10 = vector.load %arg4[%c0_8, %c0_9] : memref<1x128xf32, #tpu.memory_space<vmem>>, vector<1x128xf32>
    %cst_10 = arith.constant 9.99999974E-6 : f32
    %11 = vector.broadcast %cst_10 : f32 to vector<1x128xf32>
    %12 = arith.addf %9, %11 : vector<1x128xf32>
    %13 = math.rsqrt %12 : vector<1x128xf32>
    %14 = arith.mulf %10, %13 : vector<1x128xf32>
    %c0_11 = arith.constant 0 : index
    %c0_12 = arith.constant 0 : index
    %15 = vector.load %arg5[%c0_11, %c0_12] : memref<1x128xf32, #tpu.memory_space<vmem>>, vector<1x128xf32>
    %16 = arith.mulf %3, %14 : vector<1x128xf32>
    %17 = arith.subf %15, %16 : vector<1x128xf32>
    %c0_13 = arith.constant 0 : index
    %c0_14 = arith.constant 0 : index
    %c0_15 = arith.constant 0 : index
    %18 = vector.load %arg1[%c0_13, %c0_14, %c0_15] : memref<1x256x128xf32, #tpu.memory_space<vmem>>, vector<1x256x128xf32>
    %19 = vector.shape_cast %18 : vector<1x256x128xf32> to vector<256x128xf32>
    %20 = vector.broadcast %14 : vector<1x128xf32> to vector<256x128xf32>
    %21 = arith.mulf %19, %20 : vector<256x128xf32>
    %22 = vector.broadcast %17 : vector<1x128xf32> to vector<256x128xf32>
    %23 = arith.addf %21, %22 : vector<256x128xf32>
    %24 = arith.truncf %23 : vector<256x128xf32> to vector<256x128xbf16>
    %c0_16 = arith.constant 0 : index
    %c0_17 = arith.constant 0 : index
    %25 = vector.load %arg6[%c0_16, %c0_17] : memref<128x768xbf16, #tpu.memory_space<vmem>>, vector<128x768xbf16>
    %cst_18 = arith.constant dense<0.000000e+00> : vector<256x768xf32>
    %26 = tpu.matmul %24, %25, %cst_18 {dimension_numbers = #tpu.dot_dimension_numbers<[1], [0], [0], [1], [0, 0, 1, 1], [], []>} : vector<256x128xbf16>, vector<128x768xbf16>, vector<256x768xf32> -> vector<256x768xf32>
    %c0_19 = arith.constant 0 : index
    %c0_20 = arith.constant 0 : index
    %27 = vector.load %arg9[%c0_19, %c0_20] : memref<256x256xf32, #tpu.memory_space<vmem>>, vector<256x256xf32>
    %28 = vector.extract_strided_slice %26 {offsets = [0, 0], sizes = [256, 128], strides = [1, 1]} : vector<256x768xf32> to vector<256x128xf32>
    %29 = vector.extract_strided_slice %26 {offsets = [0, 128], sizes = [256, 128], strides = [1, 1]} : vector<256x768xf32> to vector<256x128xf32>
    %30 = vector.extract_strided_slice %26 {offsets = [0, 256], sizes = [256, 128], strides = [1, 1]} : vector<256x768xf32> to vector<256x128xf32>
    %31 = arith.truncf %28 : vector<256x128xf32> to vector<256x128xbf16>
    %32 = arith.truncf %29 : vector<256x128xf32> to vector<256x128xbf16>
    %cst_21 = arith.constant dense<0.000000e+00> : vector<256x256xf32>
    %33 = tpu.matmul %31, %32, %cst_21 {dimension_numbers = #tpu.dot_dimension_numbers<[1], [1], [0], [0], [0, 0, 1, 0], [], []>} : vector<256x128xbf16>, vector<256x128xbf16>, vector<256x256xf32> -> vector<256x256xf32>
    %cst_22 = arith.constant 0.176776692 : f32
    %34 = vector.broadcast %cst_22 : f32 to vector<256x256xf32>
    %35 = arith.mulf %33, %34 : vector<256x256xf32>
    %36 = arith.addf %35, %27 : vector<256x256xf32>
    %cst_23 = arith.constant dense<0xFF800000> : vector<256xf32>
    %37 = vector.multi_reduction <maximumf>, %36, %cst_23 [1] : vector<256x256xf32> to vector<256xf32>
    %38 = vector.shape_cast %37 : vector<256xf32> to vector<256x1xf32>
    %39 = vector.broadcast %38 : vector<256x1xf32> to vector<256x256xf32>
    %40 = arith.subf %36, %39 : vector<256x256xf32>
    %41 = math.exp %40 : vector<256x256xf32>
    %cst_24 = arith.constant dense<0.000000e+00> : vector<256xf32>
    %42 = vector.multi_reduction <add>, %41, %cst_24 [1] : vector<256x256xf32> to vector<256xf32>
    %43 = vector.shape_cast %42 : vector<256xf32> to vector<256x1xf32>
    %44 = vector.broadcast %43 : vector<256x1xf32> to vector<256x256xf32>
    %45 = arith.divf %41, %44 : vector<256x256xf32>
    %46 = arith.truncf %45 : vector<256x256xf32> to vector<256x256xbf16>
    %47 = arith.truncf %30 : vector<256x128xf32> to vector<256x128xbf16>
    %cst_25 = arith.constant dense<0.000000e+00> : vector<256x128xf32>
    %48 = tpu.matmul %46, %47, %cst_25 {dimension_numbers = #tpu.dot_dimension_numbers<[1], [0], [0], [1], [0, 0, 1, 1], [], []>} : vector<256x256xbf16>, vector<256x128xbf16>, vector<256x128xf32> -> vector<256x128xf32>
    %c0_26 = arith.constant 0 : index
    %c0_27 = arith.constant 0 : index
    %49 = vector.load %arg10[%c0_26, %c0_27] : memref<256x256xf32, #tpu.memory_space<vmem>>, vector<256x256xf32>
    %50 = vector.extract_strided_slice %26 {offsets = [0, 384], sizes = [256, 128], strides = [1, 1]} : vector<256x768xf32> to vector<256x128xf32>
    %51 = vector.extract_strided_slice %26 {offsets = [0, 512], sizes = [256, 128], strides = [1, 1]} : vector<256x768xf32> to vector<256x128xf32>
    %52 = vector.extract_strided_slice %26 {offsets = [0, 640], sizes = [256, 128], strides = [1, 1]} : vector<256x768xf32> to vector<256x128xf32>
    %53 = arith.truncf %50 : vector<256x128xf32> to vector<256x128xbf16>
    %54 = arith.truncf %51 : vector<256x128xf32> to vector<256x128xbf16>
    %cst_28 = arith.constant dense<0.000000e+00> : vector<256x256xf32>
    %55 = tpu.matmul %53, %54, %cst_28 {dimension_numbers = #tpu.dot_dimension_numbers<[1], [1], [0], [0], [0, 0, 1, 0], [], []>} : vector<256x128xbf16>, vector<256x128xbf16>, vector<256x256xf32> -> vector<256x256xf32>
    %cst_29 = arith.constant 0.176776692 : f32
    %56 = vector.broadcast %cst_29 : f32 to vector<256x256xf32>
    %57 = arith.mulf %55, %56 : vector<256x256xf32>
    %58 = arith.addf %57, %49 : vector<256x256xf32>
    %cst_30 = arith.constant dense<0xFF800000> : vector<256xf32>
    %59 = vector.multi_reduction <maximumf>, %58, %cst_30 [1] : vector<256x256xf32> to vector<256xf32>
    %60 = vector.shape_cast %59 : vector<256xf32> to vector<256x1xf32>
    %61 = vector.broadcast %60 : vector<256x1xf32> to vector<256x256xf32>
    %62 = arith.subf %58, %61 : vector<256x256xf32>
    %63 = math.exp %62 : vector<256x256xf32>
    %cst_31 = arith.constant dense<0.000000e+00> : vector<256xf32>
    %64 = vector.multi_reduction <add>, %63, %cst_31 [1] : vector<256x256xf32> to vector<256xf32>
    %65 = vector.shape_cast %64 : vector<256xf32> to vector<256x1xf32>
    %66 = vector.broadcast %65 : vector<256x1xf32> to vector<256x256xf32>
    %67 = arith.divf %63, %66 : vector<256x256xf32>
    %68 = arith.truncf %67 : vector<256x256xf32> to vector<256x256xbf16>
    %69 = arith.truncf %52 : vector<256x128xf32> to vector<256x128xbf16>
    %cst_32 = arith.constant dense<0.000000e+00> : vector<256x128xf32>
    %70 = tpu.matmul %68, %69, %cst_32 {dimension_numbers = #tpu.dot_dimension_numbers<[1], [0], [0], [1], [0, 0, 1, 1], [], []>} : vector<256x256xbf16>, vector<256x128xbf16>, vector<256x128xf32> -> vector<256x128xf32>
    %71 = tpu.concatenate %48, %70 in 1 : vector<256x128xf32>, vector<256x128xf32> -> vector<256x256xf32>
    %72 = arith.truncf %71 : vector<256x256xf32> to vector<256x256xbf16>
    %c0_33 = arith.constant 0 : index
    %c0_34 = arith.constant 0 : index
    %73 = vector.load %arg7[%c0_33, %c0_34] : memref<256x128xbf16, #tpu.memory_space<vmem>>, vector<256x128xbf16>
    %cst_35 = arith.constant dense<0.000000e+00> : vector<256x128xf32>
    %74 = tpu.matmul %72, %73, %cst_35 {dimension_numbers = #tpu.dot_dimension_numbers<[1], [0], [0], [1], [0, 0, 1, 1], [], []>} : vector<256x256xbf16>, vector<256x128xbf16>, vector<256x128xf32> -> vector<256x128xf32>
    %c0_36 = arith.constant 0 : index
    %c0_37 = arith.constant 0 : index
    %75 = vector.load %arg8[%c0_36, %c0_37] : memref<1x128xf32, #tpu.memory_space<vmem>>, vector<1x128xf32>
    %76 = vector.broadcast %75 : vector<1x128xf32> to vector<256x128xf32>
    %77 = arith.addf %74, %76 : vector<256x128xf32>
    %78 = arith.addf %23, %77 : vector<256x128xf32>
    %c0_38 = arith.constant 0 : index
    %c0_39 = arith.constant 0 : index
    %c0_40 = arith.constant 0 : index
    %79 = vector.load %arg11[%c0_38, %c0_39, %c0_40] : memref<1x256x128xf32, #tpu.memory_space<vmem>>, vector<1x256x128xf32>
    %80 = vector.shape_cast %79 : vector<1x256x128xf32> to vector<256x128xf32>
    %81 = arith.addf %78, %80 : vector<256x128xf32>
    %cst_41 = arith.constant 0.000000e+00 : f32
    %82 = vector.broadcast %cst_41 : f32 to vector<256x128xf32>
    %83 = arith.maximumf %81, %82 : vector<256x128xf32>
    %c0_42 = arith.constant 0 : index
    %c0_43 = arith.constant 0 : index
    %c0_44 = arith.constant 0 : index
    %84 = vector.load %arg12[%c0_42, %c0_43, %c0_44] : memref<1x256x128xf32, #tpu.memory_space<vmem>>, vector<1x256x128xf32>
    %85 = vector.shape_cast %84 : vector<1x256x128xf32> to vector<256x128xf32>
    %86 = vector.shape_cast %83 : vector<256x128xf32> to vector<1x256x128xf32>
    tpu.vector_store %arg12[%c0_42, %c0_43, %c0_44], %86 {strides = array<i32>} : memref<1x256x128xf32, #tpu.memory_space<vmem>>, vector<1x256x128xf32>,
    return
  }
  func.func @transform_0(%arg0: i32) -> (i32, i32, i32) {
    %c0_i32 = arith.constant 0 : i32
    %c0_i32_0 = arith.constant 0 : i32
    %c0_i32_1 = arith.constant 0 : i32
    return %arg0, %c0_i32, %c0_i32_0 : i32, i32, i32
  }
  func.func @transform_1(%arg0: i32) -> (i32, i32, i32) {
    %c0_i32 = arith.constant 0 : i32
    %c0_i32_0 = arith.constant 0 : i32
    %c0_i32_1 = arith.constant 0 : i32
    %c0_i32_2 = arith.constant 0 : i32
    return %c0_i32, %c0_i32_0, %c0_i32_1 : i32, i32, i32
  }
  func.func @transform_2(%arg0: i32) -> (i32, i32, i32) {
    %c0_i32 = arith.constant 0 : i32
    %c0_i32_0 = arith.constant 0 : i32
    %c0_i32_1 = arith.constant 0 : i32
    %c0_i32_2 = arith.constant 0 : i32
    return %c0_i32, %c0_i32_0, %c0_i32_1 : i32, i32, i32
  }
  func.func @transform_3(%arg0: i32) -> (i32, i32) {
    %c0_i32 = arith.constant 0 : i32
    %c0_i32_0 = arith.constant 0 : i32
    %c0_i32_1 = arith.constant 0 : i32
    return %c0_i32, %c0_i32_0 : i32, i32
  }
  func.func @transform_4(%arg0: i32) -> (i32, i32) {
    %c0_i32 = arith.constant 0 : i32
    %c0_i32_0 = arith.constant 0 : i32
    %c0_i32_1 = arith.constant 0 : i32
    return %c0_i32, %c0_i32_0 : i32, i32
  }
  func.func @transform_5(%arg0: i32) -> (i32, i32) {
    %c0_i32 = arith.constant 0 : i32
    %c0_i32_0 = arith.constant 0 : i32
    %c0_i32_1 = arith.constant 0 : i32
    return %c0_i32, %c0_i32_0 : i32, i32
  }
  func.func @transform_6(%arg0: i32) -> (i32, i32) {
    %c0_i32 = arith.constant 0 : i32
    %c0_i32_0 = arith.constant 0 : i32
    %c0_i32_1 = arith.constant 0 : i32
    return %c0_i32, %c0_i32_0 : i32, i32
  }
  func.func @transform_7(%arg0: i32) -> (i32, i32) {
    %c0_i32 = arith.constant 0 : i32
    %c0_i32_0 = arith.constant 0 : i32
    %c0_i32_1 = arith.constant 0 : i32
    return %c0_i32, %c0_i32_0 : i32, i32
  }
  func.func @transform_8(%arg0: i32) -> (i32, i32) {
    %c0_i32 = arith.constant 0 : i32
    %c0_i32_0 = arith.constant 0 : i32
    %c0_i32_1 = arith.constant 0 : i32
    return %c0_i32, %c0_i32_0 : i32, i32
  }
  func.func @transform_9(%arg0: i32) -> (i32, i32) {
    %c0_i32 = arith.constant 0 : i32
    %c0_i32_0 = arith.constant 0 : i32
    %c0_i32_1 = arith.constant 0 : i32
    return %c0_i32, %c0_i32_0 : i32, i32
  }
  func.func @transform_10(%arg0: i32) -> (i32, i32, i32) {
    %c0_i32 = arith.constant 0 : i32
    %c0_i32_0 = arith.constant 0 : i32
    %c0_i32_1 = arith.constant 0 : i32
    return %arg0, %c0_i32, %c0_i32_0 : i32, i32, i32
  }
  func.func @transform_11(%arg0: i32) -> (i32, i32, i32) {
    %c0_i32 = arith.constant 0 : i32
    %c0_i32_0 = arith.constant 0 : i32
    %c0_i32_1 = arith.constant 0 : i32
    return %arg0, %c0_i32, %c0_i32_0 : i32, i32, i32
  }
}

</mosaic_0001>

<bundles_post_ra>
// kernel: basic_block_forward.3
= control target key start
LH: loop header
LB: loop body
LE: loop exit
PB: predicated region body
PF: predicated region fallthrough
CT: control target
= control target key end

     0   :  { %s3119_s15 = smov 0   ;;  %s4131_s0 = inlined_call_operand.vmem [shape: f32[2,16,16,128], index: 0, kind: input, shape index: {}]   ;;  %s4132_s1 = inlined_call_operand.vmem [shape: bf16[1152,128], index: 1, kind: input, shape index: {}]   ;;  %s4133_s2 = inlined_call_operand.vmem [shape: f32[2,256,128], index: 2, kind: output, shape index: {0}]   ;;  %s4134_s3 = inlined_call_operand.vmem [shape: f32[2,1,128], index: 3, kind: output, shape index: {1}]   ;;  %s4135_s4 = inlined_call_operand.vmem [shape: f32[2,1,128], index: 4, kind: output, shape index: {2}]  }
   0x1 LB: > { %s2381_s16 = sadd.s32 4294967295, %s3090_s15   ;;  %p2385_p0 = scmp.ge.s32.totalorder %s3090_s15, 1  ;;  %s3090_s15 = sphi %s3119_s15, %s15_s15  }
   0x2   : > { %p167_p1 = scmp.lt.s32.totalorder %s3090_s15, 3 }
   0x4   : > { %p168_p2 = pnand %p2385_p0, %p167_p1 }
   0x6   : > { %171 = sbr.rel (%p168_p2) target bundleno = 547 (0x223), region = 28 }
   0xb   : > { %v3011_v0 = vld [vmem:[%s4132_s1 + $0x78] sm:$0xff]   ;;  %v3092_v2 = vmov 0.0   ;;  %v3013_v3 = vld [vmem:[%s4132_s1 + $0x70] sm:$0xff]   ;;  %p199_p3 = scmp.lt.s32.totalorder %s2381_s16, 1  ;;  %v3015_v5 = vld [vmem:[%s4132_s1 + $0x68] sm:$0xff]   ;;  %v3093_v6 = vmov 0.0|0.0  }
   0xc   : > { %v3012_v1 = vld [vmem:[%s4132_s1 + $0x38] sm:$0xff]   ;;  %249 = vst [vmem:[#allocation2 + $0x8] sm:$0xff] %v3092_v2  ;;  %250 = vst [vmem:[#allocation2 + $0x10] sm:$0xff] %v3092_v2  ;;  %2466 = vmatprep.subr.bf16.mxu0 %v3011_v0  ;;  %2986 = vmatprep.subr.bf16.mxu1 %v3011_v0  ;;  %v3014_v4 = vld [vmem:[%s4132_s1 + $0x30] sm:$0xff]  }
   0xd   : > { %248 = vst [vmem:[#allocation2] sm:$0xff] %v3092_v2  ;;  %251 = vst [vmem:[#allocation2 + $0x18] sm:$0xff] %v3092_v2  ;;  %2467 = vmatpush3.bf16.msra.mxu0 %v3012_v1  ;;  %2994 = vmatpush3.bf16.msra.mxu1 %v3012_v1  ;;  %s4159_s16 = smov (!%p199_p3, %s2381_s16), 1  ;;  %v3016_v7 = vld [vmem:[%s4132_s1 + $0x28] sm:$0xff]   ;;  %v3017_v8 = vld [vmem:[%s4132_s1 + $0x60] sm:$0xff]  }
   0xe   : > { %253 = vst [vmem:[#allocation2 + $0x220] sm:$0xff] %v3092_v2  ;;  %254 = vst [vmem:[#allocation2 + $0x228] sm:$0xff] %v3092_v2  ;;  %2468 = vmatprep.subr.bf16.mxu0 %v3013_v3  ;;  %2987 = vmatprep.subr.bf16.mxu1 %v3013_v3  ;;  %s2464_s5 = sshll.u32 %s4159_s16, 8  ;;  %v3018_v9 = vld [vmem:[%s4132_s1 + $0x20] sm:$0xff]   ;;  %v3019_v10 = vld [vmem:[%s4132_s1 + $0x58] sm:$0xff]   ;;  %s211_s9 = scalar_lea.vmem %s4134_s3, %s4159_s16 }
   0xf   : > { %255 = vst [vmem:[#allocation2 + $0x230] sm:$0xff] %v3092_v2  ;;  %256 = vst [vmem:[#allocation2 + $0x238] sm:$0xff] %v3092_v2  ;;  %1363 = vmatprep.mubr.bf16.mxu0 %v3093_v6  ;;  %s3166_s12 = scalar_lea.vmem %s4131_s0, %s2464_s5  ;;  %v3020_v11 = vld [vmem:[%s4132_s1 + $0x18] sm:$0xff]   ;;  %v3021_v12 = vld [vmem:[%s4132_s1 + $0x50] sm:$0xff]   ;;  %s3992_s7 = scalar_lea.vmem %s4133_s2, %s2464_s5 }
  0x10   : > { %258 = vst [vmem:[#allocation2 + $0x20] sm:$0xff] %v3092_v2  ;;  %259 = vst [vmem:[#allocation2 + $0x40] sm:$0xff] %v3092_v2  ;;  %v238_v13 = vld [vmem:[%s3166_s12 + $0xb0] sm:$0xff]  ;;  %v239_v14 = vld [vmem:[%s3166_s12 + $0xb8] sm:$0xff]  ;;  %s214_s13 = scalar_lea.vmem %s4135_s4, %s4159_s16 }
  0x11   : > { %260 = vst [vmem:[#allocation2 + $0x60] sm:$0xff] %v3092_v2  ;;  %261 = vst [vmem:[#allocation2 + $0x80] sm:$0xff] %v3092_v2  ;;  %2469 = vmatpush3.bf16.msra.mxu0 %v3014_v4  ;;  %2995 = vmatpush3.bf16.msra.mxu1 %v3014_v4  ;;  %v414_v15 = vpack.c.bf16 %v239_v14, %v238_v13  ;;  %v3022_v16 = vld [vmem:[%s4132_s1 + $0x10] sm:$0xff]   ;;  %v3023_v17 = vld [vmem:[%s4132_s1 + $0x48] sm:$0xff]  }
  0x12   : > { %262 = vst [vmem:[#allocation2 + $0xa0] sm:$0xff] %v3092_v2  ;;  %263 = vst [vmem:[#allocation2 + $0xc0] sm:$0xff] %v3092_v2  ;;  %2470 = vmatprep.subr.bf16.mxu0 %v3015_v5  ;;  %2988 = vmatprep.subr.bf16.mxu1 %v3015_v5  ;;  %v3024_v18 = vld [vmem:[%s4132_s1 + $0x8] sm:$0xff]   ;;  %v216_v19 = vld [vmem:[%s3166_s12] sm:$0xff] }
  0x13   : > { %264 = vst [vmem:[#allocation2 + $0xe0] sm:$0xff] %v3092_v2  ;;  %265 = vst [vmem:[#allocation2 + $0x100] sm:$0xff] %v3092_v2  ;;  %1459 = vmatprep.mubr.bf16.mxu1 %v414_v15  ;;  %v217_v20 = vld [vmem:[%s3166_s12 + $0x8] sm:$0xff]  ;;  %v3025_v21 = vld [vmem:[%s4132_s1 + $0x40] sm:$0xff]  }
  0x14   : > { %266 = vst [vmem:[#allocation2 + $0x120] sm:$0xff] %v3092_v2  ;;  %267 = vst [vmem:[#allocation2 + $0x140] sm:$0xff] %v3092_v2  ;;  %v240_v22 = vld [vmem:[%s3166_s12 + $0xc0] sm:$0xff]  ;;  %v323_v25 = vld [vmem:[#allocation2 + $0xf] sm:$0xff]  ;;  %v3212_v36 = vpack.c.bf16 %v217_v20, %v216_v19 }
  0x15   : > { %268 = vst [vmem:[#allocation2 + $0x160] sm:$0xff] %v3092_v2  ;;  %269 = vst [vmem:[#allocation2 + $0x180] sm:$0xff] %v3092_v2  ;;  %2471 = vmatpush3.bf16.msra.mxu0 %v3016_v7  ;;  %2996 = vmatpush3.bf16.msra.mxu1 %v3016_v7  ;;  %v3026_v23 = vld [vmem:[%s4132_s1] sm:$0xff]   ;;  %v241_v26 = vld [vmem:[%s3166_s12 + $0xc8] sm:$0xff] }
  0x16   : > { %270 = vst [vmem:[#allocation2 + $0x1a0] sm:$0xff] %v3092_v2  ;;  %271 = vst [vmem:[#allocation2 + $0x1c0] sm:$0xff] %v3092_v2  ;;  %2472 = vmatprep.subr.bf16.mxu0 %v3017_v8  ;;  %2989 = vmatprep.subr.bf16.mxu1 %v3017_v8  ;;  %v322_v24 = vld [vmem:[#allocation2 + $0x7] sm:$0xff]  ;;  %v3027_v28 = vld [vmem:[%s4132_s1 + $0xf8] sm:$0xff]   ;;  %v415_v41 = vpack.c.bf16 %v241_v26, %v240_v22 }
  0x17   : > { %272 = vst [vmem:[#allocation2 + $0x1e0] sm:$0xff] %v3092_v2  ;;  %273 = vst [vmem:[#allocation2 + $0x200] sm:$0xff] %v3092_v2  ;;  %v3028_v30 = vld [vmem:[%s4132_s1 + $0x178] sm:$0xff]   ;;  %v354_v31 = vpack.c.bf16 %v323_v25, %v322_v24  ;;  %v3031_v35 = vld [vmem:[%s4132_s1 + $0xf0] sm:$0xff]  }
  0x18   : > { %274 = vst [vmem:[#allocation2 + $0x38] sm:$0xff] %v3092_v2  ;;  %275 = vst [vmem:[#allocation2 + $0x58] sm:$0xff] %v3092_v2  ;;  %v3029_v33 = vld [vmem:[%s4132_s1 + $0xb8] sm:$0xff]   ;;  %v3036_v37 = vld [vmem:[%s4132_s1 + $0x170] sm:$0xff]  }
  0x19   : > { %276 = vst [vmem:[#allocation2 + $0x78] sm:$0xff] %v3092_v2  ;;  %277 = vst [vmem:[#allocation2 + $0x98] sm:$0xff] %v3092_v2  ;;  %2473 = vmatpush3.bf16.msra.mxu0 %v3018_v9  ;;  %2997 = vmatpush3.bf16.msra.mxu1 %v3018_v9  ;;  %v3030_v34 = vld [vmem:[%s4132_s1 + $0x138] sm:$0xff]   ;;  %v218_v38 = vld [vmem:[%s3166_s12 + $0x10] sm:$0xff] }
  0x1a   : > { %278 = vst [vmem:[#allocation2 + $0xb8] sm:$0xff] %v3092_v2  ;;  %279 = vst [vmem:[#allocation2 + $0xd8] sm:$0xff] %v3092_v2  ;;  %2474 = vmatprep.subr.bf16.mxu0 %v3019_v10  ;;  %2990 = vmatprep.subr.bf16.mxu1 %v3019_v10  ;;  %v219_v39 = vld [vmem:[%s3166_s12 + $0x18] sm:$0xff]  ;;  %v3032_v40 = vld [vmem:[%s4132_s1 + $0xb0] sm:$0xff]  }
  0x1b   : > { %280 = vst [vmem:[#allocation2 + $0xf8] sm:$0xff] %v3092_v2  ;;  %281 = vst [vmem:[#allocation2 + $0x118] sm:$0xff] %v3092_v2  ;;  %v3038_v44 = vld [vmem:[%s4132_s1 + $0x130] sm:$0xff]   ;;  %v243_v46 = vld [vmem:[%s3166_s12 + $0xd8] sm:$0xff]  ;;  %v3242_v56 = vpack.c.bf16 %v219_v39, %v218_v38 }
  0x1c   : > { %282 = vst [vmem:[#allocation2 + $0x138] sm:$0xff] %v3092_v2  ;;  %283 = vst [vmem:[#allocation2 + $0x158] sm:$0xff] %v3092_v2  ;;  %v242_v45 = vld [vmem:[%s3166_s12 + $0xd0] sm:$0xff]  ;;  %v3033_v49 = vld [vmem:[%s4132_s1 + $0xe8] sm:$0xff]  }
  0x1d   : > { %284 = vst [vmem:[#allocation2 + $0x178] sm:$0xff] %v3092_v2  ;;  %285 = vst [vmem:[#allocation2 + $0x198] sm:$0xff] %v3092_v2  ;;  %2475 = vmatpush3.bf16.msra.mxu0 %v3020_v11  ;;  %2998 = vmatpush3.bf16.msra.mxu1 %v3020_v11  ;;  %v3034_v50 = vld [vmem:[%s4132_s1 + $0xa8] sm:$0xff]   ;;  %v220_v53 = vld [vmem:[%s3166_s12 + $0x20] sm:$0xff]  ;;  %v416_v59 = vpack.c.bf16 %v243_v46, %v242_v45 }
  0x1e   : > { %286 = vst [vmem:[#allocation2 + $0x1b8] sm:$0xff] %v3092_v2  ;;  %287 = vst [vmem:[#allocation2 + $0x1d8] sm:$0xff] %v3092_v2  ;;  %2476 = vmatprep.subr.bf16.mxu0 %v3021_v12  ;;  %2991 = vmatprep.subr.bf16.mxu1 %v3021_v12  ;;  %v221_v54 = vld [vmem:[%s3166_s12 + $0x28] sm:$0xff]  ;;  %v244_v55 = vld [vmem:[%s3166_s12 + $0xe0] sm:$0xff] }
  0x1f   : > { %288 = vst [vmem:[#allocation2 + $0x1f8] sm:$0xff] %v3092_v2  ;;  %289 = vst [vmem:[#allocation2 + $0x218] sm:$0xff] %v3092_v2  ;;  %v245_v57 = vld [vmem:[%s3166_s12 + $0xe8] sm:$0xff]  ;;  %v3035_v58 = vld [vmem:[%s4132_s1 + $0xe0] sm:$0xff]   ;;  %v3270_v7 = vpack.c.bf16 %v221_v54, %v220_v53 }
  0x20   : > { %312 = vst [vmem:[#allocation2 + $0x188] sm:$0xff] %v238_v13  ;;  %313 = vst [vmem:[#allocation2 + $0x190] sm:$0xff] %v239_v14  ;;  %v3037_v60 = vld [vmem:[%s4132_s1 + $0xa0] sm:$0xff]   ;;  %v3039_v0 = vld [vmem:[%s4132_s1 + $0xd8] sm:$0xff]   ;;  %v417_v9 = vpack.c.bf16 %v245_v57, %v244_v55 }
  0x21   : > { %2477 = vmatpush3.bf16.msra.mxu0 %v3022_v16  ;;  %2999 = vmatpush3.bf16.msra.mxu1 %v3022_v16  ;;  %290 = vst [vmem:[#allocation2 + $0x28] sm:$0xff] %v216_v19  ;;  %291 = vst [vmem:[#allocation2 + $0x30] sm:$0xff] %v217_v20  ;;  %v3044_v1 = vld [vmem:[%s4132_s1 + $0x168] sm:$0xff]   ;;  %v3040_v6 = vld [vmem:[%s4132_s1 + $0x98] sm:$0xff]  }
  0x22   : > { %2478 = vmatprep.subr.bf16.mxu0 %v3023_v17  ;;  %2992 = vmatprep.subr.bf16.mxu1 %v3023_v17  ;;  %314 = vst [vmem:[#allocation2 + $0x1a8] sm:$0xff] %v240_v22  ;;  %315 = vst [vmem:[#allocation2 + $0x1b0] sm:$0xff] %v241_v26  ;;  %v3046_v3 = vld [vmem:[%s4132_s1 + $0x128] sm:$0xff]   ;;  %v3041_v8 = vld [vmem:[%s4132_s1 + $0xd0] sm:$0xff]  }
  0x23   : > { %292 = vst [vmem:[#allocation2 + $0x48] sm:$0xff] %v218_v38  ;;  %293 = vst [vmem:[#allocation2 + $0x50] sm:$0xff] %v219_v39  ;;  %v222_v10 = vld [vmem:[%s3166_s12 + $0x30] sm:$0xff]  ;;  %v223_v11 = vld [vmem:[%s3166_s12 + $0x38] sm:$0xff] }
  0x24   : > { %316 = vst [vmem:[#allocation2 + $0x1c8] sm:$0xff] %v242_v45  ;;  %317 = vst [vmem:[#allocation2 + $0x1d0] sm:$0xff] %v243_v46  ;;  %v3042_v12 = vld [vmem:[%s4132_s1 + $0x90] sm:$0xff]   ;;  %v3043_v16 = vld [vmem:[%s4132_s1 + $0xc8] sm:$0xff]   ;;  %v3304_v26 = vpack.c.bf16 %v223_v11, %v222_v10 }
  0x25   : > { %2479 = vmatpush3.bf16.msra.mxu0 %v3024_v18  ;;  %3000 = vmatpush3.bf16.msra.mxu1 %v3024_v18  ;;  %294 = vst [vmem:[#allocation2 + $0x68] sm:$0xff] %v220_v53  ;;  %295 = vst [vmem:[#allocation2 + $0x70] sm:$0xff] %v221_v54  ;;  %v3051_v18 = vld [vmem:[%s4132_s1 + $0x160] sm:$0xff]   ;;  %v3299_v24 = vld [vmem:[%s3166_s12 + $0x50] sm:$0xff] }
  0x26   : > { %2480 = vmatprep.subr.bf16.mxu0 %v3025_v21  ;;  %2993 = vmatprep.subr.bf16.mxu1 %v3025_v21  ;;  %318 = vst [vmem:[#allocation2 + $0x1e8] sm:$0xff] %v244_v55  ;;  %319 = vst [vmem:[#allocation2 + $0x1f0] sm:$0xff] %v245_v57  ;;  %v3052_v19 = vld [vmem:[%s4132_s1 + $0x120] sm:$0xff]   ;;  %v225_v21 = vld [vmem:[%s3166_s12 + $0x48] sm:$0xff] }
  0x27   : > { %v346_v27 = vld [vmem:[#allocation2 + $0x187] sm:$0xff]  ;;  %v347_v29 = vld [vmem:[#allocation2 + $0x18f] sm:$0xff]  ;;  %296 = vst [vmem:[#allocation2 + $0x88] sm:$0xff] %v222_v10  ;;  %297 = vst [vmem:[#allocation2 + $0x90] sm:$0xff] %v223_v11 }
  0x28   : > { %v3201_v32 = vpack.c.bf16 %v347_v29, %v346_v27  ;;  %v324_v42 = vld [vmem:[#allocation2 + $0x27] sm:$0xff]  ;;  %v325_v43 = vld [vmem:[#allocation2 + $0x2f] sm:$0xff]  ;;  %299 = vst [vmem:[#allocation2 + $0xb0] sm:$0xff] %v225_v21  ;;  %v227_v27 = vld [vmem:[%s3166_s12 + $0x58] sm:$0xff] }
  0x29   : > { %2481 = vmatpush3.bf16.msra.mxu0 %v3026_v23  ;;  %3001 = vmatpush3.bf16.msra.mxu1 %v3026_v23  ;;  %v348_v47 = vld [vmem:[#allocation2 + $0x1a7] sm:$0xff]  ;;  %v349_v48 = vld [vmem:[#allocation2 + $0x1af] sm:$0xff]  ;;  %v3235_v51 = vpack.c.bf16 %v325_v43, %v324_v42  ;;  %300 = vst [vmem:[#allocation2 + $0xc8] sm:$0xff] %v3299_v24  ;;  %301 = vst [vmem:[#allocation2 + $0xd0] sm:$0xff] %v227_v27 }
  0x2a   : > { %2578 = vmatprep.subr.bf16.mxu1 %v3027_v28  ;;  %2690 = vmatprep.subr.bf16.mxu0 %v3028_v30  ;;  %v3237_v52 = vpack.c.bf16 %v349_v48, %v348_v47  ;;  %v326_v61 = vld [vmem:[#allocation2 + $0x47] sm:$0xff]  ;;  %v327_v62 = vld [vmem:[#allocation2 + $0x4f] sm:$0xff]  ;;  %v3049_v38 = vld [vmem:[%s4132_s1 + $0x1f8] sm:$0xff]  }
  0x2b   : > { %v350_v63 = vld [vmem:[#allocation2 + $0x1c7] sm:$0xff]  ;;  %v351_v2 = vld [vmem:[#allocation2 + $0x1cf] sm:$0xff]  ;;  %v3263_v4 = vpack.c.bf16 %v327_v62, %v326_v61  ;;  %v3050_v43 = vld [vmem:[%s4132_s1 + $0x1b8] sm:$0xff]  }
  0x2c   : > { %1364 = vmatmul.mubr.bf16.vlgmr.msra.gmra.mxu0 %v354_v31  ;;  %1460 = vmatmul.mubr.bf16.vlgmr.msra.gmra.mxu1 %v3201_v32  ;;  %v3265_v5 = vpack.c.bf16 %v351_v2, %v350_v63  ;;  %v328_v13 = vld [vmem:[#allocation2 + $0x67] sm:$0xff]  ;;  %v329_v14 = vld [vmem:[#allocation2 + $0x6f] sm:$0xff]  ;;  %v3384_v63 = vpack.c.bf16 %v227_v27, %v3299_v24  ;;  %v3067_v27 = vld [vmem:[%s4132_s1 + $0x1d8] sm:$0xff]  }
  0x2d   : > { %2579 = vmatpush3.bf16.msra.mxu1 %v3029_v33  ;;  %2691 = vmatpush3.bf16.msra.mxu0 %v3030_v34  ;;  %v352_v15 = vld [vmem:[#allocation2 + $0x1e7] sm:$0xff]  ;;  %v353_v17 = vld [vmem:[#allocation2 + $0x1ef] sm:$0xff]  ;;  %v3294_v22 = vpack.c.bf16 %v329_v14, %v328_v13  ;;  %v3053_v34 = vld [vmem:[%s4132_s1 + $0x158] sm:$0xff]  }
  0x2e   : > { %2580 = vmatprep.subr.bf16.mxu1 %v3031_v35  ;;  %1371 = vmatprep.mubr.bf16.mxu0 %v3212_v36  ;;  %v224_v20 = vld [vmem:[%s3166_s12 + $0x40] sm:$0xff]  ;;  %v3296_v23 = vpack.c.bf16 %v353_v17, %v352_v15  ;;  %v3045_v25 = vld [vmem:[%s4132_s1 + $0x88] sm:$0xff]   ;;  %v419_v33 = vld [vmem:[#allocation2 + $0x11] sm:$0xff] }
  0x2f   : > { %1467 = vmatprep.mubr.bf16.mxu1 %v415_v41  ;;  %2692 = vmatprep.subr.bf16.mxu0 %v3036_v37  ;;  %298 = vst [vmem:[#allocation2 + $0xa8] sm:$0xff] %v224_v20  ;;  %v3047_v28 = vld [vmem:[%s4132_s1 + $0xc0] sm:$0xff]   ;;  %v418_v31 = vld [vmem:[#allocation2 + $0x9] sm:$0xff]  ;;  %v3055_v37 = vld [vmem:[%s4132_s1 + $0x118] sm:$0xff]  }
  0x30   : > { %v3048_v29 = vld [vmem:[%s4132_s1 + $0x80] sm:$0xff]   ;;  %v331_v35 = vld [vmem:[#allocation2 + $0x8f] sm:$0xff]  ;;  %v450_v42 = vpack.c.bf16 %v419_v33, %v418_v31 }
  0x31   : > { %2581 = vmatpush3.bf16.msra.mxu1 %v3032_v40  ;;  %2693 = vmatpush3.bf16.msra.mxu0 %v3038_v44  ;;  %v330_v30 = vld [vmem:[#allocation2 + $0x87] sm:$0xff]  ;;  %v3340_v44 = vpack.c.bf16 %v225_v21, %v224_v20  ;;  %v3054_v45 = vld [vmem:[%s4132_s1 + $0x1f0] sm:$0xff]  }
  0x32   : > { %2582 = vmatprep.subr.bf16.mxu1 %v3033_v49  ;;  %2694 = vmatprep.subr.bf16.mxu0 %v3044_v1  ;;  %v3328_v39 = vld [vmem:[%s3166_s12 + $0x60] sm:$0xff]  ;;  %v3331_v40 = vld [vmem:[%s3166_s12 + $0x68] sm:$0xff]  ;;  %v3334_v41 = vpack.c.bf16 %v331_v35, %v330_v30  ;;  %v421_v47 = vld [vmem:[#allocation2 + $0x31] sm:$0xff] }
  0x33   : > { %302 = vst [vmem:[#allocation2 + $0xe8] sm:$0xff] %v3328_v39  ;;  %303 = vst [vmem:[#allocation2 + $0xf0] sm:$0xff] %v3331_v40  ;;  %v420_v46 = vld [vmem:[#allocation2 + $0x29] sm:$0xff]  ;;  %v3063_v11 = vld [vmem:[%s4132_s1 + $0x1e0] sm:$0xff]  }
  0x34   : > { %1372 = vmatmul.mubr.bf16.gmra.mxu0 %v3235_v51  ;;  %1468 = vmatmul.mubr.bf16.gmra.mxu1 %v3237_v52  ;;  %v3056_v48 = vld [vmem:[%s4132_s1 + $0x1b0] sm:$0xff]   ;;  %v3059_v57 = vld [vmem:[%s4132_s1 + $0x1e8] sm:$0xff]   ;;  %v3376_v61 = vpack.c.bf16 %v421_v47, %v420_v46  ;;  %v3065_v15 = vld [vmem:[%s4132_s1 + $0x140] sm:$0xff]  }
  0x35   : > { %2583 = vmatpush3.bf16.msra.mxu1 %v3034_v50  ;;  %1379 = vmatprep.mubr.bf16.mxu0 %v3242_v56  ;;  %v3057_v49 = vld [vmem:[%s4132_s1 + $0x150] sm:$0xff]   ;;  %v3060_v62 = vld [vmem:[%s4132_s1 + $0x1a8] sm:$0xff]   ;;  %v3066_v17 = vld [vmem:[%s4132_s1 + $0x100] sm:$0xff]  }
  0x36   : > { %2584 = vmatprep.subr.bf16.mxu1 %v3035_v58  ;;  %1475 = vmatprep.mubr.bf16.mxu1 %v416_v59  ;;  %v3352_v50 = vld [vmem:[%s3166_s12 + $0x70] sm:$0xff]  ;;  %v332_v53 = vld [vmem:[#allocation2 + $0xa7] sm:$0xff] }
  0x37   : > { %2695 = vmatpush3.bf16.msra.mxu0 %v3046_v3  ;;  %v3058_v54 = vld [vmem:[%s4132_s1 + $0x110] sm:$0xff]   ;;  %304 = vst [vmem:[#allocation2 + $0x108] sm:$0xff] %v3352_v50  ;;  %v3369_v58 = vld [vmem:[%s3166_s12 + $0x80] sm:$0xff]  ;;  %v3372_v59 = vld [vmem:[%s3166_s12 + $0x88] sm:$0xff] }
  0x38   : > { %2696 = vmatprep.subr.bf16.mxu0 %v3051_v18  ;;  %v333_v55 = vld [vmem:[#allocation2 + $0xaf] sm:$0xff]  ;;  %306 = vst [vmem:[#allocation2 + $0x128] sm:$0xff] %v3369_v58  ;;  %307 = vst [vmem:[#allocation2 + $0x130] sm:$0xff] %v3372_v59  ;;  %v3425_v18 = vld [vmem:[%s3166_s12 + $0xa0] sm:$0xff]  ;;  %v3478_v47 = vpack.c.bf16 %v3372_v59, %v3369_v58 }
  0x39   : > { %2585 = vmatpush3.bf16.msra.mxu1 %v3037_v60  ;;  %v3374_v60 = vpack.c.bf16 %v333_v55, %v332_v53  ;;  %v3062_v1 = vld [vmem:[%s4132_s1 + $0x108] sm:$0xff]   ;;  %v3393_v2 = vld [vmem:[%s3166_s12 + $0x90] sm:$0xff]  ;;  %310 = vst [vmem:[#allocation2 + $0x168] sm:$0xff] %v3425_v18 }
  0x3a   : > { %2586 = vmatprep.subr.bf16.mxu1 %v3039_v0  ;;  %v3061_v0 = vld [vmem:[%s4132_s1 + $0x148] sm:$0xff]   ;;  %308 = vst [vmem:[#allocation2 + $0x148] sm:$0xff] %v3393_v2  ;;  %v3072_v35 = vld [vmem:[%s4132_s1 + $0x190] sm:$0xff]  }
  0x3b   : > { %2697 = vmatpush3.bf16.msra.mxu0 %v3052_v19  ;;  %v422_v3 = vld [vmem:[#allocation2 + $0x49] sm:$0xff] }
  0x3c   : > { %1380 = vmatmul.mubr.bf16.gmra.mxu0 %v3263_v4  ;;  %1476 = vmatmul.mubr.bf16.gmra.mxu1 %v3265_v5  ;;  %v335_v10 = vld [vmem:[#allocation2 + $0xcf] sm:$0xff]  ;;  %v336_v20 = vld [vmem:[#allocation2 + $0xe7] sm:$0xff] }
  0x3d   : > { %2587 = vmatpush3.bf16.msra.mxu1 %v3040_v6  ;;  %1387 = vmatprep.mubr.bf16.mxu0 %v3270_v7  ;;  %v423_v6 = vld [vmem:[#allocation2 + $0x51] sm:$0xff]  ;;  %v3428_v19 = vld [vmem:[%s3166_s12 + $0xa8] sm:$0xff] }
  0x3e   : > { %2588 = vmatprep.subr.bf16.mxu1 %v3041_v8  ;;  %1483 = vmatprep.mubr.bf16.mxu1 %v417_v9  ;;  %v3396_v8 = vld [vmem:[%s3166_s12 + $0x98] sm:$0xff]  ;;  %v334_v9 = vld [vmem:[#allocation2 + $0xc7] sm:$0xff]  ;;  %v3412_v14 = vpack.c.bf16 %v423_v6, %v422_v3  ;;  %311 = vst [vmem:[#allocation2 + $0x170] sm:$0xff] %v3428_v19  ;;  %v337_v21 = vld [vmem:[#allocation2 + $0xef] sm:$0xff] }
  0x3f   : > { %2698 = vmatprep.subr.bf16.mxu0 %v3053_v34  ;;  %309 = vst [vmem:[#allocation2 + $0x150] sm:$0xff] %v3396_v8  ;;  %v3410_v13 = vpack.c.bf16 %v335_v10, %v334_v9  ;;  %v424_v24 = vld [vmem:[#allocation2 + $0x69] sm:$0xff]  ;;  %v3448_v30 = vpack.c.bf16 %v337_v21, %v336_v20  ;;  %v431_v6 = vld [vmem:[#allocation2 + $0xd1] sm:$0xff] }
  0x40   : > { %2699 = vmatpush3.bf16.msra.mxu0 %v3055_v37  ;;  %v3070_v34 = vld [vmem:[%s4132_s1 + $0x1d0] sm:$0xff]   ;;  %v338_v37 = vld [vmem:[#allocation2 + $0x107] sm:$0xff] }
  0x41   : > { %2589 = vmatpush3.bf16.msra.mxu1 %v3042_v12  ;;  %2700 = vmatprep.subr.bf16.mxu0 %v3057_v49  ;;  %v3064_v12 = vld [vmem:[%s4132_s1 + $0x1a0] sm:$0xff]   ;;  %v3075_v46 = vld [vmem:[%s4132_s1 + $0x188] sm:$0xff]   ;;  %v246_v53 = vld [vmem:[%s3166_s12 + $0xf0] sm:$0xff] }
  0x42   : > { %2590 = vmatprep.subr.bf16.mxu1 %v3043_v16  ;;  %v3419_v16 = vpack.c.bf16 %v3331_v40, %v3328_v39  ;;  %v427_v39 = vld [vmem:[#allocation2 + $0x91] sm:$0xff]  ;;  %v428_v49 = vld [vmem:[#allocation2 + $0xa9] sm:$0xff]  ;;  %320 = vst [vmem:[#allocation2 + $0x208] sm:$0xff] %v246_v53 }
  0x43   : > { %v341_v55 = vld [vmem:[#allocation2 + $0x12f] sm:$0xff] }
  0x44   : > { %1388 = vmatmul.mubr.bf16.gmra.mxu0 %v3294_v22  ;;  %1484 = vmatmul.mubr.bf16.gmra.mxu1 %v3296_v23 }
  0x45   : > { %2591 = vmatpush3.bf16.msra.mxu1 %v3045_v25  ;;  %1395 = vmatprep.mubr.bf16.mxu0 %v3304_v26  ;;  %v425_v25 = vld [vmem:[#allocation2 + $0x71] sm:$0xff] }
  0x46   : > { %2592 = vmatprep.subr.bf16.mxu1 %v3047_v28  ;;  %1524 = vmatprep.mubr.bf16.mxu1 %v3235_v51  ;;  %v3355_v51 = vld [vmem:[%s3166_s12 + $0x78] sm:$0xff]  ;;  %v3450_v31 = vpack.c.bf16 %v425_v25, %v424_v24  ;;  %v343_v3 = vld [vmem:[#allocation2 + $0x14f] sm:$0xff] }
  0x47   : > { %305 = vst [vmem:[#allocation2 + $0x110] sm:$0xff] %v3355_v51  ;;  %2701 = vmatpush3.bf16.msra.mxu0 %v3058_v54  ;;  %v3442_v28 = vld [vmem:[%s4132_s1 + $0x238] sm:$0xff]   ;;  %v3454_v33 = vpack.c.bf16 %v3355_v51, %v3352_v50  ;;  %v3078_v51 = vld [vmem:[%s4132_s1 + $0x180] sm:$0xff]   ;;  %v3071_v25 = vld [vmem:[%s4132_s1 + $0x230] sm:$0xff]  }
  0x48   : > { %2702 = vmatprep.subr.bf16.mxu0 %v3061_v0  ;;  %v429_v50 = vld [vmem:[#allocation2 + $0xb1] sm:$0xff]  ;;  %v340_v54 = vld [vmem:[#allocation2 + $0x127] sm:$0xff] }
  0x49   : > { %2593 = vmatpush3.bf16.msra.mxu1 %v3048_v29  ;;  %v3069_v29 = vld [vmem:[%s4132_s1 + $0x198] sm:$0xff]   ;;  %v3492_v58 = vpack.c.bf16 %v341_v55, %v340_v54  ;;  %v3494_v59 = vpack.c.bf16 %v429_v50, %v428_v49  ;;  %v430_v0 = vld [vmem:[#allocation2 + $0xc9] sm:$0xff] }
  0x4a   : > { %2802 = vmatprep.subr.bf16.mxu1 %v3049_v38  ;;  %v426_v38 = vld [vmem:[#allocation2 + $0x89] sm:$0xff]  ;;  %v3506_v10 = vpack.c.bf16 %v431_v6, %v430_v0  ;;  %v447_v54 = vld [vmem:[#allocation2 + $0x1d1] sm:$0xff] }
  0x4b   : > { %2703 = vmatpush3.bf16.msra.mxu0 %v3062_v1  ;;  %v342_v1 = vld [vmem:[#allocation2 + $0x147] sm:$0xff] }
  0x4c   : > { %1396 = vmatmul.mubr.bf16.gmra.mxu0 %v3334_v41  ;;  %1525 = vmatmul.mubr.bf16.vlgmr.msra.gmra.mxu1 %v450_v42  ;;  %v3073_v42 = vld [vmem:[%s4132_s1 + $0x1c8] sm:$0xff]   ;;  %v3504_v9 = vpack.c.bf16 %v343_v3, %v342_v1 }
  0x4d   : > { %2803 = vmatpush3.bf16.msra.mxu1 %v3050_v43  ;;  %1403 = vmatprep.mubr.bf16.mxu0 %v3340_v44  ;;  %v444_v50 = vld [vmem:[#allocation2 + $0x1a9] sm:$0xff] }
  0x4e   : > { %1532 = vmatprep.mubr.bf16.mxu1 %v3263_v4  ;;  %2804 = vmatprep.subr.bf16.mxu1 %v3054_v45  ;;  %v339_v40 = vld [vmem:[#allocation2 + $0x10f] sm:$0xff]  ;;  %v3471_v45 = vpack.c.bf16 %v427_v39, %v426_v38  ;;  %v496_v55 = vld [vmem:[#allocation2 + $0x207] sm:$0xff] }
  0x4f   : > { %2704 = vmatprep.subr.bf16.mxu0 %v3065_v15  ;;  %v3469_v43 = vpack.c.bf16 %v339_v40, %v338_v37  ;;  %v433_v15 = vld [vmem:[#allocation2 + $0xf1] sm:$0xff]  ;;  %v3081_v40 = vld [vmem:[%s4132_s1 + $0x208] sm:$0xff]  }
  0x50   : > { %2705 = vmatpush3.bf16.msra.mxu0 %v3066_v17  ;;  %v3080_v38 = vld [vmem:[%s4132_s1 + $0x210] sm:$0xff]  }
  0x51   : > { %2805 = vmatpush3.bf16.msra.mxu1 %v3056_v48  ;;  %2938 = vmatprep.subr.bf16.mxu0 %v3442_v28  ;;  %v3076_v48 = vld [vmem:[%s4132_s1 + $0x1c0] sm:$0xff]   ;;  %v441_v39 = vld [vmem:[#allocation2 + $0x171] sm:$0xff]  ;;  %v448_v1 = vld [vmem:[#allocation2 + $0x1e9] sm:$0xff] }
  0x52   : > { %2806 = vmatprep.subr.bf16.mxu1 %v3059_v57  ;;  %v247_v57 = vld [vmem:[%s3166_s12 + $0xf8] sm:$0xff] }
  0x53   : > { %321 = vst [vmem:[#allocation2 + $0x210] sm:$0xff] %v247_v57  ;;  %v3520_v21 = vpack.c.bf16 %v247_v57, %v246_v53  ;;  %v446_v53 = vld [vmem:[#allocation2 + $0x1c9] sm:$0xff] }
  0x54   : > { %1404 = vmatmul.mubr.bf16.gmra.mxu0 %v3374_v60  ;;  %1533 = vmatmul.mubr.bf16.gmra.mxu1 %v3376_v61  ;;  %v3584_v0 = vpack.c.bf16 %v447_v54, %v446_v53 }
  0x55   : > { %1411 = vmatprep.mubr.bf16.mxu0 %v3384_v63  ;;  %1540 = vmatprep.mubr.bf16.mxu1 %v3294_v22 }
  0x56   : > { %2807 = vmatpush3.bf16.msra.mxu1 %v3060_v62  ;;  %v3498_v62 = vpack.c.bf16 %v3396_v8, %v3393_v2  ;;  %v3510_v2 = vpack.c.bf16 %v3428_v19, %v3425_v18  ;;  %v432_v8 = vld [vmem:[#allocation2 + $0xe9] sm:$0xff]  ;;  %v435_v19 = vld [vmem:[#allocation2 + $0x111] sm:$0xff] }
  0x57   : > { %2808 = vmatprep.subr.bf16.mxu1 %v3063_v11  ;;  %v344_v11 = vld [vmem:[#allocation2 + $0x167] sm:$0xff]  ;;  %v3518_v20 = vpack.c.bf16 %v433_v15, %v432_v8 }
  0x58   : > { %v434_v18 = vld [vmem:[#allocation2 + $0x109] sm:$0xff] }
  0x59   : > { %v3526_v24 = vpack.c.bf16 %v435_v19, %v434_v18 }
  0x5a   : > { %2809 = vmatpush3.bf16.msra.mxu1 %v3064_v12  ;;  %v345_v12 = vld [vmem:[#allocation2 + $0x16f] sm:$0xff] }
  0x5b   : > { %2810 = vmatprep.subr.bf16.mxu1 %v3067_v27  ;;  %v3516_v17 = vpack.c.bf16 %v345_v12, %v344_v11  ;;  %v436_v27 = vld [vmem:[#allocation2 + $0x129] sm:$0xff] }
  0x5c   : > { %1412 = vmatmul.mubr.bf16.gmra.mxu0 %v3410_v13  ;;  %1541 = vmatmul.mubr.bf16.gmra.mxu1 %v3412_v14  ;;  %v497_v57 = vld [vmem:[#allocation2 + $0x20f] sm:$0xff] }
  0x5d   : > { %1419 = vmatprep.mubr.bf16.mxu0 %v3419_v16  ;;  %1548 = vmatprep.mubr.bf16.mxu1 %v3334_v41 }
  0x5e   : > { %2811 = vmatpush3.bf16.msra.mxu1 %v3069_v29  ;;  %v437_v29 = vld [vmem:[#allocation2 + $0x131] sm:$0xff] }
  0x5f   : > { %2812 = vmatprep.subr.bf16.mxu1 %v3070_v34  ;;  %v3539_v34 = vpack.c.bf16 %v437_v29, %v436_v27 }
  0x62   : > { %2813 = vmatpush3.bf16.msra.mxu1 %v3072_v35  ;;  %v3079_v35 = vld [vmem:[%s4132_s1 + $0x218] sm:$0xff]  }
  0x63   : > { %2814 = vmatprep.subr.bf16.mxu1 %v3073_v42 }
  0x64   : > { %1420 = vmatmul.mubr.bf16.gmra.mxu0 %v3448_v30  ;;  %1549 = vmatmul.mubr.bf16.gmra.mxu1 %v3450_v31 }
  0x65   : > { %1427 = vmatprep.mubr.bf16.mxu0 %v3454_v33  ;;  %1556 = vmatprep.mubr.bf16.mxu1 %v3374_v60 }
  0x66   : > { %2815 = vmatpush3.bf16.msra.mxu1 %v3075_v46  ;;  %v3082_v46 = vld [vmem:[%s4132_s1 + $0x200] sm:$0xff]  }
  0x67   : > { %2816 = vmatprep.subr.bf16.mxu1 %v3076_v48  ;;  %v443_v48 = vld [vmem:[#allocation2 + $0x191] sm:$0xff] }
  0x6a   : > { %2817 = vmatpush3.bf16.msra.mxu1 %v3078_v51  ;;  %v445_v51 = vld [vmem:[#allocation2 + $0x1b1] sm:$0xff] }
  0x6c   : > { %1428 = vmatmul.mubr.bf16.gmra.mxu0 %v3469_v43  ;;  %1557 = vmatmul.mubr.bf16.gmra.mxu1 %v3471_v45 }
  0x6d   : > { %1435 = vmatprep.mubr.bf16.mxu0 %v3478_v47  ;;  %1564 = vmatprep.mubr.bf16.mxu1 %v3410_v13 }
  0x74   : > { %1436 = vmatmul.mubr.bf16.gmra.mxu0 %v3492_v58  ;;  %1565 = vmatmul.mubr.bf16.gmra.mxu1 %v3494_v59 }
  0x75   : > { %1443 = vmatprep.mubr.bf16.mxu0 %v3498_v62  ;;  %1572 = vmatprep.mubr.bf16.mxu1 %v3448_v30 }
  0x7c   : > { %1444 = vmatmul.mubr.bf16.gmra.mxu0 %v3504_v9  ;;  %1573 = vmatmul.mubr.bf16.gmra.mxu1 %v3506_v10 }
  0x7d   : > { %1451 = vmatprep.mubr.bf16.mxu0 %v3510_v2  ;;  %1580 = vmatprep.mubr.bf16.mxu1 %v3469_v43 }
  0x84   : > { %1452 = vmatmul.mubr.bf16.gmra.mxu0 %v3516_v17  ;;  %1581 = vmatmul.mubr.bf16.gmra.mxu1 %v3518_v20 }
  0x85   : > { %1588 = vmatprep.mubr.bf16.mxu1 %v3492_v58  ;;  %1685 = vmatprep.mubr.bf16.mxu0 %v3376_v61  ;;  %v3074_v61 = vld [vmem:[%s4132_s1 + $0x228] sm:$0xff]  }
  0x8c   : > { %1589 = vmatmul.mubr.bf16.gmra.mxu1 %v3526_v24  ;;  %1686 = vmatmul.mubr.bf16.vlgmr.msra.gmra.mxu0 %v3212_v36  ;;  %v3077_v36 = vld [vmem:[%s4132_s1 + $0x220] sm:$0xff]  }
  0x8d   : > { %2939 = vmatpush3.bf16.msra.mxu0 %v3442_v28  ;;  %1596 = vmatprep.mubr.bf16.mxu1 %v3504_v9  ;;  %v439_v28 = vld [vmem:[#allocation2 + $0x151] sm:$0xff] }
  0x8e   : > { %1693 = vmatprep.mubr.bf16.mxu0 %v3412_v14  ;;  %2940 = vmatprep.subr.bf16.mxu0 %v3071_v25  ;;  %v438_v14 = vld [vmem:[#allocation2 + $0x149] sm:$0xff] }
  0x8f   : > { %v3551_v37 = vpack.c.bf16 %v439_v28, %v438_v14  ;;  %v542_v14 = vld [vmem:[#allocation2 + $0x1e8] sm:$0xff]  ;;  %v543_v28 = vld [vmem:[#allocation2 + $0x1f0] sm:$0xff] }
  0x91   : > { %2941 = vmatpush3.bf16.msra.mxu0 %v3071_v25 }
  0x92   : > { %2942 = vmatprep.subr.bf16.mxu0 %v3074_v61 }
  0x94   : > { %1597 = vmatmul.mubr.bf16.gmra.mxu1 %v3539_v34  ;;  %1694 = vmatmul.mubr.bf16.gmra.mxu0 %v3242_v56 }
  0x95   : > { %1604 = vmatprep.mubr.bf16.mxu1 %v3516_v17  ;;  %1701 = vmatprep.mubr.bf16.mxu0 %v3450_v31  ;;  %v440_v31 = vld [vmem:[#allocation2 + $0x169] sm:$0xff] }
  0x96   : > { %2943 = vmatpush3.bf16.msra.mxu0 %v3074_v61  ;;  %v3563_v42 = vpack.c.bf16 %v441_v39, %v440_v31  ;;  %v592_v31 = vld [vmem:[#allocation2 + $0x209] sm:$0xff]  ;;  %v593_v39 = vld [vmem:[#allocation2 + $0x211] sm:$0xff] }
  0x97   : > { %2944 = vmatprep.subr.bf16.mxu0 %v3077_v36 }
  0x9a   : > { %2945 = vmatpush3.bf16.msra.mxu0 %v3077_v36 }
  0x9b   : > { %2946 = vmatprep.subr.bf16.mxu0 %v3079_v35 }
  0x9c   : > { %1605 = vmatmul.mubr.bf16.gmra.mxu1 %v3551_v37  ;;  %1702 = vmatmul.mubr.bf16.gmra.mxu0 %v3270_v7 }
  0x9d   : > { %1612 = vmatprep.mubr.bf16.mxu1 %v3201_v32  ;;  %1709 = vmatprep.mubr.bf16.mxu0 %v3471_v45  ;;  %v442_v32 = vld [vmem:[#allocation2 + $0x189] sm:$0xff] }
  0x9e   : > { %2947 = vmatpush3.bf16.msra.mxu0 %v3079_v35  ;;  %v3572_v49 = vpack.c.bf16 %v443_v48, %v442_v32 }
  0x9f   : > { %2948 = vmatprep.subr.bf16.mxu0 %v3080_v38 }
  0xa2   : > { %2949 = vmatpush3.bf16.msra.mxu0 %v3080_v38 }
  0xa3   : > { %2950 = vmatprep.subr.bf16.mxu0 %v3081_v40 }
  0xa4   : > { %1613 = vmatmul.mubr.bf16.gmra.mxu1 %v3563_v42  ;;  %1710 = vmatmul.mubr.bf16.gmra.mxu0 %v3304_v26 }
  0xa5   : > { %1620 = vmatprep.mubr.bf16.mxu1 %v3237_v52  ;;  %1717 = vmatprep.mubr.bf16.mxu0 %v3494_v59  ;;  %v3578_v52 = vpack.c.bf16 %v445_v51, %v444_v50  ;;  %v3640_v50 = vpack.c.bf16 %v543_v28, %v542_v14  ;;  %v3642_v51 = vpack.c.bf16 %v593_v39, %v592_v31 }
  0xa6   : > { %2951 = vmatpush3.bf16.msra.mxu0 %v3081_v40 }
  0xa7   : > { %2952 = vmatprep.subr.bf16.mxu0 %v3082_v46 }
  0xaa   : > { %2953 = vmatpush3.bf16.msra.mxu0 %v3082_v46 }
  0xac   : > { %1621 = vmatmul.mubr.bf16.gmra.mxu1 %v3572_v49  ;;  %1718 = vmatmul.mubr.bf16.gmra.mxu0 %v3340_v44 }
  0xad   : > { %1628 = vmatprep.mubr.bf16.mxu1 %v3265_v5  ;;  %1725 = vmatprep.mubr.bf16.mxu0 %v3506_v10  ;;  %v3586_v5 = vpack.c.bf16 %v497_v57, %v496_v55 }
  0xb4   : > { %1629 = vmatmul.mubr.bf16.gmra.mxu1 %v3578_v52  ;;  %1726 = vmatmul.mubr.bf16.gmra.mxu0 %v3384_v63 }
  0xb5   : > { %1636 = vmatprep.mubr.bf16.mxu1 %v3296_v23  ;;  %1733 = vmatprep.mubr.bf16.mxu0 %v3518_v20  ;;  %v449_v23 = vld [vmem:[#allocation2 + $0x1f1] sm:$0xff] }
  0xb6   : > { %v3592_v3 = vpack.c.bf16 %v449_v23, %v448_v1 }
  0xbc   : > { %1637 = vmatmul.mubr.bf16.gmra.mxu1 %v3584_v0  ;;  %1734 = vmatmul.mubr.bf16.gmra.mxu0 %v3419_v16 }
  0xbd   : > { %1644 = vmatprep.mubr.bf16.mxu1 %v3586_v5  ;;  %1741 = vmatprep.mubr.bf16.mxu0 %v3526_v24 }
  0xc4   : > { %1645 = vmatmul.mubr.bf16.gmra.mxu1 %v3592_v3  ;;  %1742 = vmatmul.mubr.bf16.gmra.mxu0 %v3454_v33 }
  0xc5   : > { %1749 = vmatprep.mubr.bf16.mxu0 %v3539_v34  ;;  %1846 = vmatprep.mubr.bf16.mxu1 %v3242_v56  ;;  %v536_v56 = vld [vmem:[#allocation2 + $0x188] sm:$0xff] }
  0xcc   : > { %1750 = vmatmul.mubr.bf16.gmra.mxu0 %v3478_v47  ;;  %1847 = vmatmul.mubr.bf16.vlgmr.msra.gmra.mxu1 %v3263_v4  ;;  %v537_v4 = vld [vmem:[#allocation2 + $0x190] sm:$0xff] }
  0xcd   : > { %1757 = vmatprep.mubr.bf16.mxu0 %v3551_v37  ;;  %1854 = vmatprep.mubr.bf16.mxu1 %v3270_v7  ;;  %v3610_v6 = vpack.c.bf16 %v537_v4, %v536_v56  ;;  %v538_v7 = vld [vmem:[#allocation2 + $0x1a8] sm:$0xff]  ;;  %v708_v4 = vld [vmem:[#allocation2 + $0x51] sm:$0xff] }
  0xce   : > { %v707_v56 = vld [vmem:[#allocation2 + $0x49] sm:$0xff] }
  0xd4   : > { %1758 = vmatmul.mubr.bf16.gmra.mxu0 %v3498_v62  ;;  %1855 = vmatmul.mubr.bf16.gmra.mxu1 %v3294_v22  ;;  %v539_v22 = vld [vmem:[#allocation2 + $0x1b0] sm:$0xff] }
  0xd5   : > { %1765 = vmatprep.mubr.bf16.mxu0 %v3563_v42  ;;  %1862 = vmatprep.mubr.bf16.mxu1 %v3304_v26  ;;  %v3616_v26 = vpack.c.bf16 %v539_v22, %v538_v7 }
  0xdc   : > { %1766 = vmatmul.mubr.bf16.gmra.mxu0 %v3510_v2  ;;  %1863 = vmatmul.mubr.bf16.gmra.mxu1 %v3334_v41 }
  0xdd   : > { %1773 = vmatprep.mubr.bf16.mxu0 %v3572_v49  ;;  %1870 = vmatprep.mubr.bf16.mxu1 %v3340_v44  ;;  %v540_v44 = vld [vmem:[#allocation2 + $0x1c8] sm:$0xff] }
  0xe4   : > { %1774 = vmatmul.mubr.bf16.gmra.mxu0 %v3610_v6  ;;  %1871 = vmatmul.mubr.bf16.gmra.mxu1 %v3374_v60  ;;  %v541_v60 = vld [vmem:[#allocation2 + $0x1d0] sm:$0xff] }
  0xe5   : > { %1781 = vmatprep.mubr.bf16.mxu0 %v3578_v52  ;;  %1878 = vmatprep.mubr.bf16.mxu1 %v3384_v63  ;;  %v3626_v25 = vpack.c.bf16 %v541_v60, %v540_v44  ;;  %v739_v44 = vpack.c.bf16 %v708_v4, %v707_v56 }
  0xec   : > { %v2482_v41 = vpop.f32.mrf.mxu0  ;;  %v2554_v8 = vpop.f32.mrf.mxu1  ;;  %1782 = vmatmul.mubr.bf16.gmra.mxu0 %v3616_v26  ;;  %1879 = vmatmul.mubr.bf16.gmra.mxu1 %v3410_v13 }
  0xed   : > { %1789 = vmatprep.mubr.bf16.mxu0 %v3584_v0  ;;  %1886 = vmatprep.mubr.bf16.mxu1 %v3419_v16 }
  0xee   : > { %v2483_v11 = vpop.f32.mrf.mxu0  ;;  %v2555_v12 = vpop.f32.mrf.mxu1 }
  0xef   : > { %v3622_v15 = vadd.f32 %v2483_v11, %v2482_v41  ;;  %v3624_v63 = vadd.f32 %v2555_v12, %v2554_v8 }
  0xf0   : > { %v2485_v18 = vpop.f32.mrf.mxu0  ;;  %v2557_v19 = vpop.f32.mrf.mxu1 }
  0xf2   : > { %v2486_v27 = vpop.f32.mrf.mxu0  ;;  %v2558_v29 = vpop.f32.mrf.mxu1 }
  0xf3   : > { %v3628_v61 = vadd.f32 %v2486_v27, %v2485_v18  ;;  %v3630_v13 = vadd.f32 %v2558_v29, %v2557_v19  ;;  %v710_v27 = vld [vmem:[#allocation2 + $0x71] sm:$0xff] }
  0xf4   : > { %v2488_v36 = vpop.f32.mrf.mxu0  ;;  %v2560_v16 = vpop.f32.mrf.mxu1  ;;  %1790 = vmatmul.mubr.bf16.gmra.mxu0 %v3626_v25  ;;  %1887 = vmatmul.mubr.bf16.gmra.mxu1 %v3448_v30 }
  0xf5   : > { %1797 = vmatprep.mubr.bf16.mxu0 %v3592_v3  ;;  %1894 = vmatprep.mubr.bf16.mxu1 %v3454_v33 }
  0xf6   : > { %v2489_v35 = vpop.f32.mrf.mxu0  ;;  %v2561_v38 = vpop.f32.mrf.mxu1 }
  0xf7   : > { %v3636_v40 = vadd.f32 %v2489_v35, %v2488_v36  ;;  %v3638_v46 = vadd.f32 %v2561_v38, %v2560_v16 }
  0xf8   : > { %v2491_v32 = vpop.f32.mrf.mxu0  ;;  %v2563_v48 = vpop.f32.mrf.mxu1 }
  0xfa   : > { %v2492_v30 = vpop.f32.mrf.mxu0  ;;  %v2564_v53 = vpop.f32.mrf.mxu1 }
  0xfb   : > { %v3644_v54 = vadd.f32 %v2492_v30, %v2491_v32  ;;  %v3646_v33 = vadd.f32 %v2564_v53, %v2563_v48 }
  0xfc   : > { %v2494_v55 = vpop.f32.mrf.mxu0  ;;  %v2566_v57 = vpop.f32.mrf.mxu1  ;;  %1798 = vmatmul.mubr.bf16.gmra.mxu0 %v3640_v50  ;;  %1895 = vmatmul.mubr.bf16.gmra.mxu1 %v3469_v43 }
  0xfd   : > { %1805 = vmatprep.mubr.bf16.mxu0 %v3642_v51  ;;  %1902 = vmatprep.mubr.bf16.mxu1 %v3478_v47  ;;  %v709_v47 = vld [vmem:[#allocation2 + $0x69] sm:$0xff] }
  0xfe   : > { %v2495_v1 = vpop.f32.mrf.mxu0  ;;  %v2567_v23 = vpop.f32.mrf.mxu1  ;;  %v740_v38 = vpack.c.bf16 %v710_v27, %v709_v47 }
  0xff   : > { %v3652_v7 = vadd.f32 %v2495_v1, %v2494_v55  ;;  %v3654_v22 = vadd.f32 %v2567_v23, %v2566_v57 }
 0x100   : > { %v2497_v41 = vpop.f32.mrf.mxu0  ;;  %v2569_v8 = vpop.f32.mrf.mxu1 }
 0x102   : > { %v2498_v60 = vpop.f32.mrf.mxu0  ;;  %v2570_v11 = vpop.f32.mrf.mxu1 }
 0x103   : > { %v3656_v12 = vadd.f32 %v2498_v60, %v2497_v41  ;;  %v3658_v43 = vadd.f32 %v2570_v11, %v2569_v8 }
 0x104   : > { %v2500_v18 = vpop.f32.mrf.mxu0  ;;  %v2572_v19 = vpop.f32.mrf.mxu1  ;;  %1806 = vmatmul.mubr.bf16.gmra.mxu0 %v3520_v21  ;;  %1903 = vmatmul.mubr.bf16.gmra.mxu1 %v3492_v58 }
 0x105   : > { %1910 = vmatprep.mubr.bf16.mxu1 %v3498_v62  ;;  %2954 = vmatprep.mubr.bf16.mxu0 %v739_v44 }
 0x106   : > { %v2501_v29 = vpop.f32.mrf.mxu0  ;;  %v2573_v36 = vpop.f32.mrf.mxu1 }
 0x107   : > { %v3663_v16 = vadd.f32 %v2501_v29, %v2500_v18  ;;  %v3665_v14 = vadd.f32 %v2573_v36, %v2572_v19 }
 0x108   : > { %v2503_v28 = vpop.f32.mrf.mxu0  ;;  %v2575_v35 = vpop.f32.mrf.mxu1 }
 0x10a   : > { %v2504_v31 = vpop.f32.mrf.mxu0  ;;  %v2576_v39 = vpop.f32.mrf.mxu1 }
 0x10b   : > { %v3667_v32 = vadd.f32 %v2504_v31, %v2503_v28  ;;  %v3669_v48 = vadd.f32 %v2576_v39, %v2575_v35  ;;  %v633_v31 = vld [vmem:[#allocation2 + $0x1a7] sm:$0xff] }
 0x10c   : > { %v2506_v58 = vpop.f32.mrf.mxu0  ;;  %v2594_v62 = vpop.f32.mrf.mxu1  ;;  %1911 = vmatmul.mubr.bf16.gmra.mxu1 %v3504_v9  ;;  %2955 = vmatmul.mubr.bf16.vlgmr.msra.gmra.mxu0 %v740_v38 }
 0x10d   : > { %1918 = vmatprep.mubr.bf16.mxu1 %v3510_v2  ;;  %2958 = vmatprep.mubr.bf16.mxu0 %v3471_v45  ;;  %v631_v2 = vld [vmem:[#allocation2 + $0x187] sm:$0xff] }
 0x10e   : > { %v2507_v30 = vpop.f32.mrf.mxu0  ;;  %v2595_v53 = vpop.f32.mrf.mxu1 }
 0x10f   : > { %v3674_v55 = vadd.f32 %v2507_v30, %v2506_v58  ;;  %v2596_v57 = vadd.f32 %v2595_v53, %v2594_v62 }
 0x110   : > { %v2509_v1 = vpop.f32.mrf.mxu0  ;;  %v2597_v23 = vpop.f32.mrf.mxu1 }
 0x111   : > { %v3677_v56 = vadd.f32 %v2596_v57, %v3622_v15  ;;  %v632_v15 = vld [vmem:[#allocation2 + $0x18f] sm:$0xff] }
 0x112   : > { %v2510_v4 = vpop.f32.mrf.mxu0  ;;  %v2598_v41 = vpop.f32.mrf.mxu1  ;;  %v653_v36 = vpack.c.bf16 %v632_v15, %v631_v2 }
 0x113   : > { %v3679_v8 = vadd.f32 %v2510_v4, %v2509_v1  ;;  %v2599_v9 = vadd.f32 %v2598_v41, %v2597_v23 }
 0x114   : > { %v2512_v44 = vpop.f32.mrf.mxu0  ;;  %v2600_v60 = vpop.f32.mrf.mxu1  ;;  %1919 = vmatmul.mubr.bf16.gmra.mxu1 %v3516_v17  ;;  %2959 = vmatmul.mubr.bf16.gmra.mxu0 %v3494_v59 }
 0x115   : > { %v3684_v45 = vadd.f32 %v2599_v9, %v3628_v61  ;;  %1926 = vmatprep.mubr.bf16.mxu1 %v3610_v6  ;;  %2962 = vmatprep.mubr.bf16.mxu0 %v3506_v10 }
 0x116   : > { %v2513_v11 = vpop.f32.mrf.mxu0  ;;  %v2601_v18 = vpop.f32.mrf.mxu1 }
 0x117   : > { %v3688_v19 = vadd.f32 %v2513_v11, %v2512_v44  ;;  %v2602_v47 = vadd.f32 %v2601_v18, %v2600_v60  ;;  %v635_v44 = vld [vmem:[#allocation2 + $0x1c7] sm:$0xff] }
 0x118   : > { %v2515_v27 = vpop.f32.mrf.mxu0  ;;  %v2603_v29 = vpop.f32.mrf.mxu1 }
 0x119   : > { %v3691_v17 = vadd.f32 %v2602_v47, %v3636_v40  ;;  %v634_v40 = vld [vmem:[#allocation2 + $0x1af] sm:$0xff] }
 0x11a   : > { %v2516_v59 = vpop.f32.mrf.mxu0  ;;  %v2604_v61 = vpop.f32.mrf.mxu1  ;;  %v654_v1 = vpack.c.bf16 %v634_v40, %v633_v31 }
 0x11b   : > { %v3693_v28 = vadd.f32 %v2516_v59, %v2515_v27  ;;  %v2605_v6 = vadd.f32 %v2604_v61, %v2603_v29 }
 0x11c   : > { %v2518_v35 = vpop.f32.mrf.mxu0  ;;  %v2606_v10 = vpop.f32.mrf.mxu1  ;;  %1927 = vmatmul.mubr.bf16.gmra.mxu1 %v653_v36  ;;  %2963 = vmatmul.mubr.bf16.gmra.mxu0 %v3518_v20 }
 0x11d   : > { %v3697_v38 = vadd.f32 %v2605_v6, %v3644_v54  ;;  %1934 = vmatprep.mubr.bf16.mxu1 %v3616_v26  ;;  %2966 = vmatprep.mubr.bf16.mxu0 %v3526_v24  ;;  %v637_v6 = vld [vmem:[#allocation2 + $0x1e7] sm:$0xff] }
 0x11e   : > { %v2519_v39 = vpop.f32.mrf.mxu0  ;;  %v2607_v58 = vpop.f32.mrf.mxu1 }
 0x11f   : > { %v3701_v62 = vadd.f32 %v2519_v39, %v2518_v35  ;;  %v2608_v30 = vadd.f32 %v2607_v58, %v2606_v10 }
 0x120   : > { %v2521_v53 = vpop.f32.mrf.mxu0  ;;  %v2609_v57 = vpop.f32.mrf.mxu1 }
 0x121   : > { %v3704_v23 = vadd.f32 %v2608_v30, %v3652_v7  ;;  %v636_v7 = vld [vmem:[#allocation2 + $0x1cf] sm:$0xff] }
 0x122   : > { %v2522_v20 = vpop.f32.mrf.mxu0  ;;  %v2610_v54 = vpop.f32.mrf.mxu1  ;;  %v655_v27 = vpack.c.bf16 %v636_v7, %v635_v44 }
 0x123   : > { %v3706_v4 = vadd.f32 %v2522_v20, %v2521_v53  ;;  %v2611_v26 = vadd.f32 %v2610_v54, %v2609_v57 }
 0x124   : > { %v2524_v41 = vpop.f32.mrf.mxu0  ;;  %v2612_v24 = vpop.f32.mrf.mxu1  ;;  %1935 = vmatmul.mubr.bf16.gmra.mxu1 %v654_v1  ;;  %2967 = vmatmul.mubr.bf16.gmra.mxu0 %v3539_v34 }
 0x125   : > { %v3710_v9 = vadd.f32 %v2611_v26, %v3656_v12  ;;  %1942 = vmatprep.mubr.bf16.mxu1 %v3626_v25  ;;  %2970 = vmatprep.mubr.bf16.mxu0 %v3551_v37 }
 0x126   : > { %v2525_v60 = vpop.f32.mrf.mxu0  ;;  %v2613_v2 = vpop.f32.mrf.mxu1 }
 0x127   : > { %v3714_v15 = vadd.f32 %v2525_v60, %v2524_v41  ;;  %v2614_v11 = vadd.f32 %v2613_v2, %v2612_v24  ;;  %v3083_v60 = vld [vmem:[#allocation2 + $0x8] sm:$0xff] }
 0x128   : > { %v2527_v18 = vpop.f32.mrf.mxu0  ;;  %v2615_v47 = vpop.f32.mrf.mxu1  ;;  %v706_v2 = vpack.c.bf16 %v3083_v60, %v3083_v60 }
 0x129   : > { %v3717_v29 = vadd.f32 %v2614_v11, %v3663_v16  ;;  %v638_v16 = vld [vmem:[#allocation2 + $0x1ef] sm:$0xff] }
 0x12a   : > { %v2528_v34 = vpop.f32.mrf.mxu0  ;;  %v2616_v12 = vpop.f32.mrf.mxu1  ;;  %v656_v30 = vpack.c.bf16 %v638_v16, %v637_v6 }
 0x12b   : > { %v3719_v36 = vadd.f32 %v2528_v34, %v2527_v18  ;;  %v2617_v25 = vadd.f32 %v2616_v12, %v2615_v47  ;;  %v737_v34 = vld [vmem:[#allocation2 + $0x229] sm:$0xff]  ;;  %v738_v12 = vld [vmem:[#allocation2 + $0x231] sm:$0xff] }
 0x12c   : > { %v2530_v59 = vpop.f32.mrf.mxu0  ;;  %v2618_v37 = vpop.f32.mrf.mxu1  ;;  %1943 = vmatmul.mubr.bf16.gmra.mxu1 %v655_v27  ;;  %2971 = vmatmul.mubr.bf16.gmra.mxu0 %v3563_v42 }
 0x12d   : > { %v3723_v61 = vadd.f32 %v2617_v25, %v3667_v32  ;;  %1950 = vmatprep.mubr.bf16.mxu1 %v3640_v50  ;;  %2974 = vmatprep.mubr.bf16.mxu0 %v3572_v49 }
 0x12e   : > { %v2531_v35 = vpop.f32.mrf.mxu0  ;;  %v2619_v10 = vpop.f32.mrf.mxu1 }
 0x12f   : > { %v3727_v31 = vadd.f32 %v2531_v35, %v2530_v59  ;;  %v2620_v40 = vadd.f32 %v2619_v10, %v2618_v37  ;;  %v754_v10 = vpack.c.bf16 %v738_v12, %v737_v34 }
 0x130   : > { %v2533_v39 = vpop.f32.mrf.mxu0  ;;  %v2621_v58 = vpop.f32.mrf.mxu1 }
 0x131   : > { %v3730_v53 = vadd.f32 %v2620_v40, %v3674_v55 }
 0x132   : > { %v2534_v42 = vpop.f32.mrf.mxu0  ;;  %v2622_v32 = vpop.f32.mrf.mxu1 }
 0x133   : > { %v3732_v57 = vadd.f32 %v2534_v42, %v2533_v39  ;;  %v2623_v50 = vadd.f32 %v2622_v32, %v2621_v58 }
 0x134   : > { %v2536_v1 = vpop.f32.mrf.mxu0  ;;  %v2624_v49 = vpop.f32.mrf.mxu1  ;;  %1951 = vmatmul.mubr.bf16.gmra.mxu1 %v656_v30  ;;  %2975 = vmatmul.mubr.bf16.gmra.mxu0 %v3578_v52 }
 0x135   : > { %v3736_v20 = vadd.f32 %v2623_v50, %v3679_v8  ;;  %1958 = vmatprep.mubr.bf16.mxu1 %v3520_v21  ;;  %2978 = vmatprep.mubr.bf16.mxu0 %v3584_v0  ;;  %v641_v0 = vld [vmem:[#allocation2 + $0x227] sm:$0xff] }
 0x136   : > { %v2537_v54 = vpop.f32.mrf.mxu0  ;;  %v2625_v55 = vpop.f32.mrf.mxu1 }
 0x137   : > { %v3740_v26 = vadd.f32 %v2537_v54, %v2536_v1  ;;  %v2626_v41 = vadd.f32 %v2625_v55, %v2624_v49 }
 0x138   : > { %v2539_v24 = vpop.f32.mrf.mxu0  ;;  %v2627_v44 = vpop.f32.mrf.mxu1 }
 0x139   : > { %v3743_v7 = vadd.f32 %v2626_v41, %v3688_v19  ;;  %v642_v19 = vld [vmem:[#allocation2 + $0x22f] sm:$0xff] }
 0x13a   : > { %v2540_v52 = vpop.f32.mrf.mxu0  ;;  %v2628_v11 = vpop.f32.mrf.mxu1 }
 0x13b   : > { %v3745_v8 = vadd.f32 %v2540_v52, %v2539_v24  ;;  %v2629_v18 = vadd.f32 %v2628_v11, %v2627_v44 }
 0x13c   : > { %v2542_v21 = vpop.f32.mrf.mxu0  ;;  %v2630_v47 = vpop.f32.mrf.mxu1  ;;  %1959 = vmatmul.mubr.bf16.gmra.mxu1 %v3586_v5  ;;  %2979 = vmatmul.mubr.bf16.gmra.mxu0 %v3592_v3  ;;  %v658_v5 = vpack.c.bf16 %v642_v19, %v641_v0 }
 0x13d   : > { %v3750_v27 = vadd.f32 %v2629_v18, %v3693_v28  ;;  %1966 = vmatprep.mubr.bf16.mxu1 %v706_v2  ;;  %2982 = vmatprep.mubr.bf16.mxu0 %v3642_v51 }
 0x13e   : > { %v2543_v25 = vpop.f32.mrf.mxu0  ;;  %v2631_v59 = vpop.f32.mrf.mxu1 }
 0x13f   : > { %v3753_v37 = vadd.f32 %v2543_v25, %v2542_v21  ;;  %v2632_v6 = vadd.f32 %v2631_v59, %v2630_v47 }
 0x140   : > { %v2545_v16 = vpop.f32.mrf.mxu0  ;;  %v2633_v35 = vpop.f32.mrf.mxu1 }
 0x141   : > { %v3756_v3 = vadd.f32 %v2632_v6, %v3701_v62 }
 0x142   : > { %v2546_v28 = vpop.f32.mrf.mxu0  ;;  %v2634_v40 = vpop.f32.mrf.mxu1 }
 0x143   : > { %v3758_v39 = vadd.f32 %v2546_v28, %v2545_v16  ;;  %v2635_v51 = vadd.f32 %v2634_v40, %v2633_v35 }
 0x144   : > { %v2548_v58 = vpop.f32.mrf.mxu0  ;;  %v2636_v30 = vpop.f32.mrf.mxu1  ;;  %1967 = vmatmul.mubr.bf16.gmra.mxu1 %v658_v5  ;;  %2983 = vmatmul.mubr.bf16.gmra.mxu0 %v754_v10 }
 0x145   : > { %v3761_v42 = vadd.f32 %v2635_v51, %v3706_v4 }
 0x146   : > { %v2549_v32 = vpop.f32.mrf.mxu0  ;;  %v2637_v50 = vpop.f32.mrf.mxu1 }
 0x147   : > { %v3763_v1 = vadd.f32 %v2549_v32, %v2548_v58  ;;  %v2638_v49 = vadd.f32 %v2637_v50, %v2636_v30 }
 0x148   : > { %v2551_v54 = vpop.f32.mrf.mxu0  ;;  %v2639_v62 = vpop.f32.mrf.mxu1 }
 0x149   : > { %v3766_v55 = vadd.f32 %v2638_v49, %v3714_v15 }
 0x14a   : > { %v2552_v41 = vpop.f32.mrf.mxu0  ;;  %v2640_v24 = vpop.f32.mrf.mxu1 }
 0x14b   : > { %v3768_v44 = vadd.f32 %v2552_v41, %v2551_v54  ;;  %v2641_v60 = vadd.f32 %v2640_v24, %v2639_v62 }
 0x14c   : > { %v2642_v2 = vpop.f32.mrf.mxu1  ;;  %v2706_v52 = vpop.f32.mrf.mxu0 }
 0x14d   : > { %v3771_v4 = vadd.f32 %v2641_v60, %v3719_v36 }
 0x14e   : > { %v2643_v11 = vpop.f32.mrf.mxu1  ;;  %v2707_v18 = vpop.f32.mrf.mxu0 }
 0x14f   : > { %v2644_v21 = vadd.f32 %v2643_v11, %v2642_v2  ;;  %v2708_v47 = vadd.f32 %v2707_v18, %v2706_v52 }
 0x150   : > { %v2645_v0 = vpop.f32.mrf.mxu1  ;;  %v2709_v19 = vpop.f32.mrf.mxu0 }
 0x151   : > { %v3774_v34 = vadd.f32 %v2644_v21, %v3727_v31  ;;  %v3777_v15 = vadd.f32 %v2708_v47, %v3677_v56 }
 0x152   : > { %v2646_v12 = vpop.f32.mrf.mxu1  ;;  %v2710_v25 = vpop.f32.mrf.mxu0 }
 0x153   : > { %v2647_v59 = vadd.f32 %v2646_v12, %v2645_v0  ;;  %v2711_v6 = vadd.f32 %v2710_v25, %v2709_v19 }
 0x154   : > { %v2648_v16 = vpop.f32.mrf.mxu1  ;;  %v2712_v35 = vpop.f32.mrf.mxu0 }
 0x155   : > { %v3780_v36 = vadd.f32 %v2647_v59, %v3732_v57  ;;  %v3783_v5 = vadd.f32 %v2711_v6, %v3684_v45 }
 0x156   : > { %v2649_v10 = vpop.f32.mrf.mxu1  ;;  %v2713_v28 = vpop.f32.mrf.mxu0 }
 0x157   : > { %v2650_v40 = vadd.f32 %v2649_v10, %v2648_v16  ;;  %v2714_v31 = vadd.f32 %v2713_v28, %v2712_v35 }
 0x158   : > { %v2651_v51 = vpop.f32.mrf.mxu1  ;;  %v2715_v58 = vpop.f32.mrf.mxu0 }
 0x159   : > { %v3786_v56 = vadd.f32 %v2650_v40, %v3740_v26  ;;  %v3789_v30 = vadd.f32 %v2714_v31, %v3691_v17 }
 0x15a   : > { %v2652_v32 = vpop.f32.mrf.mxu1  ;;  %v2716_v50 = vpop.f32.mrf.mxu0 }
 0x15b   : > { %v2653_v49 = vadd.f32 %v2652_v32, %v2651_v51  ;;  %v2717_v57 = vadd.f32 %v2716_v50, %v2715_v58 }
 0x15c   : > { %v2654_v54 = vpop.f32.mrf.mxu1  ;;  %v2718_v62 = vpop.f32.mrf.mxu0 }
 0x15d   : > { %v3792_v45 = vadd.f32 %v2653_v49, %v3745_v8  ;;  %v3795_v41 = vadd.f32 %v2717_v57, %v3697_v38 }
 0x15e   : > { %v2655_v24 = vpop.f32.mrf.mxu1  ;;  %v2719_v60 = vpop.f32.mrf.mxu0 }
 0x15f   : > { %v2656_v2 = vadd.f32 %v2655_v24, %v2654_v54  ;;  %v2720_v26 = vadd.f32 %v2719_v60, %v2718_v62 }
 0x160   : > { %v2657_v52 = vpop.f32.mrf.mxu1  ;;  %v2721_v11 = vpop.f32.mrf.mxu0 }
 0x161   : > { %v3798_v17 = vadd.f32 %v2656_v2, %v3753_v37  ;;  %v3801_v18 = vadd.f32 %v2720_v26, %v3704_v23 }
 0x162   : > { %v2658_v21 = vpop.f32.mrf.mxu1  ;;  %v2722_v47 = vpop.f32.mrf.mxu0 }
 0x163   : > { %v2659_v0 = vadd.f32 %v2658_v21, %v2657_v52  ;;  %v2723_v8 = vadd.f32 %v2722_v47, %v2721_v11 }
 0x164   : > { %v2660_v19 = vpop.f32.mrf.mxu1  ;;  %v2724_v12 = vpop.f32.mrf.mxu0 }
 0x165   : > { %v3804_v38 = vadd.f32 %v2659_v0, %v3758_v39  ;;  %v3807_v25 = vadd.f32 %v2723_v8, %v3710_v9 }
 0x166   : > { %v2661_v59 = vpop.f32.mrf.mxu1  ;;  %v2725_v6 = vpop.f32.mrf.mxu0 }
 0x167   : > { %v2662_v16 = vadd.f32 %v2661_v59, %v2660_v19  ;;  %v2726_v37 = vadd.f32 %v2725_v6, %v2724_v12 }
 0x168   : > { %v2663_v35 = vpop.f32.mrf.mxu1  ;;  %v2727_v10 = vpop.f32.mrf.mxu0 }
 0x169   : > { %v3810_v23 = vadd.f32 %v2662_v16, %v3763_v1  ;;  %v3813_v28 = vadd.f32 %v2726_v37, %v3717_v29 }
 0x16a   : > { %v2664_v40 = vpop.f32.mrf.mxu1  ;;  %v2728_v31 = vpop.f32.mrf.mxu0 }
 0x16b   : > { %v2665_v51 = vadd.f32 %v2664_v40, %v2663_v35  ;;  %v2729_v39 = vadd.f32 %v2728_v31, %v2727_v10 }
 0x16c   : > { %v2666_v58 = vpop.f32.mrf.mxu1  ;;  %v2730_v32 = vpop.f32.mrf.mxu0 }
 0x16d   : > { %v3816_v9 = vadd.f32 %v2665_v51, %v3768_v44  ;;  %v3819_v50 = vadd.f32 %v2729_v39, %v3723_v61 }
 0x16e   : > { %v2667_v49 = vpop.f32.mrf.mxu1  ;;  %v2731_v57 = vpop.f32.mrf.mxu0 }
 0x16f   : > { %v2668_v54 = vadd.f32 %v2667_v49, %v2666_v58  ;;  %v2732_v1 = vadd.f32 %v2731_v57, %v2730_v32 }
 0x170   : > { %v2669_v62 = vpop.f32.mrf.mxu1  ;;  %v2733_v24 = vpop.f32.mrf.mxu0 }
 0x171   : > { %v3822_v29 = vadd.f32 %v2668_v54, %v3624_v63  ;;  %v3825_v60 = vadd.f32 %v2732_v1, %v3730_v53 }
 0x172   : > { %v2670_v2 = vpop.f32.mrf.mxu1  ;;  %v2734_v26 = vpop.f32.mrf.mxu0 }
 0x173   : > { %v2671_v52 = vadd.f32 %v2670_v2, %v2669_v62  ;;  %v2735_v44 = vadd.f32 %v2734_v26, %v2733_v24 }
 0x174   : > { %v2672_v11 = vpop.f32.mrf.mxu1  ;;  %v2736_v21 = vpop.f32.mrf.mxu0 }
 0x175   : > { %v3828_v61 = vadd.f32 %v2671_v52, %v3630_v13  ;;  %v3831_v47 = vadd.f32 %v2735_v44, %v3736_v20 }
 0x176   : > { %v2673_v0 = vpop.f32.mrf.mxu1  ;;  %v2737_v8 = vpop.f32.mrf.mxu0 }
 0x177   : > { %v2674_v19 = vadd.f32 %v2673_v0, %v2672_v11  ;;  %v2738_v63 = vadd.f32 %v2737_v8, %v2736_v21 }
 0x178   : > { %v2675_v12 = vpop.f32.mrf.mxu1  ;;  %v2739_v59 = vpop.f32.mrf.mxu0 }
 0x179   : > { %v3834_v53 = vadd.f32 %v2674_v19, %v3638_v46  ;;  %v3837_v6 = vadd.f32 %v2738_v63, %v3743_v7 }
 0x17a   : > { %v2676_v16 = vpop.f32.mrf.mxu1  ;;  %v2740_v37 = vpop.f32.mrf.mxu0 }
 0x17b   : > { %v2677_v35 = vadd.f32 %v2676_v16, %v2675_v12  ;;  %v2741_v13 = vadd.f32 %v2740_v37, %v2739_v59 }
 0x17c   : > { %v2678_v10 = vpop.f32.mrf.mxu1  ;;  %v2742_v40 = vpop.f32.mrf.mxu0 }
 0x17d   : > { %v3840_v20 = vadd.f32 %v2677_v35, %v3646_v33  ;;  %v3843_v31 = vadd.f32 %v2741_v13, %v3750_v27 }
 0x17e   : > { %v2679_v51 = vpop.f32.mrf.mxu1  ;;  %v2743_v39 = vpop.f32.mrf.mxu0 }
 0x17f   : > { %v2680_v58 = vadd.f32 %v2679_v51, %v2678_v10  ;;  %v2744_v46 = vadd.f32 %v2743_v39, %v2742_v40 }
 0x180   : > { %v2681_v32 = vpop.f32.mrf.mxu1  ;;  %v2745_v49 = vpop.f32.mrf.mxu0 }
 0x181   : > { %v3846_v7 = vadd.f32 %v2680_v58, %v3654_v22  ;;  %v3849_v57 = vadd.f32 %v2744_v46, %v3756_v3 }
 0x182   : > { %v2682_v54 = vpop.f32.mrf.mxu1  ;;  %v2746_v1 = vpop.f32.mrf.mxu0 }
 0x183   : > { %v2683_v62 = vadd.f32 %v2682_v54, %v2681_v32  ;;  %v2747_v33 = vadd.f32 %v2746_v1, %v2745_v49 }
 0x184   : > { %v2684_v24 = vpop.f32.mrf.mxu1  ;;  %v2748_v2 = vpop.f32.mrf.mxu0 }
 0x185   : > { %v3852_v27 = vadd.f32 %v2683_v62, %v3658_v43  ;;  %v3855_v26 = vadd.f32 %v2747_v33, %v3761_v42 }
 0x186   : > { %v2685_v52 = vpop.f32.mrf.mxu1  ;;  %v2749_v44 = vpop.f32.mrf.mxu0 }
 0x187   : > { %v2686_v11 = vadd.f32 %v2685_v52, %v2684_v24  ;;  %v2750_v22 = vadd.f32 %v2749_v44, %v2748_v2 }
 0x188   : > { %v2687_v21 = vpop.f32.mrf.mxu1  ;;  %v2751_v0 = vpop.f32.mrf.mxu0 }
 0x189   : > { %v3858_v3 = vadd.f32 %v2686_v11, %v3665_v14  ;;  %v3861_v8 = vadd.f32 %v2750_v22, %v3766_v55 }
 0x18a   : > { %v2688_v19 = vpop.f32.mrf.mxu1  ;;  %v2752_v63 = vpop.f32.mrf.mxu0 }
 0x18b   : > { %v2689_v12 = vadd.f32 %v2688_v19, %v2687_v21  ;;  %v2753_v43 = vadd.f32 %v2752_v63, %v2751_v0 }
 0x18c   : > { %v2754_v59 = vpop.f32.mrf.mxu0  ;;  %v3863_v16 = vpop.f32.mrf.mxu1 }
 0x18d   : > { %v3866_v42 = vadd.f32 %v2689_v12, %v3669_v48  ;;  %v3869_v37 = vadd.f32 %v2753_v43, %v3771_v4 }
 0x18e   : > { %v2755_v35 = vpop.f32.mrf.mxu0  ;;  %v3871_v13 = vpop.f32.mrf.mxu1 }
 0x18f   : > { %v2756_v14 = vadd.f32 %v2755_v35, %v2754_v59 }
 0x190   : > { %v2757_v10 = vpop.f32.mrf.mxu0  ;;  %v3873_v55 = vpop.f32.mrf.mxu1 }
 0x191   : > { %v3876_v40 = vadd.f32 %v2756_v14, %v3774_v34 }
 0x192   : > { %v2758_v51 = vpop.f32.mrf.mxu0  ;;  %v3878_v39 = vpop.f32.mrf.mxu1 }
 0x193   : > { %v2759_v58 = vadd.f32 %v2758_v51, %v2757_v10 }
 0x194   : > { %v2760_v46 = vpop.f32.mrf.mxu0  ;;  %v3880_v48 = vpop.f32.mrf.mxu1 }
 0x195   : > { %v3883_v4 = vadd.f32 %v2759_v58, %v3780_v36 }
 0x196   : > { %v2761_v32 = vpop.f32.mrf.mxu0  ;;  %v3885_v49 = vpop.f32.mrf.mxu1 }
 0x197   : > { %4136 = vst [vmem:[#allocation3_spill] sm:$0xff] %v3883_v4  ;;  %v2762_v54 = vadd.f32 %v2761_v32, %v2760_v46 }
 0x198   : > { %v2763_v1 = vpop.f32.mrf.mxu0  ;;  %v3887_v62 = vpop.f32.mrf.mxu1 }
 0x199   : > { %v3890_v34 = vadd.f32 %v2762_v54, %v3786_v56 }
 0x19a   : > { %v2764_v33 = vpop.f32.mrf.mxu0  ;;  %v3892_v24 = vpop.f32.mrf.mxu1 }
 0x19b   : > { %v2765_v2 = vadd.f32 %v2764_v33, %v2763_v1 }
 0x19c   : > { %v2766_v52 = vpop.f32.mrf.mxu0  ;;  %v3894_v44 = vpop.f32.mrf.mxu1 }
 0x19d   : > { %v3897_v36 = vadd.f32 %v2765_v2, %v3792_v45 }
 0x19e   : > { %v2767_v11 = vpop.f32.mrf.mxu0  ;;  %v3899_v22 = vpop.f32.mrf.mxu1 }
 0x19f   : > { %v2768_v21 = vadd.f32 %v2767_v11, %v2766_v52 }
 0x1a0   : > { %v2769_v0 = vpop.f32.mrf.mxu0  ;;  %v3901_v19 = vpop.f32.mrf.mxu1 }
 0x1a1   : > { %v3904_v56 = vadd.f32 %v2768_v21, %v3798_v17 }
 0x1a2   : > { %v2770_v63 = vpop.f32.mrf.mxu0  ;;  %v3906_v12 = vpop.f32.mrf.mxu1 }
 0x1a3   : > { %4137 = vst [vmem:[#allocation4_spill] sm:$0xff] %v3904_v56  ;;  %v2771_v43 = vadd.f32 %v2770_v63, %v2769_v0 }
 0x1a4   : > { %v2772_v59 = vpop.f32.mrf.mxu0  ;;  %v3908_v35 = vpop.f32.mrf.mxu1 }
 0x1a5   : > { %v3911_v45 = vadd.f32 %v2771_v43, %v3804_v38 }
 0x1a6   : > { %v2773_v14 = vpop.f32.mrf.mxu0  ;;  %v3913_v10 = vpop.f32.mrf.mxu1 }
 0x1a7   : > { %4138 = vst [vmem:[#allocation5_spill] sm:$0xff] %v3911_v45  ;;  %v2774_v51 = vadd.f32 %v2773_v14, %v2772_v59 }
 0x1a8   : > { %v2775_v58 = vpop.f32.mrf.mxu0  ;;  %v3915_v46 = vpop.f32.mrf.mxu1 }
 0x1a9   : > { %v3918_v17 = vadd.f32 %v2774_v51, %v3810_v23 }
 0x1aa   : > { %v2776_v32 = vpop.f32.mrf.mxu0  ;;  %v3920_v54 = vpop.f32.mrf.mxu1 }
 0x1ab   : > { %4139 = vst [vmem:[#allocation6_spill] sm:$0xff] %v3918_v17  ;;  %v2777_v1 = vadd.f32 %v2776_v32, %v2775_v58 }
 0x1ac   : > { %v2778_v33 = vpop.f32.mrf.mxu0  ;;  %v3922_v2 = vpop.f32.mrf.mxu1 }
 0x1ad   : > { %v3925_v38 = vadd.f32 %v2777_v1, %v3816_v9 }
 0x1ae   : > { %v2779_v52 = vpop.f32.mrf.mxu0  ;;  %v3927_v11 = vpop.f32.mrf.mxu1 }
 0x1af   : > { %4140 = vst [vmem:[#allocation7_spill] sm:$0xff] %v3925_v38  ;;  %v2780_v21 = vadd.f32 %v2779_v52, %v2778_v33 }
 0x1b0   : > { %v2781_v0 = vpop.f32.mrf.mxu0  ;;  %v3929_v63 = vpop.f32.mrf.mxu1 }
 0x1b1   : > { %v3932_v23 = vadd.f32 %v2780_v21, %v3822_v29 }
 0x1b2   : > { %v2782_v43 = vpop.f32.mrf.mxu0  ;;  %v3934_v59 = vpop.f32.mrf.mxu1 }
 0x1b3   : > { %4141 = vst [vmem:[#allocation8_spill] sm:$0xff] %v3932_v23  ;;  %v2783_v14 = vadd.f32 %v2782_v43, %v2781_v0 }
 0x1b4   : > { %v2784_v51 = vpop.f32.mrf.mxu0  ;;  %v3936_v58 = vpop.f32.mrf.mxu1 }
 0x1b5   : > { %v3939_v9 = vadd.f32 %v2783_v14, %v3828_v61 }
 0x1b6   : > { %v2785_v32 = vpop.f32.mrf.mxu0  ;;  %v3941_v1 = vpop.f32.mrf.mxu1 }
 0x1b7   : > { %4142 = vst [vmem:[#allocation9_spill] sm:$0xff] %v3939_v9  ;;  %v2786_v33 = vadd.f32 %v2785_v32, %v2784_v51 }
 0x1b8   : > { %v2787_v52 = vpop.f32.mrf.mxu0  ;;  %v3943_v45 = vpop.f32.mrf.mxu1 }
 0x1b9   : > { %v3946_v29 = vadd.f32 %v2786_v33, %v3834_v53 }
 0x1ba   : > { %v2788_v21 = vpop.f32.mrf.mxu0  ;;  %v3948_v23 = vpop.f32.mrf.mxu1 }
 0x1bb   : > { %4143 = vst [vmem:[#allocation10_spill] sm:$0xff] %v3946_v29  ;;  %v2789_v0 = vadd.f32 %v2788_v21, %v2787_v52 }
 0x1bc   : > { %v2790_v43 = vpop.f32.mrf.mxu0  ;;  %v3950_v38 = vpop.f32.mrf.mxu1 }
 0x1bd   : > { %v3953_v61 = vadd.f32 %v2789_v0, %v3840_v20 }
 0x1be   : > { %v2791_v14 = vpop.f32.mrf.mxu0  ;;  %v3955_v9 = vpop.f32.mrf.mxu1 }
 0x1bf   : > { %4144 = vst [vmem:[#allocation11_spill] sm:$0xff] %v3953_v61  ;;  %v2792_v51 = vadd.f32 %v2791_v14, %v2790_v43  ;;  %v2826_v43 = vadd.f32 %v3885_v49, %v3880_v48 }
 0x1c0   : > { %v2793_v32 = vpop.f32.mrf.mxu0  ;;  %v3957_v56 = vpop.f32.mrf.mxu1 }
 0x1c1   : > { %v3960_v53 = vadd.f32 %v2792_v51, %v3846_v7 }
 0x1c2   : > { %v2794_v33 = vpop.f32.mrf.mxu0  ;;  %v3962_v29 = vpop.f32.mrf.mxu1 }
 0x1c3   : > { %4145 = vst [vmem:[#allocation12_spill] sm:$0xff] %v3960_v53  ;;  %v2795_v52 = vadd.f32 %v2794_v33, %v2793_v32  ;;  %v2820_v32 = vadd.f32 %v3871_v13, %v3863_v16  ;;  %v2823_v16 = vadd.f32 %v3878_v39, %v3873_v55 }
 0x1c4   : > { %v2796_v21 = vpop.f32.mrf.mxu0  ;;  %v3964_v17 = vpop.f32.mrf.mxu1 }
 0x1c5   : > { %v3967_v20 = vadd.f32 %v2795_v52, %v3852_v27  ;;  %v2829_v27 = vadd.f32 %v3892_v24, %v3887_v62  ;;  %v1852_v39 = vadd.f32 %v2823_v16, %v3783_v5 }
 0x1c6   : > { %v2797_v0 = vpop.f32.mrf.mxu0  ;;  %v3969_v61 = vpop.f32.mrf.mxu1 }
 0x1c7   : > { %4146 = vst [vmem:[#allocation13_spill] sm:$0xff] %v3967_v20  ;;  %v2798_v14 = vadd.f32 %v2797_v0, %v2796_v21  ;;  %v1857_v20 = vadd.f32 %v2826_v43, %v3789_v30  ;;  %v1849_v30 = vadd.f32 %v2820_v32, %v3777_v15  ;;  %v1860_v0 = vadd.f32 %v2829_v27, %v3795_v41 }
 0x1c8   : > { %v2799_v7 = vpop.f32.mrf.mxu0  ;;  %v3973_v51 = vpop.f32.mrf.mxu1  ;;  %v2832_v15 = vadd.f32 %v3899_v22, %v3894_v44  ;;  %v2835_v44 = vadd.f32 %v3906_v12, %v3901_v19  ;;  %v2850_v22 = vadd.f32 %v3941_v1, %v3936_v58 }
 0x1c9   : > { %v3978_v33 = vadd.f32 %v2798_v14, %v3858_v3 }
 0x1ca   : > { %v2800_v53 = vpop.f32.mrf.mxu0  ;;  %v3980_v4 = vpop.f32.mrf.mxu1 }
 0x1cb   : > { %v2801_v52 = vadd.f32 %v2800_v53, %v2799_v7  ;;  %v2838_v53 = vadd.f32 %v3913_v10, %v3908_v35  ;;  %v2841_v35 = vadd.f32 %v3920_v54, %v3915_v46 }
 0x1cc   : > { %v3985_v48 = vpop.f32.mrf.mxu1  ;;  %v2956_v3 = vpop.f32.mrf.mxu0 }
 0x1cd   : > { %v3997_v13 = vadd.f32 %v2801_v52, %v3866_v42  ;;  %v2018_v49 = vadd.f32 %v2956_v3, %v1857_v20  ;;  %v1873_v41 = vadd.f32 %v2838_v53, %v3813_v28  ;;  %v1865_v28 = vadd.f32 %v2832_v15, %v3801_v18 }
 0x1ce   : > { %v4000_v62 = vpop.f32.mrf.mxu1  ;;  %v2009_v24 = vpop.f32.mrf.mxu0  ;;  %v1876_v53 = vadd.f32 %v2841_v35, %v3819_v50  ;;  %v1889_v50 = vadd.f32 %v2850_v22, %v3837_v6 }
 0x1cf   : > { %2138 = vst [vmem:[%s3992_s7 + $0x10] sm:$0xff] %v2018_v49  ;;  %v2010_v21 = vadd.f32 %v2009_v24, %v1849_v30  ;;  %v2208_v16 = vmul.f32 %v2018_v49, %v2018_v49 }
 0x1d0   : > { %v4006_v43 = vpop.f32.mrf.mxu1  ;;  %v2957_v55 = vpop.f32.mrf.mxu0 }
 0x1d1   : > { %2136 = vst [vmem:[%s3992_s7] sm:$0xff] %v2010_v21  ;;  %v2021_v42 = vadd.f32 %v2957_v55, %v1860_v0  ;;  %v2206_v27 = vmul.f32 %v2010_v21, %v2010_v21 }
 0x1d2   : > { %v4012_v20 = vpop.f32.mrf.mxu1  ;;  %v2012_v14 = vpop.f32.mrf.mxu0 }
 0x1d3   : > { %2139 = vst [vmem:[%s3992_s7 + $0x18] sm:$0xff] %v2021_v42  ;;  %v2013_v10 = vadd.f32 %v2012_v14, %v1852_v39  ;;  %v2209_v58 = vmul.f32 %v2021_v42, %v2021_v42 }
 0x1d4   : > { %v4018_v7 = vpop.f32.mrf.mxu1  ;;  %v2960_v32 = vpop.f32.mrf.mxu0 }
 0x1d5   : > { %2137 = vst [vmem:[%s3992_s7 + $0x8] sm:$0xff] %v2013_v10  ;;  %v2168_v5 = vadd.f32 %v2013_v10, %v2010_v21  ;;  %v2207_v52 = vmul.f32 %v2013_v10, %v2013_v10  ;;  %v2034_v3 = vadd.f32 %v2960_v32, %v1873_v41  ;;  %v2844_v21 = vadd.f32 %v3927_v11, %v3922_v2 }
 0x1d6   : > { %v4025_v46 = vpop.f32.mrf.mxu1  ;;  %v2025_v54 = vpop.f32.mrf.mxu0  ;;  %v2853_v2 = vadd.f32 %v3948_v23, %v3943_v45  ;;  %v2847_v32 = vadd.f32 %v3934_v59, %v3929_v63 }
 0x1d7   : > { %v2169_v30 = vadd.f32 %v2168_v5, %v2018_v49  ;;  %v2238_v24 = vadd.f32 %v2207_v52, %v2206_v27  ;;  %2142 = vst [vmem:[%s3992_s7 + $0x30] sm:$0xff] %v2034_v3  ;;  %v2026_v0 = vadd.f32 %v2025_v54, %v1865_v28  ;;  %v1868_v49 = vadd.f32 %v2835_v44, %v3807_v25 }
 0x1d8   : > { %v4032_v19 = vpop.f32.mrf.mxu1  ;;  %v2961_v12 = vpop.f32.mrf.mxu0  ;;  %v1881_v5 = vadd.f32 %v2844_v21, %v3825_v60  ;;  %v2862_v44 = vadd.f32 %v3969_v61, %v3964_v17  ;;  %v1892_v28 = vadd.f32 %v2853_v2, %v3843_v31  ;;  %v2212_v63 = vmul.f32 %v2034_v3, %v2034_v3 }
 0x1d9   : > { %v2239_v1 = vadd.f32 %v2238_v24, %v2208_v16  ;;  %v2170_v55 = vadd.f32 %v2169_v30, %v2021_v42  ;;  %v2037_v39 = vadd.f32 %v2961_v12, %v1876_v53  ;;  %2140 = vst [vmem:[%s3992_s7 + $0x20] sm:$0xff] %v2026_v0  ;;  %v2210_v14 = vmul.f32 %v2026_v0, %v2026_v0 }
 0x1da   : > { %v4035_v18 = vpop.f32.mrf.mxu1  ;;  %v2028_v15 = vpop.f32.mrf.mxu0  ;;  %v2856_v30 = vadd.f32 %v3955_v9, %v3950_v38  ;;  %v1884_v53 = vadd.f32 %v2847_v32, %v3831_v47 }
 0x1db   : > { %v2171_v11 = vadd.f32 %v2170_v55, %v2026_v0  ;;  %v2240_v35 = vadd.f32 %v2239_v1, %v2209_v58  ;;  %2143 = vst [vmem:[%s3992_s7 + $0x38] sm:$0xff] %v2037_v39  ;;  %v2029_v10 = vadd.f32 %v2028_v15, %v1868_v49  ;;  %v2213_v17 = vmul.f32 %v2037_v39, %v2037_v39 }
 0x1dc   : > { %v4042_v42 = vpop.f32.mrf.mxu1  ;;  %v2964_v41 = vpop.f32.mrf.mxu0  ;;  %v1905_v58 = vadd.f32 %v2862_v44, %v3861_v8  ;;  %v2859_v49 = vadd.f32 %v3962_v29, %v3957_v56  ;;  %v2874_v8 = vadd.f32 %v4025_v46, %v4018_v7 }
 0x1dd   : > { %v2241_v27 = vadd.f32 %v2240_v35, %v2210_v14  ;;  %v2050_v25 = vadd.f32 %v2964_v41, %v1889_v50  ;;  %2141 = vst [vmem:[%s3992_s7 + $0x28] sm:$0xff] %v2029_v10  ;;  %v2172_v6 = vadd.f32 %v2171_v11, %v2029_v10  ;;  %v2211_v45 = vmul.f32 %v2029_v10, %v2029_v10 }
 0x1de   : > { %v4048_v23 = vpop.f32.mrf.mxu1  ;;  %v2041_v52 = vpop.f32.mrf.mxu0  ;;  %v1897_v50 = vadd.f32 %v2856_v30, %v3849_v57  ;;  %v2868_v57 = vadd.f32 %v4000_v62, %v3985_v48  ;;  %v1921_v44 = vadd.f32 %v2874_v8, %v3890_v34 }
 0x1df   : > { %2146 = vst [vmem:[%s3992_s7 + $0x50] sm:$0xff] %v2050_v25  ;;  %v2042_v22 = vadd.f32 %v2041_v52, %v1881_v5  ;;  %v2173_v59 = vadd.f32 %v2172_v6, %v2034_v3  ;;  %v2242_v54 = vadd.f32 %v2241_v27, %v2211_v45  ;;  %v2865_v3 = vadd.f32 %v3980_v4, %v3973_v51 }
 0x1e0   : > { %v4054_v16 = vpop.f32.mrf.mxu1  ;;  %v2965_v60 = vpop.f32.mrf.mxu0  ;;  %v2216_v10 = vmul.f32 %v2050_v25, %v2050_v25  ;;  %v1900_v5 = vadd.f32 %v2859_v49, %v3855_v26  ;;  %v2871_v26 = vadd.f32 %v4012_v20, %v4006_v43 }
 0x1e1   : > { %2144 = vst [vmem:[%s3992_s7 + $0x40] sm:$0xff] %v2042_v22  ;;  %v2053_v24 = vadd.f32 %v2965_v60, %v1892_v28  ;;  %v2243_v61 = vadd.f32 %v2242_v54, %v2212_v63  ;;  %v2174_v21 = vadd.f32 %v2173_v59, %v2037_v39  ;;  %v2214_v9 = vmul.f32 %v2042_v22, %v2042_v22 }
 0x1e2   : > { %v4060_v0 = vpop.f32.mrf.mxu1  ;;  %v2044_v31 = vpop.f32.mrf.mxu0  ;;  %v1908_v35 = vadd.f32 %v2865_v3, %v3869_v37  ;;  %v2877_v37 = vadd.f32 %v4035_v18, %v4032_v19  ;;  %v1913_v60 = vadd.f32 %v2868_v57, %v3876_v40  ;;  %v2880_v3 = vadd.f32 %v4048_v23, %v4042_v42 }
 0x1e3   : > { %2147 = vst [vmem:[%s3992_s7 + $0x58] sm:$0xff] %v2053_v24  ;;  %v2045_v12 = vadd.f32 %v2044_v31, %v1884_v53  ;;  %v2175_v38 = vadd.f32 %v2174_v21, %v2042_v22  ;;  %v2244_v1 = vadd.f32 %v2243_v61, %v2213_v17  ;;  %v2217_v6 = vmul.f32 %v2053_v24, %v2053_v24 }
 0x1e4   : > { %v2884_v55 = vpop.f32.mrf.mxu1  ;;  %v2968_v47 = vpop.f32.mrf.mxu0  ;;  %v1924_v17 = vadd.f32 %v2877_v37, %v3897_v36  ;;  %v4151_v37 = vld [vmem:[#allocation5_spill] sm:$0xff] }
 0x1e5   : > { %2145 = vst [vmem:[%s3992_s7 + $0x48] sm:$0xff] %v2045_v12  ;;  %v2215_v39 = vmul.f32 %v2045_v12, %v2045_v12  ;;  %v2066_v15 = vadd.f32 %v2968_v47, %v1905_v58  ;;  %v2245_v4 = vadd.f32 %v2244_v1, %v2214_v9  ;;  %v2176_v51 = vadd.f32 %v2175_v38, %v2045_v12  ;;  %v4147_v12 = vld [vmem:[#allocation3_spill] sm:$0xff] }
 0x1e6   : > { %v2885_v2 = vpop.f32.mrf.mxu1  ;;  %v2057_v11 = vpop.f32.mrf.mxu0  ;;  %v1916_v58 = vadd.f32 %v2871_v26, %v4147_v12 }
 0x1e7   : > { %2150 = vst [vmem:[%s3992_s7 + $0x70] sm:$0xff] %v2066_v15  ;;  %v2058_v14 = vadd.f32 %v2057_v11, %v1897_v50  ;;  %v2177_v56 = vadd.f32 %v2176_v51, %v2050_v25  ;;  %v2246_v29 = vadd.f32 %v2245_v4, %v2215_v39  ;;  %v2886_v34 = vadd.f32 %v2885_v2, %v2884_v55  ;;  %v4148_v39 = vld [vmem:[#allocation6_spill] sm:$0xff] }
 0x1e8   : > { %v2887_v41 = vpop.f32.mrf.mxu1  ;;  %v2969_v32 = vpop.f32.mrf.mxu0  ;;  %v2220_v61 = vmul.f32 %v2066_v15, %v2066_v15  ;;  %v2883_v2 = vadd.f32 %v4060_v0, %v4054_v16 }
 0x1e9   : > { %2148 = vst [vmem:[%s3992_s7 + $0x60] sm:$0xff] %v2058_v14  ;;  %v2069_v27 = vadd.f32 %v2969_v32, %v1908_v35  ;;  %v2247_v7 = vadd.f32 %v2246_v29, %v2216_v10  ;;  %v2178_v46 = vadd.f32 %v2177_v56, %v2053_v24  ;;  %v2218_v48 = vmul.f32 %v2058_v14, %v2058_v14 }
 0x1ea   : > { %v2888_v45 = vpop.f32.mrf.mxu1  ;;  %v2060_v52 = vpop.f32.mrf.mxu0 }
 0x1eb   : > { %2151 = vst [vmem:[%s3992_s7 + $0x78] sm:$0xff] %v2069_v27  ;;  %v2061_v25 = vadd.f32 %v2060_v52, %v1900_v5  ;;  %v2179_v22 = vadd.f32 %v2178_v46, %v2058_v14  ;;  %v2248_v62 = vadd.f32 %v2247_v7, %v2217_v6  ;;  %v2221_v38 = vmul.f32 %v2069_v27, %v2069_v27  ;;  %v4149_v14 = vld [vmem:[#allocation4_spill] sm:$0xff] }
 0x1ec   : > { %v2890_v28 = vpop.f32.mrf.mxu1  ;;  %v2972_v63 = vpop.f32.mrf.mxu0  ;;  %v2889_v36 = vadd.f32 %v2888_v45, %v2887_v41  ;;  %v1929_v35 = vadd.f32 %v2880_v3, %v4149_v14 }
 0x1ed   : > { %2149 = vst [vmem:[%s3992_s7 + $0x68] sm:$0xff] %v2061_v25  ;;  %v2219_v59 = vmul.f32 %v2061_v25, %v2061_v25  ;;  %v2082_v54 = vadd.f32 %v2972_v63, %v1921_v44  ;;  %v2249_v19 = vadd.f32 %v2248_v62, %v2218_v48  ;;  %v2180_v18 = vadd.f32 %v2179_v22, %v2061_v25 }
 0x1ee   : > { %v2891_v30 = vpop.f32.mrf.mxu1  ;;  %v2073_v24 = vpop.f32.mrf.mxu0  ;;  %v1932_v25 = vadd.f32 %v2883_v2, %v4151_v37 }
 0x1ef   : > { %2154 = vst [vmem:[%s3992_s7 + $0x90] sm:$0xff] %v2082_v54  ;;  %v2074_v53 = vadd.f32 %v2073_v24, %v1913_v60  ;;  %v2181_v21 = vadd.f32 %v2180_v18, %v2066_v15  ;;  %v2250_v31 = vadd.f32 %v2249_v19, %v2219_v59  ;;  %v1937_v15 = vadd.f32 %v2886_v34, %v4148_v39  ;;  %v4152_v60 = vld [vmem:[#allocation10_spill] sm:$0xff]  ;;  %v4155_v39 = vld [vmem:[#allocation9_spill] sm:$0xff] }
 0x1f0   : > { %v2893_v43 = vpop.f32.mrf.mxu1  ;;  %v2973_v20 = vpop.f32.mrf.mxu0  ;;  %v2224_v6 = vmul.f32 %v2082_v54, %v2082_v54  ;;  %v2892_v45 = vadd.f32 %v2891_v30, %v2890_v28 }
 0x1f1   : > { %2152 = vst [vmem:[%s3992_s7 + $0x80] sm:$0xff] %v2074_v53  ;;  %v2085_v40 = vadd.f32 %v2973_v20, %v1924_v17  ;;  %v2251_v9 = vadd.f32 %v2250_v31, %v2220_v61  ;;  %v2182_v1 = vadd.f32 %v2181_v21, %v2069_v27  ;;  %v2222_v4 = vmul.f32 %v2074_v53, %v2074_v53  ;;  %v4150_v27 = vld [vmem:[#allocation7_spill] sm:$0xff]  ;;  %v4153_v61 = vld [vmem:[#allocation8_spill] sm:$0xff] }
 0x1f2   : > { %v2894_v55 = vpop.f32.mrf.mxu1  ;;  %v2076_v47 = vpop.f32.mrf.mxu0  ;;  %v1940_v5 = vadd.f32 %v2889_v36, %v4150_v27  ;;  %v1945_v21 = vadd.f32 %v2892_v45, %v4153_v61 }
 0x1f3   : > { %2155 = vst [vmem:[%s3992_s7 + $0x98] sm:$0xff] %v2085_v40  ;;  %v2077_v49 = vadd.f32 %v2076_v47, %v1916_v58  ;;  %v2183_v50 = vadd.f32 %v2182_v1, %v2074_v53  ;;  %v2252_v51 = vadd.f32 %v2251_v9, %v2221_v38  ;;  %v2225_v44 = vmul.f32 %v2085_v40, %v2085_v40  ;;  %v4154_v58 = vld [vmem:[#allocation11_spill] sm:$0xff] }
 0x1f4   : > { %v2896_v42 = vpop.f32.mrf.mxu1  ;;  %v2976_v23 = vpop.f32.mrf.mxu0  ;;  %v2895_v34 = vadd.f32 %v2894_v55, %v2893_v43 }
 0x1f5   : > { %2153 = vst [vmem:[%s3992_s7 + $0x88] sm:$0xff] %v2077_v49  ;;  %v2223_v11 = vmul.f32 %v2077_v49, %v2077_v49  ;;  %v2098_v8 = vadd.f32 %v2976_v23, %v1937_v15  ;;  %v2253_v10 = vadd.f32 %v2252_v51, %v2222_v4  ;;  %v2184_v56 = vadd.f32 %v2183_v50, %v2077_v49 }
 0x1f6   : > { %v2897_v29 = vpop.f32.mrf.mxu1  ;;  %v2089_v41 = vpop.f32.mrf.mxu0  ;;  %v1948_v15 = vadd.f32 %v2895_v34, %v4155_v39 }
 0x1f7   : > { %2158 = vst [vmem:[%s3992_s7 + $0xb0] sm:$0xff] %v2098_v8  ;;  %v2898_v32 = vadd.f32 %v2897_v29, %v2896_v42  ;;  %v2090_v57 = vadd.f32 %v2089_v41, %v1929_v35  ;;  %v2185_v7 = vadd.f32 %v2184_v56, %v2082_v54  ;;  %v2254_v46 = vadd.f32 %v2253_v10, %v2223_v11  ;;  %v4156_v41 = vld [vmem:[#allocation12_spill] sm:$0xff] }
 0x1f8   : > { %v2899_v16 = vpop.f32.mrf.mxu1  ;;  %v2977_v0 = vpop.f32.mrf.mxu0  ;;  %v2228_v9 = vmul.f32 %v2098_v8, %v2098_v8 }
 0x1f9   : > { %2156 = vst [vmem:[%s3992_s7 + $0xa0] sm:$0xff] %v2090_v57  ;;  %v2101_v52 = vadd.f32 %v2977_v0, %v1940_v5  ;;  %v2255_v22 = vadd.f32 %v2254_v46, %v2224_v6  ;;  %v2186_v48 = vadd.f32 %v2185_v7, %v2085_v40  ;;  %v1953_v54 = vadd.f32 %v2898_v32, %v4152_v60 }
 0x1fa   : > { %v2900_v62 = vpop.f32.mrf.mxu1  ;;  %v2092_v63 = vpop.f32.mrf.mxu0  ;;  %v2226_v18 = vmul.f32 %v2090_v57, %v2090_v57 }
 0x1fb   : > { %2159 = vst [vmem:[%s3992_s7 + $0xb8] sm:$0xff] %v2101_v52  ;;  %v2901_v26 = vadd.f32 %v2900_v62, %v2899_v16  ;;  %v2093_v59 = vadd.f32 %v2092_v63, %v1932_v25  ;;  %v2187_v19 = vadd.f32 %v2186_v48, %v2090_v57  ;;  %v2256_v24 = vadd.f32 %v2255_v22, %v2225_v44  ;;  %v4157_v44 = vld [vmem:[#allocation13_spill] sm:$0xff] }
 0x1fc   : > { %v2902_v28 = vpop.f32.mrf.mxu1  ;;  %v2980_v30 = vpop.f32.mrf.mxu0  ;;  %v2229_v50 = vmul.f32 %v2101_v52, %v2101_v52 }
 0x1fd   : > { %2157 = vst [vmem:[%s3992_s7 + $0xa8] sm:$0xff] %v2093_v59  ;;  %v2227_v53 = vmul.f32 %v2093_v59, %v2093_v59  ;;  %v2114_v17 = vadd.f32 %v2980_v30, %v1953_v54  ;;  %v2257_v31 = vadd.f32 %v2256_v24, %v2226_v18  ;;  %v2188_v20 = vadd.f32 %v2187_v19, %v2093_v59 }
 0x1fe   : > { %v2903_v3 = vpop.f32.mrf.mxu1  ;;  %v2105_v40 = vpop.f32.mrf.mxu0  ;;  %v1956_v38 = vadd.f32 %v2901_v26, %v4154_v58 }
 0x1ff   : > { %2162 = vst [vmem:[%s3992_s7 + $0xd0] sm:$0xff] %v2114_v17  ;;  %v2106_v12 = vadd.f32 %v2105_v40, %v1945_v21  ;;  %v2189_v1 = vadd.f32 %v2188_v20, %v2098_v8  ;;  %v2258_v47 = vadd.f32 %v2257_v31, %v2227_v53  ;;  %v2904_v55 = vadd.f32 %v2903_v3, %v2902_v28 }
 0x200   : > { %v2905_v36 = vpop.f32.mrf.mxu1  ;;  %v2981_v43 = vpop.f32.mrf.mxu0  ;;  %v2232_v16 = vmul.f32 %v2114_v17, %v2114_v17 }
 0x201   : > { %2160 = vst [vmem:[%s3992_s7 + $0xc0] sm:$0xff] %v2106_v12  ;;  %v2117_v49 = vadd.f32 %v2981_v43, %v1956_v38  ;;  %v2259_v4 = vadd.f32 %v2258_v47, %v2228_v9  ;;  %v2190_v51 = vadd.f32 %v2189_v1, %v2101_v52  ;;  %v2230_v14 = vmul.f32 %v2106_v12, %v2106_v12 }
 0x202   : > { %v2906_v42 = vpop.f32.mrf.mxu1  ;;  %v2108_v23 = vpop.f32.mrf.mxu0  ;;  %v1961_v32 = vadd.f32 %v2904_v55, %v4156_v41 }
 0x203   : > { %2163 = vst [vmem:[%s3992_s7 + $0xd8] sm:$0xff] %v2117_v49  ;;  %v2109_v2 = vadd.f32 %v2108_v23, %v1948_v15  ;;  %v2191_v11 = vadd.f32 %v2190_v51, %v2106_v12  ;;  %v2260_v35 = vadd.f32 %v2259_v4, %v2229_v50  ;;  %v2907_v56 = vadd.f32 %v2906_v42, %v2905_v36 }
 0x204   : > { %v2908_v8 = vpop.f32.mrf.mxu1  ;;  %v2984_v10 = vpop.f32.mrf.mxu0  ;;  %v2233_v48 = vmul.f32 %v2117_v49, %v2117_v49 }
 0x205   : > { %2161 = vst [vmem:[%s3992_s7 + $0xc8] sm:$0xff] %v2109_v2  ;;  %v2231_v29 = vmul.f32 %v2109_v2, %v2109_v2  ;;  %v2261_v57 = vadd.f32 %v2260_v35, %v2230_v14  ;;  %v2192_v27 = vadd.f32 %v2191_v11, %v2109_v2  ;;  %v1964_v22 = vadd.f32 %v2907_v56, %v4157_v44 }
 0x206   : > { %v2909_v5 = vpop.f32.mrf.mxu1  ;;  %v2121_v6 = vpop.f32.mrf.mxu0 }
 0x207   : > { %v2910_v7 = vadd.f32 %v2909_v5, %v2908_v8  ;;  %v2122_v46 = vadd.f32 %v2121_v6, %v1961_v32  ;;  %v2193_v0 = vadd.f32 %v2192_v27, %v2114_v17  ;;  %v2262_v45 = vadd.f32 %v2261_v57, %v2231_v29 }
 0x208   : > { %v2911_v52 = vpop.f32.mrf.mxu1  ;;  %v2985_v37 = vpop.f32.mrf.mxu0 }
 0x209   : > { %v1969_v25 = vadd.f32 %v2910_v7, %v3978_v33  ;;  %2164 = vst [vmem:[%s3992_s7 + $0xe0] sm:$0xff] %v2122_v46  ;;  %v2263_v62 = vadd.f32 %v2262_v45, %v2232_v16  ;;  %v2194_v63 = vadd.f32 %v2193_v0, %v2117_v49  ;;  %v2234_v24 = vmul.f32 %v2122_v46, %v2122_v46 }
 0x20a   : > { %v2912_v26 = vpop.f32.mrf.mxu1  ;;  %v2124_v59 = vpop.f32.mrf.mxu0 }
 0x20b   : > { %v2130_v60 = vadd.f32 %v2984_v10, %v1969_v25  ;;  %v2913_v54 = vadd.f32 %v2912_v26, %v2911_v52  ;;  %v2125_v19 = vadd.f32 %v2124_v59, %v1964_v22  ;;  %v2195_v18 = vadd.f32 %v2194_v63, %v2122_v46 }
 0x20c   : > { %v2264_v28 = vadd.f32 %v2263_v62, %v2233_v48 }
 0x20d   : > { %2166 = vst [vmem:[%s3992_s7 + $0xf0] sm:$0xff] %v2130_v60  ;;  %v1972_v30 = vadd.f32 %v2913_v54, %v3997_v13  ;;  %2165 = vst [vmem:[%s3992_s7 + $0xe8] sm:$0xff] %v2125_v19  ;;  %v2235_v33 = vmul.f32 %v2125_v19, %v2125_v19  ;;  %v2196_v53 = vadd.f32 %v2195_v18, %v2125_v19 }
 0x20e   : > { %v2265_v34 = vadd.f32 %v2264_v28, %v2234_v24  ;;  %v2236_v61 = vmul.f32 %v2130_v60, %v2130_v60 }
 0x20f   : > { %v2133_v17 = vadd.f32 %v2985_v37, %v1972_v30  ;;  %v2197_v21 = vadd.f32 %v2196_v53, %v2130_v60 }
 0x210   : > { %v2266_v31 = vadd.f32 %v2265_v34, %v2235_v33 }
 0x211   : > { %2167 = vst [vmem:[%s3992_s7 + $0xf8] sm:$0xff] %v2133_v17  ;;  %v2237_v20 = vmul.f32 %v2133_v17, %v2133_v17  ;;  %v2198_v3 = vadd.f32 %v2197_v21, %v2133_v17 }
 0x212   : > { %v2267_v40 = vadd.f32 %v2266_v31, %v2236_v61 }
 0x213   : > { %v2199_v12 = vrot.slane %v2198_v3, 4 }
 0x214   : > { %v2268_v58 = vadd.f32 %v2267_v40, %v2237_v20 }
 0x215   : > { %v2200_v38 = vadd.f32 %v2199_v12, %v2198_v3 }
 0x216   : > { %v2269_v9 = vrot.slane %v2268_v58, 4 }
 0x217   : > { %v2201_v1 = vrot.slane %v2200_v38, 2 }
 0x218   : > { %v2270_v13 = vadd.f32 %v2269_v9, %v2268_v58 }
 0x219   : > { %v2202_v47 = vadd.f32 %v2201_v1, %v2200_v38 }
 0x21a   : > { %v2271_v36 = vrot.slane %v2270_v13, 2 }
 0x21b   : > { %v2203_v43 = vrot.slane %v2202_v47, 1 }
 0x21c   : > { %v2272_v55 = vadd.f32 %v2271_v36, %v2270_v13 }
 0x21d   : > { %v2204_v49 = vadd.f32 %v2203_v43, %v2202_v47 }
 0x21e   : > { %v2273_v39 = vrot.slane %v2272_v55, 1 }
 0x21f   : > { %2205 = vst [vmem:[%s211_s9] sm:$0x1] %v2204_v49 }
 0x220   : > { %v2274_v15 = vadd.f32 %v2273_v39, %v2272_v55 }
 0x222   : > { %2275 = vst [vmem:[%s214_s13] sm:$0x1] %v2274_v15 }
 0x223 PF: > { %s15_s15 = sadd.s32 1, %s3090_s15  }
 0x224   : > { %p12_p4 = scmp.ge.s32.totalorder %s15_s15, 4  }
 0x226   :  { %14 = sbr.rel (!%p12_p4) target bundleno = 1 (0x1), region = 85 }

// kernel: basic_block_forward.4
= control target key start
LH: loop header
LB: loop body
LE: loop exit
PB: predicated region body
PF: predicated region fallthrough
CT: control target
= control target key end

     0   :  { %s3380_s27 = smov 0   ;;  %s4544_s0 = inlined_call_operand.vmem [shape: f32[2,16,16,128], index: 0, kind: input, shape index: {}]   ;;  %s4545_s1 = inlined_call_operand.vmem [shape: f32[2,1,128], index: 1, kind: input, shape index: {}]   ;;  %s4546_s2 = inlined_call_operand.vmem [shape: f32[2,1,128], index: 2, kind: input, shape index: {}]   ;;  %s4547_s3 = inlined_call_operand.vmem [shape: f32[1,128], index: 3, kind: input, shape index: {}]   ;;  %s4548_s4 = inlined_call_operand.vmem [shape: f32[1,128], index: 4, kind: input, shape index: {}]   ;;  %s4549_s5 = inlined_call_operand.vmem [shape: bf16[1152,128], index: 5, kind: input, shape index: {}]   ;;  %s4550_s6 = inlined_call_operand.vmem [shape: f32[2,256,128], index: 6, kind: output, shape index: {0}]   ;;  %s4551_s7 = inlined_call_operand.vmem [shape: f32[2,1,128], index: 7, kind: output, shape index: {1}]   ;;  %s4552_s8 = inlined_call_operand.vmem [shape: f32[2,1,128], index: 8, kind: output, shape index: {2}]  }
   0x1 LB: > { %s2620_s28 = sadd.s32 4294967295, %s3331_s27   ;;  %p2624_p0 = scmp.ge.s32.totalorder %s3331_s27, 1  ;;  %s3331_s27 = sphi %s3380_s27, %s19_s27  }
   0x2   : > { %p267_p1 = scmp.lt.s32.totalorder %s3331_s27, 3 }
   0x4   : > { %p268_p2 = pnand %p2624_p0, %p267_p1 }
   0x6   : > { %271 = sbr.rel (%p268_p2) target bundleno = 567 (0x237), region = 44 }
   0xb   : > { %v3250_v0 = vld [vmem:[%s4549_s5 + $0x78] sm:$0xff]   ;;  %v3333_v2 = vmov 0.0   ;;  %v3252_v3 = vld [vmem:[%s4549_s5 + $0x70] sm:$0xff]   ;;  %v3254_v5 = vld [vmem:[%s4549_s5 + $0x68] sm:$0xff]   ;;  %v3334_v6 = vmov 0.0|0.0   ;;  %vm358_vm0 = vcmask 1040384   ;;  %v380_v40 = vlaneseq }
   0xc   : > { %v3251_v1 = vld [vmem:[%s4549_s5 + $0x38] sm:$0xff]   ;;  %488 = vst [vmem:[#allocation2 + $0x8] sm:$0xff] %v3333_v2  ;;  %489 = vst [vmem:[#allocation2 + $0x10] sm:$0xff] %v3333_v2  ;;  %2705 = vmatprep.subr.bf16.mxu0 %v3250_v0  ;;  %3225 = vmatprep.subr.bf16.mxu1 %v3250_v0  ;;  %v3253_v4 = vld [vmem:[%s4549_s5 + $0x30] sm:$0xff]   ;;  %p307_p3 = scmp.lt.s32.totalorder %s2620_s28, 1 }
   0xd   : > { %487 = vst [vmem:[#allocation2] sm:$0xff] %v3333_v2  ;;  %490 = vst [vmem:[#allocation2 + $0x18] sm:$0xff] %v3333_v2  ;;  %2706 = vmatpush3.bf16.msra.mxu0 %v3251_v1  ;;  %3233 = vmatpush3.bf16.msra.mxu1 %v3251_v1  ;;  %v3255_v7 = vld [vmem:[%s4549_s5 + $0x28] sm:$0xff]   ;;  %v3256_v8 = vld [vmem:[%s4549_s5 + $0x60] sm:$0xff]   ;;  %v381_v42 = vshrl.u32 %v380_v40, 7 }
   0xe   : > { %492 = vst [vmem:[#allocation2 + $0x220] sm:$0xff] %v3333_v2  ;;  %493 = vst [vmem:[#allocation2 + $0x228] sm:$0xff] %v3333_v2  ;;  %2707 = vmatprep.subr.bf16.mxu0 %v3252_v3  ;;  %3226 = vmatprep.subr.bf16.mxu1 %v3252_v3  ;;  %v3257_v9 = vld [vmem:[%s4549_s5 + $0x20] sm:$0xff]   ;;  %v3258_v10 = vld [vmem:[%s4549_s5 + $0x58] sm:$0xff]   ;;  %s4566_s28 = smov (!%p307_p3, %s2620_s28), 1 }
   0xf   : > { %494 = vst [vmem:[#allocation2 + $0x230] sm:$0xff] %v3333_v2  ;;  %495 = vst [vmem:[#allocation2 + $0x238] sm:$0xff] %v3333_v2  ;;  %1602 = vmatprep.mubr.bf16.mxu0 %v3334_v6  ;;  %v3259_v11 = vld [vmem:[%s4549_s5 + $0x18] sm:$0xff]   ;;  %v3260_v12 = vld [vmem:[%s4549_s5 + $0x50] sm:$0xff]   ;;  %s2703_s17 = sshll.u32 %s4566_s28, 8  ;;  %v382_v44 = vsub.s32 0, %v381_v42  ;;  %s319_s21 = scalar_lea.vmem %s4551_s7, %s4566_s28 }
  0x10   : > { %497 = vst [vmem:[#allocation2 + $0x20] sm:$0xff] %v3333_v2  ;;  %498 = vst [vmem:[#allocation2 + $0x40] sm:$0xff] %v3333_v2  ;;  %v356_v13 = vld [vmem:[%s4545_s1] sm:$0x1]  ;;  %v357_v14 = vld [vmem:[%s4545_s1 + $0x1] sm:$0x1]  ;;  %s3475_s20 = scalar_lea.vmem %s4544_s0, %s2703_s17  ;;  %s4427_s18 = scalar_lea.vmem %s4550_s6, %s2703_s17 }
  0x11   : > { %499 = vst [vmem:[#allocation2 + $0x60] sm:$0xff] %v3333_v2  ;;  %500 = vst [vmem:[#allocation2 + $0x80] sm:$0xff] %v3333_v2  ;;  %2708 = vmatpush3.bf16.msra.mxu0 %v3253_v4  ;;  %3234 = vmatpush3.bf16.msra.mxu1 %v3253_v4  ;;  %v359_v15 = vsel %vm358_vm0, %v356_v13, 0.0  ;;  %v360_v16 = vsel %vm358_vm0, %v357_v14, 0.0  ;;  %v364_v17 = vld [vmem:[%s4546_s2] sm:$0x1]  ;;  %s322_s23 = scalar_lea.vmem %s4552_s8, %s4566_s28 }
  0x12   : > { %501 = vst [vmem:[#allocation2 + $0xa0] sm:$0xff] %v3333_v2  ;;  %502 = vst [vmem:[#allocation2 + $0xc0] sm:$0xff] %v3333_v2  ;;  %2709 = vmatprep.subr.bf16.mxu0 %v3254_v5  ;;  %3227 = vmatprep.subr.bf16.mxu1 %v3254_v5  ;;  %v365_v18 = vld [vmem:[%s4546_s2 + $0x1] sm:$0x1]  ;;  %v3261_v19 = vld [vmem:[%s4549_s5 + $0x10] sm:$0xff]   ;;  %v361_v20 = vadd.f32 %v360_v16, %v359_v15  ;;  %v366_v21 = vsel %vm358_vm0, %v364_v17, 0.0 }
  0x13   : > { %503 = vst [vmem:[#allocation2 + $0xe0] sm:$0xff] %v3333_v2  ;;  %504 = vst [vmem:[#allocation2 + $0x100] sm:$0xff] %v3333_v2  ;;  %v367_v22 = vsel %vm358_vm0, %v365_v18, 0.0  ;;  %v3262_v23 = vld [vmem:[%s4549_s5 + $0x48] sm:$0xff]   ;;  %v3264_v29 = vld [vmem:[%s4549_s5 + $0x40] sm:$0xff]  }
  0x14   : > { %505 = vst [vmem:[#allocation2 + $0x120] sm:$0xff] %v3333_v2  ;;  %506 = vst [vmem:[#allocation2 + $0x140] sm:$0xff] %v3333_v2  ;;  %v368_v24 = vadd.f32 %v367_v22, %v366_v21  ;;  %v363_v25 = vmul.f32 0.001953125, %v361_v20  ;;  %v3263_v27 = vld [vmem:[%s4549_s5 + $0x8] sm:$0xff]   ;;  %v3265_v31 = vld [vmem:[%s4549_s5] sm:$0xff]  }
  0x15   : > { %507 = vst [vmem:[#allocation2 + $0x160] sm:$0xff] %v3333_v2  ;;  %508 = vst [vmem:[#allocation2 + $0x180] sm:$0xff] %v3333_v2  ;;  %2710 = vmatpush3.bf16.msra.mxu0 %v3255_v7  ;;  %3235 = vmatpush3.bf16.msra.mxu1 %v3255_v7  ;;  %v561_v32 = vld [vmem:[#allocation2 + $0x7] sm:$0xff]  ;;  %v562_v33 = vld [vmem:[#allocation2 + $0xf] sm:$0xff] }
  0x16   : > { %509 = vst [vmem:[#allocation2 + $0x1a0] sm:$0xff] %v3333_v2  ;;  %510 = vst [vmem:[#allocation2 + $0x1c0] sm:$0xff] %v3333_v2  ;;  %2711 = vmatprep.subr.bf16.mxu0 %v3256_v8  ;;  %3228 = vmatprep.subr.bf16.mxu1 %v3256_v8  ;;  %v369_v26 = vmul.f32 0.001953125, %v368_v24  ;;  %v370_v28 = vmul.f32 %v363_v25, %v363_v25  ;;  %v3266_v35 = vld [vmem:[%s4549_s5 + $0xf8] sm:$0xff]   ;;  %v593_v37 = vpack.c.bf16 %v562_v33, %v561_v32  ;;  %v3275_v39 = vld [vmem:[%s4549_s5 + $0x170] sm:$0xff]  }
  0x17   : > { %511 = vst [vmem:[#allocation2 + $0x1e0] sm:$0xff] %v3333_v2  ;;  %512 = vst [vmem:[#allocation2 + $0x200] sm:$0xff] %v3333_v2  ;;  %v3267_v36 = vld [vmem:[%s4549_s5 + $0x178] sm:$0xff]   ;;  %v3277_v41 = vld [vmem:[%s4549_s5 + $0x130] sm:$0xff]  }
  0x18   : > { %513 = vst [vmem:[#allocation2 + $0x38] sm:$0xff] %v3333_v2  ;;  %514 = vst [vmem:[#allocation2 + $0x58] sm:$0xff] %v3333_v2  ;;  %v371_v30 = vsub.f32 %v369_v26, %v370_v28  ;;  %v3269_v38 = vld [vmem:[%s4549_s5 + $0x138] sm:$0xff]   ;;  %v372_v43 = vld [vmem:[%s4547_s3] sm:$0x1] }
  0x19   : > { %515 = vst [vmem:[#allocation2 + $0x78] sm:$0xff] %v3333_v2  ;;  %516 = vst [vmem:[#allocation2 + $0x98] sm:$0xff] %v3333_v2  ;;  %2712 = vmatpush3.bf16.msra.mxu0 %v3257_v9  ;;  %3236 = vmatpush3.bf16.msra.mxu1 %v3257_v9  ;;  %v324_v46 = vld [vmem:[%s3475_s20] sm:$0xff]  ;;  %v325_v47 = vld [vmem:[%s3475_s20 + $0x8] sm:$0xff] }
  0x1a   : > { %517 = vst [vmem:[#allocation2 + $0xb8] sm:$0xff] %v3333_v2  ;;  %518 = vst [vmem:[#allocation2 + $0xd8] sm:$0xff] %v3333_v2  ;;  %2713 = vmatprep.subr.bf16.mxu0 %v3258_v10  ;;  %3229 = vmatprep.subr.bf16.mxu1 %v3258_v10  ;;  %v373_v34 = vadd.f32 1e-05, %v371_v30  ;;  %v376_v48 = vld [vmem:[%s4548_s4] sm:$0x1] }
  0x1b   : > { %519 = vst [vmem:[#allocation2 + $0xf8] sm:$0xff] %v3333_v2  ;;  %520 = vst [vmem:[#allocation2 + $0x118] sm:$0xff] %v3333_v2  ;;  %v346_v49 = vld [vmem:[%s3475_s20 + $0xb0] sm:$0xff]  ;;  %v3283_v50 = vld [vmem:[%s4549_s5 + $0x168] sm:$0xff]  }
  0x1c   : > { %521 = vst [vmem:[#allocation2 + $0x138] sm:$0xff] %v3333_v2  ;;  %522 = vst [vmem:[#allocation2 + $0x158] sm:$0xff] %v3333_v2  ;;  %3322 = vrsqrt.f32 %v373_v34  ;;  %v347_v52 = vld [vmem:[%s3475_s20 + $0xb8] sm:$0xff]  ;;  %v326_v53 = vld [vmem:[%s3475_s20 + $0x10] sm:$0xff] }
  0x1d   : > { %523 = vst [vmem:[#allocation2 + $0x178] sm:$0xff] %v3333_v2  ;;  %524 = vst [vmem:[#allocation2 + $0x198] sm:$0xff] %v3333_v2  ;;  %2714 = vmatpush3.bf16.msra.mxu0 %v3259_v11  ;;  %3237 = vmatpush3.bf16.msra.mxu1 %v3259_v11  ;;  %v327_v54 = vld [vmem:[%s3475_s20 + $0x18] sm:$0xff]  ;;  %v348_v55 = vld [vmem:[%s3475_s20 + $0xc0] sm:$0xff] }
  0x1e   : > { %525 = vst [vmem:[#allocation2 + $0x1b8] sm:$0xff] %v3333_v2  ;;  %526 = vst [vmem:[#allocation2 + $0x1d8] sm:$0xff] %v3333_v2  ;;  %2715 = vmatprep.subr.bf16.mxu0 %v3260_v12  ;;  %3230 = vmatprep.subr.bf16.mxu1 %v3260_v12  ;;  %v349_v56 = vld [vmem:[%s3475_s20 + $0xc8] sm:$0xff]  ;;  %v328_v57 = vld [vmem:[%s3475_s20 + $0x20] sm:$0xff] }
  0x1f   : > { %527 = vst [vmem:[#allocation2 + $0x1f8] sm:$0xff] %v3333_v2  ;;  %528 = vst [vmem:[#allocation2 + $0x218] sm:$0xff] %v3333_v2  ;;  %v329_v58 = vld [vmem:[%s3475_s20 + $0x28] sm:$0xff]  ;;  %v350_v62 = vld [vmem:[%s3475_s20 + $0xd0] sm:$0xff] }
  0x20   : > { %v3285_v59 = vld [vmem:[%s4549_s5 + $0x128] sm:$0xff]   ;;  %v351_v63 = vld [vmem:[%s3475_s20 + $0xd8] sm:$0xff]  ;;  %v330_v0 = vld [vmem:[%s3475_s20 + $0x30] sm:$0xff] }
  0x21   : > { %2716 = vmatpush3.bf16.msra.mxu0 %v3261_v19  ;;  %3238 = vmatpush3.bf16.msra.mxu1 %v3261_v19  ;;  %v331_v5 = vld [vmem:[%s3475_s20 + $0x38] sm:$0xff]  ;;  %v3290_v18 = vld [vmem:[%s4549_s5 + $0x160] sm:$0xff]   ;;  %v353_v33 = vld [vmem:[%s3475_s20 + $0xe8] sm:$0xff] }
  0x22   : > { %2717 = vmatprep.subr.bf16.mxu0 %v3262_v23  ;;  %3231 = vmatprep.subr.bf16.mxu1 %v3262_v23  ;;  %v3291_v23 = vld [vmem:[%s4549_s5 + $0x120] sm:$0xff]   ;;  %v3292_v34 = vld [vmem:[%s4549_s5 + $0x158] sm:$0xff]  }
  0x23   : > { %v352_v32 = vld [vmem:[%s3475_s20 + $0xe0] sm:$0xff] }
  0x25   : > { %2718 = vmatpush3.bf16.msra.mxu0 %v3263_v27  ;;  %3239 = vmatpush3.bf16.msra.mxu1 %v3263_v27 }
  0x26   : > { %2719 = vmatprep.subr.bf16.mxu0 %v3264_v29  ;;  %3232 = vmatprep.subr.bf16.mxu1 %v3264_v29 }
  0x29   : > { %2720 = vmatpush3.bf16.msra.mxu0 %v3265_v31  ;;  %3240 = vmatpush3.bf16.msra.mxu1 %v3265_v31  ;;  %v3323_v45 = vpop.eup %3322 }
  0x2a   : > { %2817 = vmatprep.subr.bf16.mxu1 %v3266_v35  ;;  %2929 = vmatprep.subr.bf16.mxu0 %v3267_v36  ;;  %v375_v51 = vmul.f32 %v3323_v45, %v372_v43 }
  0x2c   : > { %1603 = vmatmul.mubr.bf16.vlgmr.msra.gmra.mxu0 %v593_v37  ;;  %v377_v60 = vmul.f32 %v375_v51, %v363_v25  ;;  %v3499_v61 = vrot.slane %v375_v51, %v382_v44  ;;  %v334_v51 = vld [vmem:[%s3475_s20 + $0x50] sm:$0xff] }
  0x2d   : > { %2930 = vmatpush3.bf16.msra.mxu0 %v3269_v38 }
  0x2e   : > { %2931 = vmatprep.subr.bf16.mxu0 %v3275_v39  ;;  %v378_v1 = vsub.f32 %v376_v48, %v377_v60  ;;  %v385_v2 = vmul.f32 %v3499_v61, %v324_v46  ;;  %v386_v3 = vmul.f32 %v3499_v61, %v325_v47  ;;  %v407_v4 = vmul.f32 %v3499_v61, %v346_v49  ;;  %v332_v39 = vld [vmem:[%s3475_s20 + $0x40] sm:$0xff]  ;;  %v333_v46 = vld [vmem:[%s3475_s20 + $0x48] sm:$0xff] }
  0x2f   : > { %v408_v6 = vmul.f32 %v3499_v61, %v347_v52  ;;  %v387_v7 = vmul.f32 %v3499_v61, %v326_v53  ;;  %v388_v8 = vmul.f32 %v3499_v61, %v327_v54  ;;  %v409_v9 = vmul.f32 %v3499_v61, %v348_v55  ;;  %v3294_v52 = vld [vmem:[%s4549_s5 + $0x118] sm:$0xff]  }
  0x30   : > { %v3512_v10 = vrot.slane %v378_v1, %v382_v44  ;;  %v410_v11 = vmul.f32 %v3499_v61, %v349_v56  ;;  %v389_v12 = vmul.f32 %v3499_v61, %v328_v57  ;;  %v390_v13 = vmul.f32 %v3499_v61, %v329_v58  ;;  %v335_v57 = vld [vmem:[%s3475_s20 + $0x58] sm:$0xff]  ;;  %v336_v58 = vld [vmem:[%s3475_s20 + $0x60] sm:$0xff] }
  0x31   : > { %2932 = vmatpush3.bf16.msra.mxu0 %v3277_v41  ;;  %v411_v14 = vmul.f32 %v3499_v61, %v350_v62  ;;  %v412_v15 = vmul.f32 %v3499_v61, %v351_v63  ;;  %v391_v16 = vmul.f32 %v3499_v61, %v330_v0  ;;  %v392_v17 = vmul.f32 %v3499_v61, %v331_v5 }
  0x32   : > { %2933 = vmatprep.subr.bf16.mxu0 %v3283_v50  ;;  %v423_v19 = vadd.f32 %v3512_v10, %v385_v2  ;;  %v424_v20 = vadd.f32 %v3512_v10, %v386_v3  ;;  %v445_v21 = vadd.f32 %v3512_v10, %v407_v4  ;;  %v446_v22 = vadd.f32 %v3512_v10, %v408_v6  ;;  %v3296_v2 = vld [vmem:[%s4549_s5 + $0x150] sm:$0xff]  }
  0x33   : > { %v425_v24 = vadd.f32 %v3512_v10, %v387_v7  ;;  %v426_v25 = vadd.f32 %v3512_v10, %v388_v8  ;;  %v447_v26 = vadd.f32 %v3512_v10, %v409_v9  ;;  %v448_v27 = vadd.f32 %v3512_v10, %v410_v11  ;;  %v337_v7 = vld [vmem:[%s3475_s20 + $0x68] sm:$0xff]  ;;  %v3297_v8 = vld [vmem:[%s4549_s5 + $0x110] sm:$0xff]  }
  0x34   : > { %v455_v28 = vmax.f32 %v423_v19, 0.0  ;;  %v456_v29 = vmax.f32 %v424_v20, 0.0  ;;  %v477_v30 = vmax.f32 %v445_v21, 0.0  ;;  %v478_v31 = vmax.f32 %v446_v22, 0.0  ;;  %v3268_v19 = vld [vmem:[%s4549_s5 + $0xb8] sm:$0xff]  }
  0x35   : > { %2934 = vmatpush3.bf16.msra.mxu0 %v3285_v59  ;;  %v457_v35 = vmax.f32 %v425_v24, 0.0  ;;  %v458_v36 = vmax.f32 %v426_v25, 0.0  ;;  %v479_v37 = vmax.f32 %v447_v26, 0.0  ;;  %v480_v38 = vmax.f32 %v448_v27, 0.0  ;;  %v3270_v24 = vld [vmem:[%s4549_s5 + $0xf0] sm:$0xff]  }
  0x36   : > { %2935 = vmatprep.subr.bf16.mxu0 %v3290_v18  ;;  %529 = vst [vmem:[#allocation2 + $0x28] sm:$0xff] %v455_v28  ;;  %530 = vst [vmem:[#allocation2 + $0x30] sm:$0xff] %v456_v29  ;;  %v3541_v40 = vpack.c.bf16 %v456_v29, %v455_v28  ;;  %v653_v41 = vpack.c.bf16 %v478_v31, %v477_v30  ;;  %v3544_v42 = vadd.f32 %v3512_v10, %v389_v12 }
  0x37   : > { %551 = vst [vmem:[#allocation2 + $0x188] sm:$0xff] %v477_v30  ;;  %552 = vst [vmem:[#allocation2 + $0x190] sm:$0xff] %v478_v31  ;;  %v3547_v43 = vadd.f32 %v3512_v10, %v390_v13  ;;  %v3550_v44 = vadd.f32 %v3512_v10, %v411_v14  ;;  %v3553_v45 = vadd.f32 %v3512_v10, %v412_v15  ;;  %v338_v30 = vld [vmem:[%s3475_s20 + $0x70] sm:$0xff]  ;;  %v339_v31 = vld [vmem:[%s3475_s20 + $0x78] sm:$0xff] }
  0x38   : > { %531 = vst [vmem:[#allocation2 + $0x48] sm:$0xff] %v457_v35  ;;  %532 = vst [vmem:[#allocation2 + $0x50] sm:$0xff] %v458_v36  ;;  %1610 = vmatprep.mubr.bf16.mxu0 %v3541_v40  ;;  %1698 = vmatprep.mubr.bf16.mxu1 %v653_v41  ;;  %v459_v47 = vmax.f32 %v3544_v42, 0.0  ;;  %v3560_v49 = vadd.f32 %v3512_v10, %v391_v16  ;;  %v3563_v50 = vadd.f32 %v3512_v10, %v392_v17  ;;  %v341_v41 = vld [vmem:[%s3475_s20 + $0x88] sm:$0xff] }
  0x39   : > { %2936 = vmatpush3.bf16.msra.mxu0 %v3291_v23  ;;  %553 = vst [vmem:[#allocation2 + $0x1a8] sm:$0xff] %v479_v37  ;;  %554 = vst [vmem:[#allocation2 + $0x1b0] sm:$0xff] %v480_v38  ;;  %v460_v48 = vmax.f32 %v3547_v43, 0.0  ;;  %v481_v53 = vmax.f32 %v3550_v44, 0.0  ;;  %v482_v54 = vmax.f32 %v3553_v45, 0.0  ;;  %v413_v55 = vmul.f32 %v3499_v61, %v352_v32  ;;  %v343_v44 = vld [vmem:[%s3475_s20 + $0x98] sm:$0xff] }
  0x3a   : > { %2937 = vmatprep.subr.bf16.mxu0 %v3292_v34  ;;  %v414_v56 = vmul.f32 %v3499_v61, %v353_v33  ;;  %533 = vst [vmem:[#allocation2 + $0x68] sm:$0xff] %v459_v47  ;;  %v461_v59 = vmax.f32 %v3560_v49, 0.0  ;;  %v462_v60 = vmax.f32 %v3563_v50, 0.0  ;;  %v393_v62 = vmul.f32 %v3499_v61, %v332_v39  ;;  %v340_v39 = vld [vmem:[%s3475_s20 + $0x80] sm:$0xff]  ;;  %v3280_v49 = vld [vmem:[%s4549_s5 + $0xd0] sm:$0xff]  }
  0x3b   : > { %534 = vst [vmem:[#allocation2 + $0x70] sm:$0xff] %v460_v48  ;;  %555 = vst [vmem:[#allocation2 + $0x1c8] sm:$0xff] %v481_v53  ;;  %v3587_v63 = vadd.f32 %v3512_v10, %v413_v55  ;;  %v394_v1 = vmul.f32 %v3499_v61, %v333_v46  ;;  %v3596_v3 = vpack.c.bf16 %v458_v36, %v457_v35  ;;  %v3271_v36 = vld [vmem:[%s4549_s5 + $0xb0] sm:$0xff]   ;;  %v3272_v46 = vld [vmem:[%s4549_s5 + $0xe8] sm:$0xff]  }
  0x3c   : > { %556 = vst [vmem:[#allocation2 + $0x1d0] sm:$0xff] %v482_v54  ;;  %v3590_v0 = vadd.f32 %v3512_v10, %v414_v56  ;;  %v654_v4 = vpack.c.bf16 %v480_v38, %v479_v37  ;;  %535 = vst [vmem:[#allocation2 + $0x88] sm:$0xff] %v461_v59  ;;  %v3603_v5 = vadd.f32 %v3512_v10, %v393_v62  ;;  %v3276_v45 = vld [vmem:[%s4549_s5 + $0xa0] sm:$0xff]  }
  0x3d   : > { %2938 = vmatpush3.bf16.msra.mxu0 %v3294_v52  ;;  %536 = vst [vmem:[#allocation2 + $0x90] sm:$0xff] %v462_v60  ;;  %v395_v6 = vmul.f32 %v3499_v61, %v334_v51  ;;  %v563_v9 = vld [vmem:[#allocation2 + $0x27] sm:$0xff]  ;;  %v564_v11 = vld [vmem:[#allocation2 + $0x2f] sm:$0xff]  ;;  %v483_v13 = vmax.f32 %v3587_v63, 0.0  ;;  %v3613_v15 = vadd.f32 %v3512_v10, %v394_v1  ;;  %v396_v16 = vmul.f32 %v3499_v61, %v335_v57 }
  0x3e   : > { %v585_v12 = vld [vmem:[#allocation2 + $0x187] sm:$0xff]  ;;  %v484_v14 = vmax.f32 %v3590_v0, 0.0  ;;  %2939 = vmatprep.subr.bf16.mxu0 %v3296_v2  ;;  %v3616_v17 = vpack.c.bf16 %v564_v11, %v563_v9  ;;  %v586_v18 = vld [vmem:[#allocation2 + $0x18f] sm:$0xff]  ;;  %v463_v20 = vmax.f32 %v3603_v5, 0.0  ;;  %v397_v22 = vmul.f32 %v3499_v61, %v336_v58 }
  0x3f   : > { %v3623_v21 = vadd.f32 %v3512_v10, %v395_v6  ;;  %v605_v23 = vpack.c.bf16 %v586_v18, %v585_v12  ;;  %557 = vst [vmem:[#allocation2 + $0x1e8] sm:$0xff] %v483_v13  ;;  %v464_v25 = vmax.f32 %v3613_v15, 0.0  ;;  %v565_v26 = vld [vmem:[#allocation2 + $0x47] sm:$0xff]  ;;  %v3638_v27 = vadd.f32 %v3512_v10, %v396_v16  ;;  %v566_v32 = vld [vmem:[#allocation2 + $0x4f] sm:$0xff] }
  0x40   : > { %558 = vst [vmem:[#allocation2 + $0x1f0] sm:$0xff] %v484_v14  ;;  %1611 = vmatmul.mubr.bf16.gmra.mxu0 %v3616_v17  ;;  %537 = vst [vmem:[#allocation2 + $0xa8] sm:$0xff] %v463_v20  ;;  %v398_v29 = vmul.f32 %v3499_v61, %v337_v7  ;;  %v587_v33 = vld [vmem:[#allocation2 + $0x1a7] sm:$0xff]  ;;  %v588_v34 = vld [vmem:[#allocation2 + $0x1af] sm:$0xff]  ;;  %v3648_v35 = vadd.f32 %v3512_v10, %v397_v22  ;;  %v399_v52 = vmul.f32 %v3499_v61, %v338_v30 }
  0x41   : > { %2940 = vmatpush3.bf16.msra.mxu0 %v3297_v8  ;;  %v465_v28 = vmax.f32 %v3623_v21, 0.0  ;;  %1699 = vmatmul.mubr.bf16.vlgmr.msra.gmra.mxu1 %v605_v23  ;;  %538 = vst [vmem:[#allocation2 + $0xb0] sm:$0xff] %v464_v25  ;;  %v466_v37 = vmax.f32 %v3638_v27, 0.0  ;;  %v400_v55 = vmul.f32 %v3499_v61, %v339_v31  ;;  %v3667_v56 = vpack.c.bf16 %v566_v32, %v565_v26  ;;  %v342_v9 = vld [vmem:[%s3475_s20 + $0x90] sm:$0xff]  ;;  %v3300_v22 = vld [vmem:[%s4549_s5 + $0x148] sm:$0xff]   ;;  %v3278_v30 = vld [vmem:[%s4549_s5 + $0xd8] sm:$0xff]  }
  0x42   : > { %1618 = vmatprep.mubr.bf16.mxu0 %v3596_v3  ;;  %2818 = vmatpush3.bf16.msra.mxu1 %v3268_v19  ;;  %v3657_v38 = vadd.f32 %v3512_v10, %v398_v29  ;;  %v467_v51 = vmax.f32 %v3648_v35, 0.0  ;;  %v3669_v57 = vpack.c.bf16 %v588_v34, %v587_v33  ;;  %v3675_v58 = vpack.c.bf16 %v460_v48, %v459_v47  ;;  %v3273_v47 = vld [vmem:[%s4549_s5 + $0xa8] sm:$0xff]   ;;  %v344_v32 = vld [vmem:[%s3475_s20 + $0xa0] sm:$0xff]  ;;  %v3295_v21 = vld [vmem:[%s4549_s5 + $0x1b0] sm:$0xff]  }
  0x43   : > { %1706 = vmatprep.mubr.bf16.mxu1 %v654_v4  ;;  %539 = vst [vmem:[#allocation2 + $0xc8] sm:$0xff] %v465_v28  ;;  %2819 = vmatprep.subr.bf16.mxu1 %v3270_v24  ;;  %540 = vst [vmem:[#allocation2 + $0xd0] sm:$0xff] %v466_v37  ;;  %v3683_v1 = vadd.f32 %v3512_v10, %v399_v52  ;;  %v3686_v2 = vadd.f32 %v3512_v10, %v400_v55  ;;  %v3274_v4 = vld [vmem:[%s4549_s5 + $0xe0] sm:$0xff]   ;;  %v568_v16 = vld [vmem:[#allocation2 + $0x6f] sm:$0xff] }
  0x44   : > { %v468_v62 = vmax.f32 %v3657_v38, 0.0  ;;  %541 = vst [vmem:[#allocation2 + $0xe8] sm:$0xff] %v467_v51  ;;  %v401_v42 = vmul.f32 %v3499_v61, %v340_v39  ;;  %v402_v43 = vmul.f32 %v3499_v61, %v341_v41  ;;  %v655_v48 = vpack.c.bf16 %v482_v54, %v481_v53  ;;  %v567_v53 = vld [vmem:[#allocation2 + $0x67] sm:$0xff]  ;;  %v590_v23 = vld [vmem:[#allocation2 + $0x1cf] sm:$0xff]  ;;  %2941 = vmatprep.subr.bf16.mxu0 %v3300_v22 }
  0x45   : > { %v469_v6 = vmax.f32 %v3683_v1, 0.0  ;;  %v470_v7 = vmax.f32 %v3686_v2, 0.0  ;;  %v403_v11 = vmul.f32 %v3499_v61, %v342_v9  ;;  %v404_v12 = vmul.f32 %v3499_v61, %v343_v44  ;;  %v589_v18 = vld [vmem:[#allocation2 + $0x1c7] sm:$0xff]  ;;  %v570_v0 = vld [vmem:[#allocation2 + $0x8f] sm:$0xff] }
  0x46   : > { %2820 = vmatpush3.bf16.msra.mxu1 %v3271_v36  ;;  %542 = vst [vmem:[#allocation2 + $0xf0] sm:$0xff] %v468_v62  ;;  %v3705_v8 = vadd.f32 %v3512_v10, %v401_v42  ;;  %v3714_v54 = vadd.f32 %v3512_v10, %v402_v43  ;;  %v3301_v31 = vld [vmem:[%s4549_s5 + $0x108] sm:$0xff]   ;;  %v3744_v33 = vpack.c.bf16 %v568_v16, %v567_v53  ;;  %v3279_v42 = vld [vmem:[%s4549_s5 + $0x98] sm:$0xff]   ;;  %v3287_v5 = vld [vmem:[%s4549_s5 + $0x80] sm:$0xff]  }
  0x47   : > { %2821 = vmatprep.subr.bf16.mxu1 %v3272_v46  ;;  %543 = vst [vmem:[#allocation2 + $0x108] sm:$0xff] %v469_v6  ;;  %544 = vst [vmem:[#allocation2 + $0x110] sm:$0xff] %v470_v7  ;;  %v3730_v26 = vadd.f32 %v3512_v10, %v403_v11  ;;  %v3733_v29 = vadd.f32 %v3512_v10, %v404_v12  ;;  %v345_v39 = vld [vmem:[%s3475_s20 + $0xa8] sm:$0xff]  ;;  %v3751_v41 = vpack.c.bf16 %v590_v23, %v589_v18  ;;  %v3818_v16 = vld [vmem:[%s4549_s5 + $0x238] sm:$0xff]  }
  0x48   : > { %1619 = vmatmul.mubr.bf16.gmra.mxu0 %v3667_v56  ;;  %v471_v19 = vmax.f32 %v3705_v8, 0.0  ;;  %v472_v24 = vmax.f32 %v3714_v54, 0.0  ;;  %v3757_v46 = vpack.c.bf16 %v462_v60, %v461_v59  ;;  %v405_v52 = vmul.f32 %v3499_v61, %v344_v32  ;;  %v3281_v60 = vld [vmem:[%s4549_s5 + $0x90] sm:$0xff]   ;;  %v569_v63 = vld [vmem:[#allocation2 + $0x87] sm:$0xff]  ;;  %v3288_v23 = vld [vmem:[%s4549_s5 + $0x1f8] sm:$0xff]  }
  0x49   : > { %1707 = vmatmul.mubr.bf16.gmra.mxu1 %v3669_v57  ;;  %1626 = vmatprep.mubr.bf16.mxu0 %v3675_v58  ;;  %v473_v34 = vmax.f32 %v3730_v26, 0.0  ;;  %v474_v36 = vmax.f32 %v3733_v29, 0.0  ;;  %v406_v55 = vmul.f32 %v3499_v61, %v345_v39  ;;  %v656_v43 = vpack.c.bf16 %v484_v14, %v483_v13  ;;  %v592_v9 = vld [vmem:[#allocation2 + $0x1ef] sm:$0xff]  ;;  %v3286_v18 = vld [vmem:[%s4549_s5 + $0xc0] sm:$0xff]  }
  0x4a   : > { %2822 = vmatpush3.bf16.msra.mxu1 %v3273_v47  ;;  %1714 = vmatprep.mubr.bf16.mxu1 %v655_v48  ;;  %545 = vst [vmem:[#allocation2 + $0x128] sm:$0xff] %v471_v19  ;;  %546 = vst [vmem:[#allocation2 + $0x130] sm:$0xff] %v472_v24  ;;  %v3776_v50 = vadd.f32 %v3512_v10, %v405_v52  ;;  %v3304_v47 = vld [vmem:[%s4549_s5 + $0x140] sm:$0xff]   ;;  %v3282_v44 = vld [vmem:[%s4549_s5 + $0xc8] sm:$0xff]   ;;  %v3810_v11 = vpack.c.bf16 %v464_v25, %v463_v20 }
  0x4b   : > { %2823 = vmatprep.subr.bf16.mxu1 %v3274_v4  ;;  %2942 = vmatpush3.bf16.msra.mxu0 %v3301_v31  ;;  %547 = vst [vmem:[#allocation2 + $0x148] sm:$0xff] %v473_v34  ;;  %548 = vst [vmem:[#allocation2 + $0x150] sm:$0xff] %v474_v36  ;;  %v3779_v59 = vadd.f32 %v3512_v10, %v406_v55  ;;  %v3305_v48 = vld [vmem:[%s4549_s5 + $0x100] sm:$0xff]   ;;  %v3284_v12 = vld [vmem:[%s4549_s5 + $0x88] sm:$0xff]   ;;  %v3840_v32 = vpack.c.bf16 %v466_v37, %v465_v28 }
  0x4c   : > { %v475_v13 = vmax.f32 %v3776_v50, 0.0  ;;  %v591_v4 = vld [vmem:[#allocation2 + $0x1e7] sm:$0xff]  ;;  %2943 = vmatprep.subr.bf16.mxu0 %v3304_v47  ;;  %v572_v20 = vld [vmem:[#allocation2 + $0xaf] sm:$0xff] }
  0x4d   : > { %v476_v14 = vmax.f32 %v3779_v59, 0.0  ;;  %v3804_v53 = vpack.c.bf16 %v592_v9, %v591_v4  ;;  %v571_v15 = vld [vmem:[#allocation2 + $0xa7] sm:$0xff]  ;;  %v658_v22 = vld [vmem:[#allocation2 + $0x11] sm:$0xff] }
  0x4e   : > { %2824 = vmatpush3.bf16.msra.mxu1 %v3276_v45  ;;  %549 = vst [vmem:[#allocation2 + $0x168] sm:$0xff] %v475_v13  ;;  %v3802_v45 = vpack.c.bf16 %v570_v0, %v569_v63  ;;  %v657_v25 = vld [vmem:[#allocation2 + $0x9] sm:$0xff]  ;;  %v660_v37 = vld [vmem:[#allocation2 + $0x31] sm:$0xff]  ;;  %v3302_v0 = vld [vmem:[%s4549_s5 + $0x1e0] sm:$0xff]  }
  0x4f   : > { %2825 = vmatprep.subr.bf16.mxu1 %v3278_v30  ;;  %550 = vst [vmem:[#allocation2 + $0x170] sm:$0xff] %v476_v14  ;;  %2944 = vmatpush3.bf16.msra.mxu0 %v3305_v48  ;;  %v3834_v30 = vpack.c.bf16 %v572_v20, %v571_v15  ;;  %v689_v31 = vpack.c.bf16 %v658_v22, %v657_v25  ;;  %v3293_v39 = vld [vmem:[%s4549_s5 + $0x1f0] sm:$0xff]   ;;  %v573_v52 = vld [vmem:[#allocation2 + $0xc7] sm:$0xff]  ;;  %v355_v63 = vld [vmem:[%s3475_s20 + $0xf8] sm:$0xff] }
  0x50   : > { %1627 = vmatmul.mubr.bf16.gmra.mxu0 %v3744_v33  ;;  %3177 = vmatprep.subr.bf16.mxu0 %v3818_v16  ;;  %v574_v27 = vld [vmem:[#allocation2 + $0xcf] sm:$0xff]  ;;  %v416_v35 = vmul.f32 %v3499_v61, %v355_v63  ;;  %v575_v38 = vld [vmem:[#allocation2 + $0xe7] sm:$0xff]  ;;  %v3308_v15 = vld [vmem:[%s4549_s5 + $0x198] sm:$0xff]   ;;  %v3970_v29 = vpack.c.bf16 %v476_v14, %v475_v13 }
  0x51   : > { %1715 = vmatmul.mubr.bf16.gmra.mxu1 %v3751_v41  ;;  %1634 = vmatprep.mubr.bf16.mxu0 %v3757_v46  ;;  %v659_v28 = vld [vmem:[#allocation2 + $0x29] sm:$0xff]  ;;  %v662_v9 = vld [vmem:[#allocation2 + $0x51] sm:$0xff] }
  0x52   : > { %2826 = vmatpush3.bf16.msra.mxu1 %v3279_v42  ;;  %1722 = vmatprep.mubr.bf16.mxu1 %v656_v43  ;;  %v3298_v55 = vld [vmem:[%s4549_s5 + $0x1e8] sm:$0xff]   ;;  %v3857_v42 = vpack.c.bf16 %v574_v27, %v573_v52  ;;  %v3859_v43 = vpack.c.bf16 %v660_v37, %v659_v28  ;;  %v3884_v48 = vadd.f32 %v3512_v10, %v416_v35  ;;  %v3309_v1 = vld [vmem:[%s4549_s5 + $0x1d0] sm:$0xff]   ;;  %v3317_v52 = vld [vmem:[%s4549_s5 + $0x180] sm:$0xff]  }
  0x53   : > { %2827 = vmatprep.subr.bf16.mxu1 %v3280_v49  ;;  %v3865_v49 = vpack.c.bf16 %v468_v62, %v467_v51  ;;  %v576_v51 = vld [vmem:[#allocation2 + $0xef] sm:$0xff]  ;;  %v577_v2 = vld [vmem:[#allocation2 + $0x107] sm:$0xff]  ;;  %v3956_v28 = vpack.c.bf16 %v474_v36, %v473_v34 }
  0x54   : > { %v661_v4 = vld [vmem:[#allocation2 + $0x49] sm:$0xff]  ;;  %v664_v20 = vld [vmem:[#allocation2 + $0x71] sm:$0xff] }
  0x55   : > { %v3311_v25 = vld [vmem:[%s4549_s5 + $0x190] sm:$0xff]   ;;  %v3312_v22 = vld [vmem:[%s4549_s5 + $0x1c8] sm:$0xff]  }
  0x56   : > { %2828 = vmatpush3.bf16.msra.mxu1 %v3281_v60  ;;  %v354_v60 = vld [vmem:[%s3475_s20 + $0xf0] sm:$0xff]  ;;  %v579_v8 = vld [vmem:[#allocation2 + $0x127] sm:$0xff] }
  0x57   : > { %2829 = vmatprep.subr.bf16.mxu1 %v3282_v44  ;;  %v415_v47 = vmul.f32 %v3499_v61, %v354_v60  ;;  %v3303_v61 = vld [vmem:[%s4549_s5 + $0x1a0] sm:$0xff]   ;;  %v3306_v44 = vld [vmem:[%s4549_s5 + $0x1d8] sm:$0xff]   ;;  %v580_v54 = vld [vmem:[#allocation2 + $0x12f] sm:$0xff] }
  0x58   : > { %1635 = vmatmul.mubr.bf16.gmra.mxu0 %v3802_v45  ;;  %v581_v37 = vld [vmem:[#allocation2 + $0x147] sm:$0xff]  ;;  %v668_v60 = vld [vmem:[#allocation2 + $0xb1] sm:$0xff] }
  0x59   : > { %1723 = vmatmul.mubr.bf16.gmra.mxu1 %v3804_v53  ;;  %1642 = vmatprep.mubr.bf16.mxu0 %v3810_v11  ;;  %v3881_v62 = vadd.f32 %v3512_v10, %v415_v47  ;;  %v3895_v10 = vpack.c.bf16 %v576_v51, %v575_v38  ;;  %v583_v34 = vld [vmem:[#allocation2 + $0x167] sm:$0xff]  ;;  %v584_v36 = vld [vmem:[#allocation2 + $0x16f] sm:$0xff] }
  0x5a   : > { %2830 = vmatpush3.bf16.msra.mxu1 %v3284_v12  ;;  %1763 = vmatprep.mubr.bf16.mxu1 %v3616_v17  ;;  %v3289_v17 = vld [vmem:[%s4549_s5 + $0x1b8] sm:$0xff]   ;;  %v3976_v35 = vpack.c.bf16 %v584_v36, %v583_v34  ;;  %v671_v59 = vld [vmem:[#allocation2 + $0xe9] sm:$0xff] }
  0x5b   : > { %2831 = vmatprep.subr.bf16.mxu1 %v3286_v18  ;;  %v485_v12 = vmax.f32 %v3881_v62, 0.0  ;;  %v486_v18 = vmax.f32 %v3884_v48, 0.0  ;;  %v670_v47 = vld [vmem:[#allocation2 + $0xd1] sm:$0xff]  ;;  %v673_v62 = vld [vmem:[#allocation2 + $0x109] sm:$0xff] }
  0x5c   : > { %v672_v13 = vld [vmem:[#allocation2 + $0xf1] sm:$0xff]  ;;  %v3313_v48 = vld [vmem:[%s4549_s5 + $0x228] sm:$0xff]  }
  0x5d   : > { %559 = vst [vmem:[#allocation2 + $0x208] sm:$0xff] %v485_v12  ;;  %560 = vst [vmem:[#allocation2 + $0x210] sm:$0xff] %v486_v18  ;;  %v3984_v50 = vpack.c.bf16 %v486_v18, %v485_v12  ;;  %v3990_v14 = vpack.c.bf16 %v672_v13, %v671_v59  ;;  %v3310_v51 = vld [vmem:[%s4549_s5 + $0x230] sm:$0xff]   ;;  %v850_v34 = vld [vmem:[#allocation2 + $0x47] sm:$0xff] }
  0x5e   : > { %2832 = vmatpush3.bf16.msra.mxu1 %v3287_v5  ;;  %v3897_v5 = vpack.c.bf16 %v662_v9, %v661_v4  ;;  %v676_v9 = vld [vmem:[#allocation2 + $0x131] sm:$0xff]  ;;  %v677_v12 = vld [vmem:[#allocation2 + $0x149] sm:$0xff] }
  0x5f   : > { %3041 = vmatprep.subr.bf16.mxu1 %v3288_v23  ;;  %v678_v18 = vld [vmem:[#allocation2 + $0x151] sm:$0xff] }
  0x60   : > { %1643 = vmatmul.mubr.bf16.gmra.mxu0 %v3834_v30  ;;  %v851_v36 = vld [vmem:[#allocation2 + $0x4f] sm:$0xff] }
  0x61   : > { %1764 = vmatmul.mubr.bf16.vlgmr.msra.gmra.mxu1 %v689_v31  ;;  %1650 = vmatprep.mubr.bf16.mxu0 %v3840_v32  ;;  %v882_v59 = vpack.c.bf16 %v851_v36, %v850_v34  ;;  %v782_v34 = vld [vmem:[#allocation2 + $0x1f0] sm:$0xff] }
  0x62   : > { %3042 = vmatpush3.bf16.msra.mxu1 %v3289_v17  ;;  %1771 = vmatprep.mubr.bf16.mxu1 %v3667_v56  ;;  %v3299_v56 = vld [vmem:[%s4549_s5 + $0x1a8] sm:$0xff]  }
  0x63   : > { %3043 = vmatprep.subr.bf16.mxu1 %v3293_v39  ;;  %v3314_v17 = vld [vmem:[%s4549_s5 + $0x188] sm:$0xff]   ;;  %v3315_v39 = vld [vmem:[%s4549_s5 + $0x1c0] sm:$0xff]  }
  0x66   : > { %3044 = vmatpush3.bf16.msra.mxu1 %v3295_v21  ;;  %v3948_v21 = vpack.c.bf16 %v580_v54, %v579_v8  ;;  %v686_v8 = vld [vmem:[#allocation2 + $0x1d1] sm:$0xff]  ;;  %v735_v54 = vld [vmem:[#allocation2 + $0x207] sm:$0xff] }
  0x67   : > { %3045 = vmatprep.subr.bf16.mxu1 %v3298_v55  ;;  %v582_v55 = vld [vmem:[#allocation2 + $0x14f] sm:$0xff] }
  0x68   : > { %1651 = vmatmul.mubr.bf16.gmra.mxu0 %v3857_v42  ;;  %v3962_v63 = vpack.c.bf16 %v582_v55, %v581_v37  ;;  %v688_v37 = vld [vmem:[#allocation2 + $0x1f1] sm:$0xff]  ;;  %v898_v55 = vld [vmem:[#allocation2 + $0x48] sm:$0xff] }
  0x69   : > { %1772 = vmatmul.mubr.bf16.gmra.mxu1 %v3859_v43  ;;  %1658 = vmatprep.mubr.bf16.mxu0 %v3865_v49 }
  0x6a   : > { %1779 = vmatprep.mubr.bf16.mxu1 %v3744_v33  ;;  %3046 = vmatpush3.bf16.msra.mxu1 %v3299_v56  ;;  %v3903_v33 = vpack.c.bf16 %v470_v7, %v469_v6  ;;  %v578_v6 = vld [vmem:[#allocation2 + $0x10f] sm:$0xff] }
  0x6b   : > { %3047 = vmatprep.subr.bf16.mxu1 %v3302_v0  ;;  %v663_v7 = vld [vmem:[#allocation2 + $0x69] sm:$0xff]  ;;  %v3925_v23 = vpack.c.bf16 %v578_v6, %v577_v2  ;;  %v4027_v2 = vpack.c.bf16 %v678_v18, %v677_v12 }
  0x6c   : > { %v3927_v31 = vpack.c.bf16 %v664_v20, %v663_v7  ;;  %v667_v56 = vld [vmem:[#allocation2 + $0xa9] sm:$0xff]  ;;  %v680_v20 = vld [vmem:[#allocation2 + $0x171] sm:$0xff] }
  0x6d   : > { %v3964_v26 = vpack.c.bf16 %v668_v60, %v667_v56  ;;  %v669_v0 = vld [vmem:[#allocation2 + $0xc9] sm:$0xff] }
  0x6e   : > { %3048 = vmatpush3.bf16.msra.mxu1 %v3303_v61  ;;  %v3978_v38 = vpack.c.bf16 %v670_v47, %v669_v0  ;;  %v3318_v61 = vld [vmem:[%s4549_s5 + $0x218] sm:$0xff]   ;;  %v679_v7 = vld [vmem:[#allocation2 + $0x169] sm:$0xff] }
  0x6f   : > { %3049 = vmatprep.subr.bf16.mxu1 %v3306_v44  ;;  %v900_v0 = vld [vmem:[#allocation2 + $0x68] sm:$0xff]  ;;  %v901_v47 = vld [vmem:[#allocation2 + $0x70] sm:$0xff] }
  0x70   : > { %1659 = vmatmul.mubr.bf16.gmra.mxu0 %v3895_v10  ;;  %v931_v13 = vpack.c.bf16 %v901_v47, %v900_v0  ;;  %v832_v0 = vld [vmem:[#allocation2 + $0x211] sm:$0xff] }
  0x71   : > { %1780 = vmatmul.mubr.bf16.gmra.mxu1 %v3897_v5  ;;  %1666 = vmatprep.mubr.bf16.mxu0 %v3903_v33 }
  0x72   : > { %1787 = vmatprep.mubr.bf16.mxu1 %v3802_v45  ;;  %3050 = vmatpush3.bf16.msra.mxu1 %v3308_v15  ;;  %v3933_v45 = vpack.c.bf16 %v472_v24, %v471_v19  ;;  %v665_v19 = vld [vmem:[#allocation2 + $0x89] sm:$0xff]  ;;  %v666_v24 = vld [vmem:[#allocation2 + $0x91] sm:$0xff] }
  0x73   : > { %3051 = vmatprep.subr.bf16.mxu1 %v3309_v1  ;;  %v3950_v27 = vpack.c.bf16 %v666_v24, %v665_v19  ;;  %v728_v15 = vld [vmem:[#allocation2 + $0x18f] sm:$0xff] }
  0x74   : > { %v3320_v1 = vld [vmem:[%s4549_s5 + $0x208] sm:$0xff]  }
  0x75   : > { %v736_v19 = vld [vmem:[#allocation2 + $0x20f] sm:$0xff] }
  0x76   : > { %3052 = vmatpush3.bf16.msra.mxu1 %v3311_v25  ;;  %v4038_v25 = vpack.c.bf16 %v680_v20, %v679_v7  ;;  %v855_v7 = vld [vmem:[#allocation2 + $0x8f] sm:$0xff] }
  0x77   : > { %3053 = vmatprep.subr.bf16.mxu1 %v3312_v22  ;;  %v682_v22 = vld [vmem:[#allocation2 + $0x191] sm:$0xff]  ;;  %v904_v20 = vld [vmem:[#allocation2 + $0xa8] sm:$0xff] }
  0x78   : > { %1667 = vmatmul.mubr.bf16.gmra.mxu0 %v3925_v23 }
  0x79   : > { %1788 = vmatmul.mubr.bf16.gmra.mxu1 %v3927_v31  ;;  %1674 = vmatprep.mubr.bf16.mxu0 %v3933_v45 }
  0x7a   : > { %1795 = vmatprep.mubr.bf16.mxu1 %v3834_v30  ;;  %3054 = vmatpush3.bf16.msra.mxu1 %v3314_v17  ;;  %v683_v17 = vld [vmem:[#allocation2 + $0x1a9] sm:$0xff] }
  0x7b   : > { %3055 = vmatprep.subr.bf16.mxu1 %v3315_v39 }
  0x7e   : > { %3056 = vmatpush3.bf16.msra.mxu1 %v3317_v52  ;;  %v4058_v52 = vpack.c.bf16 %v736_v19, %v735_v54  ;;  %v779_v19 = vld [vmem:[#allocation2 + $0x1c8] sm:$0xff] }
  0x80   : > { %1675 = vmatmul.mubr.bf16.gmra.mxu0 %v3948_v21 }
  0x81   : > { %1796 = vmatmul.mubr.bf16.gmra.mxu1 %v3950_v27  ;;  %1682 = vmatprep.mubr.bf16.mxu0 %v3956_v28 }
  0x82   : > { %1803 = vmatprep.mubr.bf16.mxu1 %v3857_v42 }
  0x88   : > { %1683 = vmatmul.mubr.bf16.gmra.mxu0 %v3962_v63 }
  0x89   : > { %1804 = vmatmul.mubr.bf16.gmra.mxu1 %v3964_v26  ;;  %1690 = vmatprep.mubr.bf16.mxu0 %v3970_v29 }
  0x8a   : > { %1811 = vmatprep.mubr.bf16.mxu1 %v3895_v10 }
  0x90   : > { %1691 = vmatmul.mubr.bf16.gmra.mxu0 %v3976_v35 }
  0x91   : > { %1812 = vmatmul.mubr.bf16.gmra.mxu1 %v3978_v38  ;;  %1924 = vmatprep.mubr.bf16.mxu0 %v3859_v43  ;;  %v674_v43 = vld [vmem:[#allocation2 + $0x111] sm:$0xff] }
  0x92   : > { %1819 = vmatprep.mubr.bf16.mxu1 %v3925_v23  ;;  %v4003_v4 = vpack.c.bf16 %v674_v43, %v673_v62  ;;  %v852_v62 = vld [vmem:[#allocation2 + $0x67] sm:$0xff]  ;;  %v853_v43 = vld [vmem:[#allocation2 + $0x6f] sm:$0xff] }
  0x98   : > { %1925 = vmatmul.mubr.bf16.vlgmr.msra.gmra.mxu0 %v3541_v40  ;;  %v3316_v40 = vld [vmem:[%s4549_s5 + $0x220] sm:$0xff]  }
  0x99   : > { %1820 = vmatmul.mubr.bf16.gmra.mxu1 %v3990_v14  ;;  %1932 = vmatprep.mubr.bf16.mxu0 %v3897_v5  ;;  %v727_v5 = vld [vmem:[#allocation2 + $0x187] sm:$0xff] }
  0x9a   : > { %1827 = vmatprep.mubr.bf16.mxu1 %v3948_v21  ;;  %3178 = vmatpush3.bf16.msra.mxu0 %v3818_v16  ;;  %v675_v16 = vld [vmem:[#allocation2 + $0x129] sm:$0xff]  ;;  %v4029_v6 = vpack.c.bf16 %v728_v15, %v727_v5 }
  0x9b   : > { %3179 = vmatprep.subr.bf16.mxu0 %v3310_v51  ;;  %v4015_v44 = vpack.c.bf16 %v676_v9, %v675_v16  ;;  %v775_v15 = vld [vmem:[#allocation2 + $0x188] sm:$0xff] }
  0x9e   : > { %3180 = vmatpush3.bf16.msra.mxu0 %v3310_v51 }
  0x9f   : > { %3181 = vmatprep.subr.bf16.mxu0 %v3313_v48 }
  0xa0   : > { %1933 = vmatmul.mubr.bf16.gmra.mxu0 %v3596_v3  ;;  %v3319_v3 = vld [vmem:[%s4549_s5 + $0x210] sm:$0xff]  }
  0xa1   : > { %1828 = vmatmul.mubr.bf16.gmra.mxu1 %v4003_v4  ;;  %1940 = vmatprep.mubr.bf16.mxu0 %v3927_v31 }
  0xa2   : > { %1835 = vmatprep.mubr.bf16.mxu1 %v3962_v63  ;;  %3182 = vmatpush3.bf16.msra.mxu0 %v3313_v48  ;;  %v902_v48 = vld [vmem:[#allocation2 + $0x88] sm:$0xff] }
  0xa3   : > { %3183 = vmatprep.subr.bf16.mxu0 %v3316_v40 }
  0xa6   : > { %3184 = vmatpush3.bf16.msra.mxu0 %v3316_v40  ;;  %v903_v40 = vld [vmem:[#allocation2 + $0x90] sm:$0xff] }
  0xa7   : > { %3185 = vmatprep.subr.bf16.mxu0 %v3318_v61  ;;  %v932_v12 = vpack.c.bf16 %v903_v40, %v902_v48 }
  0xa8   : > { %1941 = vmatmul.mubr.bf16.gmra.mxu0 %v3675_v58  ;;  %v3321_v58 = vld [vmem:[%s4549_s5 + $0x200] sm:$0xff]  }
  0xa9   : > { %1836 = vmatmul.mubr.bf16.gmra.mxu1 %v4015_v44  ;;  %1948 = vmatprep.mubr.bf16.mxu0 %v3950_v27 }
  0xaa   : > { %1843 = vmatprep.mubr.bf16.mxu1 %v3976_v35  ;;  %3186 = vmatpush3.bf16.msra.mxu0 %v3318_v61  ;;  %v883_v61 = vpack.c.bf16 %v853_v43, %v852_v62 }
  0xab   : > { %3187 = vmatprep.subr.bf16.mxu0 %v3319_v3 }
  0xae   : > { %3188 = vmatpush3.bf16.msra.mxu0 %v3319_v3 }
  0xaf   : > { %3189 = vmatprep.subr.bf16.mxu0 %v3320_v1 }
  0xb0   : > { %1949 = vmatmul.mubr.bf16.gmra.mxu0 %v3757_v46  ;;  %v681_v46 = vld [vmem:[#allocation2 + $0x189] sm:$0xff] }
  0xb1   : > { %1844 = vmatmul.mubr.bf16.gmra.mxu1 %v4027_v2  ;;  %1956 = vmatprep.mubr.bf16.mxu0 %v3964_v26  ;;  %v4044_v31 = vpack.c.bf16 %v682_v22, %v681_v46  ;;  %v905_v46 = vld [vmem:[#allocation2 + $0xb0] sm:$0xff] }
  0xb2   : > { %1851 = vmatprep.mubr.bf16.mxu1 %v4029_v6  ;;  %3190 = vmatpush3.bf16.msra.mxu0 %v3320_v1  ;;  %v776_v1 = vld [vmem:[#allocation2 + $0x190] sm:$0xff] }
  0xb3   : > { %3191 = vmatprep.subr.bf16.mxu0 %v3321_v58  ;;  %v4077_v22 = vpack.c.bf16 %v776_v1, %v775_v15 }
  0xb6   : > { %3192 = vmatpush3.bf16.msra.mxu0 %v3321_v58  ;;  %v854_v58 = vld [vmem:[#allocation2 + $0x87] sm:$0xff] }
  0xb8   : > { %1957 = vmatmul.mubr.bf16.gmra.mxu0 %v3810_v11  ;;  %v684_v11 = vld [vmem:[#allocation2 + $0x1b1] sm:$0xff] }
  0xb9   : > { %1852 = vmatmul.mubr.bf16.gmra.mxu1 %v4038_v25  ;;  %1964 = vmatprep.mubr.bf16.mxu0 %v3978_v38  ;;  %v4050_v39 = vpack.c.bf16 %v684_v11, %v683_v17  ;;  %v884_v17 = vpack.c.bf16 %v855_v7, %v854_v58  ;;  %v933_v11 = vpack.c.bf16 %v905_v46, %v904_v20 }
  0xba   : > { %1859 = vmatprep.mubr.bf16.mxu1 %v3669_v57  ;;  %v685_v57 = vld [vmem:[#allocation2 + $0x1c9] sm:$0xff] }
  0xbb   : > { %v4056_v24 = vpack.c.bf16 %v686_v8, %v685_v57  ;;  %v777_v57 = vld [vmem:[#allocation2 + $0x1a8] sm:$0xff]  ;;  %v778_v8 = vld [vmem:[#allocation2 + $0x1b0] sm:$0xff] }
  0xbc   : > { %v4081_v54 = vpack.c.bf16 %v778_v8, %v777_v57 }
  0xc0   : > { %1965 = vmatmul.mubr.bf16.gmra.mxu0 %v3840_v32 }
  0xc1   : > { %1860 = vmatmul.mubr.bf16.gmra.mxu1 %v4044_v31  ;;  %1972 = vmatprep.mubr.bf16.mxu0 %v3990_v14 }
  0xc2   : > { %1867 = vmatprep.mubr.bf16.mxu1 %v3751_v41  ;;  %v687_v41 = vld [vmem:[#allocation2 + $0x1e9] sm:$0xff] }
  0xc3   : > { %v4064_v56 = vpack.c.bf16 %v688_v37, %v687_v41  ;;  %v780_v41 = vld [vmem:[#allocation2 + $0x1d0] sm:$0xff] }
  0xc4   : > { %v4087_v37 = vpack.c.bf16 %v780_v41, %v779_v19  ;;  %v948_v19 = vld [vmem:[#allocation2 + $0x69] sm:$0xff]  ;;  %v949_v41 = vld [vmem:[#allocation2 + $0x71] sm:$0xff] }
  0xc8   : > { %1973 = vmatmul.mubr.bf16.gmra.mxu0 %v3865_v49 }
  0xc9   : > { %1868 = vmatmul.mubr.bf16.gmra.mxu1 %v4050_v39  ;;  %1980 = vmatprep.mubr.bf16.mxu0 %v4003_v4 }
  0xca   : > { %1875 = vmatprep.mubr.bf16.mxu1 %v3804_v53  ;;  %v899_v53 = vld [vmem:[#allocation2 + $0x50] sm:$0xff] }
  0xcb   : > { %v930_v60 = vpack.c.bf16 %v899_v53, %v898_v55 }
  0xd0   : > { %1981 = vmatmul.mubr.bf16.gmra.mxu0 %v3903_v33 }
  0xd1   : > { %1876 = vmatmul.mubr.bf16.gmra.mxu1 %v4056_v24  ;;  %1988 = vmatprep.mubr.bf16.mxu0 %v4015_v44 }
  0xd2   : > { %1883 = vmatprep.mubr.bf16.mxu1 %v4058_v52 }
  0xd8   : > { %1989 = vmatmul.mubr.bf16.gmra.mxu0 %v3933_v45 }
  0xd9   : > { %1884 = vmatmul.mubr.bf16.gmra.mxu1 %v4064_v56  ;;  %1996 = vmatprep.mubr.bf16.mxu0 %v4027_v2 }
  0xda   : > { %2085 = vmatprep.mubr.bf16.mxu1 %v930_v60  ;;  %v781_v60 = vld [vmem:[#allocation2 + $0x1e8] sm:$0xff] }
  0xe0   : > { %1997 = vmatmul.mubr.bf16.gmra.mxu0 %v3956_v28 }
  0xe1   : > { %2086 = vmatmul.mubr.bf16.vlgmr.msra.gmra.mxu1 %v882_v59  ;;  %2004 = vmatprep.mubr.bf16.mxu0 %v4038_v25 }
  0xe2   : > { %2093 = vmatprep.mubr.bf16.mxu1 %v931_v13 }
  0xe8   : > { %2005 = vmatmul.mubr.bf16.gmra.mxu0 %v3970_v29 }
  0xe9   : > { %2094 = vmatmul.mubr.bf16.gmra.mxu1 %v883_v61  ;;  %2012 = vmatprep.mubr.bf16.mxu0 %v4044_v31 }
  0xea   : > { %2101 = vmatprep.mubr.bf16.mxu1 %v932_v12  ;;  %v946_v12 = vld [vmem:[#allocation2 + $0x49] sm:$0xff] }
  0xec   : > { %v2721_v51 = vpop.f32.mrf.mxu0 }
  0xee   : > { %v2722_v16 = vpop.f32.mrf.mxu0 }
  0xef   : > { %v4071_v9 = vadd.f32 %v2722_v16, %v2721_v51  ;;  %v4097_v51 = vpack.c.bf16 %v782_v34, %v781_v60 }
  0xf0   : > { %v2724_v3 = vpop.f32.mrf.mxu0  ;;  %2013 = vmatmul.mubr.bf16.gmra.mxu0 %v4077_v22 }
  0xf1   : > { %2102 = vmatmul.mubr.bf16.gmra.mxu1 %v884_v17  ;;  %2020 = vmatprep.mubr.bf16.mxu0 %v4050_v39 }
  0xf2   : > { %v2725_v18 = vpop.f32.mrf.mxu0  ;;  %2109 = vmatprep.mubr.bf16.mxu1 %v933_v11 }
  0xf3   : > { %v4074_v5 = vadd.f32 %v2725_v18, %v2724_v3  ;;  %v947_v18 = vld [vmem:[#allocation2 + $0x51] sm:$0xff] }
  0xf4   : > { %v978_v46 = vpack.c.bf16 %v947_v18, %v946_v12 }
  0xf8   : > { %2021 = vmatmul.mubr.bf16.gmra.mxu0 %v4081_v54 }
  0xf9   : > { %2110 = vmatmul.mubr.bf16.gmra.mxu1 %v3834_v30  ;;  %2028 = vmatprep.mubr.bf16.mxu0 %v4056_v24  ;;  %v831_v30 = vld [vmem:[#allocation2 + $0x209] sm:$0xff] }
  0xfa   : > { %2117 = vmatprep.mubr.bf16.mxu1 %v3840_v32  ;;  %v4099_v43 = vpack.c.bf16 %v832_v0, %v831_v30  ;;  %v979_v30 = vpack.c.bf16 %v949_v41, %v948_v19 }
 0x100   : > { %v2727_v55 = vpop.f32.mrf.mxu0  ;;  %2029 = vmatmul.mubr.bf16.gmra.mxu0 %v4087_v37 }
 0x101   : > { %v2793_v53 = vpop.f32.mrf.mxu1  ;;  %2118 = vmatmul.mubr.bf16.gmra.mxu1 %v3857_v42  ;;  %2036 = vmatprep.mubr.bf16.mxu0 %v4064_v56 }
 0x102   : > { %v2728_v36 = vpop.f32.mrf.mxu0  ;;  %2125 = vmatprep.mubr.bf16.mxu1 %v3865_v49 }
 0x103   : > { %v4093_v47 = vadd.f32 %v2728_v36, %v2727_v55  ;;  %v2794_v32 = vpop.f32.mrf.mxu1 }
 0x104   : > { %v4095_v59 = vadd.f32 %v2794_v32, %v2793_v53  ;;  %v2730_v13 = vpop.f32.mrf.mxu0 }
 0x105   : > { %v2796_v62 = vpop.f32.mrf.mxu1 }
 0x106   : > { %v2731_v42 = vpop.f32.mrf.mxu0 }
 0x107   : > { %v4101_v48 = vadd.f32 %v2731_v42, %v2730_v13  ;;  %v2797_v40 = vpop.f32.mrf.mxu1 }
 0x108   : > { %v4103_v16 = vadd.f32 %v2797_v40, %v2796_v62  ;;  %v2733_v49 = vpop.f32.mrf.mxu0  ;;  %2037 = vmatmul.mubr.bf16.gmra.mxu0 %v4097_v51 }
 0x109   : > { %v2799_v61 = vpop.f32.mrf.mxu1  ;;  %2126 = vmatmul.mubr.bf16.gmra.mxu1 %v3895_v10  ;;  %2044 = vmatprep.mubr.bf16.mxu0 %v4099_v43 }
 0x10a   : > { %v2734_v3 = vpop.f32.mrf.mxu0  ;;  %2133 = vmatprep.mubr.bf16.mxu1 %v3903_v33 }
 0x10b   : > { %v4109_v15 = vadd.f32 %v2734_v3, %v2733_v49  ;;  %v2800_v1 = vpop.f32.mrf.mxu1 }
 0x10c   : > { %v4111_v58 = vadd.f32 %v2800_v1, %v2799_v61  ;;  %v2736_v7 = vpop.f32.mrf.mxu0 }
 0x10d   : > { %v2802_v20 = vpop.f32.mrf.mxu1 }
 0x10e   : > { %v2737_v17 = vpop.f32.mrf.mxu0 }
 0x10f   : > { %v4113_v11 = vadd.f32 %v2737_v17, %v2736_v7  ;;  %v2803_v57 = vpop.f32.mrf.mxu1 }
 0x110   : > { %v4115_v10 = vadd.f32 %v2803_v57, %v2802_v20  ;;  %v2739_v8 = vpop.f32.mrf.mxu0  ;;  %2045 = vmatmul.mubr.bf16.gmra.mxu0 %v3984_v50 }
 0x111   : > { %v2805_v33 = vpop.f32.mrf.mxu1  ;;  %2134 = vmatmul.mubr.bf16.gmra.mxu1 %v3925_v23  ;;  %3193 = vmatprep.mubr.bf16.mxu0 %v978_v46 }
 0x112   : > { %v2740_v55 = vpop.f32.mrf.mxu0  ;;  %2141 = vmatprep.mubr.bf16.mxu1 %v3933_v45 }
 0x113   : > { %v4120_v53 = vadd.f32 %v2740_v55, %v2739_v8  ;;  %v2806_v60 = vpop.f32.mrf.mxu1 }
 0x114   : > { %v4122_v34 = vadd.f32 %v2806_v60, %v2805_v33  ;;  %v2742_v36 = vpop.f32.mrf.mxu0 }
 0x115   : > { %v2808_v0 = vpop.f32.mrf.mxu1 }
 0x116   : > { %v2743_v32 = vpop.f32.mrf.mxu0 }
 0x117   : > { %v4124_v13 = vadd.f32 %v2743_v32, %v2742_v36  ;;  %v2809_v62 = vpop.f32.mrf.mxu1 }
 0x118   : > { %v4126_v42 = vadd.f32 %v2809_v62, %v2808_v0  ;;  %v2745_v23 = vpop.f32.mrf.mxu0  ;;  %3194 = vmatmul.mubr.bf16.vlgmr.msra.gmra.mxu0 %v979_v30 }
 0x119   : > { %v2811_v40 = vpop.f32.mrf.mxu1  ;;  %2142 = vmatmul.mubr.bf16.gmra.mxu1 %v3948_v21  ;;  %3197 = vmatprep.mubr.bf16.mxu0 %v3950_v27 }
 0x11a   : > { %v2746_v45 = vpop.f32.mrf.mxu0  ;;  %2149 = vmatprep.mubr.bf16.mxu1 %v3956_v28 }
 0x11b   : > { %v4131_v49 = vadd.f32 %v2746_v45, %v2745_v23  ;;  %v2812_v61 = vpop.f32.mrf.mxu1 }
 0x11c   : > { %v4133_v3 = vadd.f32 %v2812_v61, %v2811_v40  ;;  %v2748_v12 = vpop.f32.mrf.mxu0 }
 0x11d   : > { %v2814_v18 = vpop.f32.mrf.mxu1 }
 0x11e   : > { %v2749_v1 = vpop.f32.mrf.mxu0 }
 0x11f   : > { %v4135_v7 = vadd.f32 %v2749_v1, %v2748_v12  ;;  %v2815_v20 = vpop.f32.mrf.mxu1 }
 0x120   : > { %v4137_v46 = vadd.f32 %v2815_v20, %v2814_v18  ;;  %v2751_v17 = vpop.f32.mrf.mxu0  ;;  %3198 = vmatmul.mubr.bf16.gmra.mxu0 %v3964_v26  ;;  %v873_v18 = vld [vmem:[#allocation2 + $0x1af] sm:$0xff] }
 0x121   : > { %v2833_v21 = vpop.f32.mrf.mxu1  ;;  %2150 = vmatmul.mubr.bf16.gmra.mxu1 %v3962_v63  ;;  %3201 = vmatprep.mubr.bf16.mxu0 %v3978_v38 }
 0x122   : > { %v2752_v27 = vpop.f32.mrf.mxu0  ;;  %2157 = vmatprep.mubr.bf16.mxu1 %v3970_v29 }
 0x123   : > { %v4143_v28 = vadd.f32 %v2752_v27, %v2751_v17  ;;  %v2834_v57 = vpop.f32.mrf.mxu1 }
 0x124   : > { %v2835_v8 = vadd.f32 %v2834_v57, %v2833_v21  ;;  %v2754_v33 = vpop.f32.mrf.mxu0 }
 0x125   : > { %v2836_v19 = vpop.f32.mrf.mxu1 }
 0x126   : > { %v4146_v41 = vadd.f32 %v2835_v8, %v4071_v9  ;;  %v2755_v55 = vpop.f32.mrf.mxu0 }
 0x127   : > { %v4148_v60 = vadd.f32 %v2755_v55, %v2754_v33  ;;  %v2837_v26 = vpop.f32.mrf.mxu1 }
 0x128   : > { %v2838_v36 = vadd.f32 %v2837_v26, %v2836_v19  ;;  %v2757_v63 = vpop.f32.mrf.mxu0  ;;  %3202 = vmatmul.mubr.bf16.gmra.mxu0 %v3990_v14  ;;  %v875_v26 = vld [vmem:[#allocation2 + $0x1cf] sm:$0xff] }
 0x129   : > { %v2839_v38 = vpop.f32.mrf.mxu1  ;;  %2158 = vmatmul.mubr.bf16.gmra.mxu1 %v3976_v35  ;;  %3205 = vmatprep.mubr.bf16.mxu0 %v4003_v4 }
 0x12a   : > { %v4154_v29 = vadd.f32 %v2838_v36, %v4074_v5  ;;  %v2758_v30 = vpop.f32.mrf.mxu0  ;;  %2165 = vmatprep.mubr.bf16.mxu1 %v4077_v22 }
 0x12b   : > { %v4157_v9 = vadd.f32 %v2758_v30, %v2757_v63  ;;  %v2840_v0 = vpop.f32.mrf.mxu1 }
 0x12c   : > { %v2841_v32 = vadd.f32 %v2840_v0, %v2839_v38  ;;  %v2760_v62 = vpop.f32.mrf.mxu0 }
 0x12d   : > { %v2842_v23 = vpop.f32.mrf.mxu1 }
 0x12e   : > { %v4160_v40 = vadd.f32 %v2841_v32, %v4093_v47  ;;  %v2761_v14 = vpop.f32.mrf.mxu0  ;;  %v872_v47 = vld [vmem:[#allocation2 + $0x1a7] sm:$0xff] }
 0x12f   : > { %v4162_v45 = vadd.f32 %v2761_v14, %v2760_v62  ;;  %v2843_v35 = vpop.f32.mrf.mxu1 }
 0x130   : > { %v2844_v4 = vadd.f32 %v2843_v35, %v2842_v23  ;;  %v2763_v61 = vpop.f32.mrf.mxu0  ;;  %3206 = vmatmul.mubr.bf16.gmra.mxu0 %v4015_v44  ;;  %v893_v44 = vpack.c.bf16 %v873_v18, %v872_v47 }
 0x131   : > { %v2845_v5 = vpop.f32.mrf.mxu1  ;;  %2166 = vmatmul.mubr.bf16.gmra.mxu1 %v4029_v6  ;;  %3209 = vmatprep.mubr.bf16.mxu0 %v4027_v2 }
 0x132   : > { %v4168_v22 = vadd.f32 %v2844_v4, %v4101_v48  ;;  %v2764_v12 = vpop.f32.mrf.mxu0  ;;  %2173 = vmatprep.mubr.bf16.mxu1 %v4081_v54 }
 0x133   : > { %v4171_v1 = vadd.f32 %v2764_v12, %v2763_v61  ;;  %v2846_v20 = vpop.f32.mrf.mxu1  ;;  %v877_v61 = vld [vmem:[#allocation2 + $0x1ef] sm:$0xff] }
 0x134   : > { %v2847_v17 = vadd.f32 %v2846_v20, %v2845_v5  ;;  %v2766_v21 = vpop.f32.mrf.mxu0 }
 0x135   : > { %v2848_v27 = vpop.f32.mrf.mxu1 }
 0x136   : > { %v4174_v57 = vadd.f32 %v2847_v17, %v4109_v15  ;;  %v2767_v6 = vpop.f32.mrf.mxu0  ;;  %v874_v15 = vld [vmem:[#allocation2 + $0x1c7] sm:$0xff] }
 0x137   : > { %v4176_v2 = vadd.f32 %v2767_v6, %v2766_v21  ;;  %v2849_v48 = vpop.f32.mrf.mxu1  ;;  %v894_v32 = vpack.c.bf16 %v875_v26, %v874_v15  ;;  %v976_v6 = vld [vmem:[#allocation2 + $0x229] sm:$0xff] }
 0x138   : > { %v2850_v8 = vadd.f32 %v2849_v48, %v2848_v27  ;;  %v2769_v33 = vpop.f32.mrf.mxu0  ;;  %3210 = vmatmul.mubr.bf16.gmra.mxu0 %v4038_v25  ;;  %v977_v48 = vld [vmem:[#allocation2 + $0x231] sm:$0xff] }
 0x139   : > { %v2851_v54 = vpop.f32.mrf.mxu1  ;;  %2174 = vmatmul.mubr.bf16.gmra.mxu1 %v893_v44  ;;  %3213 = vmatprep.mubr.bf16.mxu0 %v4044_v31  ;;  %v993_v26 = vpack.c.bf16 %v977_v48, %v976_v6 }
 0x13a   : > { %v4181_v19 = vadd.f32 %v2850_v8, %v4113_v11  ;;  %v2770_v55 = vpop.f32.mrf.mxu0  ;;  %2181 = vmatprep.mubr.bf16.mxu1 %v4087_v37 }
 0x13b   : > { %v4184_v36 = vadd.f32 %v2770_v55, %v2769_v33  ;;  %v2852_v63 = vpop.f32.mrf.mxu1 }
 0x13c   : > { %v2853_v38 = vadd.f32 %v2852_v63, %v2851_v54  ;;  %v2772_v30 = vpop.f32.mrf.mxu0 }
 0x13d   : > { %v2854_v0 = vpop.f32.mrf.mxu1 }
 0x13e   : > { %v4187_v25 = vadd.f32 %v2853_v38, %v4120_v53  ;;  %v2773_v62 = vpop.f32.mrf.mxu0  ;;  %v876_v53 = vld [vmem:[#allocation2 + $0x1e7] sm:$0xff] }
 0x13f   : > { %v4189_v31 = vadd.f32 %v2773_v62, %v2772_v30  ;;  %v2855_v11 = vpop.f32.mrf.mxu1  ;;  %v895_v17 = vpack.c.bf16 %v877_v61, %v876_v53 }
 0x140   : > { %v2856_v23 = vadd.f32 %v2855_v11, %v2854_v0  ;;  %v2775_v14 = vpop.f32.mrf.mxu0  ;;  %3214 = vmatmul.mubr.bf16.gmra.mxu0 %v4050_v39 }
 0x141   : > { %v2857_v37 = vpop.f32.mrf.mxu1  ;;  %2182 = vmatmul.mubr.bf16.gmra.mxu1 %v894_v32  ;;  %3217 = vmatprep.mubr.bf16.mxu0 %v4056_v24 }
 0x142   : > { %v4194_v35 = vadd.f32 %v2856_v23, %v4124_v13  ;;  %v2776_v4 = vpop.f32.mrf.mxu0  ;;  %2189 = vmatprep.mubr.bf16.mxu1 %v4097_v51 }
 0x143   : > { %v4197_v5 = vadd.f32 %v2776_v4, %v2775_v14  ;;  %v2858_v12 = vpop.f32.mrf.mxu1  ;;  %v880_v14 = vld [vmem:[#allocation2 + $0x227] sm:$0xff] }
 0x144   : > { %v2859_v47 = vadd.f32 %v2858_v12, %v2857_v37  ;;  %v2778_v18 = vpop.f32.mrf.mxu0 }
 0x145   : > { %v2860_v20 = vpop.f32.mrf.mxu1 }
 0x146   : > { %v4200_v39 = vadd.f32 %v2859_v47, %v4131_v49  ;;  %v2779_v21 = vpop.f32.mrf.mxu0 }
 0x147   : > { %v4202_v24 = vadd.f32 %v2779_v21, %v2778_v18  ;;  %v2861_v13 = vpop.f32.mrf.mxu1 }
 0x148   : > { %v2862_v27 = vadd.f32 %v2861_v13, %v2860_v20  ;;  %v2781_v44 = vpop.f32.mrf.mxu0  ;;  %3218 = vmatmul.mubr.bf16.gmra.mxu0 %v4064_v56 }
 0x149   : > { %v2863_v51 = vpop.f32.mrf.mxu1  ;;  %2190 = vmatmul.mubr.bf16.gmra.mxu1 %v895_v17  ;;  %3221 = vmatprep.mubr.bf16.mxu0 %v4099_v43  ;;  %v3324_v43 = vld [vmem:[#allocation2 + $0x8] sm:$0xff] }
 0x14a   : > { %v4207_v8 = vadd.f32 %v2862_v27, %v4135_v7  ;;  %v2782_v33 = vpop.f32.mrf.mxu0  ;;  %2197 = vmatprep.mubr.bf16.mxu1 %v3984_v50  ;;  %v945_v30 = vpack.c.bf16 %v3324_v43, %v3324_v43 }
 0x14b   : > { %v4210_v49 = vadd.f32 %v2782_v33, %v2781_v44  ;;  %v2864_v54 = vpop.f32.mrf.mxu1 }
 0x14c   : > { %v2865_v55 = vadd.f32 %v2864_v54, %v2863_v51  ;;  %v2784_v15 = vpop.f32.mrf.mxu0 }
 0x14d   : > { %v2866_v63 = vpop.f32.mrf.mxu1 }
 0x14e   : > { %v4213_v56 = vadd.f32 %v2865_v55, %v4143_v28  ;;  %v2785_v38 = vpop.f32.mrf.mxu0  ;;  %v881_v28 = vld [vmem:[#allocation2 + $0x22f] sm:$0xff] }
 0x14f   : > { %v4215_v0 = vadd.f32 %v2785_v38, %v2784_v15  ;;  %v2867_v7 = vpop.f32.mrf.mxu1  ;;  %v897_v47 = vpack.c.bf16 %v881_v28, %v880_v14 }
 0x150   : > { %v2868_v32 = vadd.f32 %v2867_v7, %v2866_v63  ;;  %v2787_v62 = vpop.f32.mrf.mxu0  ;;  %3222 = vmatmul.mubr.bf16.gmra.mxu0 %v993_v26 }
 0x151   : > { %v2869_v50 = vpop.f32.mrf.mxu1  ;;  %2198 = vmatmul.mubr.bf16.gmra.mxu1 %v4058_v52 }
 0x152   : > { %v4219_v11 = vadd.f32 %v2868_v32, %v4148_v60  ;;  %v2788_v23 = vpop.f32.mrf.mxu0  ;;  %2205 = vmatprep.mubr.bf16.mxu1 %v945_v30 }
 0x153   : > { %v4221_v37 = vadd.f32 %v2788_v23, %v2787_v62  ;;  %v2870_v4 = vpop.f32.mrf.mxu1 }
 0x154   : > { %v2871_v53 = vadd.f32 %v2870_v4, %v2869_v50  ;;  %v2790_v61 = vpop.f32.mrf.mxu0 }
 0x155   : > { %v2872_v12 = vpop.f32.mrf.mxu1 }
 0x156   : > { %v4224_v18 = vadd.f32 %v2871_v53, %v4157_v9  ;;  %v2791_v20 = vpop.f32.mrf.mxu0 }
 0x157   : > { %v4226_v17 = vadd.f32 %v2791_v20, %v2790_v61  ;;  %v2873_v52 = vpop.f32.mrf.mxu1 }
 0x158   : > { %v2874_v60 = vadd.f32 %v2873_v52, %v2872_v12  ;;  %v2945_v21 = vpop.f32.mrf.mxu0 }
 0x159   : > { %v2875_v13 = vpop.f32.mrf.mxu1  ;;  %2206 = vmatmul.mubr.bf16.gmra.mxu1 %v897_v47 }
 0x15a   : > { %v4229_v27 = vadd.f32 %v2874_v60, %v4162_v45  ;;  %v2946_v44 = vpop.f32.mrf.mxu0 }
 0x15b   : > { %v2876_v51 = vpop.f32.mrf.mxu1  ;;  %v2947_v6 = vadd.f32 %v2946_v44, %v2945_v21 }
 0x15c   : > { %v2877_v48 = vadd.f32 %v2876_v51, %v2875_v13  ;;  %v2948_v33 = vpop.f32.mrf.mxu0 }
 0x15d   : > { %v4232_v54 = vadd.f32 %v2947_v6, %v4146_v41  ;;  %v2878_v9 = vpop.f32.mrf.mxu1 }
 0x15e   : > { %v4235_v55 = vadd.f32 %v2877_v48, %v4171_v1  ;;  %v2949_v15 = vpop.f32.mrf.mxu0 }
 0x15f   : > { %v2879_v26 = vpop.f32.mrf.mxu1  ;;  %v2950_v63 = vadd.f32 %v2949_v15, %v2948_v33 }
 0x160   : > { %v2880_v38 = vadd.f32 %v2879_v26, %v2878_v9  ;;  %v2951_v43 = vpop.f32.mrf.mxu0 }
 0x161   : > { %v4238_v45 = vadd.f32 %v2950_v63, %v4154_v29  ;;  %v2881_v30 = vpop.f32.mrf.mxu1 }
 0x162   : > { %v4241_v7 = vadd.f32 %v2880_v38, %v4176_v2  ;;  %v2952_v32 = vpop.f32.mrf.mxu0 }
 0x163   : > { %v2882_v62 = vpop.f32.mrf.mxu1  ;;  %v2953_v41 = vadd.f32 %v2952_v32, %v2951_v43 }
 0x164   : > { %v2883_v50 = vadd.f32 %v2882_v62, %v2881_v30  ;;  %v2954_v23 = vpop.f32.mrf.mxu0 }
 0x165   : > { %v4244_v1 = vadd.f32 %v2953_v41, %v4160_v40  ;;  %v2884_v14 = vpop.f32.mrf.mxu1 }
 0x166   : > { %v4247_v28 = vadd.f32 %v2883_v50, %v4184_v36  ;;  %v2955_v4 = vpop.f32.mrf.mxu0 }
 0x167   : > { %v2885_v53 = vpop.f32.mrf.mxu1  ;;  %v2956_v29 = vadd.f32 %v2955_v4, %v2954_v23 }
 0x168   : > { %v2886_v61 = vadd.f32 %v2885_v53, %v2884_v14  ;;  %v2957_v12 = vpop.f32.mrf.mxu0 }
 0x169   : > { %v4250_v2 = vadd.f32 %v2956_v29, %v4168_v22  ;;  %v2887_v47 = vpop.f32.mrf.mxu1 }
 0x16a   : > { %v4253_v20 = vadd.f32 %v2886_v61, %v4189_v31  ;;  %v2958_v52 = vpop.f32.mrf.mxu0 }
 0x16b   : > { %v2888_v60 = vpop.f32.mrf.mxu1  ;;  %v2959_v40 = vadd.f32 %v2958_v52, %v2957_v12 }
 0x16c   : > { %v2889_v21 = vadd.f32 %v2888_v60, %v2887_v47  ;;  %v2960_v13 = vpop.f32.mrf.mxu0 }
 0x16d   : > { %v4256_v36 = vadd.f32 %v2959_v40, %v4174_v57  ;;  %v2890_v44 = vpop.f32.mrf.mxu1 }
 0x16e   : > { %v4259_v51 = vadd.f32 %v2889_v21, %v4197_v5  ;;  %v2961_v6 = vpop.f32.mrf.mxu0 }
 0x16f   : > { %v2891_v48 = vpop.f32.mrf.mxu1  ;;  %v2962_v22 = vadd.f32 %v2961_v6, %v2960_v13 }
 0x170   : > { %v2892_v33 = vadd.f32 %v2891_v48, %v2890_v44  ;;  %v2963_v9 = vpop.f32.mrf.mxu0 }
 0x171   : > { %v4262_v31 = vadd.f32 %v2962_v22, %v4181_v19  ;;  %v2893_v15 = vpop.f32.mrf.mxu1 }
 0x172   : > { %v4265_v26 = vadd.f32 %v2892_v33, %v4202_v24  ;;  %v2964_v63 = vpop.f32.mrf.mxu0 }
 0x173   : > { %v2894_v38 = vpop.f32.mrf.mxu1  ;;  %v2965_v57 = vadd.f32 %v2964_v63, %v2963_v9 }
 0x174   : > { %v2895_v43 = vadd.f32 %v2894_v38, %v2893_v15  ;;  %v2966_v30 = vpop.f32.mrf.mxu0 }
 0x175   : > { %v4268_v5 = vadd.f32 %v2965_v57, %v4187_v25  ;;  %v2896_v32 = vpop.f32.mrf.mxu1 }
 0x176   : > { %v4271_v62 = vadd.f32 %v2895_v43, %v4210_v49  ;;  %v2967_v41 = vpop.f32.mrf.mxu0 }
 0x177   : > { %v2897_v50 = vpop.f32.mrf.mxu1  ;;  %v2968_v19 = vadd.f32 %v2967_v41, %v2966_v30 }
 0x178   : > { %v2898_v23 = vadd.f32 %v2897_v50, %v2896_v32  ;;  %v2969_v14 = vpop.f32.mrf.mxu0 }
 0x179   : > { %v4274_v24 = vadd.f32 %v2968_v19, %v4194_v35  ;;  %v2899_v4 = vpop.f32.mrf.mxu1 }
 0x17a   : > { %v4277_v53 = vadd.f32 %v2898_v23, %v4215_v0  ;;  %v2970_v29 = vpop.f32.mrf.mxu0 }
 0x17b   : > { %v2900_v61 = vpop.f32.mrf.mxu1  ;;  %v2971_v25 = vadd.f32 %v2970_v29, %v2969_v14 }
 0x17c   : > { %v2901_v12 = vadd.f32 %v2900_v61, %v2899_v4  ;;  %v2972_v47 = vpop.f32.mrf.mxu0 }
 0x17d   : > { %v4280_v49 = vadd.f32 %v2971_v25, %v4200_v39  ;;  %v2902_v52 = vpop.f32.mrf.mxu1 }
 0x17e   : > { %v4283_v60 = vadd.f32 %v2901_v12, %v4221_v37  ;;  %v2973_v40 = vpop.f32.mrf.mxu0 }
 0x17f   : > { %v2903_v21 = vpop.f32.mrf.mxu1  ;;  %v2974_v35 = vadd.f32 %v2973_v40, %v2972_v47 }
 0x180   : > { %v2904_v13 = vadd.f32 %v2903_v21, %v2902_v52  ;;  %v2975_v44 = vpop.f32.mrf.mxu0 }
 0x181   : > { %v4286_v0 = vadd.f32 %v2974_v35, %v4207_v8  ;;  %v2905_v6 = vpop.f32.mrf.mxu1 }
 0x182   : > { %v4289_v48 = vadd.f32 %v2904_v13, %v4226_v17  ;;  %v2976_v22 = vpop.f32.mrf.mxu0 }
 0x183   : > { %v2906_v33 = vpop.f32.mrf.mxu1  ;;  %v2977_v39 = vadd.f32 %v2976_v22, %v2975_v44 }
 0x184   : > { %v2907_v9 = vadd.f32 %v2906_v33, %v2905_v6  ;;  %v2978_v15 = vpop.f32.mrf.mxu0 }
 0x185   : > { %v4292_v37 = vadd.f32 %v2977_v39, %v4213_v56  ;;  %v2908_v63 = vpop.f32.mrf.mxu1 }
 0x186   : > { %v4295_v38 = vadd.f32 %v2907_v9, %v4095_v59  ;;  %v2979_v57 = vpop.f32.mrf.mxu0 }
 0x187   : > { %v2909_v43 = vpop.f32.mrf.mxu1  ;;  %v2980_v8 = vadd.f32 %v2979_v57, %v2978_v15 }
 0x188   : > { %v2910_v30 = vadd.f32 %v2909_v43, %v2908_v63  ;;  %v2981_v32 = vpop.f32.mrf.mxu0 }
 0x189   : > { %v4298_v17 = vadd.f32 %v2980_v8, %v4219_v11  ;;  %v2911_v41 = vpop.f32.mrf.mxu1 }
 0x18a   : > { %v4301_v50 = vadd.f32 %v2910_v30, %v4103_v16  ;;  %v2982_v19 = vpop.f32.mrf.mxu0 }
 0x18b   : > { %v2912_v23 = vpop.f32.mrf.mxu1  ;;  %v2983_v56 = vadd.f32 %v2982_v19, %v2981_v32 }
 0x18c   : > { %v2913_v14 = vadd.f32 %v2912_v23, %v2911_v41  ;;  %v2984_v4 = vpop.f32.mrf.mxu0 }
 0x18d   : > { %v4304_v59 = vadd.f32 %v2983_v56, %v4224_v18  ;;  %v2914_v29 = vpop.f32.mrf.mxu1 }
 0x18e   : > { %v4307_v61 = vadd.f32 %v2913_v14, %v4111_v58  ;;  %v2985_v25 = vpop.f32.mrf.mxu0 }
 0x18f   : > { %v2915_v12 = vpop.f32.mrf.mxu1  ;;  %v2986_v11 = vadd.f32 %v2985_v25, %v2984_v4 }
 0x190   : > { %v2916_v47 = vadd.f32 %v2915_v12, %v2914_v29  ;;  %v2987_v52 = vpop.f32.mrf.mxu0 }
 0x191   : > { %v4310_v16 = vadd.f32 %v2986_v11, %v4229_v27  ;;  %v2917_v40 = vpop.f32.mrf.mxu1 }
 0x192   : > { %v4313_v21 = vadd.f32 %v2916_v47, %v4115_v10  ;;  %v2988_v35 = vpop.f32.mrf.mxu0 }
 0x193   : > { %v2918_v13 = vpop.f32.mrf.mxu1  ;;  %v2989_v18 = vadd.f32 %v2988_v35, %v2987_v52 }
 0x194   : > { %v2919_v44 = vadd.f32 %v2918_v13, %v2917_v40  ;;  %v2990_v6 = vpop.f32.mrf.mxu0 }
 0x195   : > { %v4316_v58 = vadd.f32 %v2989_v18, %v4235_v55  ;;  %v2920_v22 = vpop.f32.mrf.mxu1 }
 0x196   : > { %v4319_v33 = vadd.f32 %v2919_v44, %v4122_v34  ;;  %v2991_v39 = vpop.f32.mrf.mxu0 }
 0x197   : > { %v2921_v9 = vpop.f32.mrf.mxu1  ;;  %v2992_v27 = vadd.f32 %v2991_v39, %v2990_v6 }
 0x198   : > { %v2922_v15 = vadd.f32 %v2921_v9, %v2920_v22  ;;  %v2993_v63 = vpop.f32.mrf.mxu0 }
 0x199   : > { %v4322_v10 = vadd.f32 %v2992_v27, %v4241_v7  ;;  %v2923_v57 = vpop.f32.mrf.mxu1 }
 0x19a   : > { %v4325_v43 = vadd.f32 %v2922_v15, %v4126_v42  ;;  %v2994_v8 = vpop.f32.mrf.mxu0 }
 0x19b   : > { %v2924_v30 = vpop.f32.mrf.mxu1  ;;  %v2995_v55 = vadd.f32 %v2994_v8, %v2993_v63 }
 0x19c   : > { %v2925_v32 = vadd.f32 %v2924_v30, %v2923_v57  ;;  %v2996_v41 = vpop.f32.mrf.mxu0 }
 0x19d   : > { %v4328_v34 = vadd.f32 %v2995_v55, %v4247_v28  ;;  %v2926_v19 = vpop.f32.mrf.mxu1 }
 0x19e   : > { %v4331_v23 = vadd.f32 %v2925_v32, %v4133_v3  ;;  %v2997_v56 = vpop.f32.mrf.mxu0 }
 0x19f   : > { %v2927_v14 = vpop.f32.mrf.mxu1  ;;  %v2998_v7 = vadd.f32 %v2997_v56, %v2996_v41 }
 0x1a0   : > { %v2928_v4 = vadd.f32 %v2927_v14, %v2926_v19  ;;  %v2999_v29 = vpop.f32.mrf.mxu0 }
 0x1a1   : > { %v4334_v42 = vadd.f32 %v2998_v7, %v4253_v20  ;;  %v4336_v25 = vpop.f32.mrf.mxu1 }
 0x1a2   : > { %v4339_v12 = vadd.f32 %v2928_v4, %v4137_v46  ;;  %v3000_v11 = vpop.f32.mrf.mxu0 }
 0x1a3   : > { %v3001_v28 = vadd.f32 %v3000_v11, %v2999_v29  ;;  %v4341_v47 = vpop.f32.mrf.mxu1 }
 0x1a4   : > { %v3002_v52 = vpop.f32.mrf.mxu0 }
 0x1a5   : > { %v4344_v3 = vadd.f32 %v3001_v28, %v4259_v51  ;;  %v4346_v40 = vpop.f32.mrf.mxu1 }
 0x1a6   : > { %v3003_v35 = vpop.f32.mrf.mxu0 }
 0x1a7   : > { %v3004_v13 = vadd.f32 %v3003_v35, %v3002_v52  ;;  %v4348_v18 = vpop.f32.mrf.mxu1 }
 0x1a8   : > { %v3005_v20 = vpop.f32.mrf.mxu0 }
 0x1a9   : > { %v4351_v44 = vadd.f32 %v3004_v13, %v4265_v26  ;;  %v3063_v46 = vpop.f32.mrf.mxu1 }
 0x1aa   : > { %v3006_v6 = vpop.f32.mrf.mxu0 }
 0x1ab   : > { %v3007_v22 = vadd.f32 %v3006_v6, %v3005_v20  ;;  %v3064_v39 = vpop.f32.mrf.mxu1 }
 0x1ac   : > { %v3008_v9 = vpop.f32.mrf.mxu0 }
 0x1ad   : > { %v4354_v27 = vadd.f32 %v3007_v22, %v4271_v62  ;;  %v4356_v51 = vpop.f32.mrf.mxu1 }
 0x1ae   : > { %v3009_v15 = vpop.f32.mrf.mxu0 }
 0x1af   : > { %v3010_v63 = vadd.f32 %v3009_v15, %v3008_v9  ;;  %v3067_v57 = vpop.f32.mrf.mxu1 }
 0x1b0   : > { %v3011_v8 = vpop.f32.mrf.mxu0 }
 0x1b1   : > { %v4359_v30 = vadd.f32 %v3010_v63, %v4277_v53  ;;  %v4361_v55 = vpop.f32.mrf.mxu1 }
 0x1b2   : > { %v3012_v26 = vpop.f32.mrf.mxu0 }
 0x1b3   : > { %v3013_v32 = vadd.f32 %v3012_v26, %v3011_v8  ;;  %v4363_v41 = vpop.f32.mrf.mxu1 }
 0x1b4   : > { %v3014_v19 = vpop.f32.mrf.mxu0 }
 0x1b5   : > { %v4366_v56 = vadd.f32 %v3013_v32, %v4283_v60  ;;  %v4368_v62 = vpop.f32.mrf.mxu1 }
 0x1b6   : > { %v3015_v14 = vpop.f32.mrf.mxu0 }
 0x1b7   : > { %v3016_v7 = vadd.f32 %v3015_v14, %v3014_v19  ;;  %v4370_v4 = vpop.f32.mrf.mxu1 }
 0x1b8   : > { %v3017_v29 = vpop.f32.mrf.mxu0 }
 0x1b9   : > { %v4373_v53 = vadd.f32 %v3016_v7, %v4289_v48  ;;  %v3075_v11 = vpop.f32.mrf.mxu1 }
 0x1ba   : > { %v3018_v28 = vpop.f32.mrf.mxu0 }
 0x1bb   : > { %v3019_v52 = vadd.f32 %v3018_v28, %v3017_v29  ;;  %v3076_v35 = vpop.f32.mrf.mxu1 }
 0x1bc   : > { %v3020_v13 = vpop.f32.mrf.mxu0 }
 0x1bd   : > { %v4376_v20 = vadd.f32 %v3019_v52, %v4295_v38  ;;  %v4378_v60 = vpop.f32.mrf.mxu1 }
 0x1be   : > { %v3021_v6 = vpop.f32.mrf.mxu0 }
 0x1bf   : > { %4553 = vst [vmem:[#allocation3_spill] sm:$0xff] %v4376_v20  ;;  %v3022_v22 = vadd.f32 %v3021_v6, %v3020_v13  ;;  %v3079_v9 = vpop.f32.mrf.mxu1 }
 0x1c0   : > { %v3023_v15 = vpop.f32.mrf.mxu0 }
 0x1c1   : > { %v4381_v63 = vadd.f32 %v3022_v22, %v4301_v50  ;;  %v4383_v8 = vpop.f32.mrf.mxu1 }
 0x1c2   : > { %v3024_v48 = vpop.f32.mrf.mxu0 }
 0x1c3   : > { %4554 = vst [vmem:[#allocation4_spill] sm:$0xff] %v4381_v63  ;;  %v3025_v26 = vadd.f32 %v3024_v48, %v3023_v15  ;;  %v4385_v32 = vpop.f32.mrf.mxu1 }
 0x1c4   : > { %v3026_v19 = vpop.f32.mrf.mxu0 }
 0x1c5   : > { %v4388_v14 = vadd.f32 %v3025_v26, %v4307_v61  ;;  %v4390_v38 = vpop.f32.mrf.mxu1 }
 0x1c6   : > { %v3027_v7 = vpop.f32.mrf.mxu0 }
 0x1c7   : > { %4555 = vst [vmem:[#allocation5_spill] sm:$0xff] %v4388_v14  ;;  %v3028_v29 = vadd.f32 %v3027_v7, %v3026_v19  ;;  %v4392_v28 = vpop.f32.mrf.mxu1 }
 0x1c8   : > { %v3029_v52 = vpop.f32.mrf.mxu0 }
 0x1c9   : > { %v4395_v50 = vadd.f32 %v3028_v29, %v4313_v21  ;;  %v3087_v13 = vpop.f32.mrf.mxu1 }
 0x1ca   : > { %v3030_v6 = vpop.f32.mrf.mxu0 }
 0x1cb   : > { %4556 = vst [vmem:[#allocation6_spill] sm:$0xff] %v4395_v50  ;;  %v3031_v22 = vadd.f32 %v3030_v6, %v3029_v52  ;;  %v3088_v15 = vpop.f32.mrf.mxu1  ;;  %v3065_v52 = vadd.f32 %v3064_v39, %v3063_v46 }
 0x1cc   : > { %v3032_v48 = vpop.f32.mrf.mxu0 }
 0x1cd   : > { %v4398_v63 = vadd.f32 %v3031_v22, %v4319_v33  ;;  %v4400_v61 = vpop.f32.mrf.mxu1  ;;  %v3059_v22 = vadd.f32 %v4341_v47, %v4336_v25  ;;  %v2096_v46 = vadd.f32 %v3065_v52, %v4244_v1  ;;  %v3062_v25 = vadd.f32 %v4348_v18, %v4346_v40 }
 0x1ce   : > { %v3033_v26 = vpop.f32.mrf.mxu0 }
 0x1cf   : > { %4557 = vst [vmem:[#allocation7_spill] sm:$0xff] %v4398_v63  ;;  %v3034_v14 = vadd.f32 %v3033_v26, %v3032_v48  ;;  %v4402_v20 = vpop.f32.mrf.mxu1  ;;  %v2088_v1 = vadd.f32 %v3059_v22, %v4232_v54  ;;  %v3080_v54 = vadd.f32 %v3079_v9, %v4378_v60  ;;  %v3089_v9 = vadd.f32 %v3088_v15, %v3087_v13 }
 0x1d0   : > { %v3035_v19 = vpop.f32.mrf.mxu0 }
 0x1d1   : > { %v4405_v7 = vadd.f32 %v3034_v14, %v4325_v43  ;;  %v4407_v21 = vpop.f32.mrf.mxu1  ;;  %v3068_v43 = vadd.f32 %v3067_v57, %v4356_v51 }
 0x1d2   : > { %v3036_v29 = vpop.f32.mrf.mxu0 }
 0x1d3   : > { %4558 = vst [vmem:[#allocation8_spill] sm:$0xff] %v4405_v7  ;;  %v3037_v6 = vadd.f32 %v3036_v29, %v3035_v19  ;;  %v4409_v50 = vpop.f32.mrf.mxu1  ;;  %v2099_v52 = vadd.f32 %v3068_v43, %v4250_v2 }
 0x1d4   : > { %v3038_v33 = vpop.f32.mrf.mxu0 }
 0x1d5   : > { %v4414_v48 = vadd.f32 %v3037_v6, %v4331_v23  ;;  %v4416_v26 = vpop.f32.mrf.mxu1  ;;  %v3071_v6 = vadd.f32 %v4363_v41, %v4361_v55  ;;  %v3074_v55 = vadd.f32 %v4370_v4, %v4368_v62 }
 0x1d6   : > { %v3039_v63 = vpop.f32.mrf.mxu0 }
 0x1d7   : > { %v3040_v14 = vadd.f32 %v3039_v63, %v3038_v33  ;;  %v4419_v7 = vpop.f32.mrf.mxu1  ;;  %v3077_v63 = vadd.f32 %v3076_v35, %v3075_v11  ;;  %v2091_v33 = vadd.f32 %v3062_v25, %v4238_v45  ;;  %v2104_v43 = vadd.f32 %v3071_v6, %v4256_v36 }
 0x1d8   : > { %v3195_v23 = vpop.f32.mrf.mxu0  ;;  %v3083_v36 = vadd.f32 %v4385_v32, %v4383_v8 }
 0x1d9   : > { %v4432_v47 = vadd.f32 %v3040_v14, %v4339_v12  ;;  %v4434_v39 = vpop.f32.mrf.mxu1  ;;  %v2257_v51 = vadd.f32 %v3195_v23, %v2096_v46  ;;  %v2112_v2 = vadd.f32 %v3077_v63, %v4268_v5 }
 0x1da   : > { %v2248_v57 = vpop.f32.mrf.mxu0 }
 0x1db   : > { %2377 = vst [vmem:[%s4427_s18 + $0x10] sm:$0xff] %v2257_v51  ;;  %v3100_v19 = vpop.f32.mrf.mxu1  ;;  %v2249_v29 = vadd.f32 %v2248_v57, %v2088_v1  ;;  %v2115_v1 = vadd.f32 %v3080_v54, %v4274_v24  ;;  %v2447_v5 = vmul.f32 %v2257_v51, %v2257_v51  ;;  %v2128_v54 = vadd.f32 %v3089_v9, %v4292_v37 }
 0x1dc   : > { %v3196_v40 = vpop.f32.mrf.mxu0 }
 0x1dd   : > { %2375 = vst [vmem:[%s4427_s18] sm:$0xff] %v2249_v29  ;;  %v4442_v12 = vpop.f32.mrf.mxu1  ;;  %v2260_v18 = vadd.f32 %v3196_v40, %v2099_v52  ;;  %v2445_v14 = vmul.f32 %v2249_v29, %v2249_v29  ;;  %v2107_v52 = vadd.f32 %v3074_v55, %v4262_v31  ;;  %v2120_v55 = vadd.f32 %v3083_v36, %v4280_v49 }
 0x1de   : > { %v2251_v22 = vpop.f32.mrf.mxu0  ;;  %v3095_v49 = vadd.f32 %v4409_v50, %v4407_v21 }
 0x1df   : > { %2378 = vst [vmem:[%s4427_s18 + $0x18] sm:$0xff] %v2260_v18  ;;  %v4447_v11 = vpop.f32.mrf.mxu1  ;;  %v2252_v35 = vadd.f32 %v2251_v22, %v2091_v33  ;;  %v2448_v6 = vmul.f32 %v2260_v18, %v2260_v18 }
 0x1e0   : > { %v3199_v41 = vpop.f32.mrf.mxu0 }
 0x1e1   : > { %2376 = vst [vmem:[%s4427_s18 + $0x8] sm:$0xff] %v2252_v35  ;;  %v2407_v46 = vadd.f32 %v2252_v35, %v2249_v29  ;;  %v2446_v45 = vmul.f32 %v2252_v35, %v2252_v35  ;;  %v4454_v23 = vpop.f32.mrf.mxu1  ;;  %v2273_v60 = vadd.f32 %v3199_v41, %v2112_v2 }
 0x1e2   : > { %v2264_v25 = vpop.f32.mrf.mxu0 }
 0x1e3   : > { %v2408_v57 = vadd.f32 %v2407_v46, %v2257_v51  ;;  %v2477_v63 = vadd.f32 %v2446_v45, %v2445_v14  ;;  %2381 = vst [vmem:[%s4427_s18 + $0x30] sm:$0xff] %v2273_v60  ;;  %v4458_v62 = vpop.f32.mrf.mxu1  ;;  %v2265_v4 = vadd.f32 %v2264_v25, %v2104_v43  ;;  %v3092_v51 = vadd.f32 %v4402_v20, %v4400_v61 }
 0x1e4   : > { %v3200_v29 = vpop.f32.mrf.mxu0  ;;  %v3101_v14 = vadd.f32 %v3100_v19, %v4434_v39  ;;  %v2451_v9 = vmul.f32 %v2273_v60, %v2273_v60 }
 0x1e5   : > { %v2478_v40 = vadd.f32 %v2477_v63, %v2447_v5  ;;  %2379 = vst [vmem:[%s4427_s18 + $0x20] sm:$0xff] %v2265_v4  ;;  %v2409_v13 = vadd.f32 %v2408_v57, %v2260_v18  ;;  %v4464_v24 = vpop.f32.mrf.mxu1  ;;  %v2276_v15 = vadd.f32 %v3200_v29, %v2115_v1  ;;  %v2449_v35 = vmul.f32 %v2265_v4, %v2265_v4 }
 0x1e6   : > { %v2267_v33 = vpop.f32.mrf.mxu0  ;;  %v3086_v18 = vadd.f32 %v4392_v28, %v4390_v38  ;;  %v2131_v45 = vadd.f32 %v3092_v51, %v4298_v17  ;;  %v2144_v29 = vadd.f32 %v3101_v14, %v4316_v58 }
 0x1e7   : > { %v2410_v22 = vadd.f32 %v2409_v13, %v2265_v4  ;;  %v2479_v8 = vadd.f32 %v2478_v40, %v2448_v6  ;;  %2382 = vst [vmem:[%s4427_s18 + $0x38] sm:$0xff] %v2276_v15  ;;  %v4470_v32 = vpop.f32.mrf.mxu1  ;;  %v2268_v31 = vadd.f32 %v2267_v33, %v2107_v52  ;;  %v2452_v63 = vmul.f32 %v2276_v15, %v2276_v15 }
 0x1e8   : > { %v3203_v2 = vpop.f32.mrf.mxu0  ;;  %v2123_v57 = vadd.f32 %v3086_v18, %v4286_v0  ;;  %v3098_v0 = vadd.f32 %v4419_v7, %v4416_v26 }
 0x1e9   : > { %v2480_v41 = vadd.f32 %v2479_v8, %v2449_v35  ;;  %2380 = vst [vmem:[%s4427_s18 + $0x28] sm:$0xff] %v2268_v31  ;;  %v2411_v20 = vadd.f32 %v2410_v22, %v2268_v31  ;;  %v2450_v61 = vmul.f32 %v2268_v31, %v2268_v31  ;;  %v3111_v43 = vpop.f32.mrf.mxu1  ;;  %v2289_v37 = vadd.f32 %v3203_v2, %v2128_v54 }
 0x1ea   : > { %v2280_v46 = vpop.f32.mrf.mxu0 }
 0x1eb   : > { %v2412_v25 = vadd.f32 %v2411_v20, %v2273_v60  ;;  %v2481_v1 = vadd.f32 %v2480_v41, %v2450_v61  ;;  %2385 = vst [vmem:[%s4427_s18 + $0x50] sm:$0xff] %v2289_v37  ;;  %v3112_v38 = vpop.f32.mrf.mxu1  ;;  %v2281_v28 = vadd.f32 %v2280_v46, %v2120_v55  ;;  %v3104_v60 = vadd.f32 %v4447_v11, %v4442_v12 }
 0x1ec   : > { %v3204_v5 = vpop.f32.mrf.mxu0  ;;  %v3113_v54 = vadd.f32 %v3112_v38, %v3111_v43  ;;  %v2455_v8 = vmul.f32 %v2289_v37, %v2289_v37  ;;  %v2139_v55 = vadd.f32 %v3098_v0, %v4310_v16  ;;  %v3110_v16 = vadd.f32 %v4470_v32, %v4464_v24 }
 0x1ed   : > { %v2482_v4 = vadd.f32 %v2481_v1, %v2451_v9  ;;  %2383 = vst [vmem:[%s4427_s18 + $0x40] sm:$0xff] %v2281_v28  ;;  %v2413_v39 = vadd.f32 %v2412_v25, %v2276_v15  ;;  %v3114_v19 = vpop.f32.mrf.mxu1  ;;  %v2292_v17 = vadd.f32 %v3204_v5, %v2131_v45  ;;  %v2453_v6 = vmul.f32 %v2281_v28, %v2281_v28 }
 0x1ee   : > { %v2283_v36 = vpop.f32.mrf.mxu0  ;;  %v2136_v15 = vadd.f32 %v3095_v49, %v4304_v59  ;;  %v2147_v35 = vadd.f32 %v3104_v60, %v4322_v10  ;;  %v3107_v59 = vadd.f32 %v4458_v62, %v4454_v23  ;;  %v2160_v46 = vadd.f32 %v3113_v54, %v4344_v3 }
 0x1ef   : > { %v2414_v52 = vadd.f32 %v2413_v39, %v2281_v28  ;;  %v2483_v40 = vadd.f32 %v2482_v4, %v2452_v63  ;;  %2386 = vst [vmem:[%s4427_s18 + $0x58] sm:$0xff] %v2292_v17  ;;  %v3115_v50 = vpop.f32.mrf.mxu1  ;;  %v2284_v21 = vadd.f32 %v2283_v36, %v2123_v57  ;;  %v2456_v41 = vmul.f32 %v2292_v17, %v2292_v17 }
 0x1f0   : > { %v3207_v13 = vpop.f32.mrf.mxu0  ;;  %v3116_v14 = vadd.f32 %v3115_v50, %v3114_v19  ;;  %v2152_v38 = vadd.f32 %v3107_v59, %v4328_v34 }
 0x1f1   : > { %v2484_v51 = vadd.f32 %v2483_v40, %v2453_v6  ;;  %2384 = vst [vmem:[%s4427_s18 + $0x48] sm:$0xff] %v2284_v21  ;;  %v2415_v33 = vadd.f32 %v2414_v52, %v2284_v21  ;;  %v2454_v12 = vmul.f32 %v2284_v21, %v2284_v21  ;;  %v3117_v11 = vpop.f32.mrf.mxu1  ;;  %v2305_v58 = vadd.f32 %v3207_v13, %v2144_v29 }
 0x1f2   : > { %v2296_v22 = vpop.f32.mrf.mxu0  ;;  %v2163_v4 = vadd.f32 %v3116_v14, %v4351_v44  ;;  %v2155_v29 = vadd.f32 %v3110_v16, %v4334_v42 }
 0x1f3   : > { %v2416_v31 = vadd.f32 %v2415_v33, %v2289_v37  ;;  %v2485_v18 = vadd.f32 %v2484_v51, %v2454_v12  ;;  %2389 = vst [vmem:[%s4427_s18 + $0x70] sm:$0xff] %v2305_v58  ;;  %v3118_v2 = vpop.f32.mrf.mxu1  ;;  %v2297_v7 = vadd.f32 %v2296_v22, %v2136_v15  ;;  %v2459_v39 = vmul.f32 %v2305_v58, %v2305_v58 }
 0x1f4   : > { %v3208_v26 = vpop.f32.mrf.mxu0  ;;  %v3119_v32 = vadd.f32 %v3118_v2, %v3117_v11 }
 0x1f5   : > { %v2486_v20 = vadd.f32 %v2485_v18, %v2455_v8  ;;  %2387 = vst [vmem:[%s4427_s18 + $0x60] sm:$0xff] %v2297_v7  ;;  %v2417_v61 = vadd.f32 %v2416_v31, %v2292_v17  ;;  %v3120_v43 = vpop.f32.mrf.mxu1  ;;  %v2308_v10 = vadd.f32 %v3208_v26, %v2147_v35  ;;  %v2457_v9 = vmul.f32 %v2297_v7, %v2297_v7 }
 0x1f6   : > { %v2299_v37 = vpop.f32.mrf.mxu0  ;;  %v2168_v54 = vadd.f32 %v3119_v32, %v4354_v27 }
 0x1f7   : > { %v2418_v45 = vadd.f32 %v2417_v61, %v2297_v7  ;;  %v2487_v25 = vadd.f32 %v2486_v20, %v2456_v41  ;;  %2390 = vst [vmem:[%s4427_s18 + $0x78] sm:$0xff] %v2308_v10  ;;  %v3121_v1 = vpop.f32.mrf.mxu1  ;;  %v2300_v23 = vadd.f32 %v2299_v37, %v2139_v55  ;;  %v2460_v52 = vmul.f32 %v2308_v10, %v2308_v10 }
 0x1f8   : > { %v3211_v62 = vpop.f32.mrf.mxu0  ;;  %v3122_v11 = vadd.f32 %v3121_v1, %v3120_v43 }
 0x1f9   : > { %v2488_v28 = vadd.f32 %v2487_v25, %v2457_v9  ;;  %2388 = vst [vmem:[%s4427_s18 + $0x68] sm:$0xff] %v2300_v23  ;;  %v2419_v49 = vadd.f32 %v2418_v45, %v2300_v23  ;;  %v2458_v5 = vmul.f32 %v2300_v23, %v2300_v23  ;;  %v3123_v57 = vpop.f32.mrf.mxu1  ;;  %v2321_v3 = vadd.f32 %v3211_v62, %v2160_v46 }
 0x1fa   : > { %v2312_v63 = vpop.f32.mrf.mxu0  ;;  %v2171_v27 = vadd.f32 %v3122_v11, %v4359_v30 }
 0x1fb   : > { %v2420_v19 = vadd.f32 %v2419_v49, %v2305_v58  ;;  %v2489_v17 = vadd.f32 %v2488_v28, %v2458_v5  ;;  %2393 = vst [vmem:[%s4427_s18 + $0x90] sm:$0xff] %v2321_v3  ;;  %v3124_v60 = vpop.f32.mrf.mxu1  ;;  %v2313_v24 = vadd.f32 %v2312_v63, %v2152_v38  ;;  %v2463_v2 = vmul.f32 %v2321_v3, %v2321_v3 }
 0x1fc   : > { %v3125_v36 = vadd.f32 %v3124_v60, %v3123_v57  ;;  %v3212_v34 = vpop.f32.mrf.mxu0 }
 0x1fd   : > { %v2490_v6 = vadd.f32 %v2489_v17, %v2459_v39  ;;  %2391 = vst [vmem:[%s4427_s18 + $0x80] sm:$0xff] %v2313_v24  ;;  %v2421_v40 = vadd.f32 %v2420_v19, %v2308_v10  ;;  %v3126_v50 = vpop.f32.mrf.mxu1  ;;  %v2324_v21 = vadd.f32 %v3212_v34, %v2163_v4  ;;  %v2461_v44 = vmul.f32 %v2313_v24, %v2313_v24 }
 0x1fe   : > { %v2315_v0 = vpop.f32.mrf.mxu0  ;;  %v2176_v12 = vadd.f32 %v3125_v36, %v4366_v56 }
 0x1ff   : > { %v2422_v13 = vadd.f32 %v2421_v40, %v2313_v24  ;;  %v2491_v15 = vadd.f32 %v2490_v6, %v2460_v52  ;;  %2394 = vst [vmem:[%s4427_s18 + $0x98] sm:$0xff] %v2324_v21  ;;  %v3127_v51 = vpop.f32.mrf.mxu1  ;;  %v2316_v33 = vadd.f32 %v2315_v0, %v2155_v29  ;;  %v2464_v43 = vmul.f32 %v2324_v21, %v2324_v21  ;;  %v4560_v52 = vld [vmem:[#allocation4_spill] sm:$0xff]  ;;  %v4561_v40 = vld [vmem:[#allocation5_spill] sm:$0xff] }
 0x200   : > { %v3128_v58 = vadd.f32 %v3127_v51, %v3126_v50  ;;  %v3215_v42 = vpop.f32.mrf.mxu0 }
 0x201   : > { %v2492_v22 = vadd.f32 %v2491_v15, %v2461_v44  ;;  %2392 = vst [vmem:[%s4427_s18 + $0x88] sm:$0xff] %v2316_v33  ;;  %v2423_v35 = vadd.f32 %v2422_v13, %v2316_v33  ;;  %v2462_v8 = vmul.f32 %v2316_v33, %v2316_v33  ;;  %v3129_v31 = vpop.f32.mrf.mxu1  ;;  %v2337_v18 = vadd.f32 %v3215_v42, %v2176_v12 }
 0x202   : > { %v2328_v7 = vpop.f32.mrf.mxu0  ;;  %v2179_v41 = vadd.f32 %v3128_v58, %v4373_v53  ;;  %v4559_v53 = vld [vmem:[#allocation3_spill] sm:$0xff] }
 0x203   : > { %v2424_v59 = vadd.f32 %v2423_v35, %v2321_v3  ;;  %v2493_v26 = vadd.f32 %v2492_v22, %v2462_v8  ;;  %2397 = vst [vmem:[%s4427_s18 + $0xb0] sm:$0xff] %v2337_v18  ;;  %v3130_v55 = vpop.f32.mrf.mxu1  ;;  %v2329_v56 = vadd.f32 %v2328_v7, %v2168_v54  ;;  %v2467_v63 = vmul.f32 %v2337_v18, %v2337_v18  ;;  %v4562_v35 = vld [vmem:[#allocation6_spill] sm:$0xff] }
 0x204   : > { %v3131_v20 = vadd.f32 %v3130_v55, %v3129_v31  ;;  %v3216_v61 = vpop.f32.mrf.mxu0 }
 0x205   : > { %v2494_v10 = vadd.f32 %v2493_v26, %v2463_v2  ;;  %2395 = vst [vmem:[%s4427_s18 + $0xa0] sm:$0xff] %v2329_v56  ;;  %v2425_v14 = vadd.f32 %v2424_v59, %v2324_v21  ;;  %v3132_v37 = vpop.f32.mrf.mxu1  ;;  %v2340_v46 = vadd.f32 %v3216_v61, %v2179_v41  ;;  %v2465_v25 = vmul.f32 %v2329_v56, %v2329_v56  ;;  %v4563_v61 = vld [vmem:[#allocation7_spill] sm:$0xff] }
 0x206   : > { %v2331_v45 = vpop.f32.mrf.mxu0  ;;  %v2184_v38 = vadd.f32 %v3131_v20, %v4559_v53 }
 0x207   : > { %v2426_v9 = vadd.f32 %v2425_v14, %v2329_v56  ;;  %v2495_v1 = vadd.f32 %v2494_v10, %v2464_v43  ;;  %2398 = vst [vmem:[%s4427_s18 + $0xb8] sm:$0xff] %v2340_v46  ;;  %v3133_v23 = vpop.f32.mrf.mxu1  ;;  %v2332_v16 = vadd.f32 %v2331_v45, %v2171_v27  ;;  %v2468_v32 = vmul.f32 %v2340_v46, %v2340_v46 }
 0x208   : > { %v3219_v62 = vpop.f32.mrf.mxu0  ;;  %v3134_v30 = vadd.f32 %v3133_v23, %v3132_v37  ;;  %v4564_v23 = vld [vmem:[#allocation8_spill] sm:$0xff] }
 0x209   : > { %v2496_v28 = vadd.f32 %v2495_v1, %v2465_v25  ;;  %2396 = vst [vmem:[%s4427_s18 + $0xa8] sm:$0xff] %v2332_v16  ;;  %v2427_v49 = vadd.f32 %v2426_v9, %v2332_v16  ;;  %v2466_v5 = vmul.f32 %v2332_v16, %v2332_v16  ;;  %v3135_v57 = vpop.f32.mrf.mxu1 }
 0x20a   : > { %v2344_v3 = vpop.f32.mrf.mxu0  ;;  %v2187_v6 = vadd.f32 %v3134_v30, %v4560_v52 }
 0x20b   : > { %v2428_v4 = vadd.f32 %v2427_v49, %v2337_v18  ;;  %v2497_v39 = vadd.f32 %v2496_v28, %v2466_v5  ;;  %v3136_v19 = vpop.f32.mrf.mxu1  ;;  %v2345_v17 = vadd.f32 %v2344_v3, %v2184_v38 }
 0x20c   : > { %v3137_v60 = vadd.f32 %v3136_v19, %v3135_v57  ;;  %v3220_v24 = vpop.f32.mrf.mxu0 }
 0x20d   : > { %v2498_v36 = vadd.f32 %v2497_v39, %v2467_v63  ;;  %2399 = vst [vmem:[%s4427_s18 + $0xc0] sm:$0xff] %v2345_v17  ;;  %v2429_v34 = vadd.f32 %v2428_v4, %v2340_v46  ;;  %v3138_v29 = vpop.f32.mrf.mxu1  ;;  %v2469_v0 = vmul.f32 %v2345_v17, %v2345_v17 }
 0x20e   : > { %v2192_v50 = vadd.f32 %v3137_v60, %v4561_v40  ;;  %v2347_v21 = vpop.f32.mrf.mxu0 }
 0x20f   : > { %v2430_v44 = vadd.f32 %v2429_v34, %v2345_v17  ;;  %v2499_v13 = vadd.f32 %v2498_v36, %v2468_v32  ;;  %v3139_v15 = vpop.f32.mrf.mxu1  ;;  %v2348_v51 = vadd.f32 %v2347_v21, %v2187_v6 }
 0x210   : > { %v2353_v33 = vadd.f32 %v3219_v62, %v2192_v50  ;;  %v3140_v12 = vadd.f32 %v3139_v15, %v3138_v29  ;;  %v3223_v11 = vpop.f32.mrf.mxu0 }
 0x211   : > { %v2500_v58 = vadd.f32 %v2499_v13, %v2469_v0  ;;  %2400 = vst [vmem:[%s4427_s18 + $0xc8] sm:$0xff] %v2348_v51  ;;  %v2431_v42 = vadd.f32 %v2430_v44, %v2348_v51  ;;  %v2470_v54 = vmul.f32 %v2348_v51, %v2348_v51  ;;  %v3141_v22 = vpop.f32.mrf.mxu1 }
 0x212   : > { %2401 = vst [vmem:[%s4427_s18 + $0xd0] sm:$0xff] %v2353_v33  ;;  %v2195_v8 = vadd.f32 %v3140_v12, %v4562_v35  ;;  %v2471_v31 = vmul.f32 %v2353_v33, %v2353_v33  ;;  %v2360_v59 = vpop.f32.mrf.mxu0 }
 0x213   : > { %v2432_v18 = vadd.f32 %v2431_v42, %v2353_v33  ;;  %v2501_v2 = vadd.f32 %v2500_v58, %v2470_v54  ;;  %v3142_v7 = vpop.f32.mrf.mxu1 }
 0x214   : > { %v2356_v26 = vadd.f32 %v3220_v24, %v2195_v8  ;;  %v3143_v55 = vadd.f32 %v3142_v7, %v3141_v22  ;;  %v3224_v14 = vpop.f32.mrf.mxu0 }
 0x215   : > { %v2502_v56 = vadd.f32 %v2501_v2, %v2471_v31  ;;  %v3144_v41 = vpop.f32.mrf.mxu1 }
 0x216   : > { %2402 = vst [vmem:[%s4427_s18 + $0xd8] sm:$0xff] %v2356_v26  ;;  %v2472_v20 = vmul.f32 %v2356_v26, %v2356_v26  ;;  %v2200_v27 = vadd.f32 %v3143_v55, %v4563_v61  ;;  %v2433_v43 = vadd.f32 %v2432_v18, %v2356_v26  ;;  %v2363_v62 = vpop.f32.mrf.mxu0 }
 0x217   : > { %v3145_v10 = vpop.f32.mrf.mxu1 }
 0x218   : > { %v2361_v37 = vadd.f32 %v2360_v59, %v2200_v27  ;;  %v2503_v46 = vadd.f32 %v2502_v56, %v2472_v20  ;;  %v3146_v45 = vadd.f32 %v3145_v10, %v3144_v41 }
 0x219   : > { %v3147_v9 = vpop.f32.mrf.mxu1 }
 0x21a   : > { %2403 = vst [vmem:[%s4427_s18 + $0xe0] sm:$0xff] %v2361_v37  ;;  %v2434_v25 = vadd.f32 %v2433_v43, %v2361_v37  ;;  %v2473_v1 = vmul.f32 %v2361_v37, %v2361_v37  ;;  %v2203_v16 = vadd.f32 %v3146_v45, %v4564_v23 }
 0x21b   : > { %v3148_v53 = vpop.f32.mrf.mxu1 }
 0x21c   : > { %v2504_v38 = vadd.f32 %v2503_v46, %v2473_v1  ;;  %v2364_v28 = vadd.f32 %v2363_v62, %v2203_v16  ;;  %v3149_v30 = vadd.f32 %v3148_v53, %v3147_v9 }
 0x21d   : > { %v3150_v49 = vpop.f32.mrf.mxu1 }
 0x21e   : > { %2404 = vst [vmem:[%s4427_s18 + $0xe8] sm:$0xff] %v2364_v28  ;;  %v2435_v5 = vadd.f32 %v2434_v25, %v2364_v28  ;;  %v2474_v57 = vmul.f32 %v2364_v28, %v2364_v28  ;;  %v2208_v3 = vadd.f32 %v3149_v30, %v4414_v48 }
 0x21f   : > { %v3151_v63 = vpop.f32.mrf.mxu1 }
 0x220   : > { %v2505_v4 = vadd.f32 %v2504_v38, %v2474_v57  ;;  %v2369_v39 = vadd.f32 %v3223_v11, %v2208_v3  ;;  %v3152_v19 = vadd.f32 %v3151_v63, %v3150_v49 }
 0x222   : > { %2405 = vst [vmem:[%s4427_s18 + $0xf0] sm:$0xff] %v2369_v39  ;;  %v2436_v17 = vadd.f32 %v2435_v5, %v2369_v39  ;;  %v2475_v60 = vmul.f32 %v2369_v39, %v2369_v39  ;;  %v2211_v24 = vadd.f32 %v3152_v19, %v4432_v47 }
 0x224   : > { %v2506_v32 = vadd.f32 %v2505_v4, %v2475_v60  ;;  %v2372_v36 = vadd.f32 %v3224_v14, %v2211_v24 }
 0x226   : > { %2406 = vst [vmem:[%s4427_s18 + $0xf8] sm:$0xff] %v2372_v36  ;;  %v2437_v34 = vadd.f32 %v2436_v17, %v2372_v36  ;;  %v2476_v29 = vmul.f32 %v2372_v36, %v2372_v36 }
 0x228   : > { %v2438_v52 = vrot.slane %v2437_v34, 4  ;;  %v2507_v6 = vadd.f32 %v2506_v32, %v2476_v29 }
 0x22a   : > { %v2439_v40 = vadd.f32 %v2438_v52, %v2437_v34  ;;  %v2508_v48 = vrot.slane %v2507_v6, 4 }
 0x22c   : > { %v2440_v50 = vrot.slane %v2439_v40, 2  ;;  %v2509_v21 = vadd.f32 %v2508_v48, %v2507_v6 }
 0x22e   : > { %v2441_v44 = vadd.f32 %v2440_v50, %v2439_v40  ;;  %v2510_v0 = vrot.slane %v2509_v21, 2 }
 0x230   : > { %v2442_v13 = vrot.slane %v2441_v44, 1  ;;  %v2511_v15 = vadd.f32 %v2510_v0, %v2509_v21 }
 0x232   : > { %v2443_v47 = vadd.f32 %v2442_v13, %v2441_v44  ;;  %v2512_v51 = vrot.slane %v2511_v15, 1 }
 0x234   : > { %2444 = vst [vmem:[%s319_s21] sm:$0x1] %v2443_v47  ;;  %v2513_v33 = vadd.f32 %v2512_v51, %v2511_v15 }
 0x236   : > { %2514 = vst [vmem:[%s322_s23] sm:$0x1] %v2513_v33 }
 0x237 PF: > { %s19_s27 = sadd.s32 1, %s3331_s27  }
 0x238   : > { %p16_p4 = scmp.ge.s32.totalorder %s19_s27, 4  }
 0x23a   :  { %18 = sbr.rel (!%p16_p4) target bundleno = 1 (0x1), region = 101 }

// kernel: basic_block_forward.5
= control target key start
LH: loop header
LB: loop body
LE: loop exit
PB: predicated region body
PF: predicated region fallthrough
CT: control target
= control target key end

     0   :  { %s5254_s17 = smov 0   ;;  %s8265_s0 = inlined_call_operand.vmem [shape: f32[2,256,128], index: 0, kind: input, shape index: {}]   ;;  %s8266_s1 = inlined_call_operand.vmem [shape: f32[2,1,128], index: 1, kind: input, shape index: {}]   ;;  %s8267_s2 = inlined_call_operand.vmem [shape: f32[2,1,128], index: 2, kind: input, shape index: {}]   ;;  %s8268_s3 = inlined_call_operand.vmem [shape: f32[1,128], index: 3, kind: input, shape index: {}]   ;;  %s8269_s4 = inlined_call_operand.vmem [shape: f32[1,128], index: 4, kind: input, shape index: {}]   ;;  %s8270_s5 = inlined_call_operand.vmem [shape: bf16[128,768], index: 5, kind: input, shape index: {}]   ;;  %s8271_s6 = inlined_call_operand.vmem [shape: bf16[256,128], index: 6, kind: input, shape index: {}]   ;;  %s8272_s7 = inlined_call_operand.vmem [shape: f32[1,128], index: 7, kind: input, shape index: {}]   ;;  %s8273_s8 = inlined_call_operand.vmem [shape: f32[256,256], index: 8, kind: input, shape index: {}]   ;;  %s8274_s9 = inlined_call_operand.vmem [shape: f32[256,256], index: 9, kind: input, shape index: {}]   ;;  %s8275_s10 = inlined_call_operand.vmem [shape: f32[2,256,128], index: 10, kind: input, shape index: {}]   ;;  %s8276_s11 = inlined_call_operand.vmem [shape: f32[2,256,128], index: 11, kind: output, shape index: {}]  }
   0x1 LB: > { %s4189_s18 = sadd.s32 4294967295, %s5191_s17   ;;  %p4193_p0 = scmp.ge.s32.totalorder %s5191_s17, 1  ;;  %s5191_s17 = sphi %s5254_s17, %s21_s17  }
   0x2   : > { %p347_p1 = scmp.lt.s32.totalorder %s5191_s17, 3 }
   0x4   : > { %p348_p2 = pnand %p4193_p0, %p347_p1 }
   0x6   : > { %351 = sbr.rel (%p348_p2) target bundleno = 1758 (0x6de), region = 64 }
   0xb   : > { %v4711_v0 = vld [vmem:[%s8270_s5 + $0x154] ss:$24 sps:$4 sm:$0xff]   ;;  %v4713_v1 = vld [vmem:[%s8270_s5 + $0x150] ss:$24 sps:$4 sm:$0xff]   ;;  %v8281_v2 = vmov 0   ;;  %vm410_vm0 = vcmask 1040384   ;;  %v464_v39 = vlaneseq }
   0xc   : > { %875 = vmatprep.mubr.bf16.mxu0 %v8281_v2  ;;  %1068 = vmatprep.mubr.bf16.mxu1 %v8281_v2  ;;  %v4714_v3 = vld [vmem:[%s8270_s5 + $0x124] ss:$24 sps:$4 sm:$0xff]   ;;  %v4716_v4 = vld [vmem:[%s8270_s5 + $0x120] ss:$24 sps:$4 sm:$0xff]   ;;  %v4717_v5 = vld [vmem:[%s8270_s5 + $0xf4] ss:$24 sps:$4 sm:$0xff]  }
   0xd   : > { %843 = vmatprep.subr.bf16.mxu0 %v4711_v0  ;;  %v4719_v6 = vld [vmem:[%s8270_s5 + $0xf0] ss:$24 sps:$4 sm:$0xff]   ;;  %v4720_v7 = vld [vmem:[%s8270_s5 + $0xc4] ss:$24 sps:$4 sm:$0xff]   ;;  %v4722_v8 = vld [vmem:[%s8270_s5 + $0xc0] ss:$24 sps:$4 sm:$0xff]  }
   0xe   : > { %844 = vmatpush1.bf16.msra.mxu0 %v4713_v1  ;;  %v408_v9 = vld [vmem:[%s8266_s1] sm:$0x1]  ;;  %v409_v10 = vld [vmem:[%s8266_s1 + $0x1] sm:$0x1]  ;;  %v4723_v13 = vld [vmem:[%s8270_s5 + $0x94] ss:$24 sps:$4 sm:$0xff]  }
   0xf   : > { %845 = vmatprep.subr.bf16.mxu0 %v4714_v3  ;;  %v411_v11 = vsel %vm410_vm0, %v408_v9, 0.0  ;;  %v416_v12 = vld [vmem:[%s8267_s2] sm:$0x1]  ;;  %v412_v14 = vsel %vm410_vm0, %v409_v10, 0.0  ;;  %v417_v15 = vld [vmem:[%s8267_s2 + $0x1] sm:$0x1] }
  0x10   : > { %v418_v16 = vsel %vm410_vm0, %v416_v12, 0.0  ;;  %v413_v17 = vadd.f32 %v412_v14, %v411_v11  ;;  %v419_v18 = vsel %vm410_vm0, %v417_v15, 0.0  ;;  %v4725_v20 = vld [vmem:[%s8270_s5 + $0x90] ss:$24 sps:$4 sm:$0xff]   ;;  %v4726_v22 = vld [vmem:[%s8270_s5 + $0x64] ss:$24 sps:$4 sm:$0xff]  }
  0x11   : > { %v420_v19 = vadd.f32 %v419_v18, %v418_v16  ;;  %v4735_v25 = vld [vmem:[%s8270_s5 + $0x15c] ss:$24 sps:$4 sm:$0xff]   ;;  %v4728_v26 = vld [vmem:[%s8270_s5 + $0x60] ss:$24 sps:$4 sm:$0xff]   ;;  %v4738_v30 = vld [vmem:[%s8270_s5 + $0x12c] ss:$24 sps:$4 sm:$0xff]  }
  0x12   : > { %846 = vmatpush1.bf16.msra.mxu0 %v4716_v4  ;;  %v415_v21 = vmul.f32 0.001953125, %v413_v17  ;;  %v4729_v27 = vld [vmem:[%s8270_s5 + $0x34] ss:$24 sps:$4 sm:$0xff]   ;;  %v4737_v28 = vld [vmem:[%s8270_s5 + $0x158] ss:$24 sps:$4 sm:$0xff]   ;;  %1036 = vmatprep.subr.bf16.mxu1 %v4735_v25  ;;  %p392_p3 = scmp.lt.s32.totalorder %s4189_s18, 1 }
  0x13   : > { %847 = vmatprep.subr.bf16.mxu0 %v4717_v5  ;;  %v421_v23 = vmul.f32 0.001953125, %v420_v19  ;;  %1037 = vmatpush1.bf16.msra.mxu1 %v4737_v28  ;;  %v4740_v31 = vld [vmem:[%s8270_s5 + $0x128] ss:$24 sps:$4 sm:$0xff]   ;;  %v4741_v33 = vld [vmem:[%s8270_s5 + $0xfc] ss:$24 sps:$4 sm:$0xff]   ;;  %v465_v42 = vshrl.u32 %v464_v39, 7 }
  0x14   : > { %v422_v24 = vmul.f32 %v415_v21, %v415_v21  ;;  %1038 = vmatprep.subr.bf16.mxu1 %v4738_v30  ;;  %v4731_v34 = vld [vmem:[%s8270_s5 + $0x30] ss:$24 sps:$4 sm:$0xff]   ;;  %v4732_v35 = vld [vmem:[%s8270_s5 + $0x4] ss:$24 sps:$4 sm:$0xff]   ;;  %v4734_v38 = vld [vmem:[%s8270_s5] ss:$24 sps:$4 sm:$0xff]  }
  0x15   : > { %v4743_v36 = vld [vmem:[%s8270_s5 + $0xf8] ss:$24 sps:$4 sm:$0xff]   ;;  %v4744_v37 = vld [vmem:[%s8270_s5 + $0xcc] ss:$24 sps:$4 sm:$0xff]   ;;  %s9032_s18 = smov (!%p392_p3, %s4189_s18), 1  ;;  %v466_v47 = vsub.s32 0, %v465_v42 }
  0x16   : > { %848 = vmatpush1.bf16.msra.mxu0 %v4719_v6  ;;  %v423_v29 = vsub.f32 %v421_v23, %v422_v24  ;;  %v4746_v40 = vld [vmem:[%s8270_s5 + $0xc8] ss:$24 sps:$4 sm:$0xff]   ;;  %v4747_v41 = vld [vmem:[%s8270_s5 + $0x9c] ss:$24 sps:$4 sm:$0xff]   ;;  %s5355_s26 = sshll.u32 %s9032_s18, 8 }
  0x17   : > { %849 = vmatprep.subr.bf16.mxu0 %v4720_v7  ;;  %1039 = vmatpush1.bf16.msra.mxu1 %v4740_v31  ;;  %v4749_v43 = vld [vmem:[%s8270_s5 + $0x98] ss:$24 sps:$4 sm:$0xff]   ;;  %v4750_v44 = vld [vmem:[%s8270_s5 + $0x6c] ss:$24 sps:$4 sm:$0xff]   ;;  %v424_v46 = vld [vmem:[%s8268_s3] sm:$0x1]  ;;  %s5373_s19 = scalar_lea.vmem %s8265_s0, %s5355_s26  ;;  %s8126_s14 = scalar_lea.vmem %s8275_s10, %s5355_s26 }
  0x18   : > { %v425_v32 = vadd.f32 1e-05, %v423_v29  ;;  %1040 = vmatprep.subr.bf16.mxu1 %v4741_v33  ;;  %v4761_v45 = vld [vmem:[%s8270_s5 + $0x164] ss:$24 sps:$4 sm:$0xff]   ;;  %v4752_v49 = vld [vmem:[%s8270_s5 + $0x68] ss:$24 sps:$4 sm:$0xff]   ;;  %s8136_s16 = scalar_lea.vmem %s8276_s11, %s5355_s26 }
  0x19   : > { %v4753_v51 = vld [vmem:[%s8270_s5 + $0x3c] ss:$24 sps:$4 sm:$0xff]   ;;  %v428_v52 = vld [vmem:[%s8269_s4] sm:$0x1]  ;;  %v432_v54 = vld [vmem:[%s5373_s19 + $0x8] sm:$0xff] }
  0x1a   : > { %850 = vmatpush1.bf16.msra.mxu0 %v4722_v8  ;;  %4799 = vrsqrt.f32 %v425_v32  ;;  %v431_v53 = vld [vmem:[%s5373_s19] sm:$0xff]  ;;  %v433_v57 = vld [vmem:[%s5373_s19 + $0x10] sm:$0xff]  ;;  %v434_v62 = vld [vmem:[%s5373_s19 + $0x18] sm:$0xff] }
  0x1b   : > { %851 = vmatprep.subr.bf16.mxu0 %v4723_v13  ;;  %1041 = vmatpush1.bf16.msra.mxu1 %v4743_v36  ;;  %v4755_v58 = vld [vmem:[%s8270_s5 + $0x38] ss:$24 sps:$4 sm:$0xff]   ;;  %v4756_v63 = vld [vmem:[%s8270_s5 + $0xc] ss:$24 sps:$4 sm:$0xff]   ;;  %v4758_v4 = vld [vmem:[%s8270_s5 + $0x8] ss:$24 sps:$4 sm:$0xff]  }
  0x1c   : > { %1042 = vmatprep.subr.bf16.mxu1 %v4744_v37  ;;  %v447_v7 = vld [vmem:[%s5373_s19 + $0x80] sm:$0xff]  ;;  %v448_v8 = vld [vmem:[%s5373_s19 + $0x88] sm:$0xff]  ;;  %v449_v11 = vld [vmem:[%s5373_s19 + $0x90] sm:$0xff] }
  0x1d   : > { %v435_v9 = vld [vmem:[%s5373_s19 + $0x20] sm:$0xff]  ;;  %v436_v10 = vld [vmem:[%s5373_s19 + $0x28] sm:$0xff]  ;;  %v450_v12 = vld [vmem:[%s5373_s19 + $0x98] sm:$0xff] }
  0x1e   : > { %852 = vmatpush1.bf16.msra.mxu0 %v4725_v20  ;;  %v451_v14 = vld [vmem:[%s5373_s19 + $0xa0] sm:$0xff]  ;;  %v452_v18 = vld [vmem:[%s5373_s19 + $0xa8] sm:$0xff]  ;;  %v453_v19 = vld [vmem:[%s5373_s19 + $0xb0] sm:$0xff] }
  0x1f   : > { %853 = vmatprep.subr.bf16.mxu0 %v4726_v22  ;;  %1043 = vmatpush1.bf16.msra.mxu1 %v4746_v40  ;;  %v4759_v15 = vld [vmem:[%s8270_s5 + $0x160] ss:$24 sps:$4 sm:$0xff]   ;;  %v4764_v20 = vld [vmem:[%s8270_s5 + $0x134] ss:$24 sps:$4 sm:$0xff]   ;;  %v4762_v36 = vld [vmem:[%s8270_s5 + $0x130] ss:$24 sps:$4 sm:$0xff]  }
  0x20   : > { %1044 = vmatprep.subr.bf16.mxu1 %v4747_v41  ;;  %v455_v24 = vld [vmem:[%s5373_s19 + $0xc0] sm:$0xff]  ;;  %v456_v29 = vld [vmem:[%s5373_s19 + $0xc8] sm:$0xff]  ;;  %v457_v30 = vld [vmem:[%s5373_s19 + $0xd0] sm:$0xff] }
  0x21   : > { %v458_v31 = vld [vmem:[%s5373_s19 + $0xd8] sm:$0xff]  ;;  %v459_v37 = vld [vmem:[%s5373_s19 + $0xe0] sm:$0xff] }
  0x22   : > { %854 = vmatpush1.bf16.msra.mxu0 %v4728_v26 }
  0x23   : > { %855 = vmatprep.subr.bf16.mxu0 %v4729_v27  ;;  %1045 = vmatpush1.bf16.msra.mxu1 %v4749_v43  ;;  %v4767_v43 = vld [vmem:[%s8270_s5 + $0x104] ss:$24 sps:$4 sm:$0xff]  }
  0x24   : > { %1046 = vmatprep.subr.bf16.mxu1 %v4750_v44 }
  0x26   : > { %856 = vmatpush1.bf16.msra.mxu0 %v4731_v34 }
  0x27   : > { %857 = vmatprep.subr.bf16.mxu0 %v4732_v35  ;;  %v4800_v48 = vpop.eup %4799  ;;  %1047 = vmatpush1.bf16.msra.mxu1 %v4752_v49 }
  0x28   : > { %v427_v50 = vmul.f32 %v4800_v48, %v424_v46  ;;  %1048 = vmatprep.subr.bf16.mxu1 %v4753_v51 }
  0x2a   : > { %858 = vmatpush1.bf16.msra.mxu0 %v4734_v38  ;;  %v429_v55 = vmul.f32 %v427_v50, %v415_v21  ;;  %v5386_v56 = vrot.slane %v427_v50, %v466_v47  ;;  %v454_v21 = vld [vmem:[%s5373_s19 + $0xb8] sm:$0xff]  ;;  %v460_v38 = vld [vmem:[%s5373_s19 + $0xe8] sm:$0xff] }
  0x2b   : > { %1229 = vmatprep.subr.bf16.mxu0 %v4761_v45  ;;  %1049 = vmatpush1.bf16.msra.mxu1 %v4755_v58 }
  0x2c   : > { %v430_v59 = vsub.f32 %v428_v52, %v429_v55  ;;  %v469_v60 = vmul.f32 %v5386_v56, %v431_v53  ;;  %v470_v61 = vmul.f32 %v5386_v56, %v432_v54  ;;  %v471_v1 = vmul.f32 %v5386_v56, %v433_v57  ;;  %1050 = vmatprep.subr.bf16.mxu1 %v4756_v63 }
  0x2d   : > { %v472_v3 = vmul.f32 %v5386_v56, %v434_v62  ;;  %v485_v22 = vmul.f32 %v5386_v56, %v447_v7  ;;  %v486_v23 = vmul.f32 %v5386_v56, %v448_v8  ;;  %v473_v25 = vmul.f32 %v5386_v56, %v435_v9  ;;  %v438_v62 = vld [vmem:[%s5373_s19 + $0x38] sm:$0xff]  ;;  %v4770_v7 = vld [vmem:[%s8270_s5 + $0xd4] ss:$24 sps:$4 sm:$0xff]  }
  0x2e   : > { %v5398_v0 = vrot.slane %v430_v59, %v466_v47  ;;  %v474_v26 = vmul.f32 %v5386_v56, %v436_v10  ;;  %v487_v27 = vmul.f32 %v5386_v56, %v449_v11  ;;  %v488_v28 = vmul.f32 %v5386_v56, %v450_v12  ;;  %v461_v59 = vld [vmem:[%s5373_s19 + $0xf0] sm:$0xff] }
  0x2f   : > { %1051 = vmatpush1.bf16.msra.mxu1 %v4758_v4  ;;  %v489_v35 = vmul.f32 %v5386_v56, %v451_v14  ;;  %v490_v41 = vmul.f32 %v5386_v56, %v452_v18  ;;  %v491_v42 = vmul.f32 %v5386_v56, %v453_v19  ;;  %v492_v45 = vmul.f32 %v5386_v56, %v454_v21  ;;  %v4768_v18 = vld [vmem:[%s8270_s5 + $0xd0] ss:$24 sps:$4 sm:$0xff]   ;;  %v4773_v21 = vld [vmem:[%s8270_s5 + $0xa4] ss:$24 sps:$4 sm:$0xff]  }
  0x30   : > { %v5406_v5 = vadd.f32 %v5398_v0, %v469_v60  ;;  %v5409_v6 = vadd.f32 %v5398_v0, %v470_v61  ;;  %v5426_v16 = vadd.f32 %v5398_v0, %v471_v1  ;;  %v5429_v17 = vadd.f32 %v5398_v0, %v472_v3  ;;  %v462_v60 = vld [vmem:[%s5373_s19 + $0xf8] sm:$0xff]  ;;  %v437_v61 = vld [vmem:[%s5373_s19 + $0x30] sm:$0xff] }
  0x31   : > { %v5455_v33 = vadd.f32 %v5398_v0, %v485_v22  ;;  %v5458_v34 = vadd.f32 %v5398_v0, %v486_v23  ;;  %v5468_v39 = vadd.f32 %v5398_v0, %v487_v27  ;;  %v5471_v40 = vadd.f32 %v5398_v0, %v488_v28  ;;  %v4765_v3 = vld [vmem:[%s8270_s5 + $0x100] ss:$24 sps:$4 sm:$0xff]   ;;  %v4776_v27 = vld [vmem:[%s8270_s5 + $0x74] ss:$24 sps:$4 sm:$0xff]  }
  0x32   : > { %8480 = vst [vmem:[#allocation2_spill] sm:$0xff] %v5406_v5  ;;  %8481 = vst [vmem:[#allocation3_spill] sm:$0xff] %v5409_v6  ;;  %v5419_v13 = vpack.c.bf16 %v5409_v6, %v5406_v5  ;;  %v5452_v32 = vpack.c.bf16 %v5429_v17, %v5426_v16  ;;  %v5479_v44 = vadd.f32 %v5398_v0, %v489_v35  ;;  %v4779_v35 = vld [vmem:[%s8270_s5 + $0x44] ss:$24 sps:$4 sm:$0xff]  }
  0x33   : > { %8482 = vst [vmem:[#allocation4_spill] sm:$0xff] %v5426_v16  ;;  %8483 = vst [vmem:[#allocation5_spill] sm:$0xff] %v5429_v17  ;;  %v5483_v46 = vadd.f32 %v5398_v0, %v473_v25  ;;  %v5486_v47 = vadd.f32 %v5398_v0, %v490_v41  ;;  %v5489_v48 = vadd.f32 %v5398_v0, %v491_v42  ;;  %v440_v25 = vld [vmem:[%s5373_s19 + $0x48] sm:$0xff]  ;;  %v442_v41 = vld [vmem:[%s5373_s19 + $0x58] sm:$0xff] }
  0x34   : > { %876 = vmatmul.mubr.bf16.vlgmr.msra.gmra.mxu0 %v5419_v13  ;;  %1069 = vmatmul.mubr.bf16.vlgmr.msra.gmra.mxu1 %v5419_v13  ;;  %8484 = vst [vmem:[#allocation6_spill] sm:$0xff] %v5455_v33  ;;  %8485 = vst [vmem:[#allocation7_spill] sm:$0xff] %v5458_v34  ;;  %v493_v49 = vmul.f32 %v5386_v56, %v455_v24  ;;  %v5493_v50 = vadd.f32 %v5398_v0, %v492_v45  ;;  %v439_v24 = vld [vmem:[%s5373_s19 + $0x40] sm:$0xff] }
  0x35   : > { %885 = vmatprep.mubr.bf16.mxu0 %v8281_v2  ;;  %1078 = vmatprep.mubr.bf16.mxu1 %v8281_v2  ;;  %8486 = vst [vmem:[#allocation8_spill] sm:$0xff] %v5468_v39  ;;  %8487 = vst [vmem:[#allocation9_spill] sm:$0xff] %v5471_v40  ;;  %v494_v51 = vmul.f32 %v5386_v56, %v456_v29  ;;  %v495_v52 = vmul.f32 %v5386_v56, %v457_v30  ;;  %v4777_v42 = vld [vmem:[%s8270_s5 + $0x40] ss:$24 sps:$4 sm:$0xff]  }
  0x36   : > { %1230 = vmatpush1.bf16.msra.mxu0 %v4759_v15  ;;  %8488 = vst [vmem:[#allocation10_spill] sm:$0xff] %v5479_v44  ;;  %8489 = vst [vmem:[#allocation11_spill] sm:$0xff] %v5483_v46  ;;  %v496_v53 = vmul.f32 %v5386_v56, %v458_v31  ;;  %v5500_v54 = vadd.f32 %v5398_v0, %v474_v26  ;;  %v5503_v55 = vadd.f32 %v5398_v0, %v493_v49  ;;  %v4771_v26 = vld [vmem:[%s8270_s5 + $0xa0] ss:$24 sps:$4 sm:$0xff]   ;;  %v4774_v31 = vld [vmem:[%s8270_s5 + $0x70] ss:$24 sps:$4 sm:$0xff]  }
  0x37   : > { %1231 = vmatprep.subr.bf16.mxu0 %v4764_v20  ;;  %8490 = vst [vmem:[#allocation12_spill] sm:$0xff] %v5486_v47  ;;  %8491 = vst [vmem:[#allocation13_spill] sm:$0xff] %v5489_v48  ;;  %v497_v57 = vmul.f32 %v5386_v56, %v459_v37  ;;  %v498_v58 = vmul.f32 %v5386_v56, %v460_v38  ;;  %v5513_v63 = vadd.f32 %v5398_v0, %v494_v51  ;;  %v441_v38 = vld [vmem:[%s5373_s19 + $0x50] sm:$0xff] }
  0x38   : > { %8492 = vst [vmem:[#allocation14_spill] sm:$0xff] %v5493_v50  ;;  %8493 = vst [vmem:[#allocation15_spill] sm:$0xff] %v5500_v54  ;;  %v5516_v1 = vadd.f32 %v5398_v0, %v495_v52  ;;  %v5523_v4 = vadd.f32 %v5398_v0, %v496_v53  ;;  %v499_v10 = vmul.f32 %v5386_v56, %v461_v59  ;;  %v4780_v52 = vld [vmem:[%s8270_s5 + $0x10] ss:$24 sps:$4 sm:$0xff]  }
  0x39   : > { %8494 = vst [vmem:[#allocation16_spill] sm:$0xff] %v5503_v55  ;;  %8495 = vst [vmem:[#allocation17_spill] sm:$0xff] %v5513_v63  ;;  %v5529_v8 = vadd.f32 %v5398_v0, %v497_v57  ;;  %v5532_v9 = vadd.f32 %v5398_v0, %v498_v58  ;;  %v500_v11 = vmul.f32 %v5386_v56, %v462_v60  ;;  %v443_v58 = vld [vmem:[%s5373_s19 + $0x60] sm:$0xff]  ;;  %v444_v59 = vld [vmem:[%s5373_s19 + $0x68] sm:$0xff] }
  0x3a   : > { %1232 = vmatpush1.bf16.msra.mxu0 %v4762_v36  ;;  %8496 = vst [vmem:[#allocation18_spill] sm:$0xff] %v5516_v1  ;;  %8497 = vst [vmem:[#allocation19_spill] sm:$0xff] %v5523_v4  ;;  %v5539_v12 = vpack.c.bf16 %v5500_v54, %v5483_v46  ;;  %v475_v14 = vmul.f32 %v5386_v56, %v437_v61  ;;  %v476_v15 = vmul.f32 %v5386_v56, %v438_v62 }
  0x3b   : > { %1233 = vmatprep.subr.bf16.mxu0 %v4767_v43  ;;  %8498 = vst [vmem:[#allocation20_spill] sm:$0xff] %v5529_v8  ;;  %8499 = vst [vmem:[#allocation21_spill] sm:$0xff] %v5532_v9  ;;  %v5547_v19 = vadd.f32 %v5398_v0, %v499_v10  ;;  %v5550_v20 = vadd.f32 %v5398_v0, %v500_v11  ;;  %v477_v29 = vmul.f32 %v5386_v56, %v439_v24  ;;  %v4782_v43 = vld [vmem:[%s8270_s5 + $0x14] ss:$24 sps:$4 sm:$0xff]   ;;  %v446_v11 = vld [vmem:[%s5373_s19 + $0x78] sm:$0xff] }
  0x3c   : > { %886 = vmatmul.mubr.bf16.gmra.mxu0 %v5452_v32  ;;  %1079 = vmatmul.mubr.bf16.gmra.mxu1 %v5452_v32  ;;  %v5557_v22 = vadd.f32 %v5398_v0, %v475_v14  ;;  %v5560_v23 = vadd.f32 %v5398_v0, %v476_v15  ;;  %v478_v30 = vmul.f32 %v5386_v56, %v440_v25  ;;  %v445_v10 = vld [vmem:[%s5373_s19 + $0x70] sm:$0xff] }
  0x3d   : > { %895 = vmatprep.mubr.bf16.mxu0 %v8281_v2  ;;  %1088 = vmatprep.mubr.bf16.mxu1 %v8281_v2  ;;  %8500 = vst [vmem:[#allocation22_spill] sm:$0xff] %v5547_v19  ;;  %8501 = vst [vmem:[#allocation23_spill] sm:$0xff] %v5550_v20  ;;  %v5587_v36 = vadd.f32 %v5398_v0, %v477_v29  ;;  %v479_v49 = vmul.f32 %v5386_v56, %v441_v38 }
  0x3e   : > { %1234 = vmatpush1.bf16.msra.mxu0 %v4765_v3  ;;  %8502 = vst [vmem:[#allocation24_spill] sm:$0xff] %v5557_v22  ;;  %8503 = vst [vmem:[#allocation25_spill] sm:$0xff] %v5560_v23  ;;  %v5575_v28 = vpack.c.bf16 %v5560_v23, %v5557_v22  ;;  %v5590_v37 = vadd.f32 %v5398_v0, %v478_v30  ;;  %v480_v51 = vmul.f32 %v5386_v56, %v442_v41 }
  0x3f   : > { %1235 = vmatprep.subr.bf16.mxu0 %v4770_v7  ;;  %8504 = vst [vmem:[#allocation26_spill] sm:$0xff] %v5587_v36  ;;  %v5614_v53 = vadd.f32 %v5398_v0, %v479_v49  ;;  %v481_v61 = vmul.f32 %v5386_v56, %v443_v58  ;;  %v482_v62 = vmul.f32 %v5386_v56, %v444_v59 }
  0x40   : > { %8505 = vst [vmem:[#allocation27_spill] sm:$0xff] %v5590_v37  ;;  %v5605_v45 = vpack.c.bf16 %v5590_v37, %v5587_v36  ;;  %v5617_v57 = vadd.f32 %v5398_v0, %v480_v51  ;;  %v483_v15 = vmul.f32 %v5386_v56, %v445_v10  ;;  %v5688_v29 = vpack.c.bf16 %v5513_v63, %v5503_v55 }
  0x41   : > { %8506 = vst [vmem:[#allocation28_spill] sm:$0xff] %v5614_v53  ;;  %v5632_v3 = vadd.f32 %v5398_v0, %v481_v61  ;;  %v5635_v7 = vadd.f32 %v5398_v0, %v482_v62  ;;  %v5696_v30 = vpack.c.bf16 %v5523_v4, %v5516_v1  ;;  %v8531_v4 = vmov 0  }
  0x42   : > { %1236 = vmatpush1.bf16.msra.mxu0 %v4768_v18  ;;  %8507 = vst [vmem:[#allocation29_spill] sm:$0xff] %v5617_v57  ;;  %v5626_v60 = vpack.c.bf16 %v5617_v57, %v5614_v53  ;;  %v484_v18 = vmul.f32 %v5386_v56, %v446_v11  ;;  %v547_v56 = vpack.c.bf16 %v5458_v34, %v5455_v33 }
  0x43   : > { %1237 = vmatprep.subr.bf16.mxu0 %v4773_v21  ;;  %8508 = vst [vmem:[#allocation30_spill] sm:$0xff] %v5632_v3  ;;  %8509 = vst [vmem:[#allocation31_spill] sm:$0xff] %v5635_v7  ;;  %v5644_v14 = vpack.c.bf16 %v5635_v7, %v5632_v3  ;;  %v5650_v21 = vadd.f32 %v5398_v0, %v483_v15 }
  0x44   : > { %896 = vmatmul.mubr.bf16.gmra.mxu0 %v5539_v12  ;;  %1089 = vmatmul.mubr.bf16.gmra.mxu1 %v5539_v12  ;;  %v5653_v24 = vadd.f32 %v5398_v0, %v484_v18  ;;  %v548_v0 = vpack.c.bf16 %v5471_v40, %v5468_v39 }
  0x45   : > { %905 = vmatprep.mubr.bf16.mxu0 %v8281_v2  ;;  %1098 = vmatprep.mubr.bf16.mxu1 %v8281_v2  ;;  %8510 = vst [vmem:[#allocation32_spill] sm:$0xff] %v5650_v21 }
  0x46   : > { %1238 = vmatpush1.bf16.msra.mxu0 %v4771_v26  ;;  %8511 = vst [vmem:[#allocation33_spill] sm:$0xff] %v5653_v24  ;;  %v546_v25 = vpack.c.bf16 %v5653_v24, %v5650_v21  ;;  %v5672_v26 = vpack.c.bf16 %v5486_v47, %v5479_v44 }
  0x47   : > { %1239 = vmatprep.subr.bf16.mxu0 %v4776_v27  ;;  %v5680_v27 = vpack.c.bf16 %v5493_v50, %v5489_v48 }
  0x4a   : > { %1240 = vmatpush1.bf16.msra.mxu0 %v4774_v31  ;;  %v5704_v31 = vpack.c.bf16 %v5532_v9, %v5529_v8 }
  0x4b   : > { %1241 = vmatprep.subr.bf16.mxu0 %v4779_v35  ;;  %v5712_v35 = vpack.c.bf16 %v5550_v20, %v5547_v19 }
  0x4c   : > { %906 = vmatmul.mubr.bf16.gmra.mxu0 %v5575_v28  ;;  %1099 = vmatmul.mubr.bf16.gmra.mxu1 %v5575_v28 }
  0x4d   : > { %915 = vmatprep.mubr.bf16.mxu0 %v8281_v2  ;;  %1108 = vmatprep.mubr.bf16.mxu1 %v8281_v2 }
  0x4e   : > { %1242 = vmatpush1.bf16.msra.mxu0 %v4777_v42 }
  0x4f   : > { %1243 = vmatprep.subr.bf16.mxu0 %v4782_v43 }
  0x52   : > { %1244 = vmatpush1.bf16.msra.mxu0 %v4780_v52 }
  0x54   : > { %916 = vmatmul.mubr.bf16.gmra.mxu0 %v5605_v45  ;;  %1109 = vmatmul.mubr.bf16.gmra.mxu1 %v5605_v45 }
  0x55   : > { %925 = vmatprep.mubr.bf16.mxu0 %v8281_v2  ;;  %1118 = vmatprep.mubr.bf16.mxu1 %v8281_v2 }
  0x5c   : > { %926 = vmatmul.mubr.bf16.gmra.mxu0 %v5626_v60  ;;  %1119 = vmatmul.mubr.bf16.gmra.mxu1 %v5626_v60 }
  0x5d   : > { %935 = vmatprep.mubr.bf16.mxu0 %v8281_v2  ;;  %1128 = vmatprep.mubr.bf16.mxu1 %v8281_v2 }
  0x64   : > { %936 = vmatmul.mubr.bf16.gmra.mxu0 %v5644_v14  ;;  %1129 = vmatmul.mubr.bf16.gmra.mxu1 %v5644_v14 }
  0x65   : > { %945 = vmatprep.mubr.bf16.mxu0 %v8281_v2  ;;  %1138 = vmatprep.mubr.bf16.mxu1 %v8281_v2 }
  0x6c   : > { %946 = vmatmul.mubr.bf16.gmra.mxu0 %v546_v25  ;;  %1139 = vmatmul.mubr.bf16.gmra.mxu1 %v546_v25 }
  0x6d   : > { %955 = vmatprep.mubr.bf16.mxu0 %v8281_v2  ;;  %1148 = vmatprep.mubr.bf16.mxu1 %v8281_v2 }
  0x74   : > { %956 = vmatmul.mubr.bf16.gmra.mxu0 %v547_v56  ;;  %1149 = vmatmul.mubr.bf16.gmra.mxu1 %v547_v56 }
  0x75   : > { %965 = vmatprep.mubr.bf16.mxu0 %v8281_v2  ;;  %1158 = vmatprep.mubr.bf16.mxu1 %v8281_v2 }
  0x7c   : > { %966 = vmatmul.mubr.bf16.gmra.mxu0 %v548_v0  ;;  %1159 = vmatmul.mubr.bf16.gmra.mxu1 %v548_v0 }
  0x7d   : > { %975 = vmatprep.mubr.bf16.mxu0 %v8281_v2  ;;  %1168 = vmatprep.mubr.bf16.mxu1 %v8281_v2 }
  0x84   : > { %976 = vmatmul.mubr.bf16.gmra.mxu0 %v5672_v26  ;;  %1169 = vmatmul.mubr.bf16.gmra.mxu1 %v5672_v26 }
  0x85   : > { %985 = vmatprep.mubr.bf16.mxu0 %v8281_v2  ;;  %1178 = vmatprep.mubr.bf16.mxu1 %v8281_v2 }
  0x8c   : > { %986 = vmatmul.mubr.bf16.gmra.mxu0 %v5680_v27  ;;  %1179 = vmatmul.mubr.bf16.gmra.mxu1 %v5680_v27 }
  0x8d   : > { %995 = vmatprep.mubr.bf16.mxu0 %v8281_v2  ;;  %1188 = vmatprep.mubr.bf16.mxu1 %v8281_v2 }
  0x94   : > { %996 = vmatmul.mubr.bf16.gmra.mxu0 %v5688_v29  ;;  %1189 = vmatmul.mubr.bf16.gmra.mxu1 %v5688_v29 }
  0x95   : > { %1005 = vmatprep.mubr.bf16.mxu0 %v8281_v2  ;;  %1198 = vmatprep.mubr.bf16.mxu1 %v8281_v2 }
  0x9c   : > { %1006 = vmatmul.mubr.bf16.gmra.mxu0 %v5696_v30  ;;  %1199 = vmatmul.mubr.bf16.gmra.mxu1 %v5696_v30 }
  0x9d   : > { %1015 = vmatprep.mubr.bf16.mxu0 %v8281_v2  ;;  %1208 = vmatprep.mubr.bf16.mxu1 %v8281_v2 }
  0xa4   : > { %1016 = vmatmul.mubr.bf16.gmra.mxu0 %v5704_v31  ;;  %1209 = vmatmul.mubr.bf16.gmra.mxu1 %v5704_v31 }
  0xa5   : > { %1025 = vmatprep.mubr.bf16.mxu0 %v8281_v2  ;;  %1218 = vmatprep.mubr.bf16.mxu1 %v8281_v2 }
  0xac   : > { %1026 = vmatmul.mubr.bf16.gmra.mxu0 %v5712_v35  ;;  %1219 = vmatmul.mubr.bf16.gmra.mxu1 %v5712_v35 }
  0xad   : > { %1261 = vmatprep.mubr.bf16.mxu0 %v8281_v2 }
  0xb4   : > { %1262 = vmatmul.mubr.bf16.vlgmr.msra.gmra.mxu0 %v5419_v13 }
  0xb5   : > { %1271 = vmatprep.mubr.bf16.mxu0 %v8281_v2 }
  0xbc   : > { %1272 = vmatmul.mubr.bf16.gmra.mxu0 %v5452_v32 }
  0xbd   : > { %1281 = vmatprep.mubr.bf16.mxu0 %v8281_v2 }
  0xc4   : > { %1282 = vmatmul.mubr.bf16.gmra.mxu0 %v5539_v12 }
  0xc5   : > { %1291 = vmatprep.mubr.bf16.mxu0 %v8281_v2 }
  0xcc   : > { %1292 = vmatmul.mubr.bf16.gmra.mxu0 %v5575_v28 }
  0xcd   : > { %1301 = vmatprep.mubr.bf16.mxu0 %v8281_v2 }
  0xd4   : > { %1302 = vmatmul.mubr.bf16.gmra.mxu0 %v5605_v45 }
  0xd5   : > { %1311 = vmatprep.mubr.bf16.mxu0 %v8281_v2 }
  0xdc   : > { %1312 = vmatmul.mubr.bf16.gmra.mxu0 %v5626_v60 }
  0xdd   : > { %1321 = vmatprep.mubr.bf16.mxu0 %v8281_v2 }
  0xe4   : > { %1322 = vmatmul.mubr.bf16.gmra.mxu0 %v5644_v14 }
  0xe5   : > { %1331 = vmatprep.mubr.bf16.mxu0 %v8281_v2 }
  0xec   : > { %1332 = vmatmul.mubr.bf16.gmra.mxu0 %v546_v25 }
  0xed   : > { %1341 = vmatprep.mubr.bf16.mxu0 %v8281_v2 }
  0xf4   : > { %v877_v13 = vpop.f32.mrf.mxu0  ;;  %1342 = vmatmul.mubr.bf16.gmra.mxu0 %v547_v56  ;;  %v5735_v12 = vpop.f32.mrf.mxu1 }
  0xf5   : > { %1351 = vmatprep.mubr.bf16.mxu0 %v8281_v2 }
  0xf6   : > { %v5733_v32 = vpop.f32.mrf.mxu0  ;;  %v5737_v38 = vpop.f32.mrf.mxu1 }
  0xf7   : > { %8512 = vst [vmem:[#allocation34_spill] sm:$0xff] %v5733_v32  ;;  %8513 = vst [vmem:[#allocation35_spill] sm:$0xff] %v5737_v38 }
  0xf8   : > { %v881_v28 = vpop.f32.mrf.mxu0  ;;  %v5743_v43 = vpop.f32.mrf.mxu1 }
  0xf9   : > { %v5739_v41 = vpack.c.bf16 %v881_v28, %v877_v13 }
  0xfa   : > { %v5741_v42 = vpop.f32.mrf.mxu0  ;;  %v5748_v51 = vpop.f32.mrf.mxu1 }
  0xfb   : > { %8514 = vst [vmem:[#allocation36_spill] sm:$0xff] %v5739_v41  ;;  %8515 = vst [vmem:[#allocation37_spill] sm:$0xff] %v5741_v42  ;;  %4286 = vmatprep.mubr.bf16.mxu1 %v5739_v41 }
  0xfc   : > { %v887_v49 = vpop.f32.mrf.mxu0  ;;  %1352 = vmatmul.mubr.bf16.gmra.mxu0 %v548_v0  ;;  %8516 = vst [vmem:[#allocation38_spill] sm:$0xff] %v5748_v51  ;;  %v5753_v58 = vpop.f32.mrf.mxu1 }
  0xfd   : > { %1361 = vmatprep.mubr.bf16.mxu0 %v8281_v2 }
  0xfe   : > { %v5751_v52 = vpop.f32.mrf.mxu0  ;;  %v5755_v60 = vpop.f32.mrf.mxu1 }
  0xff   : > { %8517 = vst [vmem:[#allocation39_spill] sm:$0xff] %v5751_v52  ;;  %8518 = vst [vmem:[#allocation40_spill] sm:$0xff] %v5755_v60 }
 0x100   : > { %v891_v59 = vpop.f32.mrf.mxu0  ;;  %v5761_v10 = vpop.f32.mrf.mxu1 }
 0x101   : > { %v5757_v61 = vpack.c.bf16 %v891_v59, %v887_v49 }
 0x102   : > { %v5759_v62 = vpop.f32.mrf.mxu0  ;;  %v5766_v15 = vpop.f32.mrf.mxu1 }
 0x103   : > { %8519 = vst [vmem:[#allocation41_spill] sm:$0xff] %v5757_v61  ;;  %8520 = vst [vmem:[#allocation42_spill] sm:$0xff] %v5759_v62 }
 0x104   : > { %v897_v14 = vpop.f32.mrf.mxu0  ;;  %1362 = vmatmul.mubr.bf16.gmra.mxu0 %v5672_v26  ;;  %8521 = vst [vmem:[#allocation43_spill] sm:$0xff] %v5766_v15  ;;  %v5771_v25 = vpop.f32.mrf.mxu1 }
 0x105   : > { %1371 = vmatprep.mubr.bf16.mxu0 %v8281_v2 }
 0x106   : > { %v5769_v18 = vpop.f32.mrf.mxu0  ;;  %v5773_v0 = vpop.f32.mrf.mxu1 }
 0x107   : > { %8522 = vst [vmem:[#allocation44_spill] sm:$0xff] %v5769_v18  ;;  %8523 = vst [vmem:[#allocation45_spill] sm:$0xff] %v5773_v0 }
 0x108   : > { %v901_v56 = vpop.f32.mrf.mxu0  ;;  %v5779_v49 = vpop.f32.mrf.mxu1 }
 0x109   : > { %v5775_v13 = vpack.c.bf16 %v901_v56, %v897_v14 }
 0x10a   : > { %v5777_v28 = vpop.f32.mrf.mxu0  ;;  %v5784_v45 = vpop.f32.mrf.mxu1 }
 0x10b   : > { %8524 = vst [vmem:[#allocation46_spill] sm:$0xff] %v5775_v13  ;;  %8525 = vst [vmem:[#allocation47_spill] sm:$0xff] %v5777_v28 }
 0x10c   : > { %v907_v59 = vpop.f32.mrf.mxu0  ;;  %1372 = vmatmul.mubr.bf16.gmra.mxu0 %v5680_v27  ;;  %8526 = vst [vmem:[#allocation48_spill] sm:$0xff] %v5784_v45  ;;  %v5789_v20 = vpop.f32.mrf.mxu1 }
 0x10d   : > { %1381 = vmatprep.mubr.bf16.mxu0 %v8281_v2 }
 0x10e   : > { %v5787_v11 = vpop.f32.mrf.mxu0  ;;  %v5791_v56 = vpop.f32.mrf.mxu1 }
 0x10f   : > { %8527 = vst [vmem:[#allocation49_spill] sm:$0xff] %v5787_v11  ;;  %8528 = vst [vmem:[#allocation50_spill] sm:$0xff] %v5791_v56 }
 0x110   : > { %v911_v14 = vpop.f32.mrf.mxu0  ;;  %v5797_v8 = vpop.f32.mrf.mxu1 }
 0x111   : > { %v5793_v19 = vpack.c.bf16 %v911_v14, %v907_v59 }
 0x112   : > { %v5795_v9 = vpop.f32.mrf.mxu0  ;;  %v5802_v2 = vpop.f32.mrf.mxu1 }
 0x113   : > { %8529 = vst [vmem:[#allocation51_spill] sm:$0xff] %v5793_v19  ;;  %8530 = vst [vmem:[#allocation52_spill] sm:$0xff] %v5802_v2 }
 0x114   : > { %v917_v26 = vpop.f32.mrf.mxu0  ;;  %1382 = vmatmul.mubr.bf16.gmra.mxu0 %v5688_v29  ;;  %v5807_v63 = vpop.f32.mrf.mxu1 }
 0x115   : > { %1391 = vmatprep.mubr.bf16.mxu0 %v8531_v4 }
 0x116   : > { %v5805_v1 = vpop.f32.mrf.mxu0  ;;  %v5809_v14 = vpop.f32.mrf.mxu1 }
 0x117   : > { %8532 = vst [vmem:[#allocation53_spill] sm:$0xff] %v5809_v14 }
 0x118   : > { %v921_v59 = vpop.f32.mrf.mxu0  ;;  %v5817_v48 = vpop.f32.mrf.mxu1 }
 0x119   : > { %v5811_v55 = vpack.c.bf16 %v921_v59, %v917_v26 }
 0x11a   : > { %v5815_v27 = vpop.f32.mrf.mxu0  ;;  %v5820_v47 = vpop.f32.mrf.mxu1 }
 0x11b   : > { %8533 = vst [vmem:[#allocation54_spill] sm:$0xff] %v5811_v55  ;;  %8534 = vst [vmem:[#allocation55_spill] sm:$0xff] %v5820_v47 }
 0x11c   : > { %v927_v29 = vpop.f32.mrf.mxu0  ;;  %1392 = vmatmul.mubr.bf16.gmra.mxu0 %v5696_v30  ;;  %v5825_v40 = vpop.f32.mrf.mxu1 }
 0x11d   : > { %1401 = vmatprep.mubr.bf16.mxu0 %v8531_v4 }
 0x11e   : > { %v5823_v44 = vpop.f32.mrf.mxu0  ;;  %v5827_v59 = vpop.f32.mrf.mxu1 }
 0x11f   : > { %8535 = vst [vmem:[#allocation56_spill] sm:$0xff] %v5827_v59 }
 0x120   : > { %v931_v26 = vpop.f32.mrf.mxu0  ;;  %v5835_v33 = vpop.f32.mrf.mxu1 }
 0x121   : > { %v5829_v39 = vpack.c.bf16 %v931_v26, %v927_v29 }
 0x122   : > { %v5833_v34 = vpop.f32.mrf.mxu0  ;;  %v5838_v24 = vpop.f32.mrf.mxu1 }
 0x123   : > { %8536 = vst [vmem:[#allocation57_spill] sm:$0xff] %v5829_v39  ;;  %8537 = vst [vmem:[#allocation58_spill] sm:$0xff] %v5838_v24 }
 0x124   : > { %v937_v30 = vpop.f32.mrf.mxu0  ;;  %1402 = vmatmul.mubr.bf16.gmra.mxu0 %v5704_v31  ;;  %v5843_v7 = vpop.f32.mrf.mxu1 }
 0x125   : > { %1411 = vmatprep.mubr.bf16.mxu0 %v8531_v4 }
 0x126   : > { %v5841_v21 = vpop.f32.mrf.mxu0  ;;  %v5845_v26 = vpop.f32.mrf.mxu1 }
 0x127   : > { %8538 = vst [vmem:[#allocation59_spill] sm:$0xff] %v5845_v26 }
 0x128   : > { %v941_v29 = vpop.f32.mrf.mxu0  ;;  %v5853_v53 = vpop.f32.mrf.mxu1 }
 0x129   : > { %v5847_v3 = vpack.c.bf16 %v941_v29, %v937_v30 }
 0x12a   : > { %v5851_v57 = vpop.f32.mrf.mxu0  ;;  %v5856_v4 = vpop.f32.mrf.mxu1 }
 0x12b   : > { %8539 = vst [vmem:[#allocation60_spill] sm:$0xff] %v5847_v3  ;;  %8540 = vst [vmem:[#allocation61_spill] sm:$0xff] %v5856_v4 }
 0x12c   : > { %v947_v31 = vpop.f32.mrf.mxu0  ;;  %1412 = vmatmul.mubr.bf16.gmra.mxu0 %v5712_v35  ;;  %v5860_v36 = vpop.f32.mrf.mxu1 }
 0x12e   : > { %v5858_v37 = vpop.f32.mrf.mxu0  ;;  %v5862_v22 = vpop.f32.mrf.mxu1 }
 0x12f   : > { %8541 = vst [vmem:[#allocation62_spill] sm:$0xff] %v5862_v22 }
 0x130   : > { %v951_v23 = vpop.f32.mrf.mxu0  ;;  %v5870_v54 = vpop.f32.mrf.mxu1 }
 0x131   : > { %v5864_v30 = vpack.c.bf16 %v951_v23, %v947_v31 }
 0x132   : > { %v5868_v50 = vpop.f32.mrf.mxu0  ;;  %v5872_v35 = vpop.f32.mrf.mxu1 }
 0x133   : > { %8542 = vst [vmem:[#allocation63_spill] sm:$0xff] %v5864_v30  ;;  %8543 = vst [vmem:[#allocation64_spill] sm:$0xff] %v5872_v35 }
 0x134   : > { %v957_v46 = vpop.f32.mrf.mxu0  ;;  %v5876_v16 = vpop.f32.mrf.mxu1 }
 0x136   : > { %v5874_v17 = vpop.f32.mrf.mxu0  ;;  %v5878_v5 = vpop.f32.mrf.mxu1 }
 0x137   : > { %8544 = vst [vmem:[#allocation65_spill] sm:$0xff] %v5874_v17  ;;  %8545 = vst [vmem:[#allocation66_spill] sm:$0xff] %v5878_v5 }
 0x138   : > { %v961_v6 = vpop.f32.mrf.mxu0  ;;  %v5886_v29 = vpop.f32.mrf.mxu1 }
 0x139   : > { %v5880_v22 = vpack.c.bf16 %v961_v6, %v957_v46 }
 0x13a   : > { %v5884_v31 = vpop.f32.mrf.mxu0  ;;  %v5888_v26 = vpop.f32.mrf.mxu1 }
 0x13b   : > { %8546 = vst [vmem:[#allocation67_spill] sm:$0xff] %v5880_v22  ;;  %8547 = vst [vmem:[#allocation68_spill] sm:$0xff] %v5884_v31 }
 0x13c   : > { %v967_v4 = vpop.f32.mrf.mxu0  ;;  %8548 = vst [vmem:[#allocation69_spill] sm:$0xff] %v5888_v26  ;;  %v5892_v24 = vpop.f32.mrf.mxu1 }
 0x13e   : > { %v5890_v35 = vpop.f32.mrf.mxu0  ;;  %v5894_v47 = vpop.f32.mrf.mxu1 }
 0x13f   : > { %8549 = vst [vmem:[#allocation70_spill] sm:$0xff] %v5890_v35  ;;  %8550 = vst [vmem:[#allocation71_spill] sm:$0xff] %v5894_v47 }
 0x140   : > { %v971_v59 = vpop.f32.mrf.mxu0  ;;  %v5902_v23 = vpop.f32.mrf.mxu1 }
 0x141   : > { %v5896_v5 = vpack.c.bf16 %v971_v59, %v967_v4 }
 0x142   : > { %v5900_v46 = vpop.f32.mrf.mxu0  ;;  %v5904_v2 = vpop.f32.mrf.mxu1 }
 0x143   : > { %8551 = vst [vmem:[#allocation72_spill] sm:$0xff] %v5896_v5  ;;  %8552 = vst [vmem:[#allocation73_spill] sm:$0xff] %v5900_v46 }
 0x144   : > { %v977_v14 = vpop.f32.mrf.mxu0  ;;  %8553 = vst [vmem:[#allocation74_spill] sm:$0xff] %v5904_v2  ;;  %v5908_v56 = vpop.f32.mrf.mxu1 }
 0x146   : > { %v5906_v26 = vpop.f32.mrf.mxu0  ;;  %v5910_v0 = vpop.f32.mrf.mxu1 }
 0x147   : > { %8554 = vst [vmem:[#allocation75_spill] sm:$0xff] %v5910_v0 }
 0x148   : > { %v981_v45 = vpop.f32.mrf.mxu0  ;;  %v5918_v6 = vpop.f32.mrf.mxu1 }
 0x149   : > { %v5912_v47 = vpack.c.bf16 %v981_v45, %v977_v14  ;;  %v2358_v45 = vpack.c.bf16 %v5870_v54, %v5860_v36 }
 0x14a   : > { %v5916_v4 = vpop.f32.mrf.mxu0  ;;  %v5920_v60 = vpop.f32.mrf.mxu1 }
 0x14b   : > { %8555 = vst [vmem:[#allocation76_spill] sm:$0xff] %v5912_v47  ;;  %8556 = vst [vmem:[#allocation77_spill] sm:$0xff] %v5920_v60 }
 0x14c   : > { %v987_v15 = vpop.f32.mrf.mxu0  ;;  %v5924_v51 = vpop.f32.mrf.mxu1 }
 0x14e   : > { %v5922_v2 = vpop.f32.mrf.mxu0  ;;  %v5926_v5 = vpop.f32.mrf.mxu1 }
 0x14f   : > { %8557 = vst [vmem:[#allocation78_spill] sm:$0xff] %v5926_v5 }
 0x150   : > { %v991_v38 = vpop.f32.mrf.mxu0  ;;  %v5934_v59 = vpop.f32.mrf.mxu1 }
 0x151   : > { %v5928_v0 = vpack.c.bf16 %v991_v38, %v987_v15 }
 0x152   : > { %v5932_v14 = vpop.f32.mrf.mxu0  ;;  %v5936_v22 = vpop.f32.mrf.mxu1 }
 0x153   : > { %8558 = vst [vmem:[#allocation79_spill] sm:$0xff] %v5928_v0  ;;  %8559 = vst [vmem:[#allocation80_spill] sm:$0xff] %v5936_v22 }
 0x154   : > { %v997_v47 = vpop.f32.mrf.mxu0  ;;  %v5940_v30 = vpop.f32.mrf.mxu1 }
 0x156   : > { %v5938_v60 = vpop.f32.mrf.mxu0  ;;  %v5942_v39 = vpop.f32.mrf.mxu1 }
 0x157   : > { %8560 = vst [vmem:[#allocation81_spill] sm:$0xff] %v5942_v39 }
 0x158   : > { %v1001_v3 = vpop.f32.mrf.mxu0  ;;  %v1194_v36 = vpop.f32.mrf.mxu1 }
 0x159   : > { %v5944_v5 = vpack.c.bf16 %v1001_v3, %v997_v47 }
 0x15a   : > { %v5948_v54 = vpop.f32.mrf.mxu0  ;;  %v5950_v0 = vpop.f32.mrf.mxu1 }
 0x15b   : > { %8561 = vst [vmem:[#allocation82_spill] sm:$0xff] %v5944_v5  ;;  %8562 = vst [vmem:[#allocation83_spill] sm:$0xff] %v5950_v0 }
 0x15c   : > { %v1007_v15 = vpop.f32.mrf.mxu0  ;;  %v1200_v22 = vpop.f32.mrf.mxu1 }
 0x15e   : > { %v1009_v55 = vpop.f32.mrf.mxu0  ;;  %v5952_v13 = vpop.f32.mrf.mxu1 }
 0x15f   : > { %8563 = vst [vmem:[#allocation84_spill] sm:$0xff] %v5952_v13 }
 0x160   : > { %v1011_v19 = vpop.f32.mrf.mxu0  ;;  %v1204_v39 = vpop.f32.mrf.mxu1 }
 0x161   : > { %v5954_v61 = vpack.c.bf16 %v1011_v19, %v1007_v15 }
 0x162   : > { %v1013_v3 = vpop.f32.mrf.mxu0  ;;  %v5958_v38 = vpop.f32.mrf.mxu1 }
 0x163   : > { %8564 = vst [vmem:[#allocation85_spill] sm:$0xff] %v5954_v61  ;;  %8565 = vst [vmem:[#allocation86_spill] sm:$0xff] %v5958_v38 }
 0x164   : > { %v1017_v5 = vpop.f32.mrf.mxu0  ;;  %v1210_v32 = vpop.f32.mrf.mxu1 }
 0x166   : > { %v1019_v41 = vpop.f32.mrf.mxu0  ;;  %v5960_v52 = vpop.f32.mrf.mxu1 }
 0x167   : > { %8566 = vst [vmem:[#allocation87_spill] sm:$0xff] %v5960_v52 }
 0x168   : > { %v1021_v42 = vpop.f32.mrf.mxu0  ;;  %v1214_v31 = vpop.f32.mrf.mxu1 }
 0x169   : > { %v5962_v0 = vpack.c.bf16 %v1021_v42, %v1017_v5  ;;  %v2365_v35 = vpack.c.bf16 %v1214_v31, %v1210_v32  ;;  %v1509_v5 = vpack.c.bf16 %v5868_v50, %v5858_v37  ;;  %v8570_v50 = vpack.c.bf16 %v5853_v53, %v5843_v7  ;;  %v8622_v32 = vld [vmem:[#allocation57_spill] sm:$0xff] }
 0x16a   : > { %v1023_v62 = vpop.f32.mrf.mxu0  ;;  %v5964_v19 = vpop.f32.mrf.mxu1  ;;  %v2363_v37 = vpack.c.bf16 %v1194_v36, %v5940_v30  ;;  %v2362_v53 = vpack.c.bf16 %v5934_v59, %v5924_v51  ;;  %v8576_v30 = vpack.c.bf16 %v5797_v8, %v5789_v20  ;;  %v1506_v8 = vpack.c.bf16 %v5815_v27, %v5805_v1  ;;  %v8590_v59 = vld [vmem:[#allocation73_spill] sm:$0xff] }
 0x16b   : > { %8567 = vst [vmem:[#allocation88_spill] sm:$0xff] %v5964_v19  ;;  %v1516_v52 = vpack.c.bf16 %v1023_v62, %v1019_v41  ;;  %v1508_v41 = vpack.c.bf16 %v5851_v57, %v5841_v21  ;;  %v8572_v62 = vpack.c.bf16 %v5835_v33, %v5825_v40  ;;  %v2361_v33 = vpack.c.bf16 %v5918_v6, %v5908_v56  ;;  %v8625_v57 = vld [vmem:[#allocation60_spill] sm:$0xff]  ;;  %v8628_v6 = vld [vmem:[#allocation63_spill] sm:$0xff] }
 0x16c   : > { %v1027_v13 = vpop.f32.mrf.mxu0  ;;  %v1220_v61 = vpop.f32.mrf.mxu1  ;;  %v1507_v40 = vpack.c.bf16 %v5833_v34, %v5823_v44  ;;  %v8578_v44 = vpack.c.bf16 %v5779_v49, %v5771_v25  ;;  %v1513_v56 = vpack.c.bf16 %v5932_v14, %v5922_v2  ;;  %v8581_v31 = vpack.c.bf16 %v5761_v10, %v5753_v58  ;;  %v8593_v14 = vld [vmem:[#allocation44_spill] sm:$0xff] }
 0x16d   : > { %v8584_v2 = vpack.c.bf16 %v5743_v43, %v5735_v12  ;;  %v1512_v58 = vpack.c.bf16 %v5916_v4, %v5906_v26  ;;  %v8589_v43 = vld [vmem:[#allocation70_spill] sm:$0xff]  ;;  %v8592_v4 = vld [vmem:[#allocation47_spill] sm:$0xff] }
 0x16e   : > { %v1029_v15 = vpop.f32.mrf.mxu0  ;;  %v5966_v17 = vpop.f32.mrf.mxu1 }
 0x170   : > { %v1031_v47 = vpop.f32.mrf.mxu0  ;;  %v1224_v28 = vpop.f32.mrf.mxu1 }
 0x171   : > { %v5968_v18 = vpack.c.bf16 %v1031_v47, %v1027_v13  ;;  %v2366_v11 = vpack.c.bf16 %v1224_v28, %v1220_v61  ;;  %v2364_v13 = vpack.c.bf16 %v1204_v39, %v1200_v22  ;;  %v1515_v39 = vpack.c.bf16 %v1013_v3, %v1009_v55 }
 0x172   : > { %v1033_v38 = vpop.f32.mrf.mxu0  ;;  %v8574_v55 = vpack.c.bf16 %v5817_v48, %v5807_v63 }
 0x173   : > { %v1517_v46 = vpack.c.bf16 %v1033_v38, %v1029_v15  ;;  %4318 = vmatprep.subr.bf16.mxu0 %v2366_v11  ;;  %v1514_v11 = vpack.c.bf16 %v5948_v54, %v5938_v60  ;;  %v8579_v60 = vpack.c.bf16 %v5902_v23, %v5892_v24  ;;  %v8582_v24 = vpack.c.bf16 %v5886_v29, %v5876_v16  ;;  %v8586_v16 = vld [vmem:[#allocation49_spill] sm:$0xff] }
 0x174   : > { %v5972_v42 = vpop.f32.mrf.mxu0  ;;  %4319 = vmatpush3.bf16.msra.mxu0 %v2358_v45  ;;  %v8587_v29 = vpack.c.bf16 %v5795_v9, %v8586_v16  ;;  %v1511_v45 = vpack.c.bf16 %v8590_v59, %v8589_v43  ;;  %v8594_v38 = vpack.c.bf16 %v8592_v4, %v8593_v14  ;;  %v8596_v15 = vld [vmem:[#allocation65_spill] sm:$0xff]  ;;  %v8613_v4 = vld [vmem:[#allocation46_spill] sm:$0xff] }
 0x175   : > { %4270 = vmatprep.subr.bf16.mxu1 %v1517_v46  ;;  %4320 = vmatprep.subr.bf16.mxu0 %v2365_v35 }
 0x176   : > { %v5974_v19 = vpop.f32.mrf.mxu0  ;;  %4271 = vmatpush3.bf16.xpose.msra.mxu1 %v1509_v5  ;;  %v8597_v5 = vld [vmem:[#allocation68_spill] sm:$0xff] }
 0x177   : > { %8568 = vst [vmem:[#allocation89_spill] sm:$0xff] %v5974_v19  ;;  %4272 = vmatprep.subr.bf16.mxu1 %v1516_v52 }
 0x178   : > { %v5976_v47 = vpop.f32.mrf.mxu0  ;;  %4321 = vmatpush3.bf16.msra.mxu0 %v8570_v50 }
 0x179   : > { %4322 = vmatprep.subr.bf16.mxu0 %v2364_v13  ;;  %v1510_v13 = vpack.c.bf16 %v8597_v5, %v8596_v15 }
 0x17a   : > { %v5980_v61 = vpop.f32.mrf.mxu0 }
 0x17b   : > { %8569 = vst [vmem:[#allocation90_spill] sm:$0xff] %v5980_v61 }
 0x17c   : > { %v5988_v52 = vpop.f32.mrf.mxu0  ;;  %4323 = vmatpush3.bf16.msra.mxu0 %v8572_v62 }
 0x17d   : > { %4324 = vmatprep.subr.bf16.mxu0 %v2363_v37  ;;  %v8599_v37 = vld [vmem:[#allocation42_spill] sm:$0xff] }
 0x17e   : > { %v5990_v22 = vpop.f32.mrf.mxu0  ;;  %4273 = vmatpush3.bf16.xpose.msra.mxu1 %v1508_v41  ;;  %v8600_v41 = vld [vmem:[#allocation39_spill] sm:$0xff] }
 0x17f   : > { %8571 = vst [vmem:[#allocation91_spill] sm:$0xff] %v5990_v22  ;;  %4274 = vmatprep.subr.bf16.mxu1 %v1515_v39  ;;  %v8601_v39 = vpack.c.bf16 %v8599_v37, %v8600_v41  ;;  %v8616_v37 = vld [vmem:[#allocation51_spill] sm:$0xff] }
 0x180   : > { %v5997_v7 = vpop.f32.mrf.mxu0  ;;  %4325 = vmatpush3.bf16.msra.mxu0 %v8574_v55 }
 0x181   : > { %4326 = vmatprep.subr.bf16.mxu0 %v2362_v53 }
 0x182   : > { %v6001_v21 = vpop.f32.mrf.mxu0 }
 0x183   : > { %8573 = vst [vmem:[#allocation92_spill] sm:$0xff] %v6001_v21 }
 0x184   : > { %v6010_v51 = vpop.f32.mrf.mxu0  ;;  %4327 = vmatpush3.bf16.msra.mxu0 %v8576_v30  ;;  %v8605_v30 = vld [vmem:[#allocation34_spill] sm:$0xff] }
 0x185   : > { %4328 = vmatprep.subr.bf16.mxu0 %v2361_v33 }
 0x186   : > { %v6014_v28 = vpop.f32.mrf.mxu0  ;;  %4275 = vmatpush3.bf16.xpose.msra.mxu1 %v1507_v40 }
 0x187   : > { %8575 = vst [vmem:[#allocation93_spill] sm:$0xff] %v6014_v28  ;;  %4276 = vmatprep.subr.bf16.mxu1 %v1514_v11  ;;  %v8604_v11 = vld [vmem:[#allocation37_spill] sm:$0xff] }
 0x188   : > { %v6019_v48 = vpop.f32.mrf.mxu0  ;;  %4329 = vmatpush3.bf16.msra.mxu0 %v8578_v44  ;;  %v8606_v44 = vpack.c.bf16 %v8604_v11, %v8605_v30 }
 0x189   : > { %4330 = vmatprep.subr.bf16.mxu0 %v8579_v60 }
 0x18a   : > { %v6023_v34 = vpop.f32.mrf.mxu0 }
 0x18b   : > { %8577 = vst [vmem:[#allocation94_spill] sm:$0xff] %v6023_v34 }
 0x18c   : > { %v6033_v20 = vpop.f32.mrf.mxu0  ;;  %4331 = vmatpush3.bf16.msra.mxu0 %v8581_v31 }
 0x18d   : > { %4332 = vmatprep.subr.bf16.mxu0 %v8582_v24  ;;  %v8608_v24 = vld [vmem:[#allocation36_spill] sm:$0xff] }
 0x18e   : > { %v6037_v35 = vpop.f32.mrf.mxu0  ;;  %4277 = vmatpush3.bf16.xpose.msra.mxu1 %v1506_v8 }
 0x18f   : > { %8580 = vst [vmem:[#allocation95_spill] sm:$0xff] %v6037_v35  ;;  %4278 = vmatprep.subr.bf16.mxu1 %v1513_v56 }
 0x190   : > { %v6045_v25 = vpop.f32.mrf.mxu0  ;;  %4333 = vmatpush3.bf16.msra.mxu0 %v8584_v2 }
 0x192   : > { %v6049_v49 = vpop.f32.mrf.mxu0 }
 0x193   : > { %8583 = vst [vmem:[#allocation96_spill] sm:$0xff] %v6049_v49 }
 0x194   : > { %v6054_v27 = vpop.f32.mrf.mxu0 }
 0x196   : > { %v6058_v10 = vpop.f32.mrf.mxu0  ;;  %4279 = vmatpush3.bf16.xpose.msra.mxu1 %v8587_v29 }
 0x197   : > { %8585 = vst [vmem:[#allocation97_spill] sm:$0xff] %v6058_v10  ;;  %4280 = vmatprep.subr.bf16.mxu1 %v1512_v58  ;;  %v8610_v58 = vld [vmem:[#allocation41_spill] sm:$0xff] }
 0x198   : > { %v6063_v23 = vpop.f32.mrf.mxu0 }
 0x19a   : > { %v6067_v46 = vpop.f32.mrf.mxu0 }
 0x19b   : > { %8588 = vst [vmem:[#allocation49_spill] sm:$0xff] %v6067_v46 }
 0x19c   : > { %v6069_v12 = vpop.f32.mrf.mxu0 }
 0x19e   : > { %v6073_v26 = vpop.f32.mrf.mxu0  ;;  %4281 = vmatpush3.bf16.xpose.msra.mxu1 %v8594_v38 }
 0x19f   : > { %8591 = vst [vmem:[#allocation70_spill] sm:$0xff] %v6073_v26  ;;  %4282 = vmatprep.subr.bf16.mxu1 %v1511_v45 }
 0x1a0   : > { %v6078_v9 = vpop.f32.mrf.mxu0 }
 0x1a2   : > { %v6082_v36 = vpop.f32.mrf.mxu0 }
 0x1a3   : > { %8595 = vst [vmem:[#allocation73_spill] sm:$0xff] %v6082_v36 }
 0x1a4   : > { %v6084_v3 = vpop.f32.mrf.mxu0 }
 0x1a6   : > { %v6088_v50 = vpop.f32.mrf.mxu0  ;;  %4283 = vmatpush3.bf16.xpose.msra.mxu1 %v8601_v39 }
 0x1a7   : > { %8598 = vst [vmem:[#allocation47_spill] sm:$0xff] %v6088_v50  ;;  %4284 = vmatprep.subr.bf16.mxu1 %v1510_v13 }
 0x1a8   : > { %v6093_v62 = vpop.f32.mrf.mxu0 }
 0x1aa   : > { %v6097_v55 = vpop.f32.mrf.mxu0 }
 0x1ab   : > { %8602 = vst [vmem:[#allocation44_spill] sm:$0xff] %v6097_v55 }
 0x1ac   : > { %v1333_v33 = vpop.f32.mrf.mxu0 }
 0x1ae   : > { %v6099_v40 = vpop.f32.mrf.mxu0  ;;  %4285 = vmatpush3.bf16.xpose.msra.mxu1 %v8606_v44  ;;  %v8619_v44 = vld [vmem:[#allocation54_spill] sm:$0xff] }
 0x1af   : > { %8603 = vst [vmem:[#allocation65_spill] sm:$0xff] %v6099_v40 }
 0x1b0   : > { %v1337_v60 = vpop.f32.mrf.mxu0 }
 0x1b1   : > { %v2615_v8 = vpack.c.bf16 %v1337_v60, %v1333_v33 }
 0x1b2   : > { %v6104_v56 = vpop.f32.mrf.mxu0 }
 0x1b3   : > { %8607 = vst [vmem:[#allocation68_spill] sm:$0xff] %v6104_v56 }
 0x1b4   : > { %v6106_v31 = vpop.f32.mrf.mxu0 }
 0x1b5   : > { %4287 = vmatmul.mubr.bf16.vlgmr.msra.gmra.mxu1 %v8608_v24 }
 0x1b6   : > { %v6109_v2 = vpop.f32.mrf.mxu0  ;;  %4288 = vmatprep.mubr.bf16.mxu1 %v8610_v58 }
 0x1b7   : > { %8609 = vst [vmem:[#allocation42_spill] sm:$0xff] %v6109_v2 }
 0x1b8   : > { %v6112_v16 = vpop.f32.mrf.mxu0 }
 0x1ba   : > { %v6116_v43 = vpop.f32.mrf.mxu0 }
 0x1bb   : > { %8611 = vst [vmem:[#allocation39_spill] sm:$0xff] %v6116_v43 }
 0x1bc   : > { %v6118_v59 = vpop.f32.mrf.mxu0 }
 0x1bd   : > { %4289 = vmatmul.mubr.bf16.gmra.mxu1 %v8610_v58 }
 0x1be   : > { %v6121_v45 = vpop.f32.mrf.mxu0  ;;  %4290 = vmatprep.mubr.bf16.mxu1 %v8613_v4 }
 0x1bf   : > { %8612 = vst [vmem:[#allocation37_spill] sm:$0xff] %v6121_v45 }
 0x1c0   : > { %v6124_v14 = vpop.f32.mrf.mxu0 }
 0x1c2   : > { %v6128_v15 = vpop.f32.mrf.mxu0 }
 0x1c3   : > { %8614 = vst [vmem:[#allocation34_spill] sm:$0xff] %v6128_v15 }
 0x1c4   : > { %v6130_v5 = vpop.f32.mrf.mxu0 }
 0x1c5   : > { %4291 = vmatmul.mubr.bf16.gmra.mxu1 %v8613_v4 }
 0x1c6   : > { %v6133_v13 = vpop.f32.mrf.mxu0  ;;  %4292 = vmatprep.mubr.bf16.mxu1 %v8616_v37 }
 0x1c7   : > { %8615 = vst [vmem:[#allocation36_spill] sm:$0xff] %v6133_v13 }
 0x1c8   : > { %v1367_v41 = vpop.f32.mrf.mxu0 }
 0x1c9   : > { %v2618_v39 = vpack.c.bf16 %v1367_v41, %v6130_v5 }
 0x1ca   : > { %v6137_v33 = vpop.f32.mrf.mxu0 }
 0x1cb   : > { %8617 = vst [vmem:[#allocation41_spill] sm:$0xff] %v6137_v33 }
 0x1cc   : > { %v1373_v11 = vpop.f32.mrf.mxu0 }
 0x1cd   : > { %4293 = vmatmul.mubr.bf16.gmra.mxu1 %v8616_v37 }
 0x1ce   : > { %v6140_v30 = vpop.f32.mrf.mxu0  ;;  %4294 = vmatprep.mubr.bf16.mxu1 %v8619_v44 }
 0x1cf   : > { %8618 = vst [vmem:[#allocation46_spill] sm:$0xff] %v6140_v30 }
 0x1d0   : > { %v1377_v60 = vpop.f32.mrf.mxu0 }
 0x1d2   : > { %v6143_v24 = vpop.f32.mrf.mxu0 }
 0x1d3   : > { %8620 = vst [vmem:[#allocation51_spill] sm:$0xff] %v6143_v24 }
 0x1d4   : > { %v1383_v58 = vpop.f32.mrf.mxu0 }
 0x1d5   : > { %4295 = vmatmul.mubr.bf16.gmra.mxu1 %v8619_v44 }
 0x1d6   : > { %v6146_v4 = vpop.f32.mrf.mxu0  ;;  %4296 = vmatprep.mubr.bf16.mxu1 %v8622_v32 }
 0x1d7   : > { %8621 = vst [vmem:[#allocation54_spill] sm:$0xff] %v6146_v4 }
 0x1d8   : > { %v1387_v5 = vpop.f32.mrf.mxu0 }
 0x1da   : > { %v6149_v41 = vpop.f32.mrf.mxu0 }
 0x1db   : > { %8623 = vst [vmem:[#allocation57_spill] sm:$0xff] %v6149_v41 }
 0x1dc   : > { %v1393_v29 = vpop.f32.mrf.mxu0 }
 0x1dd   : > { %4297 = vmatmul.mubr.bf16.gmra.mxu1 %v8622_v32 }
 0x1de   : > { %v6152_v37 = vpop.f32.mrf.mxu0  ;;  %4298 = vmatprep.mubr.bf16.mxu1 %v8625_v57 }
 0x1df   : > { %8624 = vst [vmem:[#allocation98_spill] sm:$0xff] %v6152_v37  ;;  %v8630_v37 = vld [vmem:[#allocation67_spill] sm:$0xff] }
 0x1e0   : > { %v1397_v38 = vpop.f32.mrf.mxu0 }
 0x1e2   : > { %v6155_v63 = vpop.f32.mrf.mxu0 }
 0x1e3   : > { %8626 = vst [vmem:[#allocation60_spill] sm:$0xff] %v6155_v63 }
 0x1e4   : > { %v1403_v1 = vpop.f32.mrf.mxu0 }
 0x1e5   : > { %4299 = vmatmul.mubr.bf16.gmra.mxu1 %v8625_v57  ;;  %v8631_v57 = vld [vmem:[#allocation72_spill] sm:$0xff] }
 0x1e6   : > { %v6158_v44 = vpop.f32.mrf.mxu0  ;;  %4300 = vmatprep.mubr.bf16.mxu1 %v8628_v6 }
 0x1e7   : > { %8627 = vst [vmem:[#allocation99_spill] sm:$0xff] %v6158_v44 }
 0x1e8   : > { %v1407_v54 = vpop.f32.mrf.mxu0 }
 0x1e9   : > { %v2622_v24 = vpack.c.bf16 %v1407_v54, %v1403_v1  ;;  %v8633_v1 = vld [vmem:[#allocation76_spill] sm:$0xff]  ;;  %v2620_v54 = vpack.c.bf16 %v1387_v5, %v1383_v58  ;;  %v8658_v58 = vld [vmem:[#allocation61_spill] sm:$0xff]  ;;  %v8659_v5 = vld [vmem:[#allocation62_spill] sm:$0xff] }
 0x1ea   : > { %v6161_v53 = vpop.f32.mrf.mxu0 }
 0x1eb   : > { %8629 = vst [vmem:[#allocation63_spill] sm:$0xff] %v6161_v53  ;;  %v2621_v53 = vpack.c.bf16 %v1397_v38, %v1393_v29  ;;  %v2619_v29 = vpack.c.bf16 %v1377_v60, %v1373_v11  ;;  %v8651_v38 = vld [vmem:[#allocation50_spill] sm:$0xff] }
 0x1ec   : > { %v1413_v41 = vpop.f32.mrf.mxu0 }
 0x1ed   : > { %4301 = vmatmul.mubr.bf16.gmra.mxu1 %v8628_v6  ;;  %v8632_v6 = vpack.c.bf16 %v6093_v62, %v6084_v3  ;;  %v8636_v3 = vpack.c.bf16 %v6063_v23, %v6054_v27  ;;  %v8637_v62 = vld [vmem:[#allocation82_spill] sm:$0xff]  ;;  %v8641_v27 = vpack.c.bf16 %v6124_v14, %v6118_v59  ;;  %v8646_v59 = vpack.c.bf16 %v5976_v47, %v5972_v42  ;;  %v8653_v42 = vld [vmem:[#allocation53_spill] sm:$0xff]  ;;  %v8654_v47 = vld [vmem:[#allocation55_spill] sm:$0xff] }
 0x1ee   : > { %v1415_v32 = vpop.f32.mrf.mxu0  ;;  %4302 = vmatprep.mubr.bf16.mxu1 %v8630_v37  ;;  %v2596_v11 = vpack.c.bf16 %v8654_v47, %v8653_v42  ;;  %v1426_v47 = vld [vmem:[%s8273_s8 + $0x20] sm:$0xff] }
 0x1f0   : > { %v1417_v4 = vpop.f32.mrf.mxu0 }
 0x1f1   : > { %v2623_v30 = vpack.c.bf16 %v1417_v4, %v1413_v41  ;;  %v8660_v41 = vld [vmem:[#allocation64_spill] sm:$0xff] }
 0x1f2   : > { %v1419_v63 = vpop.f32.mrf.mxu0 }
 0x1f3   : > { %4430 = vmatprep.subr.bf16.mxu1 %v2623_v30  ;;  %v3472_v33 = vpack.c.bf16 %v1419_v63, %v1415_v32  ;;  %v8634_v63 = vpack.c.bf16 %v6078_v9, %v6069_v12  ;;  %v8639_v12 = vld [vmem:[#allocation85_spill] sm:$0xff]  ;;  %v8640_v9 = vpack.c.bf16 %v6019_v48, %v6010_v51  ;;  %v8644_v51 = vld [vmem:[#allocation35_spill] sm:$0xff]  ;;  %v8645_v48 = vld [vmem:[#allocation38_spill] sm:$0xff] }
 0x1f4   : > { %4431 = vmatpush3.bf16.xpose.msra.mxu1 %v2615_v8  ;;  %v8635_v8 = vld [vmem:[#allocation79_spill] sm:$0xff]  ;;  %v2592_v23 = vpack.c.bf16 %v8645_v48, %v8644_v51  ;;  %v8656_v30 = vld [vmem:[#allocation58_spill] sm:$0xff]  ;;  %v1424_v48 = vld [vmem:[%s8273_s8 + $0x10] sm:$0xff] }
 0x1f5   : > { %4303 = vmatmul.mubr.bf16.gmra.mxu1 %v8630_v37  ;;  %4432 = vmatprep.subr.bf16.mxu1 %v2622_v24  ;;  %v8657_v24 = vld [vmem:[#allocation59_spill] sm:$0xff]  ;;  %v2599_v37 = vpack.c.bf16 %v8660_v41, %v8659_v5  ;;  %v8661_v32 = vld [vmem:[#allocation66_spill] sm:$0xff]  ;;  %v1428_v5 = vld [vmem:[%s8273_s8 + $0x30] sm:$0xff] }
 0x1f6   : > { %4304 = vmatprep.mubr.bf16.mxu1 %v8631_v57  ;;  %4478 = vmatprep.subr.bf16.mxu0 %v3472_v33  ;;  %v2598_v4 = vpack.c.bf16 %v8658_v58, %v8657_v24 }
 0x1fc   : > { %4433 = vmatpush3.bf16.xpose.msra.mxu1 %v8632_v6 }
 0x1fd   : > { %4305 = vmatmul.mubr.bf16.gmra.mxu1 %v8631_v57  ;;  %4434 = vmatprep.subr.bf16.mxu1 %v2621_v53  ;;  %v8638_v53 = vpack.c.bf16 %v6045_v25, %v6033_v20  ;;  %v8642_v20 = vpack.c.bf16 %v5997_v7, %v5988_v52  ;;  %v8643_v25 = vpack.c.bf16 %v6112_v16, %v6106_v31  ;;  %v8647_v52 = vld [vmem:[#allocation40_spill] sm:$0xff]  ;;  %v8648_v7 = vld [vmem:[#allocation43_spill] sm:$0xff]  ;;  %v8662_v57 = vld [vmem:[#allocation69_spill] sm:$0xff] }
 0x1fe   : > { %4306 = vmatprep.mubr.bf16.mxu1 %v8633_v1  ;;  %v2593_v14 = vpack.c.bf16 %v8648_v7, %v8647_v52  ;;  %v8650_v31 = vld [vmem:[#allocation48_spill] sm:$0xff]  ;;  %v2600_v6 = vpack.c.bf16 %v8662_v57, %v8661_v32  ;;  %v8665_v52 = vld [vmem:[#allocation75_spill] sm:$0xff]  ;;  %v8666_v7 = vld [vmem:[#allocation77_spill] sm:$0xff] }
 0x1ff   : > { %v8667_v32 = vld [vmem:[#allocation78_spill] sm:$0xff]  ;;  %v8668_v57 = vld [vmem:[#allocation80_spill] sm:$0xff] }
 0x204   : > { %4435 = vmatpush3.bf16.xpose.msra.mxu1 %v8634_v63  ;;  %v8664_v63 = vld [vmem:[#allocation74_spill] sm:$0xff] }
 0x205   : > { %4307 = vmatmul.mubr.bf16.gmra.mxu1 %v8633_v1  ;;  %4436 = vmatprep.subr.bf16.mxu1 %v2620_v54  ;;  %v6225_v1 = vpop.f32.mrf.mxu1  ;;  %v8663_v54 = vld [vmem:[#allocation71_spill] sm:$0xff] }
 0x206   : > { %4308 = vmatprep.mubr.bf16.mxu1 %v8635_v8 }
 0x20c   : > { %4437 = vmatpush3.bf16.xpose.msra.mxu1 %v8636_v3 }
 0x20d   : > { %4309 = vmatmul.mubr.bf16.gmra.mxu1 %v8635_v8  ;;  %4438 = vmatprep.subr.bf16.mxu1 %v2619_v29  ;;  %v2601_v8 = vpack.c.bf16 %v8664_v63, %v8663_v54 }
 0x20e   : > { %4310 = vmatprep.mubr.bf16.mxu1 %v8637_v62 }
 0x214   : > { %4439 = vmatpush3.bf16.xpose.msra.mxu1 %v8638_v53  ;;  %v1422_v53 = vld [vmem:[%s8273_s8] sm:$0xff] }
 0x215   : > { %4311 = vmatmul.mubr.bf16.gmra.mxu1 %v8637_v62  ;;  %4440 = vmatprep.subr.bf16.mxu1 %v2618_v39  ;;  %v8652_v39 = vld [vmem:[#allocation52_spill] sm:$0xff] }
 0x216   : > { %4312 = vmatprep.mubr.bf16.mxu1 %v8639_v12  ;;  %v2595_v33 = vpack.c.bf16 %v8652_v39, %v8651_v38 }
 0x21c   : > { %4441 = vmatpush3.bf16.xpose.msra.mxu1 %v8640_v9 }
 0x21d   : > { %4313 = vmatmul.mubr.bf16.gmra.mxu1 %v8639_v12  ;;  %4442 = vmatprep.subr.bf16.mxu1 %v8641_v27  ;;  %v1423_v12 = vld [vmem:[%s8273_s8 + $0x8] sm:$0xff] }
 0x21e   : > { %4314 = vmatprep.mubr.bf16.mxu1 %v5962_v0 }
 0x224   : > { %4443 = vmatpush3.bf16.xpose.msra.mxu1 %v8642_v20 }
 0x225   : > { %4315 = vmatmul.mubr.bf16.gmra.mxu1 %v5962_v0  ;;  %4444 = vmatprep.subr.bf16.mxu1 %v8643_v25  ;;  %v8649_v0 = vld [vmem:[#allocation45_spill] sm:$0xff] }
 0x226   : > { %4316 = vmatprep.mubr.bf16.mxu1 %v5968_v18  ;;  %v2594_v16 = vpack.c.bf16 %v8650_v31, %v8649_v0 }
 0x22c   : > { %4445 = vmatpush3.bf16.xpose.msra.mxu1 %v8646_v59  ;;  %v1425_v59 = vld [vmem:[%s8273_s8 + $0x18] sm:$0xff] }
 0x22d   : > { %4317 = vmatmul.mubr.bf16.gmra.mxu1 %v5968_v18  ;;  %v8655_v18 = vld [vmem:[#allocation56_spill] sm:$0xff] }
 0x22e   : > { %4446 = vmatprep.mubr.bf16.mxu1 %v2592_v23  ;;  %v2597_v60 = vpack.c.bf16 %v8656_v30, %v8655_v18 }
 0x235   : > { %4447 = vmatmul.mubr.bf16.vlgmr.msra.gmra.mxu1 %v2592_v23 }
 0x236   : > { %4448 = vmatprep.mubr.bf16.mxu1 %v2593_v14 }
 0x23d   : > { %4449 = vmatmul.mubr.bf16.gmra.mxu1 %v2593_v14  ;;  %v2602_v14 = vpack.c.bf16 %v8666_v7, %v8665_v52  ;;  %v1432_v7 = vld [vmem:[%s8273_s8 + $0x50] sm:$0xff] }
 0x23e   : > { %4450 = vmatprep.mubr.bf16.mxu1 %v2594_v16 }
 0x245   : > { %4451 = vmatmul.mubr.bf16.gmra.mxu1 %v2594_v16 }
 0x246   : > { %4452 = vmatprep.mubr.bf16.mxu1 %v2595_v33 }
 0x24d   : > { %4453 = vmatmul.mubr.bf16.gmra.mxu1 %v2595_v33 }
 0x24e   : > { %4454 = vmatprep.mubr.bf16.mxu1 %v2596_v11 }
 0x255   : > { %4455 = vmatmul.mubr.bf16.gmra.mxu1 %v2596_v11  ;;  %v1427_v11 = vld [vmem:[%s8273_s8 + $0x28] sm:$0xff] }
 0x256   : > { %4456 = vmatprep.mubr.bf16.mxu1 %v2597_v60 }
 0x25d   : > { %4457 = vmatmul.mubr.bf16.gmra.mxu1 %v2597_v60 }
 0x25e   : > { %4458 = vmatprep.mubr.bf16.mxu1 %v2598_v4 }
 0x265   : > { %4459 = vmatmul.mubr.bf16.gmra.mxu1 %v2598_v4 }
 0x266   : > { %4460 = vmatprep.mubr.bf16.mxu1 %v2599_v37 }
 0x26d   : > { %4461 = vmatmul.mubr.bf16.gmra.mxu1 %v2599_v37  ;;  %v1429_v37 = vld [vmem:[%s8273_s8 + $0x38] sm:$0xff] }
 0x26e   : > { %4462 = vmatprep.mubr.bf16.mxu1 %v2600_v6 }
 0x275   : > { %v1552_v29 = vpop.f32.mrf.mxu1  ;;  %4463 = vmatmul.mubr.bf16.gmra.mxu1 %v2600_v6  ;;  %v2603_v6 = vpack.c.bf16 %v8668_v57, %v8667_v32 }
 0x276   : > { %v1711_v3 = vmul.f32 0.17677669, %v1552_v29  ;;  %4464 = vmatprep.mubr.bf16.mxu1 %v2601_v8 }
 0x277   : > { %v1554_v62 = vpop.f32.mrf.mxu1 }
 0x278   : > { %v1712_v9 = vmul.f32 0.17677669, %v1554_v62  ;;  %v6235_v25 = vadd.f32 %v1711_v3, %v1422_v53  ;;  %v1430_v53 = vld [vmem:[%s8273_s8 + $0x40] sm:$0xff] }
 0x279   : > { %v1556_v27 = vpop.f32.mrf.mxu1 }
 0x27a   : > { %v1713_v20 = vmul.f32 0.17677669, %v1556_v27  ;;  %v6237_v51 = vadd.f32 %v1712_v9, %v1423_v12  ;;  %v1431_v12 = vld [vmem:[%s8273_s8 + $0x48] sm:$0xff] }
 0x27b   : > { %v1558_v23 = vpop.f32.mrf.mxu1 }
 0x27c   : > { %v1714_v0 = vmul.f32 0.17677669, %v1558_v23  ;;  %v1839_v31 = vmax.f32 %v6235_v25, %v6237_v51  ;;  %v6249_v38 = vadd.f32 %v1713_v20, %v1424_v48 }
 0x27d   : > { %v1562_v16 = vpop.f32.mrf.mxu1  ;;  %4465 = vmatmul.mubr.bf16.gmra.mxu1 %v2601_v8 }
 0x27e   : > { %v1715_v39 = vmul.f32 0.17677669, %v1562_v16  ;;  %1840 = vmax.xlane.f32.xlu0 %v1839_v31  ;;  %v6251_v33 = vadd.f32 %v1714_v0, %v1425_v59  ;;  %4466 = vmatprep.mubr.bf16.mxu1 %v2602_v14  ;;  %v1433_v0 = vld [vmem:[%s8273_s8 + $0x58] sm:$0xff]  ;;  %v8670_v16 = vld [vmem:[#allocation83_spill] sm:$0xff] }
 0x27f   : > { %v1564_v42 = vpop.f32.mrf.mxu1  ;;  %v8669_v31 = vld [vmem:[#allocation81_spill] sm:$0xff] }
 0x280   : > { %v1716_v18 = vmul.f32 0.17677669, %v1564_v42  ;;  %v1842_v30 = vmax.f32 %v6249_v38, %v6251_v33  ;;  %v6261_v58 = vadd.f32 %v1715_v39, %v1426_v47  ;;  %v2604_v39 = vpack.c.bf16 %v8670_v16, %v8669_v31  ;;  %v1438_v31 = vld [vmem:[%s8273_s8 + $0x80] sm:$0xff]  ;;  %v1439_v16 = vld [vmem:[%s8273_s8 + $0x88] sm:$0xff] }
 0x281   : > { %v1566_v60 = vpop.f32.mrf.mxu1 }
 0x282   : > { %v1717_v24 = vmul.f32 0.17677669, %v1566_v60  ;;  %1843 = vmax.xlane.f32.xlu0 %v1842_v30  ;;  %v6263_v4 = vadd.f32 %v1716_v18, %v1427_v11 }
 0x283   : > { %v1568_v41 = vpop.f32.mrf.mxu1 }
 0x284   : > { %v1718_v54 = vmul.f32 0.17677669, %v1568_v41  ;;  %v1845_v63 = vmax.f32 %v6261_v58, %v6263_v4  ;;  %v6275_v29 = vadd.f32 %v1717_v24, %v1428_v5  ;;  %v1434_v24 = vld [vmem:[%s8273_s8 + $0x60] sm:$0xff]  ;;  %v1435_v5 = vld [vmem:[%s8273_s8 + $0x68] sm:$0xff] }
 0x285   : > { %v1572_v8 = vpop.f32.mrf.mxu1  ;;  %4467 = vmatmul.mubr.bf16.gmra.mxu1 %v2602_v14 }
 0x286   : > { %v1719_v3 = vmul.f32 0.17677669, %v1572_v8  ;;  %1846 = vmax.xlane.f32.xlu1 %v1845_v63  ;;  %v6277_v62 = vadd.f32 %v1718_v54, %v1429_v37  ;;  %4468 = vmatprep.mubr.bf16.mxu1 %v2603_v6  ;;  %v1436_v8 = vld [vmem:[%s8273_s8 + $0x70] sm:$0xff] }
 0x287   : > { %v1574_v9 = vpop.f32.mrf.mxu1 }
 0x288   : > { %v1720_v27 = vmul.f32 0.17677669, %v1574_v9  ;;  %v1848_v20 = vmax.f32 %v6275_v29, %v6277_v62  ;;  %v6287_v23 = vadd.f32 %v1719_v3, %v1430_v53  ;;  %v1437_v53 = vld [vmem:[%s8273_s8 + $0x78] sm:$0xff]  ;;  %v8672_v9 = vld [vmem:[#allocation86_spill] sm:$0xff] }
 0x289   : > { %v1576_v48 = vpop.f32.mrf.mxu1 }
 0x28a   : > { %v6289_v59 = vadd.f32 %v1720_v27, %v1431_v12  ;;  %v1721_v52 = vmul.f32 0.17677669, %v1576_v48  ;;  %1849 = vmax.xlane.f32.xlu1 %v1848_v20  ;;  %v8671_v12 = vld [vmem:[#allocation84_spill] sm:$0xff] }
 0x28b   : > { %v1578_v14 = vpop.f32.mrf.mxu1  ;;  %v2605_v27 = vpack.c.bf16 %v8672_v9, %v8671_v12 }
 0x28c   : > { %v1722_v42 = vmul.f32 0.17677669, %v1578_v14  ;;  %v1851_v47 = vmax.f32 %v6287_v23, %v6289_v59  ;;  %v6301_v18 = vadd.f32 %v1721_v52, %v1432_v7 }
 0x28d   : > { %v1582_v11 = vpop.f32.mrf.mxu1  ;;  %4469 = vmatmul.mubr.bf16.gmra.mxu1 %v2603_v6 }
 0x28e   : > { %v1723_v30 = vmul.f32 0.17677669, %v1582_v11  ;;  %1852 = vmax.xlane.f32.xlu0 %v1851_v47  ;;  %v6303_v60 = vadd.f32 %v1722_v42, %v1433_v0  ;;  %4470 = vmatprep.mubr.bf16.mxu1 %v2604_v39 }
 0x28f   : > { %v1584_v41 = vpop.f32.mrf.mxu1 }
 0x290   : > { %v1724_v37 = vmul.f32 0.17677669, %v1584_v41  ;;  %v1854_v32 = vmax.f32 %v6301_v18, %v6303_v60  ;;  %v6313_v6 = vadd.f32 %v1723_v30, %v1434_v24  ;;  %v1440_v41 = vld [vmem:[%s8273_s8 + $0x90] sm:$0xff] }
 0x291   : > { %v1586_v57 = vpop.f32.mrf.mxu1 }
 0x292   : > { %v6315_v54 = vadd.f32 %v1724_v37, %v1435_v5  ;;  %v1725_v63 = vmul.f32 0.17677669, %v1586_v57  ;;  %1855 = vmax.xlane.f32.xlu1 %v1854_v32  ;;  %v1441_v32 = vld [vmem:[%s8273_s8 + $0x98] sm:$0xff]  ;;  %v8673_v57 = vld [vmem:[#allocation87_spill] sm:$0xff] }
 0x293   : > { %v1588_v3 = vpop.f32.mrf.mxu1 }
 0x294   : > { %v1726_v20 = vmul.f32 0.17677669, %v1588_v3  ;;  %v1857_v48 = vmax.f32 %v6313_v6, %v6315_v54  ;;  %v6327_v7 = vadd.f32 %v1725_v63, %v1436_v8  ;;  %v8674_v63 = vld [vmem:[#allocation88_spill] sm:$0xff] }
 0x295   : > { %v1592_v52 = vpop.f32.mrf.mxu1  ;;  %4471 = vmatmul.mubr.bf16.gmra.mxu1 %v2604_v39  ;;  %v2606_v8 = vpack.c.bf16 %v8674_v63, %v8673_v57 }
 0x296   : > { %v1727_v14 = vmul.f32 0.17677669, %v1592_v52  ;;  %1858 = vmax.xlane.f32.xlu0 %v1857_v48  ;;  %v6329_v0 = vadd.f32 %v1726_v20, %v1437_v53  ;;  %4472 = vmatprep.mubr.bf16.mxu1 %v2605_v27  ;;  %v1442_v52 = vld [vmem:[%s8273_s8 + $0xa0] sm:$0xff] }
 0x297   : > { %v1594_v42 = vpop.f32.mrf.mxu1 }
 0x298   : > { %v1728_v47 = vmul.f32 0.17677669, %v1594_v42  ;;  %v1860_v39 = vmax.f32 %v6327_v7, %v6329_v0  ;;  %v6339_v30 = vadd.f32 %v1727_v14, %v1438_v31  ;;  %v1443_v14 = vld [vmem:[%s8273_s8 + $0xa8] sm:$0xff] }
 0x299   : > { %v1596_v11 = vpop.f32.mrf.mxu1 }
 0x29a   : > { %v6341_v24 = vadd.f32 %v1728_v47, %v1439_v16  ;;  %v1729_v5 = vmul.f32 0.17677669, %v1596_v11  ;;  %1861 = vmax.xlane.f32.xlu1 %v1860_v39 }
 0x29b   : > { %v1598_v37 = vpop.f32.mrf.mxu1 }
 0x29c   : > { %v1730_v3 = vmul.f32 0.17677669, %v1598_v37  ;;  %v1863_v53 = vmax.f32 %v6339_v30, %v6341_v24  ;;  %v6353_v9 = vadd.f32 %v1729_v5, %v1440_v41  ;;  %v1444_v5 = vld [vmem:[%s8273_s8 + $0xb0] sm:$0xff]  ;;  %v1445_v37 = vld [vmem:[%s8273_s8 + $0xb8] sm:$0xff] }
 0x29d   : > { %v1602_v12 = vpop.f32.mrf.mxu1  ;;  %4473 = vmatmul.mubr.bf16.gmra.mxu1 %v2605_v27 }
 0x29e   : > { %v1731_v20 = vmul.f32 0.17677669, %v1602_v12  ;;  %1864 = vmax.xlane.f32.xlu0 %v1863_v53  ;;  %v6355_v48 = vadd.f32 %v1730_v3, %v1441_v32  ;;  %4474 = vmatprep.mubr.bf16.mxu1 %v2606_v8  ;;  %v2607_v32 = vpack.c.bf16 %v6225_v1, %v5966_v17  ;;  %v1447_v17 = vld [vmem:[%s8273_s8 + $0xc8] sm:$0xff] }
 0x29f   : > { %v1604_v31 = vpop.f32.mrf.mxu1 }
 0x2a0   : > { %v1732_v16 = vmul.f32 0.17677669, %v1604_v31  ;;  %v1866_v27 = vmax.f32 %v6353_v9, %v6355_v48  ;;  %v6365_v47 = vadd.f32 %v1731_v20, %v1442_v52  ;;  %v1446_v52 = vld [vmem:[%s8273_s8 + $0xc0] sm:$0xff] }
 0x2a1   : > { %v1606_v42 = vpop.f32.mrf.mxu1 }
 0x2a2   : > { %v6367_v39 = vadd.f32 %v1732_v16, %v1443_v14  ;;  %v1733_v11 = vmul.f32 0.17677669, %v1606_v42  ;;  %1867 = vmax.xlane.f32.xlu1 %v1866_v27 }
 0x2a3   : > { %v1608_v41 = vpop.f32.mrf.mxu1 }
 0x2a4   : > { %v1734_v57 = vmul.f32 0.17677669, %v1608_v41  ;;  %v1869_v63 = vmax.f32 %v6365_v47, %v6367_v39  ;;  %v6379_v53 = vadd.f32 %v1733_v11, %v1444_v5  ;;  %v1448_v11 = vld [vmem:[%s8273_s8 + $0xd0] sm:$0xff]  ;;  %v1449_v41 = vld [vmem:[%s8273_s8 + $0xd8] sm:$0xff] }
 0x2a5   : > { %v1612_v3 = vpop.f32.mrf.mxu1  ;;  %4475 = vmatmul.mubr.bf16.gmra.mxu1 %v2606_v8 }
 0x2a6   : > { %v1735_v12 = vmul.f32 0.17677669, %v1612_v3  ;;  %1870 = vmax.xlane.f32.xlu0 %v1869_v63  ;;  %v6381_v20 = vadd.f32 %v1734_v57, %v1445_v37  ;;  %4476 = vmatprep.mubr.bf16.mxu1 %v2607_v32 }
 0x2a7   : > { %v1614_v1 = vpop.f32.mrf.mxu1 }
 0x2a8   : > { %v1736_v14 = vmul.f32 0.17677669, %v1614_v1  ;;  %v1872_v8 = vmax.f32 %v6379_v53, %v6381_v20  ;;  %v6391_v16 = vadd.f32 %v1735_v12, %v1446_v52  ;;  %v1451_v1 = vld [vmem:[%s8273_s8 + $0xe8] sm:$0xff] }
 0x2a9   : > { %v1616_v31 = vpop.f32.mrf.mxu1 }
 0x2aa   : > { %v6393_v27 = vadd.f32 %v1736_v14, %v1447_v17  ;;  %v1737_v42 = vmul.f32 0.17677669, %v1616_v31  ;;  %1873 = vmax.xlane.f32.xlu1 %v1872_v8  ;;  %v1450_v17 = vld [vmem:[%s8273_s8 + $0xe0] sm:$0xff] }
 0x2ab   : > { %v1618_v5 = vpop.f32.mrf.mxu1 }
 0x2ac   : > { %v1738_v37 = vmul.f32 0.17677669, %v1618_v5  ;;  %v1875_v57 = vmax.f32 %v6391_v16, %v6393_v27  ;;  %v6403_v3 = vadd.f32 %v1737_v42, %v1448_v11 }
 0x2ad   : > { %v1622_v63 = vpop.f32.mrf.mxu1  ;;  %4477 = vmatmul.mubr.bf16.gmra.mxu1 %v2607_v32 }
 0x2ae   : > { %v1739_v12 = vmul.f32 0.17677669, %v1622_v63  ;;  %1876 = vmax.xlane.f32.xlu0 %v1875_v57  ;;  %v6405_v52 = vadd.f32 %v1738_v37, %v1449_v41  ;;  %v1452_v41 = vld [vmem:[%s8273_s8 + $0xf0] sm:$0xff]  ;;  %v1453_v57 = vld [vmem:[%s8273_s8 + $0xf8] sm:$0xff] }
 0x2af   : > { %v1624_v14 = vpop.f32.mrf.mxu1 }
 0x2b0   : > { %v1740_v8 = vmul.f32 0.17677669, %v1624_v14  ;;  %v1878_v31 = vmax.f32 %v6403_v3, %v6405_v52  ;;  %v6415_v42 = vadd.f32 %v1739_v12, %v1450_v17 }
 0x2b1   : > { %v1626_v32 = vpop.f32.mrf.mxu1 }
 0x2b2   : > { %v6417_v11 = vadd.f32 %v1740_v8, %v1451_v1  ;;  %v1741_v5 = vmul.f32 0.17677669, %v1626_v32  ;;  %1879 = vmax.xlane.f32.xlu1 %v1878_v31  ;;  %v1454_v8 = vld [vmem:[%s8273_s8 + $0x100] sm:$0xff]  ;;  %v1455_v31 = vld [vmem:[%s8273_s8 + $0x108] sm:$0xff] }
 0x2b3   : > { %v1628_v37 = vpop.f32.mrf.mxu1 }
 0x2b4   : > { %v1742_v63 = vmul.f32 0.17677669, %v1628_v37  ;;  %v1881_v14 = vmax.f32 %v6415_v42, %v6417_v11  ;;  %v6427_v12 = vadd.f32 %v1741_v5, %v1452_v41 }
 0x2b5   : > { %v1632_v44 = vpop.f32.mrf.mxu1 }
 0x2b6   : > { %8675 = vst [vmem:[#allocation67_spill] sm:$0xff] %v6427_v12  ;;  %v1743_v17 = vmul.f32 0.17677669, %v1632_v44  ;;  %1882 = vmax.xlane.f32.xlu0 %v1881_v14  ;;  %v6429_v1 = vadd.f32 %v1742_v63, %v1453_v57  ;;  %v1456_v57 = vld [vmem:[%s8273_s8 + $0x110] sm:$0xff]  ;;  %v1457_v14 = vld [vmem:[%s8273_s8 + $0x118] sm:$0xff] }
 0x2b7   : > { %v1634_v32 = vpop.f32.mrf.mxu1 }
 0x2b8   : > { %8676 = vst [vmem:[#allocation72_spill] sm:$0xff] %v6429_v1  ;;  %v1744_v37 = vmul.f32 0.17677669, %v1634_v32  ;;  %v1884_v13 = vmax.f32 %v6427_v12, %v6429_v1  ;;  %v6439_v5 = vadd.f32 %v1743_v17, %v1454_v8 }
 0x2b9   : > { %v1636_v15 = vpop.f32.mrf.mxu1 }
 0x2ba   : > { %8677 = vst [vmem:[#allocation76_spill] sm:$0xff] %v6439_v5  ;;  %v6441_v44 = vadd.f32 %v1744_v37, %v1455_v31  ;;  %v1745_v41 = vmul.f32 0.17677669, %v1636_v15  ;;  %1885 = vmax.xlane.f32.xlu1 %v1884_v13  ;;  %v1458_v13 = vld [vmem:[%s8273_s8 + $0x120] sm:$0xff]  ;;  %v1459_v31 = vld [vmem:[%s8273_s8 + $0x128] sm:$0xff] }
 0x2bb   : > { %v1638_v63 = vpop.f32.mrf.mxu1 }
 0x2bc   : > { %8678 = vst [vmem:[#allocation79_spill] sm:$0xff] %v6441_v44  ;;  %v1746_v32 = vmul.f32 0.17677669, %v1638_v63  ;;  %v1887_v45 = vmax.f32 %v6439_v5, %v6441_v44  ;;  %v6451_v17 = vadd.f32 %v1745_v41, %v1456_v57  ;;  %v1460_v57 = vld [vmem:[%s8273_s8 + $0x130] sm:$0xff] }
 0x2bd   : > { %v1642_v43 = vpop.f32.mrf.mxu1 }
 0x2be   : > { %8679 = vst [vmem:[#allocation82_spill] sm:$0xff] %v6451_v17  ;;  %v1747_v8 = vmul.f32 0.17677669, %v1642_v43  ;;  %1888 = vmax.xlane.f32.xlu0 %v1887_v45  ;;  %v6453_v15 = vadd.f32 %v1746_v32, %v1457_v14  ;;  %v1461_v32 = vld [vmem:[%s8273_s8 + $0x138] sm:$0xff] }
 0x2bf   : > { %v1644_v37 = vpop.f32.mrf.mxu1 }
 0x2c0   : > { %8680 = vst [vmem:[#allocation85_spill] sm:$0xff] %v6453_v15  ;;  %v1748_v63 = vmul.f32 0.17677669, %v1644_v37  ;;  %v1890_v2 = vmax.f32 %v6451_v17, %v6453_v15  ;;  %v6463_v41 = vadd.f32 %v1747_v8, %v1458_v13 }
 0x2c1   : > { %v1646_v56 = vpop.f32.mrf.mxu1 }
 0x2c2   : > { %8681 = vst [vmem:[#allocation35_spill] sm:$0xff] %v6463_v41  ;;  %v6465_v43 = vadd.f32 %v1748_v63, %v1459_v31  ;;  %v1749_v45 = vmul.f32 0.17677669, %v1646_v56  ;;  %1891 = vmax.xlane.f32.xlu1 %v1890_v2  ;;  %v1462_v2 = vld [vmem:[%s8273_s8 + $0x140] sm:$0xff]  ;;  %v1463_v31 = vld [vmem:[%s8273_s8 + $0x148] sm:$0xff] }
 0x2c3   : > { %v1648_v14 = vpop.f32.mrf.mxu1 }
 0x2c4   : > { %8682 = vst [vmem:[#allocation38_spill] sm:$0xff] %v6465_v43  ;;  %v1750_v37 = vmul.f32 0.17677669, %v1648_v14  ;;  %v1893_v40 = vmax.f32 %v6463_v41, %v6465_v43  ;;  %v6475_v8 = vadd.f32 %v1749_v45, %v1460_v57  ;;  %v1464_v57 = vld [vmem:[%s8273_s8 + $0x150] sm:$0xff] }
 0x2c5   : > { %v1652_v55 = vpop.f32.mrf.mxu1 }
 0x2c6   : > { %8683 = vst [vmem:[#allocation40_spill] sm:$0xff] %v6475_v8  ;;  %v1751_v13 = vmul.f32 0.17677669, %v1652_v55  ;;  %1894 = vmax.xlane.f32.xlu0 %v1893_v40  ;;  %v6477_v56 = vadd.f32 %v1750_v37, %v1461_v32  ;;  %v1465_v37 = vld [vmem:[%s8273_s8 + $0x158] sm:$0xff] }
 0x2c7   : > { %v1654_v63 = vpop.f32.mrf.mxu1 }
 0x2c8   : > { %8684 = vst [vmem:[#allocation43_spill] sm:$0xff] %v6477_v56  ;;  %v1752_v14 = vmul.f32 0.17677669, %v1654_v63  ;;  %v1896_v50 = vmax.f32 %v6475_v8, %v6477_v56  ;;  %v6487_v45 = vadd.f32 %v1751_v13, %v1462_v2 }
 0x2c9   : > { %v1656_v36 = vpop.f32.mrf.mxu1 }
 0x2ca   : > { %8685 = vst [vmem:[#allocation45_spill] sm:$0xff] %v6487_v45  ;;  %v6489_v55 = vadd.f32 %v1752_v14, %v1463_v31  ;;  %v1753_v40 = vmul.f32 0.17677669, %v1656_v36  ;;  %1897 = vmax.xlane.f32.xlu1 %v1896_v50  ;;  %v1466_v50 = vld [vmem:[%s8273_s8 + $0x160] sm:$0xff]  ;;  %v1467_v31 = vld [vmem:[%s8273_s8 + $0x168] sm:$0xff] }
 0x2cb   : > { %v1658_v32 = vpop.f32.mrf.mxu1 }
 0x2cc   : > { %8686 = vst [vmem:[#allocation48_spill] sm:$0xff] %v6489_v55  ;;  %v1754_v63 = vmul.f32 0.17677669, %v1658_v32  ;;  %v1899_v26 = vmax.f32 %v6487_v45, %v6489_v55  ;;  %v6499_v13 = vadd.f32 %v1753_v40, %v1464_v57  ;;  %v1468_v57 = vld [vmem:[%s8273_s8 + $0x170] sm:$0xff] }
 0x2cd   : > { %v1662_v46 = vpop.f32.mrf.mxu1 }
 0x2ce   : > { %8687 = vst [vmem:[#allocation50_spill] sm:$0xff] %v6499_v13  ;;  %v1755_v2 = vmul.f32 0.17677669, %v1662_v46  ;;  %1900 = vmax.xlane.f32.xlu0 %v1899_v26  ;;  %v6501_v36 = vadd.f32 %v1754_v63, %v1465_v37  ;;  %v1469_v63 = vld [vmem:[%s8273_s8 + $0x178] sm:$0xff] }
 0x2cf   : > { %v1664_v14 = vpop.f32.mrf.mxu1 }
 0x2d0   : > { %8688 = vst [vmem:[#allocation52_spill] sm:$0xff] %v6501_v36  ;;  %v1756_v32 = vmul.f32 0.17677669, %v1664_v14  ;;  %v1902_v10 = vmax.f32 %v6499_v13, %v6501_v36  ;;  %v6511_v40 = vadd.f32 %v1755_v2, %v1466_v50 }
 0x2d1   : > { %v1666_v49 = vpop.f32.mrf.mxu1 }
 0x2d2   : > { %8689 = vst [vmem:[#allocation53_spill] sm:$0xff] %v6511_v40  ;;  %v6513_v46 = vadd.f32 %v1756_v32, %v1467_v31  ;;  %v1757_v26 = vmul.f32 0.17677669, %v1666_v49  ;;  %1903 = vmax.xlane.f32.xlu1 %v1902_v10 }
 0x2d3   : > { %v1668_v37 = vpop.f32.mrf.mxu1 }
 0x2d4   : > { %8690 = vst [vmem:[#allocation55_spill] sm:$0xff] %v6513_v46  ;;  %v1758_v14 = vmul.f32 0.17677669, %v1668_v37  ;;  %v1905_v35 = vmax.f32 %v6511_v40, %v6513_v46  ;;  %v6525_v2 = vadd.f32 %v1757_v26, %v1468_v57 }
 0x2d5   : > { %v6523_v34 = vpop.f32.mrf.mxu1 }
 0x2d6   : > { %8691 = vst [vmem:[#allocation56_spill] sm:$0xff] %v6525_v2  ;;  %1906 = vmax.xlane.f32.xlu0 %v1905_v35  ;;  %v6527_v49 = vadd.f32 %v1758_v14, %v1469_v63 }
 0x2d7   : > { %v1674_v10 = vpop.f32.mrf.mxu1 }
 0x2d8   : > { %8692 = vst [vmem:[#allocation58_spill] sm:$0xff] %v6527_v49  ;;  %v1908_v50 = vmax.f32 %v6525_v2, %v6527_v49 }
 0x2d9   : > { %v6531_v31 = vpop.f32.mrf.mxu1 }
 0x2da   : > { %1909 = vmax.xlane.f32.xlu1 %v1908_v50 }
 0x2db   : > { %v6533_v32 = vpop.f32.mrf.mxu1 }
 0x2dd   : > { %v6535_v37 = vpop.f32.mrf.mxu1 }
 0x2df   : > { %v6537_v28 = vpop.f32.mrf.mxu1 }
 0x2e1   : > { %v6539_v21 = vpop.f32.mrf.mxu1 }
 0x2e3   : > { %v6541_v26 = vpop.f32.mrf.mxu1 }
 0x2e5   : > { %v6543_v35 = vpop.f32.mrf.mxu1 }
 0x2e7   : > { %v6545_v57 = vpop.f32.mrf.mxu1 }
 0x2e9   : > { %v6547_v63 = vpop.f32.mrf.mxu1 }
 0x2eb   : > { %v6549_v14 = vpop.f32.mrf.mxu1 }
 0x2ed   : > { %v6551_v22 = vpop.f32.mrf.mxu1 }
 0x2ef   : > { %v6553_v50 = vpop.f32.mrf.mxu1 }
 0x2f1   : > { %v6555_v61 = vpop.f32.mrf.mxu1 }
 0x2f3   : > { %v6557_v19 = vpop.f32.mrf.mxu1 }
 0x2f5   : > { %v6559_v49 = vpop.f32.mrf.mxu1 }
 0x2f7   : > { %v6561_v2 = vpop.f32.mrf.mxu1 }
 0x2f9   : > { %v6563_v46 = vpop.f32.mrf.mxu1 }
 0x2fb   : > { %v6565_v40 = vpop.f32.mrf.mxu1 }
 0x2fd   : > { %v6567_v36 = vpop.f32.mrf.mxu1 }
 0x2fe   : > { %8693 = vst [vmem:[#allocation59_spill] sm:$0xff] %v6567_v36 }
 0x2ff   : > { %v6569_v55 = vpop.f32.mrf.mxu1 }
 0x301   : > { %v6573_v15 = vpop.f32.mrf.mxu1 }
 0x303   : > { %v6577_v36 = vpop.f32.mrf.mxu1 }
 0x307   : > { %v1841_v13 = vpop.xlane.xlu0 %1840 }
 0x308   : > { %v1935_v45 = vsub.f32 %v6235_v25, %v1841_v13  ;;  %v1936_v56 = vsub.f32 %v6237_v51, %v1841_v13 }
 0x30a   : > { %v1999_v8 = vmul.f32 1.442695, %v1935_v45  ;;  %v2001_v43 = vmul.f32 1.442695, %v1936_v56 }
 0x30b   : > { %v1844_v41 = vpop.xlane.xlu0 %1843 }
 0x30c   : > { %4801 = vpow2.f32 %v1999_v8  ;;  %v1937_v17 = vsub.f32 %v6249_v38, %v1844_v41  ;;  %v1938_v44 = vsub.f32 %v6251_v33, %v1844_v41  ;;  %v6581_v8 = vpop.f32.mrf.mxu1  ;;  %v1760_v41 = vmul.f32 0.17677669, %v1674_v10  ;;  %v1470_v10 = vld [vmem:[%s8273_s8 + $0x180] sm:$0xff] }
 0x30d   : > { %4803 = vpow2.f32 %v2001_v43 }
 0x30e   : > { %v2003_v5 = vmul.f32 1.442695, %v1937_v17  ;;  %v2005_v1 = vmul.f32 1.442695, %v1938_v44 }
 0x30f   : > { %v1847_v12 = vpop.xlane.xlu1 %1846 }
 0x310   : > { %4805 = vpow2.f32 %v2003_v5  ;;  %v1939_v25 = vsub.f32 %v6261_v58, %v1847_v12  ;;  %v1940_v51 = vsub.f32 %v6263_v4, %v1847_v12  ;;  %v1471_v58 = vld [vmem:[%s8273_s8 + $0x188] sm:$0xff]  ;;  %v6588_v4 = vpop.f32.mrf.mxu1 }
 0x311   : > { %4807 = vpow2.f32 %v2005_v1 }
 0x312   : > { %v2007_v56 = vmul.f32 1.442695, %v1939_v25  ;;  %v2009_v45 = vmul.f32 1.442695, %v1940_v51 }
 0x313   : > { %v1850_v13 = vpop.xlane.xlu1 %1849 }
 0x314   : > { %4809 = vpow2.f32 %v2007_v56  ;;  %v1941_v38 = vsub.f32 %v6275_v29, %v1850_v13  ;;  %v1942_v33 = vsub.f32 %v6277_v62, %v1850_v13  ;;  %v1759_v29 = vmul.f32 0.17677669, %v6523_v34  ;;  %v6605_v13 = vpop.f32.mrf.mxu1 }
 0x315   : > { %4811 = vpow2.f32 %v2009_v45  ;;  %v6600_v56 = vadd.f32 %v1760_v41, %v1471_v58  ;;  %v1762_v45 = vmul.f32 0.17677669, %v6533_v32  ;;  %v1761_v32 = vmul.f32 0.17677669, %v6531_v31 }
 0x316   : > { %v2011_v44 = vmul.f32 1.442695, %v1941_v38  ;;  %v2013_v17 = vmul.f32 1.442695, %v1942_v33  ;;  %v1473_v33 = vld [vmem:[%s8273_s8 + $0x198] sm:$0xff] }
 0x317   : > { %v1853_v5 = vpop.xlane.xlu0 %1852  ;;  %v1764_v58 = vmul.f32 0.17677669, %v6537_v28  ;;  %v6627_v31 = vadd.f32 %v1762_v45, %v1473_v33 }
 0x318   : > { %4813 = vpow2.f32 %v2011_v44  ;;  %v1943_v12 = vsub.f32 %v6287_v23, %v1853_v5  ;;  %v1944_v1 = vsub.f32 %v6289_v59, %v1853_v5 }
 0x319   : > { %v6592_v43 = vpop.eup %4801  ;;  %4815 = vpow2.f32 %v2013_v17  ;;  %v6614_v17 = vadd.f32 %v1759_v29, %v1470_v10  ;;  %v1475_v10 = vld [vmem:[%s8273_s8 + $0x1a8] sm:$0xff] }
 0x31a   : > { %v6595_v62 = vpop.eup %4803  ;;  %v2015_v25 = vmul.f32 1.442695, %v1943_v12  ;;  %v2017_v51 = vmul.f32 1.442695, %v1944_v1 }
 0x31b   : > { %v1856_v23 = vpop.xlane.xlu1 %1855  ;;  %v2127_v59 = vadd.f32 %v6595_v62, %v6592_v43  ;;  %v1911_v29 = vmax.f32 %v6614_v17, %v6600_v56 }
 0x31c   : > { %4817 = vpow2.f32 %v2015_v25  ;;  %v1945_v34 = vsub.f32 %v6301_v18, %v1856_v23  ;;  %v1946_v38 = vsub.f32 %v6303_v60, %v1856_v23  ;;  %v1472_v18 = vld [vmem:[%s8273_s8 + $0x190] sm:$0xff]  ;;  %v6632_v25 = vpop.f32.mrf.mxu1 }
 0x31d   : > { %v6612_v44 = vpop.eup %4805  ;;  %4819 = vpow2.f32 %v2017_v51  ;;  %2128 = vadd.xlane.f32.xlu0 %v2127_v59  ;;  %v6638_v59 = vadd.f32 %v1761_v32, %v1472_v18 }
 0x31e   : > { %v6617_v41 = vpop.eup %4807  ;;  %v2019_v5 = vmul.f32 1.442695, %v1945_v34  ;;  %v2021_v60 = vmul.f32 1.442695, %v1946_v38  ;;  %v1763_v34 = vmul.f32 0.17677669, %v6535_v37  ;;  %v6653_v18 = vpop.f32.mrf.mxu1 }
 0x31f   : > { %v1859_v12 = vpop.xlane.xlu0 %1858  ;;  %v2130_v1 = vadd.f32 %v6617_v41, %v6612_v44  ;;  %v1474_v38 = vld [vmem:[%s8273_s8 + $0x1a0] sm:$0xff]  ;;  %v1914_v37 = vmax.f32 %v6638_v59, %v6627_v31 }
 0x320   : > { %4821 = vpow2.f32 %v2019_v5  ;;  %v1947_v51 = vsub.f32 %v6313_v6, %v1859_v12  ;;  %v1948_v28 = vsub.f32 %v6315_v54, %v1859_v12  ;;  %v6646_v6 = vadd.f32 %v1764_v58, %v1475_v10  ;;  %v1477_v58 = vld [vmem:[%s8273_s8 + $0x1b8] sm:$0xff] }
 0x321   : > { %v6636_v23 = vpop.eup %4809  ;;  %4823 = vpow2.f32 %v2021_v60  ;;  %2131 = vadd.xlane.f32.xlu1 %v2130_v1  ;;  %1912 = vmax.xlane.f32.xlu0 %v1911_v29  ;;  %v1766_v54 = vmul.f32 0.17677669, %v6541_v26  ;;  %v6662_v26 = vadd.f32 %v1763_v34, %v1474_v38  ;;  %v1765_v10 = vmul.f32 0.17677669, %v6539_v21 }
 0x322   : > { %8694 = vst [vmem:[#allocation61_spill] sm:$0xff] %v6636_v23  ;;  %v6641_v45 = vpop.eup %4811  ;;  %v2023_v33 = vmul.f32 1.442695, %v1947_v51  ;;  %v2025_v5 = vmul.f32 1.442695, %v1948_v28 }
 0x323   : > { %v1862_v12 = vpop.xlane.xlu1 %1861  ;;  %v2133_v32 = vadd.f32 %v6641_v45, %v6636_v23  ;;  %v1917_v21 = vmax.f32 %v6662_v26, %v6646_v6  ;;  %v6675_v38 = vadd.f32 %v1766_v54, %v1477_v58  ;;  %v1478_v58 = vld [vmem:[%s8273_s8 + $0x1c0] sm:$0xff] }
 0x324   : > { %4825 = vpow2.f32 %v2023_v33  ;;  %v1949_v60 = vsub.f32 %v6327_v7, %v1862_v12  ;;  %v1950_v1 = vsub.f32 %v6329_v0, %v1862_v12  ;;  %v1476_v7 = vld [vmem:[%s8273_s8 + $0x1b0] sm:$0xff]  ;;  %v1768_v33 = vmul.f32 0.17677669, %v6545_v57 }
 0x325   : > { %v6660_v29 = vpop.eup %4813  ;;  %4827 = vpow2.f32 %v2025_v5  ;;  %2134 = vadd.xlane.f32.xlu0 %v2133_v32  ;;  %1915 = vmax.xlane.f32.xlu1 %v1914_v37  ;;  %v1479_v5 = vld [vmem:[%s8273_s8 + $0x1c8] sm:$0xff]  ;;  %v6680_v32 = vpop.f32.mrf.mxu1 }
 0x326   : > { %8695 = vst [vmem:[#allocation62_spill] sm:$0xff] %v6660_v29  ;;  %v6665_v51 = vpop.eup %4815  ;;  %v2027_v0 = vmul.f32 1.442695, %v1949_v60  ;;  %v2029_v28 = vmul.f32 1.442695, %v1950_v1  ;;  %v6686_v1 = vadd.f32 %v1765_v10, %v1476_v7 }
 0x327   : > { %v1865_v12 = vpop.xlane.xlu0 %1864  ;;  %v2136_v34 = vadd.f32 %v6665_v51, %v6660_v29  ;;  %v1767_v29 = vmul.f32 0.17677669, %v6543_v35  ;;  %v6701_v7 = vpop.f32.mrf.mxu1 }
 0x328   : > { %4829 = vpow2.f32 %v2027_v0  ;;  %v1951_v37 = vsub.f32 %v6339_v30, %v1865_v12  ;;  %v1952_v57 = vsub.f32 %v6341_v24, %v1865_v12  ;;  %v6694_v30 = vadd.f32 %v1768_v33, %v1479_v5  ;;  %v1481_v33 = vld [vmem:[%s8273_s8 + $0x1d8] sm:$0xff] }
 0x329   : > { %v6684_v60 = vpop.eup %4817  ;;  %4831 = vpow2.f32 %v2029_v28  ;;  %2137 = vadd.xlane.f32.xlu1 %v2136_v34  ;;  %1918 = vmax.xlane.f32.xlu0 %v1917_v21  ;;  %v1770_v24 = vmul.f32 0.17677669, %v6549_v14  ;;  %v1920_v35 = vmax.f32 %v6686_v1, %v6675_v38  ;;  %v6710_v14 = vadd.f32 %v1767_v29, %v1478_v58  ;;  %v1483_v58 = vld [vmem:[%s8273_s8 + $0x1e8] sm:$0xff] }
 0x32a   : > { %8696 = vst [vmem:[#allocation64_spill] sm:$0xff] %v6684_v60  ;;  %v6689_v54 = vpop.eup %4819  ;;  %v2031_v0 = vmul.f32 1.442695, %v1951_v37  ;;  %v2033_v23 = vmul.f32 1.442695, %v1952_v57 }
 0x32b   : > { %v1868_v12 = vpop.xlane.xlu1 %1867  ;;  %v2139_v10 = vadd.f32 %v6689_v54, %v6684_v60  ;;  %v1769_v5 = vmul.f32 0.17677669, %v6547_v63  ;;  %v1923_v63 = vmax.f32 %v6710_v14, %v6694_v30 }
 0x32c   : > { %4833 = vpow2.f32 %v2031_v0  ;;  %v1953_v28 = vsub.f32 %v6353_v9, %v1868_v12  ;;  %v1954_v34 = vsub.f32 %v6355_v48, %v1868_v12  ;;  %v1480_v9 = vld [vmem:[%s8273_s8 + $0x1d0] sm:$0xff]  ;;  %v1772_v0 = vmul.f32 0.17677669, %v6553_v50 }
 0x32d   : > { %v6708_v21 = vpop.eup %4821  ;;  %4835 = vpow2.f32 %v2033_v23  ;;  %2140 = vadd.xlane.f32.xlu0 %v2139_v10  ;;  %1921 = vmax.xlane.f32.xlu1 %v1920_v35  ;;  %v6723_v23 = vadd.f32 %v1770_v24, %v1481_v33  ;;  %v6728_v10 = vpop.f32.mrf.mxu1  ;;  %v1482_v33 = vld [vmem:[%s8273_s8 + $0x1e0] sm:$0xff] }
 0x32e   : > { %8697 = vst [vmem:[#allocation66_spill] sm:$0xff] %v6708_v21  ;;  %v6713_v37 = vpop.eup %4823  ;;  %v2035_v48 = vmul.f32 1.442695, %v1953_v28  ;;  %v2037_v57 = vmul.f32 1.442695, %v1954_v34  ;;  %v6734_v34 = vadd.f32 %v1769_v5, %v1480_v9 }
 0x32f   : > { %v1871_v12 = vpop.xlane.xlu0 %1870  ;;  %v2142_v29 = vadd.f32 %v6713_v37, %v6708_v21  ;;  %v1771_v21 = vmul.f32 0.17677669, %v6551_v22  ;;  %v6749_v9 = vpop.f32.mrf.mxu1 }
 0x330   : > { %4837 = vpow2.f32 %v2035_v48  ;;  %v1955_v35 = vsub.f32 %v6365_v47, %v1871_v12  ;;  %v1956_v50 = vsub.f32 %v6367_v39, %v1871_v12  ;;  %v6742_v47 = vadd.f32 %v1772_v0, %v1483_v58  ;;  %v1485_v0 = vld [vmem:[%s8273_s8 + $0x1f8] sm:$0xff] }
 0x331   : > { %v6732_v28 = vpop.eup %4825  ;;  %4839 = vpow2.f32 %v2037_v57  ;;  %2143 = vadd.xlane.f32.xlu1 %v2142_v29  ;;  %1924 = vmax.xlane.f32.xlu0 %v1923_v63  ;;  %v1774_v39 = vmul.f32 0.17677669, %v6557_v19  ;;  %v1926_v22 = vmax.f32 %v6734_v34, %v6723_v23  ;;  %v6758_v19 = vadd.f32 %v1771_v21, %v1482_v33  ;;  %v2529_v33 = vld [vmem:[%s8274_s9 + $0x8] sm:$0xff] }
 0x332   : > { %8698 = vst [vmem:[#allocation69_spill] sm:$0xff] %v6732_v28  ;;  %v6737_v24 = vpop.eup %4827  ;;  %v2039_v48 = vmul.f32 1.442695, %v1955_v35  ;;  %v2041_v60 = vmul.f32 1.442695, %v1956_v50 }
 0x333   : > { %8699 = vst [vmem:[#allocation71_spill] sm:$0xff] %v6737_v24  ;;  %v1874_v12 = vpop.xlane.xlu1 %1873  ;;  %v2145_v5 = vadd.f32 %v6737_v24, %v6732_v28  ;;  %v1773_v58 = vmul.f32 0.17677669, %v6555_v61  ;;  %v1929_v61 = vmax.f32 %v6758_v19, %v6742_v47 }
 0x334   : > { %4841 = vpow2.f32 %v2039_v48  ;;  %v1957_v57 = vsub.f32 %v6379_v53, %v1874_v12  ;;  %v1958_v29 = vsub.f32 %v6381_v20, %v1874_v12  ;;  %v1484_v53 = vld [vmem:[%s8273_s8 + $0x1f0] sm:$0xff]  ;;  %v2818_v48 = vmul.f32 0.17677669, %v6561_v2 }
 0x335   : > { %v6756_v63 = vpop.eup %4829  ;;  %4843 = vpow2.f32 %v2041_v60  ;;  %2146 = vadd.xlane.f32.xlu0 %v2145_v5  ;;  %1927 = vmax.xlane.f32.xlu1 %v1926_v22  ;;  %v6771_v60 = vadd.f32 %v1774_v39, %v1485_v0  ;;  %v6776_v5 = vpop.f32.mrf.mxu1  ;;  %v2528_v0 = vld [vmem:[%s8274_s9] sm:$0xff] }
 0x336   : > { %8700 = vst [vmem:[#allocation74_spill] sm:$0xff] %v6756_v63  ;;  %v6761_v35 = vpop.eup %4831  ;;  %v2043_v20 = vmul.f32 1.442695, %v1957_v57  ;;  %v2045_v50 = vmul.f32 1.442695, %v1958_v29  ;;  %v6782_v29 = vadd.f32 %v1773_v58, %v1484_v53 }
 0x337   : > { %8701 = vst [vmem:[#allocation75_spill] sm:$0xff] %v6761_v35  ;;  %v1877_v12 = vpop.xlane.xlu0 %1876  ;;  %v2148_v21 = vadd.f32 %v6761_v35, %v6756_v63  ;;  %v2817_v63 = vmul.f32 0.17677669, %v6559_v49  ;;  %v6797_v53 = vpop.f32.mrf.mxu1 }
 0x338   : > { %4845 = vpow2.f32 %v2043_v20  ;;  %v1959_v22 = vsub.f32 %v6391_v16, %v1877_v12  ;;  %v1960_v2 = vsub.f32 %v6393_v27, %v1877_v12  ;;  %v6790_v16 = vadd.f32 %v2818_v48, %v2529_v33  ;;  %v2531_v48 = vld [vmem:[%s8274_s9 + $0x18] sm:$0xff] }
 0x339   : > { %v6780_v57 = vpop.eup %4833  ;;  %4847 = vpow2.f32 %v2045_v50  ;;  %2149 = vadd.xlane.f32.xlu1 %v2148_v21  ;;  %1930 = vmax.xlane.f32.xlu0 %v1929_v61  ;;  %v2820_v27 = vmul.f32 0.17677669, %v6565_v40  ;;  %v1932_v49 = vmax.f32 %v6782_v29, %v6771_v60  ;;  %v6806_v40 = vadd.f32 %v2817_v63, %v2528_v0  ;;  %v2533_v0 = vld [vmem:[%s8274_s9 + $0x28] sm:$0xff] }
 0x33a   : > { %8702 = vst [vmem:[#allocation77_spill] sm:$0xff] %v6780_v57  ;;  %v6785_v39 = vpop.eup %4835  ;;  %v2047_v20 = vmul.f32 1.442695, %v1959_v22  ;;  %v2049_v28 = vmul.f32 1.442695, %v1960_v2 }
 0x33b   : > { %8703 = vst [vmem:[#allocation78_spill] sm:$0xff] %v6785_v39  ;;  %v1880_v12 = vpop.xlane.xlu1 %1879  ;;  %v2151_v58 = vadd.f32 %v6785_v39, %v6780_v57  ;;  %v2819_v33 = vmul.f32 0.17677669, %v6563_v46  ;;  %v2945_v46 = vmax.f32 %v6806_v40, %v6790_v16 }
 0x33c   : > { %4849 = vpow2.f32 %v2047_v20  ;;  %v1961_v50 = vsub.f32 %v6403_v3, %v1880_v12  ;;  %v1962_v21 = vsub.f32 %v6405_v52, %v1880_v12  ;;  %v2530_v3 = vld [vmem:[%s8274_s9 + $0x10] sm:$0xff]  ;;  %v2822_v20 = vmul.f32 0.17677669, %v6569_v55 }
 0x33d   : > { %v6804_v61 = vpop.eup %4837  ;;  %4851 = vpow2.f32 %v2049_v28  ;;  %2152 = vadd.xlane.f32.xlu0 %v2151_v58  ;;  %1933 = vmax.xlane.f32.xlu1 %v1932_v49  ;;  %v6819_v28 = vadd.f32 %v2820_v27, %v2531_v48  ;;  %v6824_v58 = vpop.f32.mrf.mxu1  ;;  %v2532_v48 = vld [vmem:[%s8274_s9 + $0x20] sm:$0xff] }
 0x33e   : > { %8704 = vst [vmem:[#allocation80_spill] sm:$0xff] %v6804_v61  ;;  %v6809_v22 = vpop.eup %4839  ;;  %v2051_v52 = vmul.f32 1.442695, %v1961_v50  ;;  %v2053_v2 = vmul.f32 1.442695, %v1962_v21  ;;  %v6830_v21 = vadd.f32 %v2819_v33, %v2530_v3 }
 0x33f   : > { %8705 = vst [vmem:[#allocation81_spill] sm:$0xff] %v6809_v22  ;;  %v1883_v12 = vpop.xlane.xlu0 %1882  ;;  %v2154_v63 = vadd.f32 %v6809_v22, %v6804_v61  ;;  %v8707_v61 = vld [vmem:[#allocation59_spill] sm:$0xff]  ;;  %v6845_v3 = vpop.f32.mrf.mxu1 }
 0x340   : > { %4853 = vpow2.f32 %v2051_v52  ;;  %v1963_v49 = vsub.f32 %v6415_v42, %v1883_v12  ;;  %v1964_v55 = vsub.f32 %v6417_v11, %v1883_v12  ;;  %v2821_v57 = vmul.f32 0.17677669, %v8707_v61 }
 0x341   : > { %v6828_v50 = vpop.eup %4841  ;;  %4855 = vpow2.f32 %v2053_v2  ;;  %2155 = vadd.xlane.f32.xlu1 %v2154_v63  ;;  %2946 = vmax.xlane.f32.xlu0 %v2945_v46  ;;  %v6838_v42 = vadd.f32 %v2822_v20, %v2533_v0  ;;  %v2824_v11 = vmul.f32 0.17677669, %v6577_v36  ;;  %v2948_v61 = vmax.f32 %v6830_v21, %v6819_v28  ;;  %v8710_v2 = vld [vmem:[#allocation67_spill] sm:$0xff]  ;;  %v8711_v46 = vld [vmem:[#allocation72_spill] sm:$0xff]  ;;  %v2535_v20 = vld [vmem:[%s8274_s9 + $0x38] sm:$0xff] }
 0x342   : > { %8706 = vst [vmem:[#allocation83_spill] sm:$0xff] %v6828_v50  ;;  %v6833_v27 = vpop.eup %4843  ;;  %v2055_v52 = vmul.f32 1.442695, %v1963_v49  ;;  %v2057_v22 = vmul.f32 1.442695, %v1964_v55  ;;  %v6854_v36 = vadd.f32 %v2821_v57, %v2532_v48  ;;  %v2537_v48 = vld [vmem:[%s8274_s9 + $0x48] sm:$0xff] }
 0x343   : > { %8708 = vst [vmem:[#allocation84_spill] sm:$0xff] %v6833_v27  ;;  %8709 = vst [vmem:[#allocation86_spill] sm:$0xff] %v6838_v42  ;;  %v1886_v12 = vpop.xlane.xlu1 %1885  ;;  %v2157_v33 = vadd.f32 %v6833_v27, %v6828_v50  ;;  %v2823_v49 = vmul.f32 0.17677669, %v6573_v15 }
 0x344   : > { %4857 = vpow2.f32 %v2055_v52  ;;  %v1965_v63 = vsub.f32 %v8710_v2, %v1886_v12  ;;  %v1966_v39 = vsub.f32 %v8711_v46, %v1886_v12  ;;  %8713 = vst [vmem:[#allocation88_spill] sm:$0xff] %v6854_v36  ;;  %v2534_v52 = vld [vmem:[%s8274_s9 + $0x30] sm:$0xff]  ;;  %v2826_v46 = vmul.f32 0.17677669, %v6588_v4 }
 0x345   : > { %v6852_v0 = vpop.eup %4845  ;;  %4859 = vpow2.f32 %v2057_v22  ;;  %2158 = vadd.xlane.f32.xlu0 %v2157_v33  ;;  %2949 = vmax.xlane.f32.xlu1 %v2948_v61  ;;  %v2951_v15 = vmax.f32 %v6854_v36, %v6838_v42  ;;  %v6867_v22 = vadd.f32 %v2824_v11, %v2535_v20  ;;  %v6872_v33 = vpop.f32.mrf.mxu1  ;;  %v8716_v61 = vld [vmem:[#allocation76_spill] sm:$0xff]  ;;  %v6878_v35 = vadd.f32 %v2823_v49, %v2534_v52  ;;  %v2536_v20 = vld [vmem:[%s8274_s9 + $0x40] sm:$0xff] }
 0x346   : > { %8712 = vst [vmem:[#allocation87_spill] sm:$0xff] %v6852_v0  ;;  %v6857_v55 = vpop.eup %4847  ;;  %v2059_v12 = vmul.f32 1.442695, %v1965_v63  ;;  %v2061_v2 = vmul.f32 1.442695, %v1966_v39  ;;  %v8717_v63 = vld [vmem:[#allocation79_spill] sm:$0xff] }
 0x347   : > { %8714 = vst [vmem:[#allocation59_spill] sm:$0xff] %v6857_v55  ;;  %v1889_v50 = vpop.xlane.xlu0 %1888  ;;  %v2160_v57 = vadd.f32 %v6857_v55, %v6852_v0  ;;  %8715 = vst [vmem:[#allocation67_spill] sm:$0xff] %v6867_v22  ;;  %v2825_v0 = vmul.f32 0.17677669, %v6581_v8  ;;  %v2954_v8 = vmax.f32 %v6878_v35, %v6867_v22  ;;  %v6893_v52 = vpop.f32.mrf.mxu1 }
 0x348   : > { %4861 = vpow2.f32 %v2059_v12  ;;  %v1967_v39 = vsub.f32 %v8716_v61, %v1889_v50  ;;  %v1968_v4 = vsub.f32 %v8717_v63, %v1889_v50  ;;  %8719 = vst [vmem:[#allocation76_spill] sm:$0xff] %v6878_v35  ;;  %v6886_v61 = vadd.f32 %v2826_v46, %v2537_v48  ;;  %v2539_v46 = vld [vmem:[%s8274_s9 + $0x58] sm:$0xff] }
 0x349   : > { %v6876_v27 = vpop.eup %4849  ;;  %4863 = vpow2.f32 %v2061_v2  ;;  %2161 = vadd.xlane.f32.xlu1 %v2160_v57  ;;  %2952 = vmax.xlane.f32.xlu0 %v2951_v15  ;;  %v2828_v50 = vmul.f32 0.17677669, %v6632_v25  ;;  %v8722_v2 = vld [vmem:[#allocation82_spill] sm:$0xff]  ;;  %v8723_v15 = vld [vmem:[#allocation85_spill] sm:$0xff]  ;;  %v6902_v25 = vadd.f32 %v2825_v0, %v2536_v20  ;;  %v2541_v20 = vld [vmem:[%s8274_s9 + $0x68] sm:$0xff] }
 0x34a   : > { %8718 = vst [vmem:[#allocation72_spill] sm:$0xff] %v6876_v27  ;;  %v6881_v11 = vpop.eup %4851  ;;  %v2063_v12 = vmul.f32 1.442695, %v1967_v39  ;;  %v2065_v55 = vmul.f32 1.442695, %v1968_v4  ;;  %8721 = vst [vmem:[#allocation100_spill] sm:$0xff] %v6886_v61 }
 0x34b   : > { %8720 = vst [vmem:[#allocation79_spill] sm:$0xff] %v6881_v11  ;;  %v1892_v63 = vpop.xlane.xlu1 %1891  ;;  %v2163_v49 = vadd.f32 %v6881_v11, %v6876_v27  ;;  %8725 = vst [vmem:[#allocation85_spill] sm:$0xff] %v6902_v25  ;;  %v2827_v39 = vmul.f32 0.17677669, %v6605_v13  ;;  %v2957_v13 = vmax.f32 %v6902_v25, %v6886_v61  ;;  %v8796_v25 = vld [vmem:[#allocation47_spill] sm:$0xff] }
 0x34c   : > { %4865 = vpow2.f32 %v2063_v12  ;;  %v1969_v57 = vsub.f32 %v8722_v2, %v1892_v63  ;;  %v1970_v42 = vsub.f32 %v8723_v15, %v1892_v63  ;;  %v2538_v12 = vld [vmem:[%s8274_s9 + $0x50] sm:$0xff]  ;;  %v2830_v15 = vmul.f32 0.17677669, %v6680_v32 }
 0x34d   : > { %v6900_v48 = vpop.eup %4853  ;;  %4867 = vpow2.f32 %v2065_v55  ;;  %2164 = vadd.xlane.f32.xlu0 %v2163_v49  ;;  %2955 = vmax.xlane.f32.xlu1 %v2954_v8  ;;  %v6915_v55 = vadd.f32 %v2828_v50, %v2539_v46  ;;  %v6920_v49 = vpop.f32.mrf.mxu1  ;;  %v8728_v8 = vld [vmem:[#allocation35_spill] sm:$0xff]  ;;  %v6926_v22 = vadd.f32 %v2827_v39, %v2538_v12  ;;  %v2540_v46 = vld [vmem:[%s8274_s9 + $0x60] sm:$0xff] }
 0x34e   : > { %8724 = vst [vmem:[#allocation82_spill] sm:$0xff] %v6900_v48  ;;  %v6905_v4 = vpop.eup %4855  ;;  %v2067_v63 = vmul.f32 1.442695, %v1969_v57  ;;  %v2069_v2 = vmul.f32 1.442695, %v1970_v42  ;;  %v8729_v57 = vld [vmem:[#allocation38_spill] sm:$0xff] }
 0x34f   : > { %8726 = vst [vmem:[#allocation101_spill] sm:$0xff] %v6905_v4  ;;  %v1895_v27 = vpop.xlane.xlu0 %1894  ;;  %v2166_v0 = vadd.f32 %v6905_v4, %v6900_v48  ;;  %8727 = vst [vmem:[#allocation102_spill] sm:$0xff] %v6915_v55  ;;  %v2829_v48 = vmul.f32 0.17677669, %v6653_v18  ;;  %v2960_v18 = vmax.f32 %v6926_v22, %v6915_v55  ;;  %v6941_v12 = vpop.f32.mrf.mxu1 }
 0x350   : > { %4869 = vpow2.f32 %v2067_v63  ;;  %v1971_v42 = vsub.f32 %v8728_v8, %v1895_v27  ;;  %v1972_v32 = vsub.f32 %v8729_v57, %v1895_v27  ;;  %8731 = vst [vmem:[#allocation38_spill] sm:$0xff] %v6926_v22  ;;  %v6934_v8 = vadd.f32 %v2830_v15, %v2541_v20  ;;  %v2543_v15 = vld [vmem:[%s8274_s9 + $0x78] sm:$0xff]  ;;  %v8807_v22 = vld [vmem:[#allocation51_spill] sm:$0xff] }
 0x351   : > { %v6924_v11 = vpop.eup %4857  ;;  %4871 = vpow2.f32 %v2069_v2  ;;  %2167 = vadd.xlane.f32.xlu1 %v2166_v0  ;;  %2958 = vmax.xlane.f32.xlu0 %v2957_v13  ;;  %v2832_v27 = vmul.f32 0.17677669, %v6728_v10  ;;  %v8734_v2 = vld [vmem:[#allocation40_spill] sm:$0xff]  ;;  %v8735_v13 = vld [vmem:[#allocation43_spill] sm:$0xff]  ;;  %v6950_v10 = vadd.f32 %v2829_v48, %v2540_v46 }
 0x352   : > { %8730 = vst [vmem:[#allocation35_spill] sm:$0xff] %v6924_v11  ;;  %v6929_v50 = vpop.eup %4859  ;;  %v2071_v63 = vmul.f32 1.442695, %v1971_v42  ;;  %v2073_v4 = vmul.f32 1.442695, %v1972_v32  ;;  %8733 = vst [vmem:[#allocation104_spill] sm:$0xff] %v6934_v8 }
 0x353   : > { %8732 = vst [vmem:[#allocation103_spill] sm:$0xff] %v6929_v50  ;;  %v1898_v57 = vpop.xlane.xlu1 %1897  ;;  %v2169_v39 = vadd.f32 %v6929_v50, %v6924_v11  ;;  %8737 = vst [vmem:[#allocation43_spill] sm:$0xff] %v6950_v10  ;;  %v2831_v42 = vmul.f32 0.17677669, %v6701_v7  ;;  %v2963_v7 = vmax.f32 %v6950_v10, %v6934_v8  ;;  %v2545_v46 = vld [vmem:[%s8274_s9 + $0x88] sm:$0xff] }
 0x354   : > { %4873 = vpow2.f32 %v2071_v63  ;;  %v1973_v0 = vsub.f32 %v8734_v2, %v1898_v57  ;;  %v1974_v61 = vsub.f32 %v8735_v13, %v1898_v57  ;;  %v2542_v63 = vld [vmem:[%s8274_s9 + $0x70] sm:$0xff]  ;;  %v2834_v13 = vmul.f32 0.17677669, %v6776_v5 }
 0x355   : > { %v6948_v20 = vpop.eup %4861  ;;  %4875 = vpow2.f32 %v2073_v4  ;;  %2170 = vadd.xlane.f32.xlu0 %v2169_v39  ;;  %2961 = vmax.xlane.f32.xlu1 %v2960_v18  ;;  %v6963_v4 = vadd.f32 %v2832_v27, %v2543_v15  ;;  %v6968_v39 = vpop.f32.mrf.mxu1  ;;  %v8740_v18 = vld [vmem:[#allocation45_spill] sm:$0xff]  ;;  %v6974_v55 = vadd.f32 %v2831_v42, %v2542_v63  ;;  %v2544_v15 = vld [vmem:[%s8274_s9 + $0x80] sm:$0xff] }
 0x356   : > { %8736 = vst [vmem:[#allocation40_spill] sm:$0xff] %v6948_v20  ;;  %v6953_v32 = vpop.eup %4863  ;;  %v2075_v57 = vmul.f32 1.442695, %v1973_v0  ;;  %v2077_v2 = vmul.f32 1.442695, %v1974_v61  ;;  %v8741_v0 = vld [vmem:[#allocation48_spill] sm:$0xff] }
 0x357   : > { %8738 = vst [vmem:[#allocation105_spill] sm:$0xff] %v6953_v32  ;;  %v1901_v11 = vpop.xlane.xlu0 %1900  ;;  %v2172_v48 = vadd.f32 %v6953_v32, %v6948_v20  ;;  %8739 = vst [vmem:[#allocation106_spill] sm:$0xff] %v6963_v4  ;;  %v2833_v20 = vmul.f32 0.17677669, %v6749_v9  ;;  %v2966_v9 = vmax.f32 %v6974_v55, %v6963_v4  ;;  %v2547_v63 = vld [vmem:[%s8274_s9 + $0x98] sm:$0xff] }
 0x358   : > { %4877 = vpow2.f32 %v2075_v57  ;;  %v1975_v61 = vsub.f32 %v8740_v18, %v1901_v11  ;;  %v1976_v5 = vsub.f32 %v8741_v0, %v1901_v11  ;;  %8743 = vst [vmem:[#allocation48_spill] sm:$0xff] %v6974_v55  ;;  %v6982_v18 = vadd.f32 %v2834_v13, %v2545_v46  ;;  %v8747_v13 = vld [vmem:[#allocation52_spill] sm:$0xff]  ;;  %v8793_v55 = vld [vmem:[#allocation49_spill] sm:$0xff] }
 0x359   : > { %v6972_v50 = vpop.eup %4865  ;;  %4879 = vpow2.f32 %v2077_v2  ;;  %2173 = vadd.xlane.f32.xlu1 %v2172_v48  ;;  %2964 = vmax.xlane.f32.xlu0 %v2963_v7  ;;  %v2836_v11 = vmul.f32 0.17677669, %v6824_v58  ;;  %v6992_v2 = vpop.f32.mrf.mxu1  ;;  %v8746_v48 = vld [vmem:[#allocation50_spill] sm:$0xff]  ;;  %v6998_v58 = vadd.f32 %v2833_v20, %v2544_v15 }
 0x35a   : > { %8742 = vst [vmem:[#allocation45_spill] sm:$0xff] %v6972_v50  ;;  %v6977_v27 = vpop.eup %4867  ;;  %v2079_v57 = vmul.f32 1.442695, %v1975_v61  ;;  %v2081_v32 = vmul.f32 1.442695, %v1976_v5  ;;  %8745 = vst [vmem:[#allocation108_spill] sm:$0xff] %v6982_v18 }
 0x35b   : > { %8744 = vst [vmem:[#allocation107_spill] sm:$0xff] %v6977_v27  ;;  %v1904_v0 = vpop.xlane.xlu1 %1903  ;;  %v2175_v42 = vadd.f32 %v6977_v27, %v6972_v50  ;;  %8749 = vst [vmem:[#allocation52_spill] sm:$0xff] %v6998_v58  ;;  %v2835_v5 = vmul.f32 0.17677669, %v6797_v53  ;;  %v2546_v27 = vld [vmem:[%s8274_s9 + $0x90] sm:$0xff]  ;;  %v2969_v53 = vmax.f32 %v6998_v58, %v6982_v18  ;;  %v2724_v15 = vpop.f32.mrf.mxu1 }
 0x35c   : > { %4881 = vpow2.f32 %v2079_v57  ;;  %v1977_v7 = vsub.f32 %v8746_v48, %v1904_v0  ;;  %v1978_v46 = vsub.f32 %v8747_v13, %v1904_v0  ;;  %v7006_v48 = vadd.f32 %v2836_v11, %v2547_v63 }
 0x35d   : > { %v6996_v61 = vpop.eup %4869  ;;  %4883 = vpow2.f32 %v2081_v32  ;;  %2176 = vadd.xlane.f32.xlu0 %v2175_v42  ;;  %2967 = vmax.xlane.f32.xlu1 %v2966_v9  ;;  %v2838_v0 = vmul.f32 0.17677669, %v6872_v33  ;;  %v2549_v32 = vld [vmem:[%s8274_s9 + $0xa8] sm:$0xff]  ;;  %v8752_v42 = vld [vmem:[#allocation53_spill] sm:$0xff]  ;;  %v7020_v33 = vadd.f32 %v2835_v5, %v2546_v27  ;;  %v2728_v5 = vpop.f32.mrf.mxu1 }
 0x35e   : > { %8748 = vst [vmem:[#allocation50_spill] sm:$0xff] %v6996_v61  ;;  %v7001_v50 = vpop.eup %4871  ;;  %v2083_v57 = vmul.f32 1.442695, %v1977_v7  ;;  %v2085_v4 = vmul.f32 1.442695, %v1978_v46  ;;  %8751 = vst [vmem:[#allocation110_spill] sm:$0xff] %v7006_v48 }
 0x35f   : > { %8750 = vst [vmem:[#allocation109_spill] sm:$0xff] %v7001_v50  ;;  %v1907_v13 = vpop.xlane.xlu0 %1906  ;;  %v2178_v20 = vadd.f32 %v7001_v50, %v6996_v61  ;;  %v8753_v7 = vld [vmem:[#allocation55_spill] sm:$0xff]  ;;  %v2837_v46 = vmul.f32 0.17677669, %v6845_v3  ;;  %v2548_v50 = vld [vmem:[%s8274_s9 + $0xa0] sm:$0xff]  ;;  %v2972_v3 = vmax.f32 %v7020_v33, %v7006_v48 }
 0x360   : > { %4885 = vpow2.f32 %v2083_v57  ;;  %v1979_v9 = vsub.f32 %v8752_v42, %v1907_v13  ;;  %v1980_v11 = vsub.f32 %v8753_v7, %v1907_v13  ;;  %8755 = vst [vmem:[#allocation55_spill] sm:$0xff] %v7020_v33  ;;  %v7028_v42 = vadd.f32 %v2838_v0, %v2549_v32 }
 0x361   : > { %v7018_v63 = vpop.eup %4873  ;;  %4887 = vpow2.f32 %v2085_v4  ;;  %2179 = vadd.xlane.f32.xlu1 %v2178_v20  ;;  %2970 = vmax.xlane.f32.xlu0 %v2969_v53  ;;  %v2840_v13 = vmul.f32 0.17677669, %v6920_v49  ;;  %v2551_v4 = vld [vmem:[%s8274_s9 + $0xb8] sm:$0xff]  ;;  %v8758_v20 = vld [vmem:[#allocation56_spill] sm:$0xff]  ;;  %v7042_v49 = vadd.f32 %v2837_v46, %v2548_v50  ;;  %v2730_v46 = vpop.f32.mrf.mxu1 }
 0x362   : > { %8754 = vst [vmem:[#allocation53_spill] sm:$0xff] %v7018_v63  ;;  %v7023_v61 = vpop.eup %4875  ;;  %v2087_v57 = vmul.f32 1.442695, %v1979_v9  ;;  %v2089_v18 = vmul.f32 1.442695, %v1980_v11  ;;  %8757 = vst [vmem:[#allocation112_spill] sm:$0xff] %v7028_v42 }
 0x363   : > { %8756 = vst [vmem:[#allocation111_spill] sm:$0xff] %v7023_v61  ;;  %v1910_v7 = vpop.xlane.xlu1 %1909  ;;  %v2181_v27 = vadd.f32 %v7023_v61, %v7018_v63  ;;  %v8759_v9 = vld [vmem:[#allocation58_spill] sm:$0xff]  ;;  %v2839_v11 = vmul.f32 0.17677669, %v6893_v52  ;;  %v2550_v61 = vld [vmem:[%s8274_s9 + $0xb0] sm:$0xff]  ;;  %v2975_v52 = vmax.f32 %v7042_v49, %v7028_v42 }
 0x364   : > { %4889 = vpow2.f32 %v2087_v57  ;;  %v1981_v53 = vsub.f32 %v8758_v20, %v1910_v7  ;;  %v1982_v0 = vsub.f32 %v8759_v9, %v1910_v7  ;;  %8761 = vst [vmem:[#allocation58_spill] sm:$0xff] %v7042_v49  ;;  %v7050_v20 = vadd.f32 %v2840_v13, %v2551_v4  ;;  %v2552_v4 = vld [vmem:[%s8274_s9 + $0xc0] sm:$0xff] }
 0x365   : > { %v7040_v32 = vpop.eup %4877  ;;  %4891 = vpow2.f32 %v2089_v18  ;;  %2182 = vadd.xlane.f32.xlu0 %v2181_v27  ;;  %2973 = vmax.xlane.f32.xlu1 %v2972_v3  ;;  %v2842_v7 = vmul.f32 0.17677669, %v6968_v39  ;;  %v2553_v18 = vld [vmem:[%s8274_s9 + $0xc8] sm:$0xff]  ;;  %v7062_v3 = vadd.f32 %v2839_v11, %v2550_v61  ;;  %v2841_v13 = vmul.f32 0.17677669, %v6941_v12  ;;  %v2555_v12 = vld [vmem:[%s8274_s9 + $0xd8] sm:$0xff] }
 0x366   : > { %8760 = vst [vmem:[#allocation56_spill] sm:$0xff] %v7040_v32  ;;  %v7045_v63 = vpop.eup %4879  ;;  %v2091_v57 = vmul.f32 1.442695, %v1981_v53  ;;  %v2093_v48 = vmul.f32 1.442695, %v1982_v0  ;;  %8763 = vst [vmem:[#allocation114_spill] sm:$0xff] %v7050_v20 }
 0x367   : > { %8762 = vst [vmem:[#allocation113_spill] sm:$0xff] %v7045_v63  ;;  %v2184_v50 = vadd.f32 %v7045_v63, %v7040_v32  ;;  %8765 = vst [vmem:[#allocation116_spill] sm:$0xff] %v7062_v3  ;;  %v7070_v53 = vadd.f32 %v2842_v7, %v2553_v18  ;;  %v2844_v9 = vmul.f32 0.17677669, %v2724_v15  ;;  %v2978_v61 = vmax.f32 %v7062_v3, %v7050_v20  ;;  %v2554_v7 = vld [vmem:[%s8274_s9 + $0xd0] sm:$0xff] }
 0x368   : > { %4893 = vpow2.f32 %v2091_v57  ;;  %v7081_v57 = vadd.f32 %v2841_v13, %v2552_v4  ;;  %v2846_v18 = vmul.f32 0.17677669, %v2730_v46  ;;  %v2556_v46 = vld [vmem:[%s8274_s9 + $0xe0] sm:$0xff] }
 0x369   : > { %v7060_v27 = vpop.eup %4881  ;;  %4895 = vpow2.f32 %v2093_v48  ;;  %2185 = vadd.xlane.f32.xlu1 %v2184_v50  ;;  %2976 = vmax.xlane.f32.xlu0 %v2975_v52  ;;  %8767 = vst [vmem:[#allocation118_spill] sm:$0xff] %v7070_v53  ;;  %v2732_v48 = vpop.f32.mrf.mxu1  ;;  %v2843_v50 = vmul.f32 0.17677669, %v6992_v2  ;;  %v7089_v52 = vadd.f32 %v2844_v9, %v2555_v12  ;;  %v2557_v2 = vld [vmem:[%s8274_s9 + $0xe8] sm:$0xff] }
 0x36a   : > { %8764 = vst [vmem:[#allocation115_spill] sm:$0xff] %v7060_v27  ;;  %v7065_v39 = vpop.eup %4883  ;;  %8769 = vst [vmem:[#allocation120_spill] sm:$0xff] %v7081_v57  ;;  %v2981_v13 = vmax.f32 %v7081_v57, %v7070_v53  ;;  %v7107_v12 = vadd.f32 %v2846_v18, %v2557_v2 }
 0x36b   : > { %8766 = vst [vmem:[#allocation117_spill] sm:$0xff] %v7065_v39  ;;  %v2187_v0 = vadd.f32 %v7065_v39, %v7060_v27  ;;  %8771 = vst [vmem:[#allocation122_spill] sm:$0xff] %v7089_v52  ;;  %v2734_v4 = vpop.f32.mrf.mxu1  ;;  %v2845_v39 = vmul.f32 0.17677669, %v2728_v5  ;;  %v2559_v5 = vld [vmem:[%s8274_s9 + $0xf8] sm:$0xff] }
 0x36c   : > { %8775 = vst [vmem:[#allocation126_spill] sm:$0xff] %v7107_v12 }
 0x36d   : > { %v7079_v11 = vpop.eup %4885  ;;  %2188 = vadd.xlane.f32.xlu0 %v2187_v0  ;;  %2979 = vmax.xlane.f32.xlu1 %v2978_v61  ;;  %v7100_v61 = vadd.f32 %v2843_v50, %v2554_v7  ;;  %v7118_v50 = vadd.f32 %v2845_v39, %v2556_v46  ;;  %v2847_v7 = vmul.f32 0.17677669, %v2732_v48 }
 0x36e   : > { %8768 = vst [vmem:[#allocation119_spill] sm:$0xff] %v7079_v11  ;;  %v7084_v15 = vpop.eup %4887 }
 0x36f   : > { %8770 = vst [vmem:[#allocation121_spill] sm:$0xff] %v7084_v15  ;;  %v2190_v27 = vadd.f32 %v7084_v15, %v7079_v11  ;;  %8773 = vst [vmem:[#allocation124_spill] sm:$0xff] %v7100_v61  ;;  %v2848_v11 = vmul.f32 0.17677669, %v2734_v4  ;;  %v2984_v32 = vmax.f32 %v7100_v61, %v7089_v52  ;;  %v7127_v4 = vpop.f32.mrf.mxu1  ;;  %v2987_v39 = vmax.f32 %v7118_v50, %v7107_v12 }
 0x370   : > { %8777 = vst [vmem:[#allocation128_spill] sm:$0xff] %v7118_v50  ;;  %v2849_v58 = vmul.f32 0.17677669, %v7127_v4 }
 0x371   : > { %v7098_v0 = vpop.eup %4889  ;;  %2191 = vadd.xlane.f32.xlu1 %v2190_v27  ;;  %2982 = vmax.xlane.f32.xlu0 %v2981_v13  ;;  %v2558_v13 = vld [vmem:[%s8274_s9 + $0xf0] sm:$0xff]  ;;  %v7125_v2 = vadd.f32 %v2848_v11, %v2559_v5 }
 0x372   : > { %8772 = vst [vmem:[#allocation123_spill] sm:$0xff] %v7098_v0  ;;  %v7102_v9 = vpop.eup %4891  ;;  %v7133_v46 = vadd.f32 %v2847_v7, %v2558_v13 }
 0x373   : > { %8774 = vst [vmem:[#allocation125_spill] sm:$0xff] %v7102_v9  ;;  %v2193_v15 = vadd.f32 %v7102_v9, %v7098_v0  ;;  %8779 = vst [vmem:[#allocation130_spill] sm:$0xff] %v7125_v2 }
 0x374   : > { %8780 = vst [vmem:[#allocation131_spill] sm:$0xff] %v7133_v46  ;;  %v2990_v48 = vmax.f32 %v7133_v46, %v7125_v2 }
 0x375   : > { %v7116_v27 = vpop.eup %4893  ;;  %2194 = vadd.xlane.f32.xlu0 %v2193_v15  ;;  %2985 = vmax.xlane.f32.xlu1 %v2984_v32  ;;  %v7135_v32 = vpop.f32.mrf.mxu1 }
 0x376   : > { %8776 = vst [vmem:[#allocation127_spill] sm:$0xff] %v7116_v27  ;;  %v7120_v18 = vpop.eup %4895 }
 0x377   : > { %8778 = vst [vmem:[#allocation129_spill] sm:$0xff] %v7120_v18  ;;  %v2196_v0 = vadd.f32 %v7120_v18, %v7116_v27  ;;  %v7139_v11 = vpop.f32.mrf.mxu1 }
 0x379   : > { %2197 = vadd.xlane.f32.xlu1 %v2196_v0  ;;  %2988 = vmax.xlane.f32.xlu0 %v2987_v39  ;;  %v7141_v15 = vpop.f32.mrf.mxu1 }
 0x37b   : > { %v7143_v5 = vpop.f32.mrf.mxu1 }
 0x37d   : > { %2991 = vmax.xlane.f32.xlu1 %v2990_v48  ;;  %v7145_v27 = vpop.f32.mrf.mxu1 }
 0x37f   : > { %v7147_v18 = vpop.f32.mrf.mxu1 }
 0x381   : > { %v7149_v7 = vpop.f32.mrf.mxu1 }
 0x383   : > { %v7151_v0 = vpop.f32.mrf.mxu1 }
 0x385   : > { %v7153_v13 = vpop.f32.mrf.mxu1 }
 0x387   : > { %v7155_v39 = vpop.f32.mrf.mxu1 }
 0x389   : > { %v7157_v9 = vpop.f32.mrf.mxu1 }
 0x38b   : > { %v7159_v2 = vpop.f32.mrf.mxu1 }
 0x38c   : > { %8781 = vst [vmem:[#allocation132_spill] sm:$0xff] %v7159_v2 }
 0x38d   : > { %v7161_v12 = vpop.f32.mrf.mxu1 }
 0x38f   : > { %v7165_v3 = vpop.f32.mrf.mxu1 }
 0x390   : > { %8782 = vst [vmem:[#allocation133_spill] sm:$0xff] %v7165_v3  ;;  %v8806_v3 = vld [vmem:[#allocation46_spill] sm:$0xff] }
 0x3a6   : > { %v2129_v48 = vpop.xlane.xlu0 %2128 }
 0x3a7   : > { %4897 = vrcp.f32 %v2129_v48 }
 0x3aa   : > { %v2132_v46 = vpop.xlane.xlu1 %2131  ;;  %v1913_v63 = vpop.xlane.xlu0 %1912 }
 0x3ab   : > { %4899 = vrcp.f32 %v2132_v46  ;;  %v1983_v50 = vsub.f32 %v6614_v17, %v1913_v63  ;;  %v1984_v52 = vsub.f32 %v6600_v56, %v1913_v63  ;;  %v8794_v56 = vld [vmem:[#allocation70_spill] sm:$0xff]  ;;  %v8797_v17 = vld [vmem:[#allocation44_spill] sm:$0xff]  ;;  %v2850_v46 = vmul.f32 0.17677669, %v7135_v32 }
 0x3ad   : > { %v2095_v61 = vmul.f32 1.442695, %v1983_v50  ;;  %v2097_v53 = vmul.f32 1.442695, %v1984_v52  ;;  %v8799_v50 = vld [vmem:[#allocation68_spill] sm:$0xff] }
 0x3ae   : > { %v2135_v57 = vpop.xlane.xlu0 %2134  ;;  %v1916_v20 = vpop.xlane.xlu1 %1915 }
 0x3af   : > { %4901 = vpow2.f32 %v2095_v61  ;;  %v1985_v42 = vsub.f32 %v6638_v59, %v1916_v20  ;;  %v1986_v48 = vsub.f32 %v6627_v31, %v1916_v20  ;;  %v7175_v61 = vpop.f32.mrf.mxu1 }
 0x3b0   : > { %4903 = vpow2.f32 %v2097_v53  ;;  %8789 = vst [vmem:[#allocation134_spill] sm:$0xff] %v7175_v61  ;;  %v8809_v53 = vld [vmem:[#allocation54_spill] sm:$0xff] }
 0x3b1   : > { %v2099_v49 = vmul.f32 1.442695, %v1985_v42  ;;  %v2101_v33 = vmul.f32 1.442695, %v1986_v48  ;;  %4905 = vrcp.f32 %v2135_v57  ;;  %v8792_v48 = vld [vmem:[#allocation97_spill] sm:$0xff] }
 0x3b2   : > { %v2138_v63 = vpop.xlane.xlu1 %2137  ;;  %v1919_v52 = vpop.xlane.xlu0 %1918  ;;  %v8795_v57 = vld [vmem:[#allocation73_spill] sm:$0xff] }
 0x3b3   : > { %4907 = vpow2.f32 %v2099_v49  ;;  %v1987_v31 = vsub.f32 %v6662_v26, %v1919_v52  ;;  %v1988_v59 = vsub.f32 %v6646_v6, %v1919_v52  ;;  %v8798_v26 = vld [vmem:[#allocation65_spill] sm:$0xff] }
 0x3b4   : > { %4909 = vpow2.f32 %v2101_v33  ;;  %v4898_v35 = vpop.eup %4897  ;;  %v8805_v42 = vld [vmem:[#allocation41_spill] sm:$0xff] }
 0x3b5   : > { %4911 = vrcp.f32 %v2138_v63  ;;  %v2103_v8 = vmul.f32 1.442695, %v1987_v31  ;;  %v2105_v49 = vmul.f32 1.442695, %v1988_v59  ;;  %v7197_v31 = vpop.f32.mrf.mxu1  ;;  %v8810_v52 = vld [vmem:[#allocation57_spill] sm:$0xff]  ;;  %v2561_v63 = vld [vmem:[%s8274_s9 + $0x108] sm:$0xff]  ;;  %v2225_v4 = vmul.f32 %v4898_v35, %v6595_v62 }
 0x3b6   : > { %v2141_v33 = vpop.xlane.xlu0 %2140  ;;  %v1922_v20 = vpop.xlane.xlu1 %1921  ;;  %8808 = vst [vmem:[#allocation97_spill] sm:$0xff] %v7197_v31  ;;  %v2224_v31 = vmul.f32 %v4898_v35, %v6592_v43  ;;  %v2562_v62 = vld [vmem:[%s8274_s9 + $0x110] sm:$0xff]  ;;  %v2852_v35 = vmul.f32 0.17677669, %v7141_v15 }
 0x3b7   : > { %4913 = vpow2.f32 %v2103_v8  ;;  %v1989_v59 = vsub.f32 %v6686_v1, %v1922_v20  ;;  %v1990_v6 = vsub.f32 %v6675_v38, %v1922_v20  ;;  %v2851_v38 = vmul.f32 0.17677669, %v7139_v11  ;;  %v7216_v24 = vpop.f32.mrf.mxu1 }
 0x3b8   : > { %v4900_v2 = vpop.eup %4899  ;;  %4915 = vpow2.f32 %v2105_v49  ;;  %v2560_v49 = vld [vmem:[%s8274_s9 + $0x100] sm:$0xff]  ;;  %8811 = vst [vmem:[#allocation49_spill] sm:$0xff] %v7216_v24 }
 0x3b9   : > { %v2227_v8 = vmul.f32 %v4900_v2, %v6612_v44  ;;  %v2107_v1 = vmul.f32 1.442695, %v1989_v59  ;;  %v2109_v36 = vmul.f32 1.442695, %v1990_v6  ;;  %4917 = vrcp.f32 %v2141_v33 }
 0x3ba   : > { %v2144_v20 = vpop.xlane.xlu1 %2143  ;;  %v1925_v10 = vpop.xlane.xlu0 %1924  ;;  %v2228_v32 = vmul.f32 %v4900_v2, %v6617_v41  ;;  %v7222_v33 = vadd.f32 %v2850_v46, %v2561_v63  ;;  %v2563_v41 = vld [vmem:[%s8274_s9 + $0x118] sm:$0xff]  ;;  %v8812_v63 = vld [vmem:[#allocation98_spill] sm:$0xff]  ;;  %v7238_v61 = vadd.f32 %v2849_v58, %v2560_v49 }
 0x3bb   : > { %4919 = vpow2.f32 %v2107_v1  ;;  %v1991_v43 = vsub.f32 %v6710_v14, %v1925_v10  ;;  %v1992_v44 = vsub.f32 %v6694_v30, %v1925_v10  ;;  %v2319_v6 = vpack.c.bf16 %v2227_v8, %v2224_v31  ;;  %v8813_v31 = vld [vmem:[#allocation60_spill] sm:$0xff]  ;;  %v8814_v8 = vld [vmem:[#allocation99_spill] sm:$0xff] }
 0x3bc   : > { %v7220_v11 = vpop.eup %4901  ;;  %4921 = vpow2.f32 %v2109_v36  ;;  %v2320_v2 = vpack.c.bf16 %v2228_v32, %v2225_v4  ;;  %v2854_v30 = vmul.f32 0.17677669, %v7145_v27  ;;  %v3470_v59 = vpack.c.bf16 %v8813_v31, %v8812_v63  ;;  %v8815_v1 = vld [vmem:[#allocation63_spill] sm:$0xff] }
 0x3bd   : > { %v7231_v14 = vpop.eup %4903  ;;  %4923 = vrcp.f32 %v2144_v20  ;;  %v2111_v10 = vmul.f32 1.442695, %v1991_v43  ;;  %v2113_v46 = vmul.f32 1.442695, %v1992_v44  ;;  %v3471_v24 = vpack.c.bf16 %v8815_v1, %v8814_v8  ;;  %v2565_v36 = vld [vmem:[%s8274_s9 + $0x128] sm:$0xff]  ;;  %v7247_v43 = vpop.f32.mrf.mxu1 }
 0x3be   : > { %2399 = vmatprep.mubr.bf16.mxu0 %v2320_v2  ;;  %v2147_v15 = vpop.xlane.xlu0 %2146  ;;  %v1928_v4 = vpop.xlane.xlu1 %1927  ;;  %v2199_v27 = vadd.f32 %v7231_v14, %v7220_v11  ;;  %v7245_v32 = vadd.f32 %v2851_v38, %v2562_v62  ;;  %v7253_v63 = vadd.f32 %v2852_v35, %v2563_v41  ;;  %v2853_v2 = vmul.f32 0.17677669, %v7143_v5 }
 0x3bf   : > { %v4906_v20 = vpop.eup %4905  ;;  %4925 = vpow2.f32 %v2111_v10  ;;  %2400 = vmatmul.mubr.bf16.vlgmr.msra.gmra.mxu0 %v2319_v6  ;;  %v1993_v58 = vsub.f32 %v6734_v34, %v1928_v4  ;;  %v1994_v49 = vsub.f32 %v6723_v23, %v1928_v4  ;;  %v8816_v31 = vpack.c.bf16 %v8799_v50, %v8798_v26  ;;  %v7273_v8 = vpop.f32.mrf.mxu1  ;;  %v8818_v4 = vld [vmem:[#allocation61_spill] sm:$0xff] }
 0x3c0   : > { %v7251_v44 = vpop.eup %4907  ;;  %4927 = vpow2.f32 %v2113_v46  ;;  %2200 = vadd.xlane.f32.xlu0 %v2199_v27  ;;  %v2993_v38 = vmax.f32 %v7238_v61, %v7222_v33  ;;  %v7263_v34 = vadd.f32 %v2854_v30, %v2565_v36  ;;  %v2855_v23 = vmul.f32 0.17677669, %v7147_v18  ;;  %v2564_v30 = vld [vmem:[%s8274_s9 + $0x120] sm:$0xff]  ;;  %v2566_v36 = vld [vmem:[%s8274_s9 + $0x130] sm:$0xff] }
 0x3c1   : > { %4479 = vmatpush3.bf16.msra.mxu0 %v8816_v31  ;;  %v7261_v6 = vpop.eup %4909  ;;  %v2115_v62 = vmul.f32 1.442695, %v1993_v58  ;;  %v2117_v41 = vmul.f32 1.442695, %v1994_v49  ;;  %v2856_v5 = vmul.f32 0.17677669, %v7149_v7  ;;  %4929 = vrcp.f32 %v2147_v15 }
 0x3c2   : > { %4480 = vmatprep.subr.bf16.mxu0 %v3471_v24  ;;  %v4912_v35 = vpop.eup %4911  ;;  %v2150_v10 = vpop.xlane.xlu1 %2149  ;;  %v2202_v26 = vadd.f32 %v7261_v6, %v7251_v44  ;;  %v2231_v46 = vmul.f32 %v4906_v20, %v6641_v45  ;;  %v2858_v45 = vmul.f32 0.17677669, %v7153_v13  ;;  %v8817_v15 = vpack.c.bf16 %v8797_v17, %v8796_v25  ;;  %v8819_v27 = vld [vmem:[#allocation62_spill] sm:$0xff]  ;;  %v2569_v25 = vld [vmem:[%s8274_s9 + $0x148] sm:$0xff] }
 0x3c3   : > { %v1931_v50 = vpop.xlane.xlu0 %1930  ;;  %4931 = vpow2.f32 %v2115_v62  ;;  %v2234_v7 = vmul.f32 %v4912_v35, %v6665_v51  ;;  %v2567_v51 = vld [vmem:[%s8274_s9 + $0x138] sm:$0xff]  ;;  %v7294_v62 = vadd.f32 %v2853_v2, %v2564_v30 }
 0x3c4   : > { %v1995_v24 = vsub.f32 %v6758_v19, %v1931_v50  ;;  %v1996_v18 = vsub.f32 %v6742_v47, %v1931_v50  ;;  %v7278_v1 = vpop.eup %4913  ;;  %4933 = vpow2.f32 %v2117_v41  ;;  %2203 = vadd.xlane.f32.xlu1 %v2202_v26  ;;  %v2230_v19 = vmul.f32 %v4906_v20, %v8818_v4  ;;  %2994 = vmax.xlane.f32.xlu0 %v2993_v38 }
 0x3c5   : > { %4481 = vmatpush3.bf16.msra.mxu0 %v8817_v15  ;;  %v2233_v47 = vmul.f32 %v4912_v35, %v8819_v27  ;;  %v7289_v58 = vpop.eup %4915  ;;  %4935 = vrcp.f32 %v2150_v10  ;;  %v2322_v13 = vpack.c.bf16 %v2234_v7, %v2231_v46  ;;  %v2996_v10 = vmax.f32 %v7245_v32, %v7253_v63 }
 0x3c6   : > { %v2119_v49 = vmul.f32 1.442695, %v1995_v24  ;;  %v2121_v31 = vmul.f32 1.442695, %v1996_v18  ;;  %4482 = vmatprep.subr.bf16.mxu0 %v3470_v59  ;;  %v1934_v41 = vpop.xlane.xlu1 %1933  ;;  %v2205_v35 = vadd.f32 %v7289_v58, %v7278_v1  ;;  %v4918_v50 = vpop.eup %4917  ;;  %v7303_v26 = vadd.f32 %v2855_v23, %v2566_v36 }
 0x3c7   : > { %v2321_v17 = vpack.c.bf16 %v2233_v47, %v2230_v19  ;;  %v2153_v20 = vpop.xlane.xlu0 %2152  ;;  %v7305_v59 = vpop.f32.mrf.mxu1  ;;  %2407 = vmatprep.mubr.bf16.mxu0 %v2322_v13  ;;  %v1997_v2 = vsub.f32 %v6782_v29, %v1934_v41  ;;  %v1998_v38 = vsub.f32 %v6771_v60, %v1934_v41  ;;  %v7311_v30 = vadd.f32 %v2856_v5, %v2567_v51  ;;  %v2570_v51 = vld [vmem:[%s8274_s9 + $0x150] sm:$0xff]  ;;  %v8823_v13 = vld [vmem:[#allocation66_spill] sm:$0xff] }
 0x3c8   : > { %4937 = vpow2.f32 %v2119_v49  ;;  %v7309_v46 = vpop.eup %4919  ;;  %v2857_v24 = vmul.f32 0.17677669, %v7151_v0  ;;  %2997 = vmax.xlane.f32.xlu1 %v2996_v10  ;;  %v2999_v23 = vmax.f32 %v7294_v62, %v7263_v34  ;;  %v7318_v7 = vadd.f32 %v2858_v45, %v2569_v25  ;;  %2206 = vadd.xlane.f32.xlu0 %v2205_v35  ;;  %v8822_v49 = vld [vmem:[#allocation64_spill] sm:$0xff]  ;;  %v2573_v35 = vld [vmem:[%s8274_s9 + $0x168] sm:$0xff] }
 0x3c9   : > { %4939 = vpow2.f32 %v2121_v31  ;;  %2408 = vmatmul.mubr.bf16.gmra.mxu0 %v2321_v17  ;;  %v7316_v18 = vpop.eup %4921  ;;  %v2859_v29 = vmul.f32 0.17677669, %v7155_v39  ;;  %v2123_v36 = vmul.f32 1.442695, %v1997_v2  ;;  %v2125_v60 = vmul.f32 1.442695, %v1998_v38 }
 0x3ca   : > { %v8820_v5 = vpack.c.bf16 %v8795_v57, %v8794_v56  ;;  %v4924_v0 = vpop.eup %4923  ;;  %v2860_v15 = vmul.f32 0.17677669, %v7157_v9  ;;  %4941 = vrcp.f32 %v2153_v20  ;;  %v8821_v4 = vpack.c.bf16 %v8810_v52, %v8809_v53  ;;  %v2156_v19 = vpop.xlane.xlu1 %2155  ;;  %v2568_v56 = vld [vmem:[%s8274_s9 + $0x140] sm:$0xff] }
 0x3cb   : > { %v2947_v45 = vpop.xlane.xlu0 %2946  ;;  %v2208_v39 = vadd.f32 %v7316_v18, %v7309_v46  ;;  %v2237_v27 = vmul.f32 %v4918_v50, %v6689_v54  ;;  %v7334_v57 = vpop.f32.mrf.mxu1  ;;  %4943 = vpow2.f32 %v2123_v36  ;;  %v2240_v53 = vmul.f32 %v4924_v0, %v6713_v37  ;;  %v2571_v37 = vld [vmem:[%s8274_s9 + $0x158] sm:$0xff] }
 0x3cc   : > { %4483 = vmatpush3.bf16.msra.mxu0 %v8820_v5  ;;  %v3041_v9 = vsub.f32 %v6806_v40, %v2947_v45  ;;  %v3042_v47 = vsub.f32 %v6790_v16, %v2947_v45  ;;  %v7339_v52 = vpop.eup %4925  ;;  %v2862_v54 = vmul.f32 0.17677669, %v7161_v12  ;;  %4945 = vpow2.f32 %v2125_v60  ;;  %3000 = vmax.xlane.f32.xlu0 %v2999_v23 }
 0x3cd   : > { %4484 = vmatprep.subr.bf16.mxu0 %v8821_v4  ;;  %2209 = vadd.xlane.f32.xlu1 %v2208_v39  ;;  %v2236_v31 = vmul.f32 %v4918_v50, %v8822_v49  ;;  %v2239_v25 = vmul.f32 %v4924_v0, %v8823_v13  ;;  %v7347_v17 = vpop.eup %4927  ;;  %4947 = vrcp.f32 %v2156_v19  ;;  %v8824_v20 = vpack.c.bf16 %v8793_v55, %v8792_v48  ;;  %v7369_v23 = vpop.f32.mrf.mxu1  ;;  %v8826_v0 = vld [vmem:[#allocation132_spill] sm:$0xff]  ;;  %v8827_v39 = vld [vmem:[#allocation133_spill] sm:$0xff] }
 0x3ce   : > { %v3105_v16 = vmul.f32 1.442695, %v3041_v9  ;;  %v3107_v40 = vmul.f32 1.442695, %v3042_v47  ;;  %v2324_v12 = vpack.c.bf16 %v2240_v53, %v2237_v27  ;;  %v7355_v41 = vadd.f32 %v2857_v24, %v2568_v56  ;;  %v2950_v38 = vpop.xlane.xlu1 %2949  ;;  %v4930_v48 = vpop.eup %4929  ;;  %v8828_v56 = vld [vmem:[#allocation96_spill] sm:$0xff]  ;;  %v8829_v9 = vld [vmem:[#allocation95_spill] sm:$0xff] }
 0x3cf   : > { %v8825_v10 = vpack.c.bf16 %v8807_v22, %v8806_v3  ;;  %v2323_v50 = vpack.c.bf16 %v2239_v25, %v2236_v31  ;;  %v2159_v2 = vpop.xlane.xlu0 %2158  ;;  %v2211_v36 = vadd.f32 %v7347_v17, %v7339_v52  ;;  %v3002_v55 = vmax.f32 %v7303_v26, %v7311_v30  ;;  %v8831_v53 = vld [vmem:[#allocation134_spill] sm:$0xff]  ;;  %v8832_v49 = vld [vmem:[#allocation36_spill] sm:$0xff] }
 0x3d0   : > { %4485 = vmatpush3.bf16.msra.mxu0 %v8824_v20  ;;  %v7367_v24 = vadd.f32 %v2859_v29, %v2570_v51  ;;  %4949 = vpow2.f32 %v3105_v16  ;;  %2415 = vmatprep.mubr.bf16.mxu0 %v2324_v12  ;;  %v3043_v60 = vsub.f32 %v6830_v21, %v2950_v38  ;;  %v3044_v22 = vsub.f32 %v6819_v28, %v2950_v38  ;;  %v7373_v3 = vpop.eup %4931  ;;  %v7398_v20 = vpop.f32.mrf.mxu1  ;;  %v8835_v12 = vld [vmem:[#allocation88_spill] sm:$0xff] }
 0x3d1   : > { %4486 = vmatprep.subr.bf16.mxu0 %v8825_v10  ;;  %v7375_v5 = vadd.f32 %v2860_v15, %v2571_v37  ;;  %v2861_v4 = vmul.f32 0.17677669, %v8826_v0  ;;  %4951 = vpow2.f32 %v3107_v40  ;;  %2416 = vmatmul.mubr.bf16.gmra.mxu0 %v2323_v50  ;;  %v3005_v29 = vmax.f32 %v7355_v41, %v7318_v7  ;;  %v7380_v19 = vpop.eup %4933  ;;  %v8834_v37 = vld [vmem:[#allocation71_spill] sm:$0xff]  ;;  %v2572_v40 = vld [vmem:[%s8274_s9 + $0x160] sm:$0xff] }
 0x3d2   : > { %3003 = vmax.xlane.f32.xlu1 %v3002_v55  ;;  %v7382_v45 = vadd.f32 %v2862_v54, %v2573_v35  ;;  %v2863_v21 = vmul.f32 0.17677669, %v8827_v39  ;;  %v3109_v27 = vmul.f32 1.442695, %v3043_v60  ;;  %v3111_v28 = vmul.f32 1.442695, %v3044_v22  ;;  %2212 = vadd.xlane.f32.xlu0 %v2211_v36  ;;  %v4936_v47 = vpop.eup %4935  ;;  %v2162_v13 = vpop.xlane.xlu1 %2161 }
 0x3d3   : > { %v8830_v15 = vpack.c.bf16 %v8828_v56, %v8829_v9  ;;  %v2864_v51 = vmul.f32 0.17677669, %v8831_v53  ;;  %4953 = vrcp.f32 %v2159_v2  ;;  %v8833_v31 = vpack.c.bf16 %v8805_v42, %v8832_v49  ;;  %v2953_v54 = vpop.xlane.xlu0 %2952  ;;  %v8836_v10 = vld [vmem:[#allocation86_spill] sm:$0xff]  ;;  %v8837_v42 = vld [vmem:[#allocation75_spill] sm:$0xff]  ;;  %v2574_v36 = vld [vmem:[%s8274_s9 + $0x170] sm:$0xff] }
 0x3d4   : > { %v2214_v25 = vadd.f32 %v7380_v19, %v7373_v3  ;;  %v2243_v16 = vmul.f32 %v4930_v48, %v8834_v37  ;;  %4955 = vpow2.f32 %v3109_v27  ;;  %v3045_v35 = vsub.f32 %v8835_v12, %v2953_v54  ;;  %v8839_v55 = vld [vmem:[#allocation49_spill] sm:$0xff]  ;;  %v8841_v39 = vld [vmem:[#allocation74_spill] sm:$0xff] }
 0x3d5   : > { %4487 = vmatpush3.bf16.msra.mxu0 %v8830_v15  ;;  %v3046_v50 = vsub.f32 %v8836_v10, %v2953_v54  ;;  %v2246_v2 = vmul.f32 %v4936_v47, %v8837_v42  ;;  %v7403_v38 = vpop.eup %4937  ;;  %v2866_v60 = vmul.f32 0.17677669, %v8839_v55  ;;  %4957 = vpow2.f32 %v3111_v28  ;;  %v8840_v22 = vld [vmem:[#allocation69_spill] sm:$0xff]  ;;  %v8843_v49 = vld [vmem:[#allocation94_spill] sm:$0xff]  ;;  %v8849_v42 = vld [vmem:[#allocation76_spill] sm:$0xff] }
 0x3d6   : > { %4488 = vmatprep.subr.bf16.mxu0 %v8833_v31  ;;  %8838 = vst [vmem:[#allocation70_spill] sm:$0xff] %v7403_v38  ;;  %2215 = vadd.xlane.f32.xlu1 %v2214_v25  ;;  %v2242_v0 = vmul.f32 %v4930_v48, %v8840_v22  ;;  %v2245_v27 = vmul.f32 %v4936_v47, %v8841_v39  ;;  %v7411_v56 = vpop.eup %4939  ;;  %v2575_v9 = vld [vmem:[%s8274_s9 + $0x178] sm:$0xff]  ;;  %4959 = vrcp.f32 %v2162_v13  ;;  %v3113_v15 = vmul.f32 1.442695, %v3045_v35  ;;  %v2577_v48 = vld [vmem:[%s8274_s9 + $0x188] sm:$0xff]  ;;  %v8846_v47 = vld [vmem:[#allocation34_spill] sm:$0xff]  ;;  %v2956_v35 = vpop.xlane.xlu1 %2955 }
 0x3d7   : > { %8842 = vst [vmem:[#allocation73_spill] sm:$0xff] %v7411_v56  ;;  %v3115_v53 = vmul.f32 1.442695, %v3046_v50  ;;  %v8844_v31 = vld [vmem:[#allocation93_spill] sm:$0xff]  ;;  %3006 = vmax.xlane.f32.xlu0 %v3005_v29  ;;  %v2326_v28 = vpack.c.bf16 %v2246_v2, %v2243_v16  ;;  %v7419_v25 = vadd.f32 %v2861_v4, %v2572_v40  ;;  %v2165_v13 = vpop.xlane.xlu0 %2164  ;;  %v2217_v50 = vadd.f32 %v7411_v56, %v7403_v38  ;;  %v4942_v16 = vpop.eup %4941  ;;  %v8850_v55 = vld [vmem:[#allocation67_spill] sm:$0xff] }
 0x3d8   : > { %v8845_v54 = vpack.c.bf16 %v8843_v49, %v8844_v31  ;;  %v8847_v37 = vld [vmem:[#allocation37_spill] sm:$0xff]  ;;  %v2325_v10 = vpack.c.bf16 %v2245_v27, %v2242_v0  ;;  %v3008_v29 = vmax.f32 %v7367_v24, %v7375_v5  ;;  %v7431_v4 = vadd.f32 %v2863_v21, %v2574_v36  ;;  %v7433_v40 = vpop.f32.mrf.mxu1  ;;  %v7437_v0 = vpop.eup %4943 }
 0x3d9   : > { %v8848_v12 = vpack.c.bf16 %v8846_v47, %v8847_v37  ;;  %4961 = vpow2.f32 %v3113_v15  ;;  %2423 = vmatprep.mubr.bf16.mxu0 %v2326_v28  ;;  %v3047_v2 = vsub.f32 %v8849_v42, %v2956_v35  ;;  %v3048_v22 = vsub.f32 %v8850_v55, %v2956_v35  ;;  %8851 = vst [vmem:[#allocation47_spill] sm:$0xff] %v7437_v0  ;;  %v8852_v27 = vld [vmem:[#allocation97_spill] sm:$0xff]  ;;  %v7444_v36 = vpop.eup %4945  ;;  %v8854_v47 = vld [vmem:[#allocation92_spill] sm:$0xff]  ;;  %v8855_v37 = vld [vmem:[#allocation91_spill] sm:$0xff] }
 0x3da   : > { %4489 = vmatpush3.bf16.msra.mxu0 %v8845_v54  ;;  %v7439_v39 = vadd.f32 %v2864_v51, %v2575_v9  ;;  %v2865_v49 = vmul.f32 0.17677669, %v8852_v27  ;;  %4963 = vpow2.f32 %v3115_v53  ;;  %3009 = vmax.xlane.f32.xlu1 %v3008_v29  ;;  %v3011_v21 = vmax.f32 %v7419_v25, %v7382_v45  ;;  %8853 = vst [vmem:[#allocation44_spill] sm:$0xff] %v7444_v36  ;;  %v4948_v9 = vpop.eup %4947  ;;  %v2168_v29 = vpop.xlane.xlu1 %2167  ;;  %v8861_v55 = vld [vmem:[#allocation85_spill] sm:$0xff] }
 0x3db   : > { %4490 = vmatprep.subr.bf16.mxu0 %v8848_v12  ;;  %2424 = vmatmul.mubr.bf16.gmra.mxu0 %v2325_v10  ;;  %v7446_v15 = vadd.f32 %v2866_v60, %v2577_v48  ;;  %v2867_v31 = vmul.f32 0.17677669, %v7247_v43  ;;  %v3117_v54 = vmul.f32 1.442695, %v3047_v2  ;;  %v3119_v28 = vmul.f32 1.442695, %v3048_v22  ;;  %v2959_v60 = vpop.xlane.xlu0 %2958 }
 0x3dc   : > { %v8856_v51 = vpack.c.bf16 %v8854_v47, %v8855_v37  ;;  %2218 = vadd.xlane.f32.xlu0 %v2217_v50  ;;  %v2868_v53 = vmul.f32 0.17677669, %v7273_v8  ;;  %4965 = vrcp.f32 %v2165_v13  ;;  %v8857_v12 = vld [vmem:[#allocation39_spill] sm:$0xff]  ;;  %v8858_v10 = vld [vmem:[#allocation42_spill] sm:$0xff]  ;;  %v2220_v43 = vadd.f32 %v7444_v36, %v7437_v0  ;;  %v2800_v50 = vpop.f32.mrf.mxu1  ;;  %v8862_v13 = vld [vmem:[#allocation100_spill] sm:$0xff] }
 0x3dd   : > { %v8859_v35 = vpack.c.bf16 %v8857_v12, %v8858_v10  ;;  %v8860_v48 = vld [vmem:[#allocation78_spill] sm:$0xff]  ;;  %4967 = vpow2.f32 %v3117_v54  ;;  %v3049_v8 = vsub.f32 %v8861_v55, %v2959_v60  ;;  %v3050_v22 = vsub.f32 %v8862_v13, %v2959_v60  ;;  %v8863_v27 = vld [vmem:[#allocation81_spill] sm:$0xff]  ;;  %v7465_v37 = vpop.eup %4949 }
 0x3de   : > { %4491 = vmatpush3.bf16.msra.mxu0 %v8856_v51  ;;  %v2249_v42 = vmul.f32 %v4942_v16, %v8860_v48  ;;  %v2576_v2 = vld [vmem:[%s8274_s9 + $0x180] sm:$0xff]  ;;  %v2252_v47 = vmul.f32 %v4948_v9, %v8863_v27  ;;  %8864 = vst [vmem:[#allocation65_spill] sm:$0xff] %v7465_v37  ;;  %v2578_v51 = vld [vmem:[%s8274_s9 + $0x190] sm:$0xff]  ;;  %v2870_v12 = vmul.f32 0.17677669, %v7334_v57  ;;  %4969 = vpow2.f32 %v3119_v28  ;;  %2221 = vadd.xlane.f32.xlu1 %v2220_v43  ;;  %v8865_v10 = vld [vmem:[#allocation77_spill] sm:$0xff]  ;;  %v7473_v0 = vpop.eup %4951 }
 0x3df   : > { %4492 = vmatprep.subr.bf16.mxu0 %v8859_v35  ;;  %v2248_v35 = vmul.f32 %v4942_v16, %v8865_v10  ;;  %v8866_v48 = vld [vmem:[#allocation80_spill] sm:$0xff]  ;;  %8867 = vst [vmem:[#allocation68_spill] sm:$0xff] %v7473_v0  ;;  %v2579_v60 = vld [vmem:[%s8274_s9 + $0x198] sm:$0xff]  ;;  %4971 = vrcp.f32 %v2168_v29  ;;  %v3121_v55 = vmul.f32 1.442695, %v3049_v8  ;;  %v8868_v27 = vld [vmem:[#allocation90_spill] sm:$0xff]  ;;  %v7481_v28 = vadd.f32 %v2865_v49, %v2576_v2  ;;  %v2171_v43 = vpop.xlane.xlu0 %2170  ;;  %v2962_v10 = vpop.xlane.xlu1 %2961 }
 0x3e0   : > { %v2251_v54 = vmul.f32 %v4948_v9, %v8866_v48  ;;  %v3123_v13 = vmul.f32 1.442695, %v3050_v22  ;;  %v8869_v38 = vld [vmem:[#allocation89_spill] sm:$0xff]  ;;  %3012 = vmax.xlane.f32.xlu0 %v3011_v21  ;;  %v2328_v57 = vpack.c.bf16 %v2252_v47, %v2249_v42  ;;  %v2581_v16 = vld [vmem:[%s8274_s9 + $0x1a8] sm:$0xff]  ;;  %v3233_v29 = vadd.f32 %v7473_v0, %v7465_v37  ;;  %v4954_v22 = vpop.eup %4953  ;;  %v7492_v21 = vpop.f32.mrf.mxu1  ;;  %v8871_v49 = vld [vmem:[#allocation38_spill] sm:$0xff] }
 0x3e1   : > { %v8870_v36 = vpack.c.bf16 %v8868_v27, %v8869_v38  ;;  %v3014_v8 = vmax.f32 %v7431_v4, %v7439_v39  ;;  %v7490_v38 = vadd.f32 %v2867_v31, %v2578_v51  ;;  %4973 = vpow2.f32 %v3121_v55  ;;  %v8872_v42 = vld [vmem:[#allocation102_spill] sm:$0xff]  ;;  %v7496_v47 = vpop.eup %4955 }
 0x3e2   : > { %v2327_v9 = vpack.c.bf16 %v2251_v54, %v2248_v35  ;;  %2431 = vmatprep.mubr.bf16.mxu0 %v2328_v57  ;;  %v3052_v2 = vsub.f32 %v8872_v42, %v2962_v10  ;;  %8873 = vst [vmem:[#allocation41_spill] sm:$0xff] %v7496_v47  ;;  %v7498_v35 = vadd.f32 %v2868_v53, %v2579_v60  ;;  %v2869_v48 = vmul.f32 0.17677669, %v7305_v59  ;;  %v7503_v51 = vpop.eup %4957  ;;  %v8879_v42 = vld [vmem:[#allocation59_spill] sm:$0xff] }
 0x3e3   : > { %4493 = vmatpush3.bf16.msra.mxu0 %v8870_v36  ;;  %v3051_v36 = vsub.f32 %v8871_v49, %v2962_v10  ;;  %4975 = vpow2.f32 %v3123_v13  ;;  %3015 = vmax.xlane.f32.xlu1 %v3014_v8  ;;  %v3017_v31 = vmax.f32 %v7481_v28, %v7446_v15  ;;  %8874 = vst [vmem:[#allocation46_spill] sm:$0xff] %v7503_v51  ;;  %v2871_v55 = vmul.f32 0.17677669, %v7369_v23  ;;  %v4960_v10 = vpop.eup %4959  ;;  %v2174_v59 = vpop.xlane.xlu1 %2173  ;;  %v8877_v23 = vld [vmem:[#allocation43_spill] sm:$0xff] }
 0x3e4   : > { %2432 = vmatmul.mubr.bf16.gmra.mxu0 %v2327_v9  ;;  %v7505_v54 = vadd.f32 %v2870_v12, %v2581_v16  ;;  %v3127_v57 = vmul.f32 1.442695, %v3052_v2  ;;  %3234 = vadd.xlane.f32.xlu0 %v3233_v29  ;;  %v2872_v53 = vmul.f32 0.17677669, %v7398_v20  ;;  %4977 = vrcp.f32 %v2171_v43  ;;  %v2965_v60 = vpop.xlane.xlu0 %2964  ;;  %v8876_v9 = vld [vmem:[#allocation84_spill] sm:$0xff]  ;;  %v2580_v12 = vld [vmem:[%s8274_s9 + $0x1a0] sm:$0xff]  ;;  %v2804_v16 = vpop.f32.mrf.mxu1 }
 0x3e5   : > { %v3125_v27 = vmul.f32 1.442695, %v3051_v36  ;;  %v3236_v13 = vadd.f32 %v7503_v51, %v7496_v47  ;;  %v2255_v8 = vmul.f32 %v4954_v22, %v8876_v9  ;;  %v3053_v49 = vsub.f32 %v8877_v23, %v2965_v60  ;;  %v8878_v29 = vld [vmem:[#allocation104_spill] sm:$0xff]  ;;  %v8881_v51 = vld [vmem:[#allocation83_spill] sm:$0xff] }
 0x3e6   : > { %8875 = vst [vmem:[#allocation51_spill] sm:$0xff] %v7505_v54  ;;  %v3054_v36 = vsub.f32 %v8878_v29, %v2965_v60  ;;  %v2258_v20 = vmul.f32 %v4960_v10, %v8879_v42  ;;  %v7518_v43 = vpop.eup %4961  ;;  %v2874_v2 = vmul.f32 0.17677669, %v2800_v50  ;;  %v2254_v0 = vmul.f32 %v4954_v22, %v8881_v51  ;;  %v8882_v9 = vld [vmem:[#allocation87_spill] sm:$0xff]  ;;  %v2583_v50 = vld [vmem:[%s8274_s9 + $0x1b8] sm:$0xff] }
 0x3e7   : > { %4979 = vpow2.f32 %v3125_v27  ;;  %8880 = vst [vmem:[#allocation54_spill] sm:$0xff] %v7518_v43  ;;  %3237 = vadd.xlane.f32.xlu1 %v3236_v13  ;;  %v2257_v47 = vmul.f32 %v4960_v10, %v8882_v9  ;;  %v7522_v37 = vpop.eup %4963  ;;  %v2582_v27 = vld [vmem:[%s8274_s9 + $0x1b0] sm:$0xff]  ;;  %v3129_v23 = vmul.f32 1.442695, %v3053_v49  ;;  %v7527_v42 = vadd.f32 %v2869_v48, %v2580_v12  ;;  %v2585_v22 = vld [vmem:[%s8274_s9 + $0x1c8] sm:$0xff]  ;;  %v2968_v10 = vpop.xlane.xlu1 %2967  ;;  %v8886_v49 = vld [vmem:[#allocation106_spill] sm:$0xff] }
 0x3e8   : > { %4981 = vpow2.f32 %v3127_v57  ;;  %8883 = vst [vmem:[#allocation57_spill] sm:$0xff] %v7522_v37  ;;  %v3131_v60 = vmul.f32 1.442695, %v3054_v36  ;;  %3018 = vmax.xlane.f32.xlu0 %v3017_v31  ;;  %v2330_v29 = vpack.c.bf16 %v2258_v20, %v2255_v8  ;;  %v2177_v57 = vpop.xlane.xlu0 %2176  ;;  %v3020_v31 = vmax.f32 %v7490_v38, %v7498_v35  ;;  %v7539_v48 = vpop.f32.mrf.mxu1  ;;  %v8885_v8 = vld [vmem:[#allocation48_spill] sm:$0xff] }
 0x3e9   : > { %4983 = vrcp.f32 %v2174_v59  ;;  %8884 = vst [vmem:[#allocation98_spill] sm:$0xff] %v7527_v42  ;;  %v2329_v51 = vpack.c.bf16 %v2257_v47, %v2254_v0  ;;  %v3239_v59 = vadd.f32 %v7522_v37, %v7518_v43  ;;  %v4966_v13 = vpop.eup %4965  ;;  %v3055_v12 = vsub.f32 %v8885_v8, %v2968_v10 }
 0x3ea   : > { %4985 = vpow2.f32 %v3129_v23  ;;  %2439 = vmatprep.mubr.bf16.mxu0 %v2330_v29  ;;  %v3056_v36 = vsub.f32 %v8886_v49, %v2968_v10  ;;  %v7543_v20 = vpop.eup %4967  ;;  %v7545_v0 = vadd.f32 %v2871_v55, %v2582_v27  ;;  %v2873_v47 = vmul.f32 0.17677669, %v7433_v40  ;;  %v2810_v37 = vpop.f32.mrf.mxu1 }
 0x3eb   : > { %8887 = vst [vmem:[#allocation60_spill] sm:$0xff] %v7543_v20  ;;  %4987 = vpow2.f32 %v3131_v60  ;;  %3021 = vmax.xlane.f32.xlu1 %v3020_v31  ;;  %v3023_v9 = vmax.f32 %v7527_v42, %v7505_v54  ;;  %v7550_v43 = vpop.eup %4969  ;;  %v7552_v23 = vadd.f32 %v2872_v53, %v2583_v50  ;;  %v7554_v29 = vadd.f32 %v2874_v2, %v2585_v22  ;;  %v2180_v40 = vpop.xlane.xlu1 %2179  ;;  %v8893_v53 = vld [vmem:[#allocation52_spill] sm:$0xff] }
 0x3ec   : > { %8888 = vst [vmem:[#allocation99_spill] sm:$0xff] %v7545_v0  ;;  %2440 = vmatmul.mubr.bf16.gmra.mxu0 %v2329_v51  ;;  %8889 = vst [vmem:[#allocation63_spill] sm:$0xff] %v7550_v43  ;;  %v3133_v8 = vmul.f32 1.442695, %v3055_v12  ;;  %v3135_v10 = vmul.f32 1.442695, %v3056_v36  ;;  %3240 = vadd.xlane.f32.xlu0 %v3239_v59  ;;  %v4972_v49 = vpop.eup %4971  ;;  %4989 = vrcp.f32 %v2177_v57  ;;  %v2971_v27 = vpop.xlane.xlu0 %2970  ;;  %v3242_v60 = vadd.f32 %v7550_v43, %v7543_v20 }
 0x3ed   : > { %8890 = vst [vmem:[#allocation61_spill] sm:$0xff] %v7552_v23  ;;  %8891 = vst [vmem:[#allocation62_spill] sm:$0xff] %v7554_v29  ;;  %v2875_v55 = vmul.f32 0.17677669, %v7492_v21  ;;  %v8892_v51 = vld [vmem:[#allocation79_spill] sm:$0xff]  ;;  %v3057_v50 = vsub.f32 %v8893_v53, %v2971_v27  ;;  %v8894_v2 = vld [vmem:[#allocation108_spill] sm:$0xff] }
 0x3ee   : > { %v2261_v31 = vmul.f32 %v4966_v13, %v8892_v51  ;;  %4991 = vpow2.f32 %v3133_v8  ;;  %v3058_v22 = vsub.f32 %v8894_v2, %v2971_v27  ;;  %v8895_v12 = vld [vmem:[#allocation101_spill] sm:$0xff]  ;;  %v7563_v59 = vpop.eup %4973  ;;  %v2584_v21 = vld [vmem:[%s8274_s9 + $0x1c0] sm:$0xff]  ;;  %v2876_v57 = vmul.f32 0.17677669, %v2804_v16  ;;  %v8897_v20 = vld [vmem:[#allocation72_spill] sm:$0xff] }
 0x3ef   : > { %v2264_v36 = vmul.f32 %v4972_v49, %v8895_v12  ;;  %8896 = vst [vmem:[#allocation64_spill] sm:$0xff] %v7563_v59  ;;  %4993 = vpow2.f32 %v3135_v10  ;;  %3243 = vadd.xlane.f32.xlu1 %v3242_v60  ;;  %v2260_v43 = vmul.f32 %v4966_v13, %v8897_v20  ;;  %v8898_v51 = vld [vmem:[#allocation82_spill] sm:$0xff]  ;;  %v2586_v27 = vld [vmem:[%s8274_s9 + $0x1d0] sm:$0xff]  ;;  %v3137_v53 = vmul.f32 1.442695, %v3057_v50  ;;  %v2587_v16 = vld [vmem:[%s8274_s9 + $0x1d8] sm:$0xff]  ;;  %v2974_v13 = vpop.xlane.xlu1 %2973 }
 0x3f0   : > { %v2263_v54 = vmul.f32 %v4972_v49, %v8898_v51  ;;  %v7570_v8 = vpop.eup %4975  ;;  %4995 = vrcp.f32 %v2180_v40  ;;  %v3139_v2 = vmul.f32 1.442695, %v3058_v22  ;;  %3024 = vmax.xlane.f32.xlu0 %v3023_v9  ;;  %v2183_v60 = vpop.xlane.xlu0 %2182  ;;  %v3026_v49 = vmax.f32 %v7545_v0, %v7552_v23  ;;  %v8901_v9 = vld [vmem:[#allocation55_spill] sm:$0xff]  ;;  %v8902_v50 = vld [vmem:[#allocation110_spill] sm:$0xff] }
 0x3f1   : > { %8899 = vst [vmem:[#allocation66_spill] sm:$0xff] %v7570_v8  ;;  %v2332_v12 = vpack.c.bf16 %v2264_v36, %v2261_v31  ;;  %v3245_v20 = vadd.f32 %v7570_v8, %v7563_v59  ;;  %v4978_v51 = vpop.eup %4977  ;;  %v7582_v42 = vadd.f32 %v2873_v47, %v2584_v21  ;;  %v2812_v40 = vpop.f32.mrf.mxu1  ;;  %4997 = vpow2.f32 %v3137_v53  ;;  %v2589_v47 = vld [vmem:[%s8274_s9 + $0x1e8] sm:$0xff] }
 0x3f2   : > { %v2331_v10 = vpack.c.bf16 %v2263_v54, %v2260_v43  ;;  %v3059_v31 = vsub.f32 %v8901_v9, %v2974_v13  ;;  %v3060_v22 = vsub.f32 %v8902_v50, %v2974_v13  ;;  %v7588_v54 = vadd.f32 %v2875_v55, %v2586_v27  ;;  %v8908_v50 = vld [vmem:[#allocation105_spill] sm:$0xff] }
 0x3f3   : > { %8900 = vst [vmem:[#allocation132_spill] sm:$0xff] %v7582_v42  ;;  %2447 = vmatprep.mubr.bf16.mxu0 %v2332_v12  ;;  %v2878_v43 = vmul.f32 0.17677669, %v2810_v37  ;;  %4999 = vpow2.f32 %v3139_v2  ;;  %3027 = vmax.xlane.f32.xlu1 %v3026_v49  ;;  %v7592_v8 = vadd.f32 %v2876_v57, %v2587_v16  ;;  %v3029_v12 = vmax.f32 %v7582_v42, %v7554_v29  ;;  %v2186_v27 = vpop.xlane.xlu1 %2185  ;;  %v8905_v16 = vld [vmem:[#allocation103_spill] sm:$0xff]  ;;  %v2814_v13 = vpop.f32.mrf.mxu1  ;;  %v8906_v49 = vld [vmem:[#allocation58_spill] sm:$0xff] }
 0x3f4   : > { %v7586_v36 = vpop.eup %4979  ;;  %2448 = vmatmul.mubr.bf16.gmra.mxu0 %v2331_v10  ;;  %v3141_v21 = vmul.f32 1.442695, %v3059_v31  ;;  %v3143_v53 = vmul.f32 1.442695, %v3060_v22  ;;  %3246 = vadd.xlane.f32.xlu0 %v3245_v20  ;;  %v2877_v37 = vmul.f32 0.17677669, %v7539_v48  ;;  %5001 = vrcp.f32 %v2183_v60  ;;  %v2977_v2 = vpop.xlane.xlu0 %2976 }
 0x3f5   : > { %8903 = vst [vmem:[#allocation133_spill] sm:$0xff] %v7586_v36  ;;  %v7590_v59 = vpop.eup %4981  ;;  %v2267_v10 = vmul.f32 %v4978_v51, %v8905_v16  ;;  %v3061_v9 = vsub.f32 %v8906_v49, %v2977_v2  ;;  %v8907_v31 = vld [vmem:[#allocation112_spill] sm:$0xff]  ;;  %v2588_v48 = vld [vmem:[%s8274_s9 + $0x1e0] sm:$0xff]  ;;  %v7611_v60 = vadd.f32 %v2878_v43, %v2589_v47  ;;  %v3032_v47 = vmax.f32 %v7588_v54, %v7592_v8 }
 0x3f6   : > { %8904 = vst [vmem:[#allocation96_spill] sm:$0xff] %v7590_v59  ;;  %v4984_v55 = vpop.eup %4983  ;;  %v3248_v57 = vadd.f32 %v7590_v59, %v7586_v36  ;;  %5003 = vpow2.f32 %v3141_v21  ;;  %v3062_v20 = vsub.f32 %v8907_v31, %v2977_v2  ;;  %v8910_v36 = vld [vmem:[#allocation35_spill] sm:$0xff]  ;;  %v8911_v59 = vld [vmem:[#allocation40_spill] sm:$0xff] }
 0x3f7   : > { %v2270_v22 = vmul.f32 %v4984_v55, %v8908_v50  ;;  %v7606_v29 = vpop.eup %4985  ;;  %5005 = vpow2.f32 %v3143_v53  ;;  %v2266_v16 = vmul.f32 %v4978_v51, %v8910_v36  ;;  %v2269_v21 = vmul.f32 %v4984_v55, %v8911_v59  ;;  %v2980_v56 = vpop.xlane.xlu1 %2979  ;;  %v2591_v59 = vld [vmem:[%s8274_s9 + $0x1f8] sm:$0xff]  ;;  %v8912_v53 = vld [vmem:[#allocation116_spill] sm:$0xff]  ;;  %v8913_v55 = vld [vmem:[#allocation114_spill] sm:$0xff] }
 0x3f8   : > { %8909 = vst [vmem:[#allocation95_spill] sm:$0xff] %v7606_v29  ;;  %3249 = vadd.xlane.f32.xlu1 %v3248_v57  ;;  %v7615_v42 = vpop.eup %4987  ;;  %5007 = vrcp.f32 %v2186_v27  ;;  %v3145_v2 = vmul.f32 1.442695, %v3061_v9  ;;  %v3147_v49 = vmul.f32 1.442695, %v3062_v20  ;;  %3030 = vmax.xlane.f32.xlu0 %v3029_v12  ;;  %v2189_v0 = vpop.xlane.xlu0 %2188  ;;  %v7621_v36 = vadd.f32 %v2877_v37, %v2588_v48  ;;  %v2590_v37 = vld [vmem:[%s8274_s9 + $0x1f0] sm:$0xff] }
 0x3f9   : > { %v2334_v31 = vpack.c.bf16 %v2270_v22, %v2267_v10  ;;  %v2880_v50 = vmul.f32 0.17677669, %v2814_v13  ;;  %v2333_v23 = vpack.c.bf16 %v2269_v21, %v2266_v16  ;;  %v3251_v43 = vadd.f32 %v7615_v42, %v7606_v29  ;;  %v4990_v51 = vpop.eup %4989  ;;  %v8915_v21 = vld [vmem:[#allocation107_spill] sm:$0xff] }
 0x3fa   : > { %5009 = vpow2.f32 %v3145_v2  ;;  %v3063_v12 = vsub.f32 %v8912_v53, %v2980_v56  ;;  %v3064_v27 = vsub.f32 %v8913_v55, %v2980_v56  ;;  %v2879_v10 = vmul.f32 0.17677669, %v2812_v40 }
 0x3fb   : > { %2455 = vmatprep.mubr.bf16.mxu0 %v2334_v31  ;;  %v7628_v57 = vpop.eup %4991  ;;  %5011 = vpow2.f32 %v3147_v49  ;;  %v3035_v22 = vmax.f32 %v7621_v36, %v7611_v60  ;;  %v7637_v56 = vadd.f32 %v2880_v50, %v2591_v59  ;;  %v2192_v40 = vpop.xlane.xlu1 %2191  ;;  %v2273_v2 = vmul.f32 %v4990_v51, %v8915_v21  ;;  %v8916_v49 = vld [vmem:[#allocation120_spill] sm:$0xff]  ;;  %v8921_v59 = vld [vmem:[#allocation50_spill] sm:$0xff] }
 0x3fc   : > { %8914 = vst [vmem:[#allocation134_spill] sm:$0xff] %v7628_v57  ;;  %2456 = vmatmul.mubr.bf16.gmra.mxu0 %v2333_v23  ;;  %3033 = vmax.xlane.f32.xlu1 %v3032_v47  ;;  %v7630_v13 = vpop.eup %4993  ;;  %v3149_v9 = vmul.f32 1.442695, %v3063_v12  ;;  %v3151_v20 = vmul.f32 1.442695, %v3064_v27  ;;  %5013 = vrcp.f32 %v2189_v0  ;;  %v2983_v16 = vpop.xlane.xlu0 %2982  ;;  %v8917_v47 = vld [vmem:[#allocation118_spill] sm:$0xff]  ;;  %v7647_v27 = vadd.f32 %v2879_v10, %v2590_v37 }
 0x3fd   : > { %3252 = vadd.xlane.f32.xlu0 %v3251_v43  ;;  %v4996_v48 = vpop.eup %4995  ;;  %v3254_v23 = vadd.f32 %v7630_v13, %v7628_v57  ;;  %v3065_v31 = vsub.f32 %v8916_v49, %v2983_v16  ;;  %v3066_v53 = vsub.f32 %v8917_v47, %v2983_v16  ;;  %v8918_v43 = vld [vmem:[#allocation109_spill] sm:$0xff] }
 0x3fe   : > { %5015 = vpow2.f32 %v3149_v9  ;;  %v2276_v12 = vmul.f32 %v4996_v48, %v8918_v43  ;;  %v7645_v55 = vpop.eup %4997  ;;  %v8920_v0 = vld [vmem:[#allocation45_spill] sm:$0xff]  ;;  %v2275_v29 = vmul.f32 %v4996_v48, %v8921_v59  ;;  %v3038_v37 = vmax.f32 %v7647_v27, %v7637_v56  ;;  %v8926_v59 = vld [vmem:[#allocation111_spill] sm:$0xff] }
 0x3ff   : > { %8919 = vst [vmem:[#allocation36_spill] sm:$0xff] %v7645_v55  ;;  %5017 = vpow2.f32 %v3151_v20  ;;  %v2272_v50 = vmul.f32 %v4990_v51, %v8920_v0  ;;  %v3153_v9 = vmul.f32 1.442695, %v3065_v31  ;;  %v3155_v21 = vmul.f32 1.442695, %v3066_v53  ;;  %v2986_v43 = vpop.xlane.xlu1 %2985  ;;  %v8922_v51 = vld [vmem:[#allocation124_spill] sm:$0xff] }
 0x400   : > { %3255 = vadd.xlane.f32.xlu1 %v3254_v23  ;;  %v7651_v57 = vpop.eup %4999  ;;  %5019 = vrcp.f32 %v2192_v40  ;;  %v2336_v49 = vpack.c.bf16 %v2276_v12, %v2273_v2  ;;  %v2195_v47 = vpop.xlane.xlu0 %2194  ;;  %v3067_v48 = vsub.f32 %v8922_v51, %v2986_v43  ;;  %v8923_v23 = vld [vmem:[#allocation122_spill] sm:$0xff] }
 0x401   : > { %3036 = vmax.xlane.f32.xlu0 %v3035_v22  ;;  %v2335_v16 = vpack.c.bf16 %v2275_v29, %v2272_v50  ;;  %v3257_v10 = vadd.f32 %v7651_v57, %v7645_v55  ;;  %v5002_v20 = vpop.eup %5001  ;;  %5021 = vpow2.f32 %v3153_v9  ;;  %v3068_v40 = vsub.f32 %v8923_v23, %v2986_v43 }
 0x402   : > { %2463 = vmatprep.mubr.bf16.mxu0 %v2336_v49  ;;  %5023 = vpow2.f32 %v3155_v21  ;;  %v3157_v22 = vmul.f32 1.442695, %v3067_v48  ;;  %v2279_v9 = vmul.f32 %v5002_v20, %v8926_v59  ;;  %v8927_v49 = vld [vmem:[#allocation128_spill] sm:$0xff]  ;;  %v8928_v21 = vld [vmem:[#allocation126_spill] sm:$0xff] }
 0x403   : > { %v7659_v31 = vpop.eup %5003  ;;  %v3159_v2 = vmul.f32 1.442695, %v3068_v40  ;;  %5025 = vrcp.f32 %v2195_v47  ;;  %v2198_v12 = vpop.xlane.xlu1 %2197  ;;  %v8931_v48 = vld [vmem:[#allocation56_spill] sm:$0xff] }
 0x404   : > { %8924 = vst [vmem:[#allocation71_spill] sm:$0xff] %v7659_v31  ;;  %2464 = vmatmul.mubr.bf16.gmra.mxu0 %v2335_v16  ;;  %3039 = vmax.xlane.f32.xlu1 %v3038_v37  ;;  %v7661_v29 = vpop.eup %5005  ;;  %v2989_v0 = vpop.xlane.xlu0 %2988  ;;  %5027 = vpow2.f32 %v3157_v22  ;;  %v8929_v37 = vld [vmem:[#allocation113_spill] sm:$0xff] }
 0x405   : > { %8925 = vst [vmem:[#allocation88_spill] sm:$0xff] %v7661_v29  ;;  %3258 = vadd.xlane.f32.xlu0 %v3257_v10  ;;  %v5008_v53 = vpop.eup %5007  ;;  %v3260_v50 = vadd.f32 %v7661_v29, %v7659_v31  ;;  %v3069_v43 = vsub.f32 %v8927_v49, %v2989_v0  ;;  %v3070_v16 = vsub.f32 %v8928_v21, %v2989_v0  ;;  %5029 = vpow2.f32 %v3159_v2  ;;  %v8930_v10 = vld [vmem:[#allocation53_spill] sm:$0xff]  ;;  %v8932_v2 = vld [vmem:[#allocation131_spill] sm:$0xff] }
 0x406   : > { %v2282_v51 = vmul.f32 %v5008_v53, %v8929_v37  ;;  %v2278_v47 = vmul.f32 %v5002_v20, %v8930_v10  ;;  %v2281_v40 = vmul.f32 %v5008_v53, %v8931_v48  ;;  %5031 = vrcp.f32 %v2198_v12  ;;  %v8933_v37 = vld [vmem:[#allocation130_spill] sm:$0xff] }
 0x407   : > { %v7669_v23 = vpop.eup %5009  ;;  %v3161_v31 = vmul.f32 1.442695, %v3069_v43  ;;  %v3163_v59 = vmul.f32 1.442695, %v3070_v16  ;;  %v2992_v49 = vpop.xlane.xlu1 %2991 }
 0x408   : > { %3261 = vadd.xlane.f32.xlu1 %v3260_v50  ;;  %v7673_v55 = vpop.eup %5011  ;;  %v2338_v22 = vpack.c.bf16 %v2282_v51, %v2279_v9  ;;  %v2337_v29 = vpack.c.bf16 %v2281_v40, %v2278_v47  ;;  %v3071_v50 = vsub.f32 %v8932_v2, %v2992_v49  ;;  %v3072_v20 = vsub.f32 %v8933_v37, %v2992_v49  ;;  %v8934_v51 = vld [vmem:[#allocation117_spill] sm:$0xff]  ;;  %v8936_v40 = vld [vmem:[#allocation115_spill] sm:$0xff] }
 0x409   : > { %v3263_v0 = vadd.f32 %v7673_v55, %v7669_v23  ;;  %v5014_v21 = vpop.eup %5013  ;;  %5033 = vpow2.f32 %v3161_v31  ;;  %v8935_v47 = vld [vmem:[#allocation121_spill] sm:$0xff]  ;;  %v8937_v49 = vld [vmem:[#allocation119_spill] sm:$0xff] }
 0x40a   : > { %2471 = vmatprep.mubr.bf16.mxu0 %v2338_v22  ;;  %5035 = vpow2.f32 %v3163_v59  ;;  %v3165_v12 = vmul.f32 1.442695, %v3071_v50  ;;  %v3167_v9 = vmul.f32 1.442695, %v3072_v20  ;;  %v2285_v31 = vmul.f32 %v5014_v21, %v8934_v51 }
 0x40b   : > { %v7679_v10 = vpop.eup %5015  ;;  %3264 = vadd.xlane.f32.xlu0 %v3263_v0  ;;  %v2284_v22 = vmul.f32 %v5014_v21, %v8936_v40 }
 0x40c   : > { %2472 = vmatmul.mubr.bf16.gmra.mxu0 %v2337_v29  ;;  %v7681_v53 = vpop.eup %5017  ;;  %5037 = vpow2.f32 %v3165_v12 }
 0x40d   : > { %v5020_v43 = vpop.eup %5019  ;;  %v3266_v16 = vadd.f32 %v7681_v53, %v7679_v10  ;;  %5039 = vpow2.f32 %v3167_v9 }
 0x40e   : > { %v2288_v48 = vmul.f32 %v5020_v43, %v8935_v47  ;;  %v2287_v2 = vmul.f32 %v5020_v43, %v8937_v49  ;;  %v7689_v59 = vpop.eup %5021  ;;  %v8941_v47 = vld [vmem:[#allocation129_spill] sm:$0xff] }
 0x40f   : > { %8938 = vst [vmem:[#allocation86_spill] sm:$0xff] %v7689_v59  ;;  %3267 = vadd.xlane.f32.xlu1 %v3266_v16  ;;  %v7691_v29 = vpop.eup %5023  ;;  %v8940_v16 = vld [vmem:[#allocation125_spill] sm:$0xff] }
 0x410   : > { %v2340_v0 = vpack.c.bf16 %v2288_v48, %v2285_v31  ;;  %v2339_v50 = vpack.c.bf16 %v2287_v2, %v2284_v22  ;;  %v3269_v37 = vadd.f32 %v7691_v29, %v7689_v59  ;;  %v5026_v20 = vpop.eup %5025  ;;  %v8942_v48 = vld [vmem:[#allocation123_spill] sm:$0xff] }
 0x411   : > { %v7695_v12 = vpop.eup %5027  ;;  %v2291_v51 = vmul.f32 %v5026_v20, %v8940_v16  ;;  %v2290_v40 = vmul.f32 %v5026_v20, %v8942_v48  ;;  %v8943_v22 = vld [vmem:[#allocation127_spill] sm:$0xff] }
 0x412   : > { %2479 = vmatprep.mubr.bf16.mxu0 %v2340_v0  ;;  %8939 = vst [vmem:[#allocation75_spill] sm:$0xff] %v7695_v12  ;;  %3270 = vadd.xlane.f32.xlu0 %v3269_v37  ;;  %v7697_v21 = vpop.eup %5029 }
 0x413   : > { %v5032_v43 = vpop.eup %5031  ;;  %v3272_v9 = vadd.f32 %v7697_v21, %v7695_v12 }
 0x414   : > { %2480 = vmatmul.mubr.bf16.gmra.mxu0 %v2339_v50  ;;  %v2294_v31 = vmul.f32 %v5032_v43, %v8941_v47  ;;  %v2293_v49 = vmul.f32 %v5032_v43, %v8943_v22 }
 0x415   : > { %3273 = vadd.xlane.f32.xlu1 %v3272_v9 }
 0x416   : > { %v7705_v2 = vpop.eup %5033  ;;  %v2342_v50 = vpack.c.bf16 %v2294_v31, %v2291_v51  ;;  %v2341_v37 = vpack.c.bf16 %v2293_v49, %v2290_v40 }
 0x417   : > { %8944 = vst [vmem:[#allocation49_spill] sm:$0xff] %v7705_v2  ;;  %v7707_v0 = vpop.eup %5035 }
 0x418   : > { %v3275_v59 = vadd.f32 %v7707_v0, %v7705_v2  ;;  %2487 = vmatprep.mubr.bf16.mxu0 %v2342_v50 }
 0x419   : > { %v7711_v12 = vpop.eup %5037 }
 0x41a   : > { %3276 = vadd.xlane.f32.xlu0 %v3275_v59  ;;  %v7713_v16 = vpop.eup %5039 }
 0x41b   : > { %v3278_v20 = vadd.f32 %v7713_v16, %v7711_v12 }
 0x41c   : > { %2488 = vmatmul.mubr.bf16.gmra.mxu0 %v2341_v37 }
 0x41d   : > { %3279 = vadd.xlane.f32.xlu1 %v3278_v20 }
 0x449   : > { %v2201_v43 = vpop.xlane.xlu0 %2200 }
 0x44a   : > { %5041 = vrcp.f32 %v2201_v43 }
 0x44d   : > { %v2204_v9 = vpop.xlane.xlu1 %2203  ;;  %v2995_v51 = vpop.xlane.xlu0 %2994 }
 0x44e   : > { %5043 = vrcp.f32 %v2204_v9  ;;  %v3073_v47 = vsub.f32 %v7238_v61, %v2995_v51  ;;  %v3074_v31 = vsub.f32 %v7222_v33, %v2995_v51 }
 0x450   : > { %v3169_v48 = vmul.f32 1.442695, %v3073_v47  ;;  %v3171_v40 = vmul.f32 1.442695, %v3074_v31 }
 0x451   : > { %v2998_v22 = vpop.xlane.xlu1 %2997  ;;  %v2207_v49 = vpop.xlane.xlu0 %2206 }
 0x452   : > { %v3075_v59 = vsub.f32 %v7245_v32, %v2998_v22  ;;  %v3076_v50 = vsub.f32 %v7253_v63, %v2998_v22  ;;  %5045 = vpow2.f32 %v3169_v48 }
 0x453   : > { %5047 = vpow2.f32 %v3171_v40 }
 0x454   : > { %v3173_v37 = vmul.f32 1.442695, %v3075_v59  ;;  %v3175_v20 = vmul.f32 1.442695, %v3076_v50  ;;  %5049 = vrcp.f32 %v2207_v49 }
 0x455   : > { %v3001_v9 = vpop.xlane.xlu0 %3000 }
 0x456   : > { %v2210_v43 = vpop.xlane.xlu1 %2209  ;;  %5051 = vpow2.f32 %v3173_v37  ;;  %v3077_v61 = vsub.f32 %v7294_v62, %v3001_v9  ;;  %v3078_v33 = vsub.f32 %v7263_v34, %v3001_v9 }
 0x457   : > { %5053 = vpow2.f32 %v3175_v20  ;;  %v5042_v51 = vpop.eup %5041 }
 0x458   : > { %5055 = vrcp.f32 %v2210_v43  ;;  %v3177_v47 = vmul.f32 1.442695, %v3077_v61  ;;  %v3179_v31 = vmul.f32 1.442695, %v3078_v33  ;;  %v2297_v22 = vmul.f32 %v5042_v51, %v7231_v14 }
 0x459   : > { %v2296_v50 = vmul.f32 %v5042_v51, %v7220_v11 }
 0x45a   : > { %5057 = vpow2.f32 %v3177_v47 }
 0x45b   : > { %v3004_v32 = vpop.xlane.xlu1 %3003  ;;  %v2213_v2 = vpop.xlane.xlu0 %2212  ;;  %5059 = vpow2.f32 %v3179_v31 }
 0x45c   : > { %v3079_v63 = vsub.f32 %v7303_v26, %v3004_v32  ;;  %v3080_v48 = vsub.f32 %v7311_v30, %v3004_v32  ;;  %v5044_v40 = vpop.eup %5043  ;;  %5061 = vrcp.f32 %v2213_v2 }
 0x45d   : > { %v2300_v62 = vmul.f32 %v5044_v40, %v7261_v6  ;;  %v2299_v37 = vmul.f32 %v5044_v40, %v7251_v44 }
 0x45e   : > { %v3181_v49 = vmul.f32 1.442695, %v3079_v63  ;;  %v3183_v59 = vmul.f32 1.442695, %v3080_v48 }
 0x45f   : > { %v2216_v34 = vpop.xlane.xlu1 %2215  ;;  %v2344_v26 = vpack.c.bf16 %v2300_v62, %v2297_v22  ;;  %v2343_v14 = vpack.c.bf16 %v2299_v37, %v2296_v50  ;;  %v7731_v9 = vpop.eup %5045 }
 0x460   : > { %5063 = vpow2.f32 %v3181_v49  ;;  %v3007_v20 = vpop.xlane.xlu0 %3006  ;;  %v7733_v6 = vpop.eup %5047 }
 0x461   : > { %5065 = vpow2.f32 %v3183_v59  ;;  %v3081_v30 = vsub.f32 %v7355_v41, %v3007_v20  ;;  %v3082_v43 = vsub.f32 %v7318_v7, %v3007_v20  ;;  %2495 = vmatprep.mubr.bf16.mxu0 %v2344_v26  ;;  %v5050_v44 = vpop.eup %5049  ;;  %v3281_v7 = vadd.f32 %v7733_v6, %v7731_v9 }
 0x462   : > { %5067 = vrcp.f32 %v2216_v34  ;;  %2496 = vmatmul.mubr.bf16.gmra.mxu0 %v2343_v14  ;;  %v2302_v59 = vmul.f32 %v5050_v44, %v7278_v1 }
 0x463   : > { %v3185_v2 = vmul.f32 1.442695, %v3081_v30  ;;  %v3187_v61 = vmul.f32 1.442695, %v3082_v43  ;;  %v3010_v11 = vpop.xlane.xlu1 %3009  ;;  %v7739_v41 = vpop.eup %5051  ;;  %3282 = vadd.xlane.f32.xlu0 %v3281_v7 }
 0x464   : > { %v3083_v51 = vsub.f32 %v7367_v24, %v3010_v11  ;;  %v3084_v47 = vsub.f32 %v7375_v5, %v3010_v11  ;;  %v7741_v31 = vpop.eup %5053  ;;  %v2303_v5 = vmul.f32 %v5050_v44, %v7289_v58 }
 0x465   : > { %v2219_v33 = vpop.xlane.xlu0 %2218  ;;  %5069 = vpow2.f32 %v3185_v2  ;;  %v5056_v48 = vpop.eup %5055  ;;  %v3284_v24 = vadd.f32 %v7741_v31, %v7739_v41 }
 0x466   : > { %5071 = vpow2.f32 %v3187_v61  ;;  %v3189_v32 = vmul.f32 1.442695, %v3083_v51  ;;  %v3191_v63 = vmul.f32 1.442695, %v3084_v47  ;;  %v2306_v49 = vmul.f32 %v5056_v48, %v7316_v18 }
 0x467   : > { %5073 = vrcp.f32 %v2219_v33  ;;  %v2222_v40 = vpop.xlane.xlu1 %2221  ;;  %v2305_v62 = vmul.f32 %v5056_v48, %v7309_v46  ;;  %3285 = vadd.xlane.f32.xlu1 %v3284_v24  ;;  %v7751_v37 = vpop.eup %5057 }
 0x468   : > { %5075 = vpow2.f32 %v3189_v32  ;;  %v2346_v20 = vpack.c.bf16 %v2306_v49, %v2303_v5  ;;  %v7753_v58 = vpop.eup %5059 }
 0x469   : > { %v3013_v22 = vpop.xlane.xlu0 %3012  ;;  %5077 = vpow2.f32 %v3191_v63  ;;  %v2345_v26 = vpack.c.bf16 %v2305_v62, %v2302_v59  ;;  %v5062_v14 = vpop.eup %5061 }
 0x46a   : > { %v3085_v34 = vsub.f32 %v7419_v25, %v3013_v22  ;;  %v3086_v50 = vsub.f32 %v7382_v45, %v3013_v22  ;;  %5079 = vrcp.f32 %v2222_v40  ;;  %2503 = vmatprep.mubr.bf16.mxu0 %v2346_v20  ;;  %v3287_v45 = vadd.f32 %v7753_v58, %v7751_v37 }
 0x46b   : > { %2504 = vmatmul.mubr.bf16.gmra.mxu0 %v2345_v26  ;;  %v2308_v32 = vmul.f32 %v5062_v14, %v7339_v52 }
 0x46c   : > { %v3193_v30 = vmul.f32 1.442695, %v3085_v34  ;;  %v3195_v43 = vmul.f32 1.442695, %v3086_v50  ;;  %v3016_v18 = vpop.xlane.xlu1 %3015  ;;  %3288 = vadd.xlane.f32.xlu0 %v3287_v45 }
 0x46d   : > { %v3235_v1 = vpop.xlane.xlu0 %3234  ;;  %v3087_v46 = vsub.f32 %v7431_v4, %v3016_v18  ;;  %v3088_v25 = vsub.f32 %v7439_v39, %v3016_v18  ;;  %v7759_v2 = vpop.eup %5063  ;;  %v2309_v39 = vmul.f32 %v5062_v14, %v7347_v17 }
 0x46e   : > { %5081 = vpow2.f32 %v3193_v30  ;;  %v7761_v61 = vpop.eup %5065 }
 0x46f   : > { %5083 = vpow2.f32 %v3195_v43  ;;  %v3197_v11 = vmul.f32 1.442695, %v3087_v46  ;;  %v3199_v44 = vmul.f32 1.442695, %v3088_v25  ;;  %v5068_v33 = vpop.eup %5067  ;;  %v3290_v4 = vadd.f32 %v7761_v61, %v7759_v2  ;;  %v8947_v25 = vld [vmem:[#allocation70_spill] sm:$0xff] }
 0x470   : > { %5085 = vrcp.f32 %v3235_v1  ;;  %v3238_v51 = vpop.xlane.xlu1 %3237  ;;  %v2312_v7 = vmul.f32 %v5068_v33, %v7380_v19  ;;  %v2311_v63 = vmul.f32 %v5068_v33, %v7373_v3  ;;  %v8946_v1 = vld [vmem:[#allocation44_spill] sm:$0xff]  ;;  %v8949_v33 = vld [vmem:[#allocation98_spill] sm:$0xff] }
 0x471   : > { %5087 = vpow2.f32 %v3197_v11  ;;  %v3019_v47 = vpop.xlane.xlu0 %3018  ;;  %3291 = vadd.xlane.f32.xlu1 %v3290_v4  ;;  %v8948_v11 = vld [vmem:[#allocation47_spill] sm:$0xff] }
 0x472   : > { %5089 = vpow2.f32 %v3199_v44  ;;  %v3089_v48 = vsub.f32 %v7481_v28, %v3019_v47  ;;  %v3090_v40 = vsub.f32 %v7446_v15, %v3019_v47  ;;  %v7771_v24 = vpop.eup %5069  ;;  %v2348_v5 = vpack.c.bf16 %v2312_v7, %v2309_v39  ;;  %v8950_v4 = vld [vmem:[#allocation51_spill] sm:$0xff] }
 0x473   : > { %5091 = vrcp.f32 %v3238_v51  ;;  %v2347_v22 = vpack.c.bf16 %v2311_v63, %v2308_v32  ;;  %v7773_v17 = vpop.eup %5071 }
 0x474   : > { %v3201_v49 = vmul.f32 1.442695, %v3089_v48  ;;  %v3203_v59 = vmul.f32 1.442695, %v3090_v40  ;;  %v3022_v19 = vpop.xlane.xlu1 %3021  ;;  %v5074_v62 = vpop.eup %5073  ;;  %2511 = vmatprep.mubr.bf16.mxu0 %v2348_v5  ;;  %v3293_v15 = vadd.f32 %v7773_v17, %v7771_v24 }
 0x475   : > { %v3241_v52 = vpop.xlane.xlu0 %3240  ;;  %v3091_v3 = vsub.f32 %v7490_v38, %v3022_v19  ;;  %v3092_v28 = vsub.f32 %v7498_v35, %v3022_v19  ;;  %v7779_v34 = vpop.eup %5075  ;;  %2512 = vmatmul.mubr.bf16.gmra.mxu0 %v2347_v22  ;;  %v8945_v35 = vld [vmem:[#allocation73_spill] sm:$0xff]  ;;  %v2314_v45 = vmul.f32 %v5074_v62, %v8947_v25  ;;  %v8955_v25 = vld [vmem:[#allocation68_spill] sm:$0xff] }
 0x476   : > { %5093 = vpow2.f32 %v3201_v49  ;;  %v7781_v50 = vpop.eup %5077  ;;  %3294 = vadd.xlane.f32.xlu0 %v3293_v15  ;;  %v2315_v18 = vmul.f32 %v5074_v62, %v8945_v35  ;;  %v8952_v62 = vld [vmem:[#allocation61_spill] sm:$0xff] }
 0x477   : > { %5095 = vpow2.f32 %v3203_v59  ;;  %v3205_v20 = vmul.f32 1.442695, %v3091_v3  ;;  %v3207_v26 = vmul.f32 1.442695, %v3092_v28  ;;  %v5080_v30 = vpop.eup %5079  ;;  %v3296_v38 = vadd.f32 %v7781_v50, %v7779_v34  ;;  %v8951_v59 = vld [vmem:[#allocation99_spill] sm:$0xff] }
 0x478   : > { %5097 = vrcp.f32 %v3241_v52  ;;  %v3244_v43 = vpop.xlane.xlu1 %3243  ;;  %v2318_v46 = vmul.f32 %v5080_v30, %v8946_v1  ;;  %v2317_v44 = vmul.f32 %v5080_v30, %v8948_v11  ;;  %v8956_v11 = vld [vmem:[#allocation46_spill] sm:$0xff] }
 0x479   : > { %5099 = vpow2.f32 %v3205_v20  ;;  %v3025_v14 = vpop.xlane.xlu0 %3024  ;;  %3297 = vadd.xlane.f32.xlu1 %v3296_v38 }
 0x47a   : > { %5101 = vpow2.f32 %v3207_v26  ;;  %v3093_v51 = vsub.f32 %v8949_v33, %v3025_v14  ;;  %v3094_v39 = vsub.f32 %v8950_v4, %v3025_v14  ;;  %v2350_v7 = vpack.c.bf16 %v2318_v46, %v2315_v18  ;;  %v8954_v14 = vld [vmem:[#allocation41_spill] sm:$0xff]  ;;  %v8957_v33 = vld [vmem:[#allocation132_spill] sm:$0xff]  ;;  %v8958_v4 = vld [vmem:[#allocation62_spill] sm:$0xff] }
 0x47b   : > { %v7791_v47 = vpop.eup %5081  ;;  %5103 = vrcp.f32 %v3244_v43  ;;  %v2349_v32 = vpack.c.bf16 %v2317_v44, %v2314_v45  ;;  %v8953_v43 = vld [vmem:[#allocation65_spill] sm:$0xff] }
 0x47c   : > { %v7793_v63 = vpop.eup %5083  ;;  %v3209_v48 = vmul.f32 1.442695, %v3093_v51  ;;  %v3211_v40 = vmul.f32 1.442695, %v3094_v39  ;;  %v3028_v5 = vpop.xlane.xlu1 %3027  ;;  %2519 = vmatprep.mubr.bf16.mxu0 %v2350_v7 }
 0x47d   : > { %v5086_v22 = vpop.eup %5085  ;;  %v3247_v49 = vpop.xlane.xlu0 %3246  ;;  %v3095_v19 = vsub.f32 %v8951_v59, %v3028_v5  ;;  %v3096_v52 = vsub.f32 %v8952_v62, %v3028_v5  ;;  %v3299_v3 = vadd.f32 %v7793_v63, %v7791_v47  ;;  %2520 = vmatmul.mubr.bf16.gmra.mxu0 %v2349_v32 }
 0x47e   : > { %v7799_v28 = vpop.eup %5087  ;;  %5105 = vpow2.f32 %v3209_v48  ;;  %v3330_v38 = vmul.f32 %v5086_v22, %v8953_v43  ;;  %v3331_v45 = vmul.f32 %v5086_v22, %v8955_v25  ;;  %v8960_v25 = vld [vmem:[#allocation57_spill] sm:$0xff] }
 0x47f   : > { %v7801_v15 = vpop.eup %5089  ;;  %5107 = vpow2.f32 %v3211_v40  ;;  %v3213_v20 = vmul.f32 1.442695, %v3095_v19  ;;  %v3215_v26 = vmul.f32 1.442695, %v3096_v52  ;;  %3300 = vadd.xlane.f32.xlu0 %v3299_v3  ;;  %v4334_v7 = vpop.f32.mrf.mxu0 }
 0x480   : > { %v5092_v30 = vpop.eup %5091  ;;  %5109 = vrcp.f32 %v3247_v49  ;;  %v3302_v18 = vadd.f32 %v7801_v15, %v7799_v28 }
 0x481   : > { %v3250_v35 = vpop.xlane.xlu1 %3249  ;;  %v3333_v1 = vmul.f32 %v5092_v30, %v8954_v14  ;;  %5111 = vpow2.f32 %v3213_v20  ;;  %v3031_v46 = vpop.xlane.xlu0 %3030  ;;  %v3334_v44 = vmul.f32 %v5092_v30, %v8956_v11  ;;  %v8961_v11 = vld [vmem:[#allocation54_spill] sm:$0xff] }
 0x482   : > { %5113 = vpow2.f32 %v3215_v26  ;;  %v3097_v51 = vsub.f32 %v8957_v33, %v3031_v46  ;;  %v3098_v39 = vsub.f32 %v8958_v4, %v3031_v46  ;;  %3303 = vadd.xlane.f32.xlu1 %v3302_v18  ;;  %v4335_v22 = vpop.f32.mrf.mxu0  ;;  %v8963_v4 = vld [vmem:[#allocation63_spill] sm:$0xff] }
 0x483   : > { %v7811_v32 = vpop.eup %5093  ;;  %v3425_v48 = vpack.c.bf16 %v3333_v1, %v3330_v38  ;;  %5115 = vrcp.f32 %v3250_v35  ;;  %v3426_v40 = vpack.c.bf16 %v3334_v44, %v3331_v45  ;;  %v7817_v26 = vadd.f32 %v4335_v22, %v4334_v7  ;;  %v8964_v7 = vld [vmem:[#allocation60_spill] sm:$0xff] }
 0x484   : > { %v7813_v5 = vpop.eup %5095  ;;  %v3217_v49 = vmul.f32 1.442695, %v3097_v51  ;;  %v3219_v59 = vmul.f32 1.442695, %v3098_v39  ;;  %v4337_v38 = vpop.f32.mrf.mxu0 }
 0x485   : > { %v3034_v19 = vpop.xlane.xlu1 %3033  ;;  %v5098_v62 = vpop.eup %5097  ;;  %3505 = vmatprep.mubr.bf16.mxu0 %v3426_v40  ;;  %8959 = vst [vmem:[#allocation69_spill] sm:$0xff] %v7817_v26  ;;  %v3305_v30 = vadd.f32 %v7813_v5, %v7811_v32 }
 0x486   : > { %v3253_v52 = vpop.xlane.xlu0 %3252  ;;  %v3099_v3 = vsub.f32 %v7588_v54, %v3034_v19  ;;  %v3100_v20 = vsub.f32 %v7592_v8, %v3034_v19  ;;  %v7821_v43 = vpop.eup %5099  ;;  %5117 = vpow2.f32 %v3217_v49  ;;  %3506 = vmatmul.mubr.bf16.vlgmr.msra.gmra.mxu0 %v3425_v48  ;;  %v3337_v45 = vmul.f32 %v5098_v62, %v8960_v25 }
 0x487   : > { %v7823_v35 = vpop.eup %5101  ;;  %5119 = vpow2.f32 %v3219_v59  ;;  %3306 = vadd.xlane.f32.xlu0 %v3305_v30  ;;  %v4338_v8 = vpop.f32.mrf.mxu0  ;;  %v3336_v44 = vmul.f32 %v5098_v62, %v8961_v11 }
 0x488   : > { %v3221_v18 = vmul.f32 1.442695, %v3099_v3  ;;  %v3223_v14 = vmul.f32 1.442695, %v3100_v20  ;;  %v5104_v1 = vpop.eup %5103  ;;  %5121 = vrcp.f32 %v3253_v52  ;;  %v3308_v46 = vadd.f32 %v7823_v35, %v7821_v43 }
 0x489   : > { %v3256_v54 = vpop.xlane.xlu1 %3255  ;;  %v7829_v51 = vadd.f32 %v4338_v8, %v4337_v38  ;;  %v3340_v39 = vmul.f32 %v5104_v1, %v8963_v4  ;;  %v3339_v48 = vmul.f32 %v5104_v1, %v8964_v7  ;;  %v4340_v22 = vpop.f32.mrf.mxu0  ;;  %v8966_v4 = vld [vmem:[#allocation66_spill] sm:$0xff] }
 0x48a   : > { %5123 = vpow2.f32 %v3221_v18  ;;  %v3037_v33 = vpop.xlane.xlu0 %3036  ;;  %3309 = vadd.xlane.f32.xlu1 %v3308_v46 }
 0x48b   : > { %8962 = vst [vmem:[#allocation74_spill] sm:$0xff] %v7829_v51  ;;  %5125 = vpow2.f32 %v3223_v14  ;;  %v3101_v40 = vsub.f32 %v7621_v36, %v3037_v33  ;;  %v3102_v49 = vsub.f32 %v7611_v60, %v3037_v33  ;;  %v7835_v59 = vpop.eup %5105  ;;  %v3428_v62 = vpack.c.bf16 %v3340_v39, %v3337_v45  ;;  %v4341_v1 = vpop.f32.mrf.mxu0 }
 0x48c   : > { %5127 = vrcp.f32 %v3256_v54  ;;  %v3427_v52 = vpack.c.bf16 %v3339_v48, %v3336_v44  ;;  %v7839_v3 = vpop.eup %5107  ;;  %v7847_v46 = vadd.f32 %v4341_v1, %v4340_v22  ;;  %v8967_v48 = vld [vmem:[#allocation96_spill] sm:$0xff] }
 0x48d   : > { %v3225_v20 = vmul.f32 1.442695, %v3101_v40  ;;  %v3227_v30 = vmul.f32 1.442695, %v3102_v49  ;;  %v3040_v38 = vpop.xlane.xlu1 %3039  ;;  %v5110_v18 = vpop.eup %5109  ;;  %3513 = vmatprep.mubr.bf16.mxu0 %v3428_v62  ;;  %v3311_v54 = vadd.f32 %v7839_v3, %v7835_v59  ;;  %v8968_v49 = vld [vmem:[#allocation64_spill] sm:$0xff]  ;;  %v8969_v62 = vld [vmem:[#allocation133_spill] sm:$0xff] }
 0x48e   : > { %v3259_v36 = vpop.xlane.xlu0 %3258  ;;  %v3103_v60 = vsub.f32 %v7647_v27, %v3040_v38  ;;  %v3104_v14 = vsub.f32 %v7637_v56, %v3040_v38  ;;  %v7845_v8 = vpop.eup %5111  ;;  %8965 = vst [vmem:[#allocation94_spill] sm:$0xff] %v7847_v46  ;;  %3514 = vmatmul.mubr.bf16.gmra.mxu0 %v3427_v52  ;;  %v3343_v39 = vmul.f32 %v5110_v18, %v8966_v4 }
 0x48f   : > { %5129 = vpow2.f32 %v3225_v20  ;;  %v7849_v25 = vpop.eup %5113  ;;  %3312 = vadd.xlane.f32.xlu0 %v3311_v54  ;;  %v4343_v44 = vpop.f32.mrf.mxu0  ;;  %v3342_v22 = vmul.f32 %v5110_v18, %v8968_v49 }
 0x490   : > { %5131 = vpow2.f32 %v3227_v30  ;;  %v3229_v45 = vmul.f32 1.442695, %v3103_v60  ;;  %v3231_v11 = vmul.f32 1.442695, %v3104_v14  ;;  %v5116_v27 = vpop.eup %5115  ;;  %v3314_v33 = vadd.f32 %v7849_v25, %v7845_v8 }
 0x491   : > { %5133 = vrcp.f32 %v3259_v36  ;;  %v3262_v56 = vpop.xlane.xlu1 %3261  ;;  %v4344_v7 = vpop.f32.mrf.mxu0  ;;  %v3346_v40 = vmul.f32 %v5116_v27, %v8967_v48  ;;  %v3345_v52 = vmul.f32 %v5116_v27, %v8969_v62 }
 0x492   : > { %5135 = vpow2.f32 %v3229_v45  ;;  %v7857_v20 = vadd.f32 %v4344_v7, %v4343_v44  ;;  %3315 = vadd.xlane.f32.xlu1 %v3314_v33 }
 0x493   : > { %5137 = vpow2.f32 %v3231_v11  ;;  %v7859_v30 = vpop.eup %5117  ;;  %v4346_v38 = vpop.f32.mrf.mxu0  ;;  %v3430_v36 = vpack.c.bf16 %v3346_v40, %v3343_v39  ;;  %v3429_v60 = vpack.c.bf16 %v3345_v52, %v3342_v22  ;;  %v8972_v22 = vld [vmem:[#allocation95_spill] sm:$0xff]  ;;  %v8973_v52 = vld [vmem:[#allocation134_spill] sm:$0xff] }
 0x494   : > { %8970 = vst [vmem:[#allocation93_spill] sm:$0xff] %v7857_v20  ;;  %5139 = vrcp.f32 %v3262_v56  ;;  %v7861_v14 = vpop.eup %5119  ;;  %v3265_v54 = vpop.xlane.xlu0 %3264 }
 0x495   : > { %v5122_v45 = vpop.eup %5121  ;;  %3521 = vmatprep.mubr.bf16.mxu0 %v3430_v36  ;;  %v4347_v18 = vpop.f32.mrf.mxu0  ;;  %v3317_v11 = vadd.f32 %v7861_v14, %v7859_v30  ;;  %5141 = vrcp.f32 %v3265_v54 }
 0x496   : > { %v7869_v27 = vadd.f32 %v4347_v18, %v4346_v38  ;;  %3522 = vmatmul.mubr.bf16.gmra.mxu0 %v3429_v60  ;;  %v3349_v48 = vmul.f32 %v5122_v45, %v7615_v42  ;;  %v3348_v62 = vmul.f32 %v5122_v45, %v8972_v22  ;;  %v8976_v42 = vld [vmem:[#allocation36_spill] sm:$0xff] }
 0x497   : > { %v7867_v44 = vpop.eup %5123  ;;  %3318 = vadd.xlane.f32.xlu0 %v3317_v11  ;;  %v4349_v33 = vpop.f32.mrf.mxu0 }
 0x498   : > { %8971 = vst [vmem:[#allocation34_spill] sm:$0xff] %v7869_v27  ;;  %v7871_v56 = vpop.eup %5125  ;;  %v3268_v39 = vpop.xlane.xlu1 %3267 }
 0x499   : > { %v5128_v4 = vpop.eup %5127  ;;  %v3320_v7 = vadd.f32 %v7871_v56, %v7867_v44  ;;  %5143 = vrcp.f32 %v3268_v39  ;;  %v4350_v40 = vpop.f32.mrf.mxu0 }
 0x49a   : > { %v3352_v49 = vmul.f32 %v5128_v4, %v7630_v13  ;;  %v3351_v38 = vmul.f32 %v5128_v4, %v8973_v52  ;;  %v7879_v36 = vadd.f32 %v4350_v40, %v4349_v33 }
 0x49b   : > { %3321 = vadd.xlane.f32.xlu1 %v3320_v7  ;;  %v4352_v54 = vpop.f32.mrf.mxu0  ;;  %v3271_v39 = vpop.xlane.xlu0 %3270 }
 0x49c   : > { %8974 = vst [vmem:[#allocation37_spill] sm:$0xff] %v7879_v36  ;;  %v7881_v60 = vpop.eup %5129  ;;  %v3432_v18 = vpack.c.bf16 %v3352_v49, %v3349_v48  ;;  %v3431_v11 = vpack.c.bf16 %v3351_v38, %v3348_v62  ;;  %5145 = vrcp.f32 %v3271_v39  ;;  %v8975_v38 = vld [vmem:[#allocation88_spill] sm:$0xff] }
 0x49d   : > { %v7883_v1 = vpop.eup %5131  ;;  %v4353_v13 = vpop.f32.mrf.mxu0 }
 0x49e   : > { %v5134_v19 = vpop.eup %5133  ;;  %3529 = vmatprep.mubr.bf16.mxu0 %v3432_v18  ;;  %v3323_v45 = vadd.f32 %v7883_v1, %v7881_v60  ;;  %v7891_v4 = vadd.f32 %v4353_v13, %v4352_v54  ;;  %v3274_v49 = vpop.xlane.xlu1 %3273  ;;  %v8977_v13 = vld [vmem:[#allocation71_spill] sm:$0xff] }
 0x49f   : > { %v7889_v33 = vpop.eup %5135  ;;  %3530 = vmatmul.mubr.bf16.gmra.mxu0 %v3431_v11  ;;  %v4355_v48 = vpop.f32.mrf.mxu0  ;;  %v3355_v62 = vmul.f32 %v5134_v19, %v7651_v57  ;;  %5147 = vrcp.f32 %v3274_v49  ;;  %v3354_v54 = vmul.f32 %v5134_v19, %v8976_v42 }
 0x4a0   : > { %v7893_v7 = vpop.eup %5137  ;;  %3324 = vadd.xlane.f32.xlu0 %v3323_v45 }
 0x4a1   : > { %v5140_v40 = vpop.eup %5139  ;;  %v3326_v22 = vadd.f32 %v7893_v7, %v7889_v33  ;;  %v4356_v52 = vpop.f32.mrf.mxu0 }
 0x4a2   : > { %v3358_v18 = vmul.f32 %v5140_v40, %v8975_v38  ;;  %v3357_v11 = vmul.f32 %v5140_v40, %v8977_v13  ;;  %v7901_v27 = vadd.f32 %v4356_v52, %v4355_v48  ;;  %v5142_v46 = vpop.eup %5141 }
 0x4a3   : > { %3327 = vadd.xlane.f32.xlu1 %v3326_v22  ;;  %v3277_v26 = vpop.xlane.xlu0 %3276  ;;  %v3361_v42 = vmul.f32 %v5142_v46, %v7673_v55 }
 0x4a4   : > { %v4358_v39 = vpop.f32.mrf.mxu0  ;;  %v3434_v45 = vpack.c.bf16 %v3358_v18, %v3355_v62  ;;  %v3433_v36 = vpack.c.bf16 %v3357_v11, %v3354_v54  ;;  %5149 = vrcp.f32 %v3277_v26  ;;  %v3360_v62 = vmul.f32 %v5142_v46, %v7669_v23 }
 0x4a6   : > { %3537 = vmatprep.mubr.bf16.mxu0 %v3434_v45  ;;  %v4359_v57 = vpop.f32.mrf.mxu0  ;;  %v5144_v49 = vpop.eup %5143 }
 0x4a7   : > { %v7905_v51 = vadd.f32 %v4359_v57, %v4358_v39  ;;  %3538 = vmatmul.mubr.bf16.gmra.mxu0 %v3433_v36  ;;  %v3364_v48 = vmul.f32 %v5144_v49, %v7681_v53  ;;  %v3363_v40 = vmul.f32 %v5144_v49, %v7679_v10  ;;  %v3280_v22 = vpop.xlane.xlu1 %3279  ;;  %v8978_v39 = vld [vmem:[#allocation75_spill] sm:$0xff]  ;;  %v8979_v57 = vld [vmem:[#allocation86_spill] sm:$0xff] }
 0x4a8   : > { %v4361_v19 = vpop.f32.mrf.mxu0  ;;  %5151 = vrcp.f32 %v3280_v22 }
 0x4a9   : > { %v3436_v38 = vpack.c.bf16 %v3364_v48, %v3361_v42  ;;  %v3435_v54 = vpack.c.bf16 %v3363_v40, %v3360_v62  ;;  %v5146_v36 = vpop.eup %5145  ;;  %v4783_v48 = vld [vmem:[%s8271_s6 + $0x78] sm:$0xff]  }
 0x4aa   : > { %v4362_v52 = vpop.f32.mrf.mxu0  ;;  %v3367_v23 = vmul.f32 %v5146_v36, %v7691_v29  ;;  %v3366_v49 = vmul.f32 %v5146_v36, %v8979_v57  ;;  %v4784_v62 = vld [vmem:[%s8271_s6 + $0x38] sm:$0xff]   ;;  %4590 = vmatprep.subr.bf16.mxu1 %v4783_v48 }
 0x4ab   : > { %v7911_v18 = vadd.f32 %v4362_v52, %v4361_v19  ;;  %3545 = vmatprep.mubr.bf16.mxu0 %v3436_v38  ;;  %4591 = vmatpush3.bf16.msra.mxu1 %v4784_v62  ;;  %v4789_v62 = vld [vmem:[%s8271_s6 + $0x60] sm:$0xff]  }
 0x4ac   : > { %v4364_v13 = vpop.f32.mrf.mxu0  ;;  %v5148_v11 = vpop.eup %5147 }
 0x4ad   : > { %v3370_v46 = vmul.f32 %v5148_v11, %v7697_v21  ;;  %v3369_v45 = vmul.f32 %v5148_v11, %v8978_v39  ;;  %v8980_v39 = vld [vmem:[#allocation49_spill] sm:$0xff] }
 0x4ae   : > { %v4365_v55 = vpop.f32.mrf.mxu0 }
 0x4af   : > { %v7915_v53 = vadd.f32 %v4365_v55, %v4364_v13  ;;  %3546 = vmatmul.mubr.bf16.gmra.mxu0 %v3435_v54  ;;  %v3438_v42 = vpack.c.bf16 %v3370_v46, %v3367_v23  ;;  %v3437_v22 = vpack.c.bf16 %v3369_v45, %v3366_v49  ;;  %v4785_v54 = vld [vmem:[%s8271_s6 + $0x70] sm:$0xff]  }
 0x4b0   : > { %v4367_v10 = vpop.f32.mrf.mxu0  ;;  %v4786_v55 = vld [vmem:[%s8271_s6 + $0x30] sm:$0xff]   ;;  %4592 = vmatprep.subr.bf16.mxu1 %v4785_v54 }
 0x4b1   : > { %3553 = vmatprep.mubr.bf16.mxu0 %v3438_v42  ;;  %v5150_v21 = vpop.eup %5149  ;;  %4593 = vmatpush3.bf16.msra.mxu1 %v4786_v55 }
 0x4b2   : > { %v4368_v19 = vpop.f32.mrf.mxu0  ;;  %v3372_v45 = vmul.f32 %v5150_v21, %v8980_v39  ;;  %v4793_v39 = vld [vmem:[%s8271_s6 + $0x50] sm:$0xff]  }
 0x4b3   : > { %v7924_v40 = vadd.f32 %v4368_v19, %v4367_v10  ;;  %v3373_v10 = vmul.f32 %v5150_v21, %v7707_v0  ;;  %v4787_v19 = vld [vmem:[%s8271_s6 + $0x68] sm:$0xff]   ;;  %v4790_v21 = vld [vmem:[%s8271_s6 + $0x20] sm:$0xff]  }
 0x4b4   : > { %v4370_v29 = vpop.f32.mrf.mxu0  ;;  %v4788_v0 = vld [vmem:[%s8271_s6 + $0x28] sm:$0xff]   ;;  %4594 = vmatprep.subr.bf16.mxu1 %v4787_v19 }
 0x4b5   : > { %v5152_v13 = vpop.eup %5151  ;;  %4595 = vmatpush3.bf16.msra.mxu1 %v4788_v0 }
 0x4b6   : > { %v4371_v38 = vpop.f32.mrf.mxu0  ;;  %v3376_v23 = vmul.f32 %v5152_v13, %v7713_v16  ;;  %v3375_v46 = vmul.f32 %v5152_v13, %v7711_v12  ;;  %4596 = vmatprep.subr.bf16.mxu1 %v4789_v62  ;;  %v4791_v13 = vld [vmem:[%s8271_s6 + $0x58] sm:$0xff]  }
 0x4b7   : > { %v7934_v36 = vadd.f32 %v4371_v38, %v4370_v29  ;;  %3554 = vmatmul.mubr.bf16.gmra.mxu0 %v3437_v22 }
 0x4b8   : > { %v4373_v11 = vpop.f32.mrf.mxu0  ;;  %v3440_v49 = vpack.c.bf16 %v3376_v23, %v3373_v10  ;;  %v3439_v48 = vpack.c.bf16 %v3375_v46, %v3372_v45 }
 0x4b9   : > { %4597 = vmatpush3.bf16.msra.mxu1 %v4790_v21 }
 0x4ba   : > { %v4374_v57 = vpop.f32.mrf.mxu0  ;;  %3561 = vmatprep.mubr.bf16.mxu0 %v3440_v49  ;;  %4598 = vmatprep.subr.bf16.mxu1 %v4791_v13  ;;  %v4798_v13 = vld [vmem:[%s8271_s6] sm:$0xff]  }
 0x4bb   : > { %v7946_v42 = vadd.f32 %v4374_v57, %v4373_v11  ;;  %v4792_v11 = vld [vmem:[%s8271_s6 + $0x18] sm:$0xff]   ;;  %v4794_v57 = vld [vmem:[%s8271_s6 + $0x10] sm:$0xff]  }
 0x4bc   : > { %v4376_v16 = vpop.f32.mrf.mxu0 }
 0x4bd   : > { %4599 = vmatpush3.bf16.msra.mxu1 %v4792_v11 }
 0x4be   : > { %v4377_v22 = vpop.f32.mrf.mxu0  ;;  %4600 = vmatprep.subr.bf16.mxu1 %v4793_v39 }
 0x4bf   : > { %v7956_v29 = vadd.f32 %v4377_v22, %v4376_v16  ;;  %3562 = vmatmul.mubr.bf16.gmra.mxu0 %v3439_v48  ;;  %v4795_v48 = vld [vmem:[%s8271_s6 + $0x48] sm:$0xff]  }
 0x4c0   : > { %v4379_v38 = vpop.f32.mrf.mxu0  ;;  %v4796_v16 = vld [vmem:[%s8271_s6 + $0x8] sm:$0xff]  }
 0x4c1   : > { %4601 = vmatpush3.bf16.msra.mxu1 %v4794_v57 }
 0x4c2   : > { %v4380_v54 = vpop.f32.mrf.mxu0  ;;  %4602 = vmatprep.subr.bf16.mxu1 %v4795_v48 }
 0x4c3   : > { %v7964_v55 = vadd.f32 %v4380_v54, %v4379_v38  ;;  %v4797_v38 = vld [vmem:[%s8271_s6 + $0x40] sm:$0xff]  }
 0x4c4   : > { %v4382_v10 = vpop.f32.mrf.mxu0 }
 0x4c5   : > { %4603 = vmatpush3.bf16.msra.mxu1 %v4796_v16 }
 0x4c6   : > { %v4383_v46 = vpop.f32.mrf.mxu0  ;;  %4604 = vmatprep.subr.bf16.mxu1 %v4797_v38 }
 0x4c7   : > { %v7974_v45 = vadd.f32 %v4383_v46, %v4382_v10 }
 0x4c8   : > { %v4385_v49 = vpop.f32.mrf.mxu0 }
 0x4c9   : > { %4605 = vmatpush3.bf16.msra.mxu1 %v4798_v13 }
 0x4ca   : > { %v4386_v19 = vpop.f32.mrf.mxu0 }
 0x4cb   : > { %v7982_v0 = vadd.f32 %v4386_v19, %v4385_v49 }
 0x4cc   : > { %v4388_v22 = vpop.f32.mrf.mxu0 }
 0x4ce   : > { %v4389_v21 = vpop.f32.mrf.mxu0 }
 0x4cf   : > { %v7992_v54 = vadd.f32 %v4389_v21, %v4388_v22 }
 0x4d0   : > { %v4391_v11 = vpop.f32.mrf.mxu0 }
 0x4d2   : > { %v4392_v10 = vpop.f32.mrf.mxu0 }
 0x4d3   : > { %v7997_v46 = vadd.f32 %v4392_v10, %v4391_v11 }
 0x4d4   : > { %v4394_v39 = vpop.f32.mrf.mxu0 }
 0x4d6   : > { %v4395_v49 = vpop.f32.mrf.mxu0 }
 0x4d7   : > { %v8001_v19 = vadd.f32 %v4395_v49, %v4394_v39 }
 0x4d8   : > { %v4397_v48 = vpop.f32.mrf.mxu0 }
 0x4da   : > { %v4398_v16 = vpop.f32.mrf.mxu0 }
 0x4db   : > { %v8003_v22 = vadd.f32 %v4398_v16, %v4397_v48 }
 0x4dc   : > { %v4400_v21 = vpop.f32.mrf.mxu0 }
 0x4de   : > { %v4401_v38 = vpop.f32.mrf.mxu0 }
 0x4df   : > { %v8007_v13 = vadd.f32 %v4401_v38, %v4400_v21 }
 0x4e0   : > { %v4403_v11 = vpop.f32.mrf.mxu0 }
 0x4e2   : > { %v4404_v10 = vpop.f32.mrf.mxu0 }
 0x4e3   : > { %v8009_v23 = vadd.f32 %v4404_v10, %v4403_v11 }
 0x4ec   : > { %v3283_v39 = vpop.xlane.xlu0 %3282 }
 0x4ed   : > { %5153 = vrcp.f32 %v3283_v39 }
 0x4f0   : > { %v3286_v49 = vpop.xlane.xlu1 %3285 }
 0x4f1   : > { %5155 = vrcp.f32 %v3286_v49 }
 0x4f5   : > { %v3289_v48 = vpop.xlane.xlu0 %3288 }
 0x4f6   : > { %5157 = vrcp.f32 %v3289_v48 }
 0x4fa   : > { %v3292_v16 = vpop.xlane.xlu1 %3291  ;;  %v5154_v12 = vpop.eup %5153 }
 0x4fb   : > { %5159 = vrcp.f32 %v3292_v16  ;;  %v3379_v21 = vmul.f32 %v5154_v12, %v7733_v6  ;;  %v3378_v11 = vmul.f32 %v5154_v12, %v7731_v9 }
 0x4fe   : > { %v5156_v52 = vpop.eup %5155 }
 0x4ff   : > { %v3295_v62 = vpop.xlane.xlu0 %3294  ;;  %v3382_v38 = vmul.f32 %v5156_v52, %v7741_v31  ;;  %v3381_v10 = vmul.f32 %v5156_v52, %v7739_v41 }
 0x500   : > { %5161 = vrcp.f32 %v3295_v62 }
 0x501   : > { %v3442_v39 = vpack.c.bf16 %v3382_v38, %v3379_v21  ;;  %v3441_v49 = vpack.c.bf16 %v3381_v10, %v3378_v11 }
 0x502   : > { %v3298_v57 = vpop.xlane.xlu1 %3297 }
 0x503   : > { %5163 = vrcp.f32 %v3298_v57  ;;  %v5158_v26 = vpop.eup %5157  ;;  %3569 = vmatprep.mubr.bf16.mxu0 %v3442_v39 }
 0x504   : > { %3570 = vmatmul.mubr.bf16.gmra.mxu0 %v3441_v49  ;;  %v3385_v20 = vmul.f32 %v5158_v26, %v7753_v58  ;;  %v3384_v31 = vmul.f32 %v5158_v26, %v7751_v37 }
 0x508   : > { %v3301_v48 = vpop.xlane.xlu0 %3300  ;;  %v5160_v16 = vpop.eup %5159 }
 0x509   : > { %5165 = vrcp.f32 %v3301_v48  ;;  %v3388_v6 = vmul.f32 %v5160_v16, %v7761_v61  ;;  %v3387_v9 = vmul.f32 %v5160_v16, %v7759_v2 }
 0x50b   : > { %v3304_v12 = vpop.xlane.xlu1 %3303  ;;  %v3444_v41 = vpack.c.bf16 %v3388_v6, %v3385_v20  ;;  %v3443_v52 = vpack.c.bf16 %v3387_v9, %v3384_v31 }
 0x50c   : > { %5167 = vrcp.f32 %v3304_v12 }
 0x50d   : > { %3577 = vmatprep.mubr.bf16.mxu0 %v3444_v41  ;;  %v5162_v62 = vpop.eup %5161 }
 0x50e   : > { %3578 = vmatmul.mubr.bf16.gmra.mxu0 %v3443_v52  ;;  %v3391_v38 = vmul.f32 %v5162_v62, %v7773_v17  ;;  %v3390_v61 = vmul.f32 %v5162_v62, %v7771_v24 }
 0x510   : > { %v3307_v57 = vpop.xlane.xlu0 %3306  ;;  %v5164_v21 = vpop.eup %5163 }
 0x511   : > { %5169 = vrcp.f32 %v3307_v57  ;;  %v3394_v58 = vmul.f32 %v5164_v21, %v7781_v50  ;;  %v3393_v37 = vmul.f32 %v5164_v21, %v7779_v34 }
 0x513   : > { %v3310_v26 = vpop.xlane.xlu1 %3309  ;;  %v3446_v2 = vpack.c.bf16 %v3394_v58, %v3391_v38  ;;  %v3445_v11 = vpack.c.bf16 %v3393_v37, %v3390_v61 }
 0x514   : > { %5171 = vrcp.f32 %v3310_v26 }
 0x515   : > { %3585 = vmatprep.mubr.bf16.mxu0 %v3446_v2 }
 0x516   : > { %v5166_v20 = vpop.eup %5165  ;;  %3586 = vmatmul.mubr.bf16.gmra.mxu0 %v3445_v11 }
 0x517   : > { %v3397_v49 = vmul.f32 %v5166_v20, %v7793_v63  ;;  %v3396_v50 = vmul.f32 %v5166_v20, %v7791_v47 }
 0x518   : > { %v3313_v10 = vpop.xlane.xlu0 %3312 }
 0x519   : > { %v5168_v39 = vpop.eup %5167  ;;  %5173 = vrcp.f32 %v3313_v10 }
 0x51a   : > { %v3400_v17 = vmul.f32 %v5168_v39, %v7801_v15  ;;  %v3399_v24 = vmul.f32 %v5168_v39, %v7799_v28 }
 0x51b   : > { %v3316_v48 = vpop.xlane.xlu1 %3315 }
 0x51c   : > { %5175 = vrcp.f32 %v3316_v48  ;;  %v3448_v34 = vpack.c.bf16 %v3400_v17, %v3397_v49  ;;  %v3447_v16 = vpack.c.bf16 %v3399_v24, %v3396_v50 }
 0x51e   : > { %v5170_v6 = vpop.eup %5169  ;;  %3593 = vmatprep.mubr.bf16.mxu0 %v3448_v34 }
 0x51f   : > { %3594 = vmatmul.mubr.bf16.gmra.mxu0 %v3447_v16  ;;  %v3403_v12 = vmul.f32 %v5170_v6, %v7813_v5  ;;  %v3402_v15 = vmul.f32 %v5170_v6, %v7811_v32 }
 0x520   : > { %v3319_v31 = vpop.xlane.xlu0 %3318 }
 0x521   : > { %v5172_v9 = vpop.eup %5171  ;;  %5177 = vrcp.f32 %v3319_v31 }
 0x522   : > { %v3406_v63 = vmul.f32 %v5172_v9, %v7823_v35  ;;  %v3405_v47 = vmul.f32 %v5172_v9, %v7821_v43  ;;  %v4406_v28 = vpop.f32.mrf.mxu0 }
 0x524   : > { %v3322_v41 = vpop.xlane.xlu1 %3321  ;;  %v3450_v52 = vpack.c.bf16 %v3406_v63, %v3403_v12  ;;  %v3449_v62 = vpack.c.bf16 %v3405_v47, %v3402_v15  ;;  %v4407_v21 = vpop.f32.mrf.mxu0 }
 0x525   : > { %5179 = vrcp.f32 %v3322_v41  ;;  %v8033_v38 = vadd.f32 %v4407_v21, %v4406_v28 }
 0x526   : > { %v5174_v57 = vpop.eup %5173  ;;  %3601 = vmatprep.mubr.bf16.mxu0 %v3450_v52  ;;  %v4409_v5 = vpop.f32.mrf.mxu0 }
 0x527   : > { %3602 = vmatmul.mubr.bf16.gmra.mxu0 %v3449_v62  ;;  %v3409_v35 = vmul.f32 %v5174_v57, %v7839_v3  ;;  %v3408_v37 = vmul.f32 %v5174_v57, %v7835_v59 }
 0x528   : > { %v4410_v32 = vpop.f32.mrf.mxu0 }
 0x529   : > { %v3325_v58 = vpop.xlane.xlu0 %3324  ;;  %v5176_v61 = vpop.eup %5175  ;;  %v8039_v11 = vadd.f32 %v4410_v32, %v4409_v5 }
 0x52a   : > { %5181 = vrcp.f32 %v3325_v58  ;;  %v3412_v43 = vmul.f32 %v5176_v61, %v7849_v25  ;;  %v3411_v26 = vmul.f32 %v5176_v61, %v7845_v8 }
 0x52b   : > { %v3658_v39 = vpack.c.bf16 %v8039_v11, %v8033_v38  ;;  %v4412_v49 = vpop.f32.mrf.mxu0 }
 0x52c   : > { %v3328_v2 = vpop.xlane.xlu1 %3327  ;;  %v3452_v20 = vpack.c.bf16 %v3412_v43, %v3409_v35  ;;  %v3451_v10 = vpack.c.bf16 %v3411_v26, %v3408_v37 }
 0x52d   : > { %5183 = vrcp.f32 %v3328_v2  ;;  %v4413_v17 = vpop.f32.mrf.mxu0 }
 0x52e   : > { %3609 = vmatprep.mubr.bf16.mxu0 %v3452_v20  ;;  %v5178_v3 = vpop.eup %5177  ;;  %v8043_v25 = vadd.f32 %v4413_v17, %v4412_v49 }
 0x52f   : > { %3610 = vmatmul.mubr.bf16.gmra.mxu0 %v3451_v10  ;;  %v4415_v59 = vpop.f32.mrf.mxu0  ;;  %v3415_v8 = vmul.f32 %v5178_v3, %v7861_v14  ;;  %v3414_v48 = vmul.f32 %v5178_v3, %v7859_v30 }
 0x531   : > { %v4416_v16 = vpop.f32.mrf.mxu0 }
 0x532   : > { %v5180_v50 = vpop.eup %5179  ;;  %v8049_v9 = vadd.f32 %v4416_v16, %v4415_v59  ;;  %v8981_v59 = vld [vmem:[#allocation74_spill] sm:$0xff] }
 0x533   : > { %v3418_v24 = vmul.f32 %v5180_v50, %v7871_v56  ;;  %v3417_v34 = vmul.f32 %v5180_v50, %v7867_v44 }
 0x534   : > { %v3660_v15 = vpack.c.bf16 %v8049_v9, %v8043_v25  ;;  %v8120_v9 = vld [vmem:[%s8272_s7] ss:$0 sm:$0xff] }
 0x535   : > { %v3454_v6 = vpack.c.bf16 %v3418_v24, %v3415_v8  ;;  %v3453_v31 = vpack.c.bf16 %v3417_v34, %v3414_v48  ;;  %v4418_v12 = vpop.f32.mrf.mxu0  ;;  %v8982_v8 = vld [vmem:[#allocation69_spill] sm:$0xff] }
 0x536   : > { %v8983_v24 = vpack.c.bf16 %v8981_v59, %v8982_v8 }
 0x537   : > { %3617 = vmatprep.mubr.bf16.mxu0 %v3454_v6  ;;  %v5182_v63 = vpop.eup %5181  ;;  %v4419_v47 = vpop.f32.mrf.mxu0 }
 0x538   : > { %3618 = vmatmul.mubr.bf16.gmra.mxu0 %v3453_v31  ;;  %v8053_v41 = vadd.f32 %v4419_v47, %v4418_v12  ;;  %v3421_v30 = vmul.f32 %v5182_v63, %v7883_v1  ;;  %v3420_v28 = vmul.f32 %v5182_v63, %v7881_v60  ;;  %v8984_v47 = vld [vmem:[#allocation93_spill] sm:$0xff] }
 0x539   : > { %v4421_v56 = vpop.f32.mrf.mxu0 }
 0x53a   : > { %v5184_v14 = vpop.eup %5183 }
 0x53b   : > { %v3424_v44 = vmul.f32 %v5184_v14, %v7893_v7  ;;  %v3423_v52 = vmul.f32 %v5184_v14, %v7889_v33  ;;  %v4422_v62 = vpop.f32.mrf.mxu0  ;;  %v8985_v14 = vld [vmem:[#allocation94_spill] sm:$0xff] }
 0x53c   : > { %v8059_v58 = vadd.f32 %v4422_v62, %v4421_v56  ;;  %v8986_v56 = vpack.c.bf16 %v8984_v47, %v8985_v14 }
 0x53d   : > { %v3456_v57 = vpack.c.bf16 %v3424_v44, %v3421_v30  ;;  %v3455_v21 = vpack.c.bf16 %v3423_v52, %v3420_v28  ;;  %v4424_v5 = vpop.f32.mrf.mxu0 }
 0x53e   : > { %v3662_v61 = vpack.c.bf16 %v8059_v58, %v8053_v41 }
 0x53f   : > { %3625 = vmatprep.mubr.bf16.mxu0 %v3456_v57  ;;  %v4425_v35 = vpop.f32.mrf.mxu0 }
 0x540   : > { %3626 = vmatmul.mubr.bf16.gmra.mxu0 %v3455_v21  ;;  %v8063_v32 = vadd.f32 %v4425_v35, %v4424_v5  ;;  %v8987_v5 = vld [vmem:[#allocation37_spill] sm:$0xff]  ;;  %v8988_v35 = vld [vmem:[#allocation34_spill] sm:$0xff] }
 0x541   : > { %v4427_v1 = vpop.f32.mrf.mxu0 }
 0x543   : > { %v4428_v7 = vpop.f32.mrf.mxu0 }
 0x544   : > { %v8065_v43 = vadd.f32 %v4428_v7, %v4427_v1  ;;  %v8989_v1 = vpack.c.bf16 %v8987_v5, %v8988_v35 }
 0x546   : > { %v4494_v60 = vpop.f32.mrf.mxu0  ;;  %v3664_v33 = vpack.c.bf16 %v8065_v43, %v8063_v32  ;;  %v3994_v32 = vld [vmem:[%s8126_s14] sm:$0xff] }
 0x548   : > { %v4495_v37 = vpop.f32.mrf.mxu0 }
 0x549   : > { %v4496_v20 = vadd.f32 %v4495_v37, %v4494_v60 }
 0x54a   : > { %v4497_v26 = vpop.f32.mrf.mxu0 }
 0x54c   : > { %v4498_v2 = vpop.f32.mrf.mxu0 }
 0x54d   : > { %v4499_v10 = vadd.f32 %v4498_v2, %v4497_v26 }
 0x54e   : > { %v4500_v49 = vpop.f32.mrf.mxu0 }
 0x54f   : > { %v3635_v3 = vpack.c.bf16 %v4499_v10, %v4496_v20 }
 0x550   : > { %v4501_v17 = vpop.f32.mrf.mxu0 }
 0x551   : > { %3833 = vmatprep.mubr.bf16.mxu1 %v3635_v3  ;;  %v4502_v34 = vadd.f32 %v4501_v17, %v4500_v49  ;;  %v8990_v49 = vpack.c.bf16 %v7901_v27, %v7891_v4  ;;  %v8992_v4 = vpack.c.bf16 %v7924_v40, %v7915_v53  ;;  %v8994_v53 = vpack.c.bf16 %v7964_v55, %v7956_v29 }
 0x552   : > { %v4503_v50 = vpop.f32.mrf.mxu0  ;;  %3834 = vmatmul.mubr.bf16.vlgmr.msra.gmra.mxu1 %v8983_v24 }
 0x554   : > { %v4504_v48 = vpop.f32.mrf.mxu0 }
 0x555   : > { %v4505_v16 = vadd.f32 %v4504_v48, %v4503_v50 }
 0x556   : > { %v4506_v6 = vpop.f32.mrf.mxu0 }
 0x557   : > { %v3637_v31 = vpack.c.bf16 %v4505_v16, %v4502_v34  ;;  %v8991_v34 = vpack.c.bf16 %v7911_v18, %v7905_v51  ;;  %v8993_v18 = vpack.c.bf16 %v7946_v42, %v7934_v36  ;;  %v8995_v42 = vpack.c.bf16 %v7982_v0, %v7974_v45 }
 0x558   : > { %v4507_v12 = vpop.f32.mrf.mxu0  ;;  %v8997_v0 = vpack.c.bf16 %v8003_v22, %v8001_v19 }
 0x559   : > { %3841 = vmatprep.mubr.bf16.mxu1 %v3637_v31  ;;  %v4508_v44 = vadd.f32 %v4507_v12, %v4506_v6 }
 0x55a   : > { %v4509_v63 = vpop.f32.mrf.mxu0  ;;  %3842 = vmatmul.mubr.bf16.gmra.mxu1 %v8986_v56 }
 0x55c   : > { %v4510_v30 = vpop.f32.mrf.mxu0 }
 0x55d   : > { %v4511_v28 = vadd.f32 %v4510_v30, %v4509_v63 }
 0x55f   : > { %v4512_v52 = vpop.f32.mrf.mxu0  ;;  %v3639_v62 = vpack.c.bf16 %v4511_v28, %v4508_v44 }
 0x561   : > { %v4513_v57 = vpop.f32.mrf.mxu0  ;;  %3849 = vmatprep.mubr.bf16.mxu1 %v3639_v62 }
 0x562   : > { %3850 = vmatmul.mubr.bf16.gmra.mxu1 %v8989_v1  ;;  %v4514_v60 = vadd.f32 %v4513_v57, %v4512_v52 }
 0x563   : > { %v4515_v21 = vpop.f32.mrf.mxu0 }
 0x565   : > { %v4516_v7 = vpop.f32.mrf.mxu0 }
 0x566   : > { %v4517_v37 = vadd.f32 %v4516_v7, %v4515_v21 }
 0x567   : > { %v4518_v26 = vpop.f32.mrf.mxu0 }
 0x568   : > { %v3641_v2 = vpack.c.bf16 %v4517_v37, %v4514_v60 }
 0x569   : > { %v4519_v20 = vpop.f32.mrf.mxu0 }
 0x56a   : > { %3857 = vmatprep.mubr.bf16.mxu1 %v3641_v2  ;;  %v4520_v17 = vadd.f32 %v4519_v20, %v4518_v26 }
 0x56b   : > { %v4521_v10 = vpop.f32.mrf.mxu0  ;;  %3858 = vmatmul.mubr.bf16.gmra.mxu1 %v8990_v49 }
 0x56d   : > { %v4522_v3 = vpop.f32.mrf.mxu0 }
 0x56e   : > { %v4523_v50 = vadd.f32 %v4522_v3, %v4521_v10 }
 0x56f   : > { %v4524_v59 = vpop.f32.mrf.mxu0 }
 0x570   : > { %v3643_v8 = vpack.c.bf16 %v4523_v50, %v4520_v17 }
 0x571   : > { %v4525_v24 = vpop.f32.mrf.mxu0 }
 0x572   : > { %3865 = vmatprep.mubr.bf16.mxu1 %v3643_v8  ;;  %v4526_v6 = vadd.f32 %v4525_v24, %v4524_v59  ;;  %v8996_v59 = vpack.c.bf16 %v7997_v46, %v7992_v54  ;;  %v8998_v46 = vpack.c.bf16 %v8009_v23, %v8007_v13 }
 0x573   : > { %v4527_v48 = vpop.f32.mrf.mxu0  ;;  %3866 = vmatmul.mubr.bf16.gmra.mxu1 %v8991_v34 }
 0x575   : > { %v4528_v16 = vpop.f32.mrf.mxu0 }
 0x576   : > { %v4529_v31 = vadd.f32 %v4528_v16, %v4527_v48 }
 0x577   : > { %v4530_v12 = vpop.f32.mrf.mxu0 }
 0x578   : > { %v3645_v63 = vpack.c.bf16 %v4529_v31, %v4526_v6 }
 0x579   : > { %v4531_v47 = vpop.f32.mrf.mxu0 }
 0x57a   : > { %3873 = vmatprep.mubr.bf16.mxu1 %v3645_v63  ;;  %v4532_v56 = vadd.f32 %v4531_v47, %v4530_v12 }
 0x57b   : > { %v4533_v27 = vpop.f32.mrf.mxu0  ;;  %3874 = vmatmul.mubr.bf16.gmra.mxu1 %v8992_v4 }
 0x57d   : > { %v4534_v14 = vpop.f32.mrf.mxu0 }
 0x57e   : > { %v4535_v30 = vadd.f32 %v4534_v14, %v4533_v27 }
 0x57f   : > { %v4536_v44 = vpop.f32.mrf.mxu0 }
 0x580   : > { %v3647_v28 = vpack.c.bf16 %v4535_v30, %v4532_v56 }
 0x581   : > { %v4537_v52 = vpop.f32.mrf.mxu0 }
 0x582   : > { %3881 = vmatprep.mubr.bf16.mxu1 %v3647_v28  ;;  %v4538_v57 = vadd.f32 %v4537_v52, %v4536_v44 }
 0x583   : > { %v4539_v51 = vpop.f32.mrf.mxu0  ;;  %3882 = vmatmul.mubr.bf16.gmra.mxu1 %v8993_v18 }
 0x585   : > { %v4540_v62 = vpop.f32.mrf.mxu0 }
 0x586   : > { %v4541_v21 = vadd.f32 %v4540_v62, %v4539_v51 }
 0x588   : > { %v3649_v5 = vpack.c.bf16 %v4541_v21, %v4538_v57 }
 0x58a   : > { %3889 = vmatprep.mubr.bf16.mxu1 %v3649_v5 }
 0x58b   : > { %3890 = vmatmul.mubr.bf16.gmra.mxu1 %v8994_v53 }
 0x5c4   : > { %v4542_v40 = vpop.f32.mrf.mxu0 }
 0x5c6   : > { %v4543_v35 = vpop.f32.mrf.mxu0 }
 0x5c7   : > { %v4544_v60 = vadd.f32 %v4543_v35, %v4542_v40 }
 0x5c8   : > { %v4545_v1 = vpop.f32.mrf.mxu0 }
 0x5ca   : > { %v4546_v7 = vpop.f32.mrf.mxu0 }
 0x5cb   : > { %v4547_v37 = vadd.f32 %v4546_v7, %v4545_v1 }
 0x5cd   : > { %v3651_v2 = vpack.c.bf16 %v4547_v37, %v4544_v60 }
 0x5ce   : > { %v4548_v26 = vpop.f32.mrf.mxu0 }
 0x5cf   : > { %3897 = vmatprep.mubr.bf16.mxu1 %v3651_v2 }
 0x5d0   : > { %v4549_v20 = vpop.f32.mrf.mxu0  ;;  %3898 = vmatmul.mubr.bf16.gmra.mxu1 %v8995_v42  ;;  %v3995_v42 = vld [vmem:[%s8126_s14 + $0x8] sm:$0xff] }
 0x5d1   : > { %v4550_v49 = vadd.f32 %v4549_v20, %v4548_v26 }
 0x5d2   : > { %v4551_v36 = vpop.f32.mrf.mxu0 }
 0x5d4   : > { %v4552_v10 = vpop.f32.mrf.mxu0 }
 0x5d5   : > { %v4553_v3 = vadd.f32 %v4552_v10, %v4551_v36 }
 0x5d6   : > { %v4554_v29 = vpop.f32.mrf.mxu0 }
 0x5d7   : > { %v3653_v55 = vpack.c.bf16 %v4553_v3, %v4550_v49  ;;  %v9000_v3 = vld [vmem:[#allocation3_spill] sm:$0xff] }
 0x5d8   : > { %v4555_v17 = vpop.f32.mrf.mxu0 }
 0x5d9   : > { %3905 = vmatprep.mubr.bf16.mxu1 %v3653_v55  ;;  %v4556_v24 = vadd.f32 %v4555_v17, %v4554_v29 }
 0x5da   : > { %v4557_v50 = vpop.f32.mrf.mxu0  ;;  %3906 = vmatmul.mubr.bf16.gmra.mxu1 %v8996_v59 }
 0x5dc   : > { %v4558_v8 = vpop.f32.mrf.mxu0 }
 0x5dd   : > { %v4559_v48 = vadd.f32 %v4558_v8, %v4557_v50  ;;  %v3996_v8 = vld [vmem:[%s8126_s14 + $0x10] sm:$0xff] }
 0x5df   : > { %v4560_v34 = vpop.f32.mrf.mxu0  ;;  %v3655_v16 = vpack.c.bf16 %v4559_v48, %v4556_v24 }
 0x5e1   : > { %v4561_v6 = vpop.f32.mrf.mxu0  ;;  %3913 = vmatprep.mubr.bf16.mxu1 %v3655_v16 }
 0x5e2   : > { %3914 = vmatmul.mubr.bf16.gmra.mxu1 %v8997_v0  ;;  %v4562_v12 = vadd.f32 %v4561_v6, %v4560_v34  ;;  %v9001_v34 = vld [vmem:[#allocation4_spill] sm:$0xff] }
 0x5e3   : > { %v4563_v45 = vpop.f32.mrf.mxu0 }
 0x5e5   : > { %v4564_v31 = vpop.f32.mrf.mxu0 }
 0x5e6   : > { %v4565_v63 = vadd.f32 %v4564_v31, %v4563_v45 }
 0x5e7   : > { %v4566_v47 = vpop.f32.mrf.mxu0 }
 0x5e8   : > { %v3657_v27 = vpack.c.bf16 %v4565_v63, %v4562_v12  ;;  %v3997_v12 = vld [vmem:[%s8126_s14 + $0x18] sm:$0xff] }
 0x5e9   : > { %v4567_v4 = vpop.f32.mrf.mxu0 }
 0x5ea   : > { %3921 = vmatprep.mubr.bf16.mxu1 %v3657_v27  ;;  %v4568_v56 = vadd.f32 %v4567_v4, %v4566_v47  ;;  %v9002_v27 = vld [vmem:[#allocation5_spill] sm:$0xff] }
 0x5eb   : > { %v4569_v54 = vpop.f32.mrf.mxu0  ;;  %3922 = vmatmul.mubr.bf16.gmra.mxu1 %v8998_v46 }
 0x5ed   : > { %v4570_v14 = vpop.f32.mrf.mxu0 }
 0x5ee   : > { %v4571_v30 = vadd.f32 %v4570_v14, %v4569_v54 }
 0x5ef   : > { %v4572_v44 = vpop.f32.mrf.mxu0 }
 0x5f0   : > { %v3659_v28 = vpack.c.bf16 %v4571_v30, %v4568_v56  ;;  %v3998_v30 = vld [vmem:[%s8126_s14 + $0x20] sm:$0xff] }
 0x5f1   : > { %v4573_v52 = vpop.f32.mrf.mxu0 }
 0x5f2   : > { %3929 = vmatprep.mubr.bf16.mxu1 %v3659_v28  ;;  %v4574_v51 = vadd.f32 %v4573_v52, %v4572_v44  ;;  %v9003_v52 = vld [vmem:[#allocation11_spill] sm:$0xff] }
 0x5f3   : > { %v4575_v19 = vpop.f32.mrf.mxu0  ;;  %3930 = vmatmul.mubr.bf16.gmra.mxu1 %v3658_v39 }
 0x5f5   : > { %v4576_v22 = vpop.f32.mrf.mxu0 }
 0x5f6   : > { %v4577_v18 = vadd.f32 %v4576_v22, %v4575_v19 }
 0x5f8   : > { %v4578_v62 = vpop.f32.mrf.mxu0  ;;  %v3661_v57 = vpack.c.bf16 %v4577_v18, %v4574_v51 }
 0x5fa   : > { %v4579_v21 = vpop.f32.mrf.mxu0  ;;  %3937 = vmatprep.mubr.bf16.mxu1 %v3661_v57  ;;  %v3999_v57 = vld [vmem:[%s8126_s14 + $0x28] sm:$0xff] }
 0x5fb   : > { %3938 = vmatmul.mubr.bf16.gmra.mxu1 %v3660_v15  ;;  %v4580_v5 = vadd.f32 %v4579_v21, %v4578_v62 }
 0x5fc   : > { %v4581_v23 = vpop.f32.mrf.mxu0 }
 0x5fe   : > { %v4582_v13 = vpop.f32.mrf.mxu0 }
 0x5ff   : > { %v4583_v53 = vadd.f32 %v4582_v13, %v4581_v23  ;;  %v9004_v13 = vld [vmem:[#allocation15_spill] sm:$0xff] }
 0x600   : > { %v4584_v40 = vpop.f32.mrf.mxu0 }
 0x601   : > { %v3663_v35 = vpack.c.bf16 %v4583_v53, %v4580_v5 }
 0x602   : > { %v4585_v38 = vpop.f32.mrf.mxu0 }
 0x603   : > { %3945 = vmatprep.mubr.bf16.mxu1 %v3663_v35  ;;  %v4586_v1 = vadd.f32 %v4585_v38, %v4584_v40 }
 0x604   : > { %v4587_v11 = vpop.f32.mrf.mxu0  ;;  %3946 = vmatmul.mubr.bf16.gmra.mxu1 %v3662_v61 }
 0x606   : > { %v4588_v39 = vpop.f32.mrf.mxu0 }
 0x607   : > { %v4589_v7 = vadd.f32 %v4588_v39, %v4587_v11  ;;  %v4000_v11 = vld [vmem:[%s8126_s14 + $0x30] sm:$0xff] }
 0x609   : > { %v3665_v60 = vpack.c.bf16 %v4589_v7, %v4586_v1  ;;  %v9005_v7 = vld [vmem:[#allocation24_spill] sm:$0xff] }
 0x60b   : > { %3953 = vmatprep.mubr.bf16.mxu1 %v3665_v60 }
 0x60c   : > { %3954 = vmatmul.mubr.bf16.gmra.mxu1 %v3664_v33  ;;  %v8999_v33 = vld [vmem:[#allocation2_spill] sm:$0xff] }
 0x612   : > { %v4606_v25 = vpop.f32.mrf.mxu1 }
 0x614   : > { %v4607_v15 = vpop.f32.mrf.mxu1 }
 0x615   : > { %v4608_v41 = vadd.f32 %v4607_v15, %v4606_v25 }
 0x616   : > { %v4609_v58 = vpop.f32.mrf.mxu1 }
 0x617   : > { %v3836_v61 = vadd.f32 %v4608_v41, %v8120_v9 }
 0x618   : > { %v4610_v43 = vpop.f32.mrf.mxu1 }
 0x619   : > { %v3962_v37 = vadd.f32 %v3836_v61, %v8999_v33  ;;  %v4611_v26 = vadd.f32 %v4610_v43, %v4609_v58  ;;  %v4001_v61 = vld [vmem:[%s8126_s14 + $0x38] sm:$0xff] }
 0x61a   : > { %v4612_v2 = vpop.f32.mrf.mxu1  ;;  %v9006_v33 = vld [vmem:[#allocation25_spill] sm:$0xff] }
 0x61b   : > { %v4026_v20 = vadd.f32 %v3994_v32, %v3962_v37  ;;  %v3839_v36 = vadd.f32 %v4611_v26, %v8120_v9 }
 0x61c   : > { %v4613_v10 = vpop.f32.mrf.mxu1 }
 0x61d   : > { %v4058_v49 = vmax.f32 %v4026_v20, 0.0  ;;  %v3963_v29 = vadd.f32 %v3839_v36, %v9000_v3  ;;  %v4614_v55 = vadd.f32 %v4613_v10, %v4612_v2  ;;  %v9007_v3 = vld [vmem:[#allocation26_spill] sm:$0xff] }
 0x61e   : > { %v4615_v17 = vpop.f32.mrf.mxu1 }
 0x61f   : > { %4090 = vst [vmem:[%s8136_s16] sm:$0xff] %v4058_v49  ;;  %v4027_v50 = vadd.f32 %v3995_v42, %v3963_v29  ;;  %v3844_v59 = vadd.f32 %v4614_v55, %v8120_v9  ;;  %v4002_v42 = vld [vmem:[%s8126_s14 + $0x40] sm:$0xff] }
 0x620   : > { %v4616_v24 = vpop.f32.mrf.mxu1 }
 0x621   : > { %v4059_v48 = vmax.f32 %v4027_v50, 0.0  ;;  %v3964_v16 = vadd.f32 %v3844_v59, %v9001_v34  ;;  %v4617_v6 = vadd.f32 %v4616_v24, %v4615_v17  ;;  %v9008_v34 = vld [vmem:[#allocation27_spill] sm:$0xff] }
 0x622   : > { %v4618_v45 = vpop.f32.mrf.mxu1 }
 0x623   : > { %4091 = vst [vmem:[%s8136_s16 + $0x8] sm:$0xff] %v4059_v48  ;;  %v4028_v0 = vadd.f32 %v3996_v8, %v3964_v16  ;;  %v3847_v31 = vadd.f32 %v4617_v6, %v8120_v9  ;;  %v4003_v8 = vld [vmem:[%s8126_s14 + $0x48] sm:$0xff] }
 0x624   : > { %v4619_v63 = vpop.f32.mrf.mxu1 }
 0x625   : > { %v4060_v47 = vmax.f32 %v4028_v0, 0.0  ;;  %v3965_v4 = vadd.f32 %v3847_v31, %v9002_v27  ;;  %v4620_v54 = vadd.f32 %v4619_v63, %v4618_v45  ;;  %v9009_v27 = vld [vmem:[#allocation28_spill] sm:$0xff] }
 0x626   : > { %v4621_v46 = vpop.f32.mrf.mxu1 }
 0x627   : > { %4092 = vst [vmem:[%s8136_s16 + $0x10] sm:$0xff] %v4060_v47  ;;  %v4029_v14 = vadd.f32 %v3997_v12, %v3965_v4  ;;  %v3852_v56 = vadd.f32 %v4620_v54, %v8120_v9  ;;  %v4004_v12 = vld [vmem:[%s8126_s14 + $0x50] sm:$0xff] }
 0x628   : > { %v4622_v44 = vpop.f32.mrf.mxu1 }
 0x629   : > { %v4061_v28 = vmax.f32 %v4029_v14, 0.0  ;;  %v3966_v19 = vadd.f32 %v3852_v56, %v9003_v52  ;;  %v4623_v22 = vadd.f32 %v4622_v44, %v4621_v46  ;;  %v9010_v52 = vld [vmem:[#allocation29_spill] sm:$0xff] }
 0x62b   : > { %v4624_v51 = vpop.f32.mrf.mxu1  ;;  %4093 = vst [vmem:[%s8136_s16 + $0x18] sm:$0xff] %v4061_v28  ;;  %v4030_v18 = vadd.f32 %v3998_v30, %v3966_v19  ;;  %v3855_v62 = vadd.f32 %v4623_v22, %v8120_v9  ;;  %v4005_v30 = vld [vmem:[%s8126_s14 + $0x58] sm:$0xff] }
 0x62d   : > { %v4625_v21 = vpop.f32.mrf.mxu1  ;;  %v4062_v23 = vmax.f32 %v4030_v18, 0.0  ;;  %v3967_v5 = vadd.f32 %v3855_v62, %v9004_v13  ;;  %v9011_v13 = vld [vmem:[#allocation30_spill] sm:$0xff] }
 0x62e   : > { %v4626_v53 = vadd.f32 %v4625_v21, %v4624_v51 }
 0x62f   : > { %v4627_v40 = vpop.f32.mrf.mxu1  ;;  %4094 = vst [vmem:[%s8136_s16 + $0x20] sm:$0xff] %v4062_v23  ;;  %v4031_v35 = vadd.f32 %v3999_v57, %v3967_v5  ;;  %v4006_v57 = vld [vmem:[%s8126_s14 + $0x60] sm:$0xff] }
 0x630   : > { %v3860_v38 = vadd.f32 %v4626_v53, %v8120_v9 }
 0x631   : > { %v4628_v39 = vpop.f32.mrf.mxu1  ;;  %v4063_v1 = vmax.f32 %v4031_v35, 0.0 }
 0x632   : > { %v3968_v60 = vadd.f32 %v3860_v38, %v9005_v7  ;;  %v4629_v25 = vadd.f32 %v4628_v39, %v4627_v40  ;;  %v9012_v7 = vld [vmem:[#allocation31_spill] sm:$0xff] }
 0x633   : > { %v4630_v15 = vpop.f32.mrf.mxu1  ;;  %4095 = vst [vmem:[%s8136_s16 + $0x28] sm:$0xff] %v4063_v1 }
 0x634   : > { %v4032_v41 = vadd.f32 %v4000_v11, %v3968_v60  ;;  %v3863_v58 = vadd.f32 %v4629_v25, %v8120_v9  ;;  %v4007_v11 = vld [vmem:[%s8126_s14 + $0x68] sm:$0xff] }
 0x635   : > { %v4631_v32 = vpop.f32.mrf.mxu1 }
 0x636   : > { %v4064_v43 = vmax.f32 %v4032_v41, 0.0  ;;  %v3969_v37 = vadd.f32 %v3863_v58, %v9006_v33  ;;  %v4632_v26 = vadd.f32 %v4631_v32, %v4630_v15  ;;  %v9013_v33 = vld [vmem:[#allocation32_spill] sm:$0xff] }
 0x637   : > { %v4633_v2 = vpop.f32.mrf.mxu1 }
 0x638   : > { %4096 = vst [vmem:[%s8136_s16 + $0x30] sm:$0xff] %v4064_v43  ;;  %v4033_v20 = vadd.f32 %v4001_v61, %v3969_v37  ;;  %v3868_v36 = vadd.f32 %v4632_v26, %v8120_v9  ;;  %v4008_v61 = vld [vmem:[%s8126_s14 + $0x70] sm:$0xff] }
 0x639   : > { %v4634_v10 = vpop.f32.mrf.mxu1 }
 0x63a   : > { %v4065_v49 = vmax.f32 %v4033_v20, 0.0  ;;  %v3970_v29 = vadd.f32 %v3868_v36, %v9007_v3  ;;  %v4635_v55 = vadd.f32 %v4634_v10, %v4633_v2  ;;  %v4009_v36 = vld [vmem:[%s8126_s14 + $0x78] sm:$0xff] }
 0x63b   : > { %v4636_v17 = vpop.f32.mrf.mxu1  ;;  %v9014_v10 = vld [vmem:[#allocation33_spill] sm:$0xff] }
 0x63c   : > { %4097 = vst [vmem:[%s8136_s16 + $0x38] sm:$0xff] %v4065_v49  ;;  %v4034_v50 = vadd.f32 %v4002_v42, %v3970_v29  ;;  %v3871_v59 = vadd.f32 %v4635_v55, %v8120_v9 }
 0x63d   : > { %v4637_v24 = vpop.f32.mrf.mxu1 }
 0x63e   : > { %v4066_v48 = vmax.f32 %v4034_v50, 0.0  ;;  %v3971_v16 = vadd.f32 %v3871_v59, %v9008_v34  ;;  %v4638_v6 = vadd.f32 %v4637_v24, %v4636_v17  ;;  %v4010_v24 = vld [vmem:[%s8126_s14 + $0x80] sm:$0xff] }
 0x63f   : > { %v4639_v45 = vpop.f32.mrf.mxu1  ;;  %v9015_v34 = vld [vmem:[#allocation6_spill] sm:$0xff] }
 0x640   : > { %4098 = vst [vmem:[%s8136_s16 + $0x40] sm:$0xff] %v4066_v48  ;;  %v4035_v0 = vadd.f32 %v4003_v8, %v3971_v16  ;;  %v3876_v31 = vadd.f32 %v4638_v6, %v8120_v9 }
 0x641   : > { %v4640_v63 = vpop.f32.mrf.mxu1 }
 0x642   : > { %v4067_v47 = vmax.f32 %v4035_v0, 0.0  ;;  %v3972_v4 = vadd.f32 %v3876_v31, %v9009_v27  ;;  %v4641_v54 = vadd.f32 %v4640_v63, %v4639_v45  ;;  %v9016_v27 = vld [vmem:[#allocation7_spill] sm:$0xff] }
 0x643   : > { %v4642_v46 = vpop.f32.mrf.mxu1 }
 0x644   : > { %4099 = vst [vmem:[%s8136_s16 + $0x48] sm:$0xff] %v4067_v47  ;;  %v4036_v14 = vadd.f32 %v4004_v12, %v3972_v4  ;;  %v3879_v56 = vadd.f32 %v4641_v54, %v8120_v9  ;;  %v4011_v12 = vld [vmem:[%s8126_s14 + $0x88] sm:$0xff] }
 0x645   : > { %v4643_v44 = vpop.f32.mrf.mxu1 }
 0x646   : > { %v4068_v28 = vmax.f32 %v4036_v14, 0.0  ;;  %v3973_v19 = vadd.f32 %v3879_v56, %v9010_v52  ;;  %v4644_v22 = vadd.f32 %v4643_v44, %v4642_v46  ;;  %v9017_v52 = vld [vmem:[#allocation8_spill] sm:$0xff] }
 0x647   : > { %v4645_v51 = vpop.f32.mrf.mxu1 }
 0x648   : > { %4100 = vst [vmem:[%s8136_s16 + $0x50] sm:$0xff] %v4068_v28  ;;  %v4037_v18 = vadd.f32 %v4005_v30, %v3973_v19  ;;  %v3884_v62 = vadd.f32 %v4644_v22, %v8120_v9  ;;  %v4012_v30 = vld [vmem:[%s8126_s14 + $0x90] sm:$0xff] }
 0x649   : > { %v4646_v21 = vpop.f32.mrf.mxu1 }
 0x64a   : > { %v4069_v23 = vmax.f32 %v4037_v18, 0.0  ;;  %v3974_v5 = vadd.f32 %v3884_v62, %v9011_v13  ;;  %v4647_v53 = vadd.f32 %v4646_v21, %v4645_v51  ;;  %v9018_v13 = vld [vmem:[#allocation9_spill] sm:$0xff] }
 0x64b   : > { %v4648_v40 = vpop.f32.mrf.mxu1 }
 0x64c   : > { %4101 = vst [vmem:[%s8136_s16 + $0x58] sm:$0xff] %v4069_v23  ;;  %v4038_v35 = vadd.f32 %v4006_v57, %v3974_v5  ;;  %v3887_v38 = vadd.f32 %v4647_v53, %v8120_v9  ;;  %v4013_v57 = vld [vmem:[%s8126_s14 + $0x98] sm:$0xff] }
 0x64d   : > { %v4649_v39 = vpop.f32.mrf.mxu1 }
 0x64e   : > { %v4070_v1 = vmax.f32 %v4038_v35, 0.0  ;;  %v3975_v60 = vadd.f32 %v3887_v38, %v9012_v7  ;;  %v4650_v25 = vadd.f32 %v4649_v39, %v4648_v40  ;;  %v9019_v7 = vld [vmem:[#allocation10_spill] sm:$0xff] }
 0x64f   : > { %v4651_v15 = vpop.f32.mrf.mxu1 }
 0x650   : > { %4102 = vst [vmem:[%s8136_s16 + $0x60] sm:$0xff] %v4070_v1  ;;  %v4039_v41 = vadd.f32 %v4007_v11, %v3975_v60  ;;  %v3892_v58 = vadd.f32 %v4650_v25, %v8120_v9  ;;  %v4014_v11 = vld [vmem:[%s8126_s14 + $0xa0] sm:$0xff] }
 0x651   : > { %v4652_v32 = vpop.f32.mrf.mxu1 }
 0x652   : > { %v4071_v43 = vmax.f32 %v4039_v41, 0.0  ;;  %v3976_v37 = vadd.f32 %v3892_v58, %v9013_v33  ;;  %v4653_v26 = vadd.f32 %v4652_v32, %v4651_v15  ;;  %v9020_v33 = vld [vmem:[#allocation12_spill] sm:$0xff] }
 0x654   : > { %4103 = vst [vmem:[%s8136_s16 + $0x68] sm:$0xff] %v4071_v43  ;;  %v4040_v2 = vadd.f32 %v4008_v61, %v3976_v37  ;;  %v3895_v20 = vadd.f32 %v4653_v26, %v8120_v9  ;;  %v4015_v61 = vld [vmem:[%s8126_s14 + $0xa8] sm:$0xff] }
 0x656   : > { %v4072_v42 = vmax.f32 %v4040_v2, 0.0  ;;  %v3977_v49 = vadd.f32 %v3895_v20, %v9014_v10 }
 0x658   : > { %4104 = vst [vmem:[%s8136_s16 + $0x70] sm:$0xff] %v4072_v42  ;;  %v4041_v3 = vadd.f32 %v4009_v36, %v3977_v49  ;;  %v4016_v42 = vld [vmem:[%s8126_s14 + $0xb0] sm:$0xff] }
 0x65a   : > { %v4073_v29 = vmax.f32 %v4041_v3, 0.0  ;;  %v9021_v3 = vld [vmem:[#allocation13_spill] sm:$0xff] }
 0x65c   : > { %4105 = vst [vmem:[%s8136_s16 + $0x78] sm:$0xff] %v4073_v29 }
 0x690   : > { %v4654_v55 = vpop.f32.mrf.mxu1 }
 0x692   : > { %v4655_v17 = vpop.f32.mrf.mxu1 }
 0x693   : > { %v4656_v50 = vadd.f32 %v4655_v17, %v4654_v55 }
 0x694   : > { %v4657_v59 = vpop.f32.mrf.mxu1 }
 0x695   : > { %v3900_v8 = vadd.f32 %v4656_v50, %v8120_v9 }
 0x696   : > { %v4658_v48 = vpop.f32.mrf.mxu1 }
 0x697   : > { %v3978_v16 = vadd.f32 %v3900_v8, %v9015_v34  ;;  %v4659_v6 = vadd.f32 %v4658_v48, %v4657_v59  ;;  %v4017_v8 = vld [vmem:[%s8126_s14 + $0xb8] sm:$0xff]  ;;  %v9022_v34 = vld [vmem:[#allocation14_spill] sm:$0xff] }
 0x699   : > { %v4042_v0 = vadd.f32 %v4010_v24, %v3978_v16  ;;  %v3903_v31 = vadd.f32 %v4659_v6, %v8120_v9 }
 0x69a   : > { %v4660_v45 = vpop.f32.mrf.mxu1 }
 0x69b   : > { %v4074_v47 = vmax.f32 %v4042_v0, 0.0  ;;  %v3979_v4 = vadd.f32 %v3903_v31, %v9016_v27  ;;  %v9023_v27 = vld [vmem:[#allocation16_spill] sm:$0xff] }
 0x69c   : > { %v4661_v63 = vpop.f32.mrf.mxu1 }
 0x69d   : > { %v4662_v54 = vadd.f32 %v4661_v63, %v4660_v45  ;;  %4106 = vst [vmem:[%s8136_s16 + $0x80] sm:$0xff] %v4074_v47  ;;  %v4043_v14 = vadd.f32 %v4011_v12, %v3979_v4  ;;  %v4018_v12 = vld [vmem:[%s8126_s14 + $0xc0] sm:$0xff] }
 0x69e   : > { %v4663_v46 = vpop.f32.mrf.mxu1 }
 0x69f   : > { %v3908_v56 = vadd.f32 %v4662_v54, %v8120_v9  ;;  %v4075_v28 = vmax.f32 %v4043_v14, 0.0 }
 0x6a0   : > { %v4664_v44 = vpop.f32.mrf.mxu1 }
 0x6a1   : > { %v3980_v19 = vadd.f32 %v3908_v56, %v9017_v52  ;;  %v4665_v22 = vadd.f32 %v4664_v44, %v4663_v46  ;;  %4107 = vst [vmem:[%s8136_s16 + $0x88] sm:$0xff] %v4075_v28  ;;  %v9024_v52 = vld [vmem:[#allocation17_spill] sm:$0xff] }
 0x6a2   : > { %v4666_v51 = vpop.f32.mrf.mxu1 }
 0x6a3   : > { %v4044_v18 = vadd.f32 %v4012_v30, %v3980_v19  ;;  %v3911_v62 = vadd.f32 %v4665_v22, %v8120_v9  ;;  %v4019_v30 = vld [vmem:[%s8126_s14 + $0xc8] sm:$0xff] }
 0x6a4   : > { %v4667_v21 = vpop.f32.mrf.mxu1 }
 0x6a5   : > { %v4076_v23 = vmax.f32 %v4044_v18, 0.0  ;;  %v3981_v5 = vadd.f32 %v3911_v62, %v9018_v13  ;;  %v4668_v53 = vadd.f32 %v4667_v21, %v4666_v51  ;;  %v9025_v13 = vld [vmem:[#allocation18_spill] sm:$0xff] }
 0x6a6   : > { %v4669_v40 = vpop.f32.mrf.mxu1 }
 0x6a7   : > { %4108 = vst [vmem:[%s8136_s16 + $0x90] sm:$0xff] %v4076_v23  ;;  %v4045_v35 = vadd.f32 %v4013_v57, %v3981_v5  ;;  %v3916_v38 = vadd.f32 %v4668_v53, %v8120_v9  ;;  %v4020_v57 = vld [vmem:[%s8126_s14 + $0xd0] sm:$0xff] }
 0x6a8   : > { %v4670_v39 = vpop.f32.mrf.mxu1 }
 0x6a9   : > { %v4077_v1 = vmax.f32 %v4045_v35, 0.0  ;;  %v3982_v60 = vadd.f32 %v3916_v38, %v9019_v7  ;;  %v4671_v25 = vadd.f32 %v4670_v39, %v4669_v40  ;;  %v9026_v7 = vld [vmem:[#allocation19_spill] sm:$0xff] }
 0x6ab   : > { %v4672_v15 = vpop.f32.mrf.mxu1  ;;  %4109 = vst [vmem:[%s8136_s16 + $0x98] sm:$0xff] %v4077_v1  ;;  %v4046_v41 = vadd.f32 %v4014_v11, %v3982_v60  ;;  %v3919_v58 = vadd.f32 %v4671_v25, %v8120_v9  ;;  %v4021_v11 = vld [vmem:[%s8126_s14 + $0xd8] sm:$0xff] }
 0x6ad   : > { %v4673_v32 = vpop.f32.mrf.mxu1  ;;  %v4078_v43 = vmax.f32 %v4046_v41, 0.0  ;;  %v3983_v37 = vadd.f32 %v3919_v58, %v9020_v33  ;;  %v9027_v33 = vld [vmem:[#allocation20_spill] sm:$0xff] }
 0x6ae   : > { %v4674_v26 = vadd.f32 %v4673_v32, %v4672_v15 }
 0x6af   : > { %v4675_v2 = vpop.f32.mrf.mxu1  ;;  %4110 = vst [vmem:[%s8136_s16 + $0xa0] sm:$0xff] %v4078_v43  ;;  %v4047_v20 = vadd.f32 %v4015_v61, %v3983_v37  ;;  %v4022_v61 = vld [vmem:[%s8126_s14 + $0xe0] sm:$0xff] }
 0x6b0   : > { %v3924_v36 = vadd.f32 %v4674_v26, %v8120_v9 }
 0x6b1   : > { %v4676_v10 = vpop.f32.mrf.mxu1  ;;  %v4079_v49 = vmax.f32 %v4047_v20, 0.0 }
 0x6b2   : > { %v3984_v29 = vadd.f32 %v3924_v36, %v9021_v3  ;;  %v4677_v55 = vadd.f32 %v4676_v10, %v4675_v2  ;;  %v9028_v3 = vld [vmem:[#allocation21_spill] sm:$0xff] }
 0x6b3   : > { %v4678_v17 = vpop.f32.mrf.mxu1  ;;  %4111 = vst [vmem:[%s8136_s16 + $0xa8] sm:$0xff] %v4079_v49 }
 0x6b4   : > { %v4048_v50 = vadd.f32 %v4016_v42, %v3984_v29  ;;  %v3927_v59 = vadd.f32 %v4677_v55, %v8120_v9  ;;  %v4023_v42 = vld [vmem:[%s8126_s14 + $0xe8] sm:$0xff] }
 0x6b5   : > { %v4679_v24 = vpop.f32.mrf.mxu1 }
 0x6b6   : > { %v4080_v48 = vmax.f32 %v4048_v50, 0.0  ;;  %v3985_v16 = vadd.f32 %v3927_v59, %v9022_v34  ;;  %v4680_v6 = vadd.f32 %v4679_v24, %v4678_v17  ;;  %v9029_v34 = vld [vmem:[#allocation22_spill] sm:$0xff] }
 0x6b7   : > { %v4681_v45 = vpop.f32.mrf.mxu1 }
 0x6b8   : > { %4112 = vst [vmem:[%s8136_s16 + $0xb0] sm:$0xff] %v4080_v48  ;;  %v4049_v0 = vadd.f32 %v4017_v8, %v3985_v16  ;;  %v3932_v31 = vadd.f32 %v4680_v6, %v8120_v9  ;;  %v4024_v8 = vld [vmem:[%s8126_s14 + $0xf0] sm:$0xff] }
 0x6b9   : > { %v4682_v63 = vpop.f32.mrf.mxu1 }
 0x6ba   : > { %v4081_v47 = vmax.f32 %v4049_v0, 0.0  ;;  %v3986_v4 = vadd.f32 %v3932_v31, %v9023_v27  ;;  %v4683_v54 = vadd.f32 %v4682_v63, %v4681_v45  ;;  %v4025_v31 = vld [vmem:[%s8126_s14 + $0xf8] sm:$0xff]  ;;  %v9030_v63 = vld [vmem:[#allocation23_spill] sm:$0xff] }
 0x6bb   : > { %v4684_v46 = vpop.f32.mrf.mxu1 }
 0x6bc   : > { %4113 = vst [vmem:[%s8136_s16 + $0xb8] sm:$0xff] %v4081_v47  ;;  %v4050_v14 = vadd.f32 %v4018_v12, %v3986_v4  ;;  %v3935_v56 = vadd.f32 %v4683_v54, %v8120_v9 }
 0x6bd   : > { %v4685_v44 = vpop.f32.mrf.mxu1 }
 0x6be   : > { %v4082_v28 = vmax.f32 %v4050_v14, 0.0  ;;  %v3987_v19 = vadd.f32 %v3935_v56, %v9024_v52  ;;  %v4686_v22 = vadd.f32 %v4685_v44, %v4684_v46 }
 0x6bf   : > { %v4687_v51 = vpop.f32.mrf.mxu1 }
 0x6c0   : > { %4114 = vst [vmem:[%s8136_s16 + $0xc0] sm:$0xff] %v4082_v28  ;;  %v4051_v18 = vadd.f32 %v4019_v30, %v3987_v19  ;;  %v3940_v62 = vadd.f32 %v4686_v22, %v8120_v9 }
 0x6c1   : > { %v4688_v21 = vpop.f32.mrf.mxu1 }
 0x6c2   : > { %v4083_v23 = vmax.f32 %v4051_v18, 0.0  ;;  %v3988_v5 = vadd.f32 %v3940_v62, %v9025_v13  ;;  %v4689_v53 = vadd.f32 %v4688_v21, %v4687_v51 }
 0x6c4   : > { %v4690_v40 = vpop.f32.mrf.mxu1  ;;  %4115 = vst [vmem:[%s8136_s16 + $0xc8] sm:$0xff] %v4083_v23  ;;  %v4052_v35 = vadd.f32 %v4020_v57, %v3988_v5  ;;  %v3943_v38 = vadd.f32 %v4689_v53, %v8120_v9 }
 0x6c6   : > { %v4691_v39 = vpop.f32.mrf.mxu1  ;;  %v4084_v1 = vmax.f32 %v4052_v35, 0.0  ;;  %v3989_v60 = vadd.f32 %v3943_v38, %v9026_v7 }
 0x6c7   : > { %v4692_v25 = vadd.f32 %v4691_v39, %v4690_v40 }
 0x6c8   : > { %v4693_v15 = vpop.f32.mrf.mxu1  ;;  %4116 = vst [vmem:[%s8136_s16 + $0xd0] sm:$0xff] %v4084_v1  ;;  %v4053_v41 = vadd.f32 %v4021_v11, %v3989_v60 }
 0x6c9   : > { %v3948_v58 = vadd.f32 %v4692_v25, %v8120_v9 }
 0x6ca   : > { %v4694_v32 = vpop.f32.mrf.mxu1  ;;  %v4085_v43 = vmax.f32 %v4053_v41, 0.0 }
 0x6cb   : > { %v3990_v37 = vadd.f32 %v3948_v58, %v9027_v33  ;;  %v4695_v26 = vadd.f32 %v4694_v32, %v4693_v15 }
 0x6cc   : > { %v4696_v2 = vpop.f32.mrf.mxu1  ;;  %4117 = vst [vmem:[%s8136_s16 + $0xd8] sm:$0xff] %v4085_v43 }
 0x6cd   : > { %v4054_v20 = vadd.f32 %v4022_v61, %v3990_v37  ;;  %v3951_v36 = vadd.f32 %v4695_v26, %v8120_v9 }
 0x6ce   : > { %v4697_v10 = vpop.f32.mrf.mxu1 }
 0x6cf   : > { %v4086_v49 = vmax.f32 %v4054_v20, 0.0  ;;  %v3991_v29 = vadd.f32 %v3951_v36, %v9028_v3  ;;  %v4698_v55 = vadd.f32 %v4697_v10, %v4696_v2 }
 0x6d0   : > { %v4699_v17 = vpop.f32.mrf.mxu1 }
 0x6d1   : > { %4118 = vst [vmem:[%s8136_s16 + $0xe0] sm:$0xff] %v4086_v49  ;;  %v4055_v50 = vadd.f32 %v4023_v42, %v3991_v29  ;;  %v3956_v59 = vadd.f32 %v4698_v55, %v8120_v9 }
 0x6d2   : > { %v4700_v24 = vpop.f32.mrf.mxu1 }
 0x6d3   : > { %v4087_v48 = vmax.f32 %v4055_v50, 0.0  ;;  %v3992_v16 = vadd.f32 %v3956_v59, %v9029_v34  ;;  %v4701_v6 = vadd.f32 %v4700_v24, %v4699_v17 }
 0x6d5   : > { %4119 = vst [vmem:[%s8136_s16 + $0xe8] sm:$0xff] %v4087_v48  ;;  %v4056_v45 = vadd.f32 %v4024_v8, %v3992_v16  ;;  %v3959_v0 = vadd.f32 %v4701_v6, %v8120_v9 }
 0x6d7   : > { %v4088_v12 = vmax.f32 %v4056_v45, 0.0  ;;  %v3993_v47 = vadd.f32 %v3959_v0, %v9030_v63 }
 0x6d9   : > { %4120 = vst [vmem:[%s8136_s16 + $0xf0] sm:$0xff] %v4088_v12  ;;  %v4057_v27 = vadd.f32 %v4025_v31, %v3993_v47 }
 0x6db   : > { %v4089_v4 = vmax.f32 %v4057_v27, 0.0 }
 0x6dd   : > { %4121 = vst [vmem:[%s8136_s16 + $0xf8] sm:$0xff] %v4089_v4 }
 0x6de PF: > { %s21_s17 = sadd.s32 1, %s5191_s17  }
 0x6df   : > { %p18_p4 = scmp.ge.s32.totalorder %s21_s17, 4  }
 0x6e1   :  { %20 = sbr.rel (!%p18_p4) target bundleno = 1 (0x1), region = 97 }

</bundles_post_ra>
